<compile_context>
chip_gen: v7x
topology: tpu7x:2x2x1
jax: 0.10.0
libtpu: 0.0.40
codegen_flags: <defaults>
</compile_context>

<pallas_src>
import functools

import jax
import jax.numpy as jnp
from jax.experimental import pallas as pl
from jax.experimental.pallas import tpu as pltpu

EPS = 1e-5


# ----------------------------- Pallas kernel --------------------------------

def _gmm_bn_relu_kernel(a_ref, b_ref, s_ref, t_ref, o_ref, *, relu, pool):
    """One (super-)group per grid step:
       out = maybe_avgpool2(maybe_relu((A @ B) * scale + shift))."""
    acc = jnp.dot(a_ref[0], b_ref[0], preferred_element_type=jnp.float32)
    out = acc * s_ref[0] + t_ref[0]
    if relu:
        out = jnp.maximum(out, 0.0)
    if pool:
        # Rows were pre-ordered so the four 2x2-pool taps live in the four
        # contiguous (8-aligned) quarters of the M axis.
        m4 = out.shape[0] // 4
        out = (out[0:m4] + out[m4:2 * m4] + out[2 * m4:3 * m4] + out[3 * m4:]) * 0.25
    o_ref[0] = out.astype(o_ref.dtype)


def gmm_bn_relu(a, b, scale, shift, *, relu=True, pool=False):
    """Batched-over-groups fused matmul: (G,M,K) @ (G,K,N) * scale + shift.

    Operands go to the MXU in bf16; accumulation / epilogue in f32.  The
    group axis is the grid and is marked "parallel".
    """
    G, M, K = a.shape
    N = b.shape[-1]
    Mo = M // 4 if pool else M
    a = a.astype(jnp.bfloat16)
    b = b.astype(jnp.bfloat16)
    scale = scale.astype(jnp.float32)
    shift = shift.astype(jnp.float32)
    return pl.pallas_call(
        functools.partial(_gmm_bn_relu_kernel, relu=relu, pool=pool),
        out_shape=jax.ShapeDtypeStruct((G, Mo, N), jnp.float32),
        grid=(G,),
        in_specs=[
            pl.BlockSpec((1, M, K), lambda g: (g, 0, 0)),
            pl.BlockSpec((1, K, N), lambda g: (g, 0, 0)),
            pl.BlockSpec((1, 1, N), lambda g: (g, 0, 0)),
            pl.BlockSpec((1, 1, N), lambda g: (g, 0, 0)),
        ],
        out_specs=pl.BlockSpec((1, Mo, N), lambda g: (g, 0, 0)),
        compiler_params=pltpu.CompilerParams(
            dimension_semantics=("parallel",)),
    )(a, b, scale, shift)


# ------------------------------- JAX glue ------------------------------------

def _choose_sg(groups, n_per_group):
    """Pack groups so each tile's output width is ~128 lanes."""
    sg = max(1, min(groups, 128 // max(n_per_group, 1)))
    while groups % sg:
        sg -= 1
    return sg


def _pack_a(a, sg):
    """(G, M, K) -> (G//sg, M, sg*K), columns ordered (sg_local, k)."""
    g, m, k = a.shape
    if sg == 1:
        return a
    gt = g // sg
    a = a.reshape(gt, sg, m, k)
    return jnp.transpose(a, (0, 2, 1, 3)).reshape(gt, m, sg * k)


def _pack_b(wg, sg):
    """(G, K, N) per-group mats -> (G//sg, sg*K, sg*N) block-diagonal tiles."""
    g, k, n = wg.shape
    if sg == 1:
        return wg
    gt = g // sg
    wg = wg.reshape(gt, sg, k, n)
    big = jnp.zeros((gt, sg * k, sg * n), wg.dtype)
    for s in range(sg):
        big = big.at[:, s * k:(s + 1) * k, s * n:(s + 1) * n].set(wg[:, s])
    return big


def _im2col_grouped(x, groups, k, pad, pool):
    """NHWC -> per-group im2col matrix (G, M, k*k*Cg).

    Column order inside a group is (tap = kh*k + kw, c_in_group), matching
    _conv_weight_groups.  With pool=True the M rows are ordered
    (h%2, w%2, b, h//2, w//2) so the fused 2x2 avg-pool in the kernel is three
    adds of the four contiguous M quarters.
    """
    B, H, W, C = x.shape
    cg = C // groups
    xp = jnp.pad(x, ((0, 0), (pad, pad), (pad, pad), (0, 0)))
    ho = H + 2 * pad - k + 1
    wo = W + 2 * pad - k + 1
    taps = [xp[:, dh:dh + ho, dw:dw + wo, :] for dh in range(k) for dw in range(k)]
    p = jnp.stack(taps, axis=3)                           # (B, Ho, Wo, k*k, C)
    p = p.reshape(B, ho, wo, k * k, groups, cg)
    if pool:
        p = p.reshape(B, ho // 2, 2, wo // 2, 2, k * k, groups, cg)
        p = jnp.transpose(p, (2, 4, 0, 1, 3, 5, 6, 7))    # (r, s, b, h', w', ...)
        m = 4 * B * (ho // 2) * (wo // 2)
    else:
        m = B * ho * wo
    p = p.reshape(m, k * k, groups, cg)
    a = jnp.transpose(p, (2, 0, 1, 3)).reshape(groups, m, k * k * cg)
    return a, ho, wo


def _conv_weight_groups(w, groups):
    """PyTorch conv weight (Cout, Cin/G, kh, kw) -> (G, kh*kw*Cin/G, Cout/G)."""
    cout, cin_g, kh, kw = w.shape
    ng = cout // groups
    wg = w.reshape(groups, ng, cin_g, kh, kw)
    wg = jnp.transpose(wg, (0, 3, 4, 2, 1))               # (G, kh, kw, Cin_g, Ng)
    return wg.reshape(groups, kh * kw * cin_g, ng)


def _unpack_out(out, cout):
    """(Gt, Mo, SG*Ng) -> (Mo, Cout) in PyTorch (group-major) channel order."""
    _, mo, _ = out.shape
    return jnp.transpose(out, (1, 0, 2)).reshape(mo, cout)


def conv_bn_relu(x, w, scale, shift, *, groups=1, k=3, pad=1, pool=False):
    """Grouped Conv2d + BN affine + ReLU (+ optional fused AvgPool2d(2))."""
    B, H, W, _ = x.shape
    cout = w.shape[0]
    ng = cout // groups
    a, ho, wo = _im2col_grouped(x, groups, k, pad, pool)
    bmat = _conv_weight_groups(w, groups)
    sg = _choose_sg(groups, ng)
    gt = groups // sg
    out = gmm_bn_relu(
        _pack_a(a, sg), _pack_b(bmat, sg),
        scale.reshape(gt, 1, sg * ng), shift.reshape(gt, 1, sg * ng),
        relu=True, pool=pool)
    y = _unpack_out(out, cout)
    if pool:
        ho, wo = ho // 2, wo // 2
    return y.reshape(B, ho, wo, cout)


def tconv_bn_relu(x, wt, scale, shift, *, groups):
    """ConvTranspose2d(k=3, stride=2, padding=1, output_padding=1, groups)
    + BN + ReLU, decomposed into the four output-parity sub-convolutions so
    no zero-dilated input is ever materialized.

    Output (2i+r, 2j+s) receives x[i+dh, j+dw] * W[kh, kw] with
    (kh, kw) = (r+1-2dh, s+1-2dw) whenever that index lies in [0, 2].
    """
    B, H, W, cin = x.shape
    cin_g = cin // groups
    cout_g = wt.shape[1]
    cout = groups * cout_g

    # 2x2-tap im2col on the bottom/right zero-padded input.
    xp = jnp.pad(x, ((0, 0), (0, 1), (0, 1), (0, 0)))
    taps = [xp[:, dh:dh + H, dw:dw + W, :] for dh in range(2) for dw in range(2)]
    p = jnp.stack(taps, axis=3).reshape(B, H, W, 4, groups, cin_g)
    m = B * H * W
    p = p.reshape(m, 4, groups, cin_g)
    a = jnp.transpose(p, (2, 0, 1, 3)).reshape(groups, m, 4 * cin_g)

    # Per-group weight with a 4-wide output-parity axis.
    wt_g = wt.reshape(groups, cin_g, cout_g, 3, 3)
    bmat = jnp.zeros((groups, 4 * cin_g, 4 * cout_g), wt.dtype)
    for r in range(2):
        for s in range(2):
            par = r * 2 + s
            for dh in range(2):
                kh = r + 1 - 2 * dh
                if not 0 <= kh <= 2:
                    continue
                for dw in range(2):
                    kw = s + 1 - 2 * dw
                    if not 0 <= kw <= 2:
                        continue
                    tap = dh * 2 + dw
                    bmat = bmat.at[:, tap * cin_g:(tap + 1) * cin_g,
                                   par * cout_g:(par + 1) * cout_g].set(
                        wt_g[:, :, :, kh, kw])

    npg = 4 * cout_g                                 # per-group output (parity, ch)
    scale4 = jnp.broadcast_to(scale.reshape(groups, 1, 1, cout_g),
                              (groups, 1, 4, cout_g)).reshape(groups, 1, npg)
    shift4 = jnp.broadcast_to(shift.reshape(groups, 1, 1, cout_g),
                              (groups, 1, 4, cout_g)).reshape(groups, 1, npg)

    sg = _choose_sg(groups, npg)
    gt = groups // sg
    out = gmm_bn_relu(
        _pack_a(a, sg), _pack_b(bmat, sg),
        scale4.reshape(gt, 1, sg * npg), shift4.reshape(gt, 1, sg * npg),
        relu=True, pool=False)                       # (Gt, M, sg*4*Cout_g)

    o = _unpack_out(out, groups * npg)               # (M, G*4*Cout_g): (g, r, s, c)
    o = o.reshape(B, H, W, groups, 2, 2, cout_g)     # (b, i, j, g, r, s, c)
    o = jnp.transpose(o, (0, 1, 4, 2, 5, 3, 6))      # (b, i, r, j, s, g, c)
    return o.reshape(B, 2 * H, 2 * W, cout)


# --------------------------- parameters (synthetic) ---------------------------

def init_params(key):
    keys = iter(jax.random.split(key, 40))

    def conv_w(c_out, c_in_g, k):
        fan_in = c_in_g * k * k
        return jax.random.normal(next(keys), (c_out, c_in_g, k, k),
                                 jnp.float32) * (2.0 / fan_in) ** 0.5

    def bn(c):
        k1, k2, k3, k4 = jax.random.split(next(keys), 4)
        gamma = 1.0 + 0.1 * jax.random.normal(k1, (c,), jnp.float32)
        beta = 0.1 * jax.random.normal(k2, (c,), jnp.float32)
        mean = 0.1 * jax.random.normal(k3, (c,), jnp.float32)
        var = 1.0 + 0.5 * jax.random.uniform(k4, (c,), jnp.float32)
        scale = gamma * jax.lax.rsqrt(var + EPS)
        shift = beta - mean * scale
        return scale, shift

    p = {}
    p["w1"] = conv_w(128, 3, 3);           p["bn1"] = bn(128)
    p["w2"] = conv_w(256, 128 // 8, 3);    p["bn2"] = bn(256)
    p["w3"] = conv_w(1024, 256 // 16, 3);  p["bn3"] = bn(1024)
    p["w4"] = conv_w(256, 1024 // 4, 1);   p["bn4"] = bn(256)
    p["w5"] = conv_w(16, 256, 1);          p["bn5"] = bn(16)
    p["w6"] = conv_w(128, 256, 1);         p["bn6"] = bn(128)
    # tconv7 weight in PyTorch ConvTranspose2d layout (c_in, c_out/g, kh, kw)
    p["w7"] = jax.random.normal(next(keys), (128, 128 // 8, 3, 3),
                                jnp.float32) * (2.0 / (16 * 9)) ** 0.5
    p["bn7"] = bn(128)
    p["w8"] = conv_w(16, 384 // 2, 1);     p["bn8"] = bn(16)
    # Linear stored as (in_features, out_features) == W.T, rows in (c,h,w) order
    p["fc1"] = jax.random.normal(next(keys), (4 * 4 * 16, 10),
                                 jnp.float32) * (1.0 / 256) ** 0.5
    p["fc2"] = jax.random.normal(next(keys), (8 * 8 * 16, 10),
                                 jnp.float32) * (1.0 / 1024) ** 0.5
    return p


# --------------------------------- forward ------------------------------------

def testnet0_forward(x_nchw, p):
    x = jnp.transpose(x_nchw, (0, 2, 3, 1))                         # NHWC (B,32,32,3)

    x = conv_bn_relu(x, p["w1"], *p["bn1"], groups=1, k=3, pad=1, pool=True)   # (B,16,16,128)
    x = conv_bn_relu(x, p["w2"], *p["bn2"], groups=8, k=3, pad=1, pool=True)   # (B,8,8,256)
    y1 = conv_bn_relu(x, p["w3"], *p["bn3"], groups=16, k=3, pad=1, pool=True) # (B,4,4,1024)
    y1 = conv_bn_relu(y1, p["w4"], *p["bn4"], groups=4, k=1, pad=0)            # (B,4,4,256)

    # conv5 (256->16) and conv6 (256->128) share the same input: one fused
    # 1x1-conv call with a 144-wide output, split afterwards.
    B = y1.shape[0]
    a56, _, _ = _im2col_grouped(y1, 1, 1, 0, False)                 # (1, B*16, 256)
    w56 = jnp.concatenate([_conv_weight_groups(p["w5"], 1),
                           _conv_weight_groups(p["w6"], 1)], axis=-1)  # (1,256,144)
    s56 = jnp.concatenate([p["bn5"][0], p["bn6"][0]])[None, None, :]
    t56 = jnp.concatenate([p["bn5"][1], p["bn6"][1]])[None, None, :]
    y56 = gmm_bn_relu(a56, w56, s56, t56, relu=True)[0]             # (B*16, 144)
    y5 = y56[:, :16]                                                # rows (b,h,w)
    y6 = y56[:, 16:].reshape(B, 4, 4, 128)

    y7 = tconv_bn_relu(y6, p["w7"], *p["bn7"], groups=8)            # (B,8,8,128)
    y2 = jnp.concatenate([x, y7], axis=-1)                          # (B,8,8,384)
    y2 = conv_bn_relu(y2, p["w8"], *p["bn8"], groups=2, k=1, pad=0) # (B,8,8,16)

    # Both FC heads in one kernel.  Activations are NHWC-flattened ((h,w,c));
    # the PyTorch (c,h,w) view() order is absorbed into a permutation of the
    # FC weights, and the two problems are packed block-diagonally.
    y1f = y5.reshape(B, 4 * 4 * 16)
    y2f = y2.reshape(B, 8 * 8 * 16)
    w1p = jnp.transpose(p["fc1"].reshape(16, 4, 4, 10), (1, 2, 0, 3)).reshape(256, 10)
    w2p = jnp.transpose(p["fc2"].reshape(16, 8, 8, 10), (1, 2, 0, 3)).reshape(1024, 10)
    wfc = jnp.zeros((256 + 1024, 20), jnp.float32)
    wfc = wfc.at[:256, :10].set(w1p).at[256:, 10:].set(w2p)
    afc = jnp.concatenate([y1f, y2f], axis=1)[None]                 # (1, B, 1280)
    ones = jnp.ones((1, 1, 20), jnp.float32)
    zeros = jnp.zeros((1, 1, 20), jnp.float32)
    out = gmm_bn_relu(afc, wfc[None], ones, zeros, relu=False)[0]   # (B, 20)
    return out[:, :10], out[:, 10:]


if __name__ == "__main__":
    key = jax.random.PRNGKey(0)
    kx, kp = jax.random.split(key)
    # Spatial size is fixed to 32x32 by fc1 (4*4*16) / fc2 (8*8*16); batch = 2.
    x = jax.random.normal(kx, (2, 3, 32, 32), jnp.float32)   # NCHW, like PyTorch
    params = init_params(kp)

    y1, y2 = jax.jit(testnet0_forward)(x, params)
    jax.block_until_ready((y1, y2))
    assert y1.shape == (2, 10) and y2.shape == (2, 10)
    assert y1.dtype == jnp.float32 and y2.dtype == jnp.float32
    print("KERNEL_OK")
</pallas_src>

<mosaic_0001>
module attributes {stable_mosaic.version = 11 : i64} {
  func.func @_gmm_bn_relu_kernel(%arg0: i32, %arg1: memref<1x2048x27xbf16, #tpu.memory_space<vmem>>, %arg2: memref<1x27x128xbf16, #tpu.memory_space<vmem>>, %arg3: memref<1x1x128xf32, #tpu.memory_space<vmem>>, %arg4: memref<1x1x128xf32, #tpu.memory_space<vmem>>, %arg5: memref<1x512x128xf32, #tpu.memory_space<vmem>>) attributes {dimension_semantics = [#tpu.dimension_semantics<parallel>], iteration_bounds = array<i64: 1>, scalar_prefetch = 0 : i64, scratch_operands = 0 : i64, tpu.core_type = #tpu.core_type<tc>, window_params = [{transform_indices = @transform_0, window_bounds = array<i64: 1, 2048, 27>}, {transform_indices = @transform_1, window_bounds = array<i64: 1, 27, 128>}, {transform_indices = @transform_2, window_bounds = array<i64: 1, 1, 128>}, {transform_indices = @transform_3, window_bounds = array<i64: 1, 1, 128>}, {transform_indices = @transform_4, window_bounds = array<i64: 1, 512, 128>}]} {
    %c0 = arith.constant 0 : index
    %c0_0 = arith.constant 0 : index
    %c0_1 = arith.constant 0 : index
    %0 = vector.load %arg1[%c0, %c0_0, %c0_1] : memref<1x2048x27xbf16, #tpu.memory_space<vmem>>, vector<1x2048x27xbf16>
    %1 = vector.shape_cast %0 : vector<1x2048x27xbf16> to vector<2048x27xbf16>
    %c0_2 = arith.constant 0 : index
    %c0_3 = arith.constant 0 : index
    %c0_4 = arith.constant 0 : index
    %2 = vector.load %arg2[%c0_2, %c0_3, %c0_4] : memref<1x27x128xbf16, #tpu.memory_space<vmem>>, vector<1x27x128xbf16>
    %3 = vector.shape_cast %2 : vector<1x27x128xbf16> to vector<27x128xbf16>
    %cst = arith.constant dense<0.000000e+00> : vector<2048x128xf32>
    %4 = tpu.matmul %1, %3, %cst {dimension_numbers = #tpu.dot_dimension_numbers<[1], [0], [0], [1], [0, 0, 1, 1], [], []>} : vector<2048x27xbf16>, vector<27x128xbf16>, vector<2048x128xf32> -> vector<2048x128xf32>
    %c0_5 = arith.constant 0 : index
    %c0_6 = arith.constant 0 : index
    %c0_7 = arith.constant 0 : index
    %5 = vector.load %arg3[%c0_5, %c0_6, %c0_7] : memref<1x1x128xf32, #tpu.memory_space<vmem>>, vector<1x1x128xf32>
    %6 = vector.shape_cast %5 : vector<1x1x128xf32> to vector<1x128xf32>
    %7 = vector.broadcast %6 : vector<1x128xf32> to vector<2048x128xf32>
    %8 = arith.mulf %4, %7 : vector<2048x128xf32>
    %c0_8 = arith.constant 0 : index
    %c0_9 = arith.constant 0 : index
    %c0_10 = arith.constant 0 : index
    %9 = vector.load %arg4[%c0_8, %c0_9, %c0_10] : memref<1x1x128xf32, #tpu.memory_space<vmem>>, vector<1x1x128xf32>
    %10 = vector.shape_cast %9 : vector<1x1x128xf32> to vector<1x128xf32>
    %11 = vector.broadcast %10 : vector<1x128xf32> to vector<2048x128xf32>
    %12 = arith.addf %8, %11 : vector<2048x128xf32>
    %cst_11 = arith.constant 0.000000e+00 : f32
    %13 = vector.broadcast %cst_11 : f32 to vector<2048x128xf32>
    %14 = arith.maximumf %12, %13 : vector<2048x128xf32>
    %15 = vector.extract_strided_slice %14 {offsets = [0, 0], sizes = [512, 128], strides = [1, 1]} : vector<2048x128xf32> to vector<512x128xf32>
    %16 = vector.extract_strided_slice %14 {offsets = [512, 0], sizes = [512, 128], strides = [1, 1]} : vector<2048x128xf32> to vector<512x128xf32>
    %17 = arith.addf %15, %16 : vector<512x128xf32>
    %18 = vector.extract_strided_slice %14 {offsets = [1024, 0], sizes = [512, 128], strides = [1, 1]} : vector<2048x128xf32> to vector<512x128xf32>
    %19 = arith.addf %17, %18 : vector<512x128xf32>
    %20 = vector.extract_strided_slice %14 {offsets = [1536, 0], sizes = [512, 128], strides = [1, 1]} : vector<2048x128xf32> to vector<512x128xf32>
    %21 = arith.addf %19, %20 : vector<512x128xf32>
    %cst_12 = arith.constant 2.500000e-01 : f32
    %22 = vector.broadcast %cst_12 : f32 to vector<512x128xf32>
    %23 = arith.mulf %21, %22 : vector<512x128xf32>
    %c0_13 = arith.constant 0 : index
    %c0_14 = arith.constant 0 : index
    %c0_15 = arith.constant 0 : index
    %24 = vector.load %arg5[%c0_13, %c0_14, %c0_15] : memref<1x512x128xf32, #tpu.memory_space<vmem>>, vector<1x512x128xf32>
    %25 = vector.shape_cast %24 : vector<1x512x128xf32> to vector<512x128xf32>
    %26 = vector.shape_cast %23 : vector<512x128xf32> to vector<1x512x128xf32>
    tpu.vector_store %arg5[%c0_13, %c0_14, %c0_15], %26 {strides = array<i32>} : memref<1x512x128xf32, #tpu.memory_space<vmem>>, vector<1x512x128xf32>,
    return
  }
  func.func @transform_0(%arg0: i32) -> (i32, i32, i32) {
    %c0_i32 = arith.constant 0 : i32
    %c0_i32_0 = arith.constant 0 : i32
    %c0_i32_1 = arith.constant 0 : i32
    return %arg0, %c0_i32, %c0_i32_0 : i32, i32, i32
  }
  func.func @transform_1(%arg0: i32) -> (i32, i32, i32) {
    %c0_i32 = arith.constant 0 : i32
    %c0_i32_0 = arith.constant 0 : i32
    %c0_i32_1 = arith.constant 0 : i32
    return %arg0, %c0_i32, %c0_i32_0 : i32, i32, i32
  }
  func.func @transform_2(%arg0: i32) -> (i32, i32, i32) {
    %c0_i32 = arith.constant 0 : i32
    %c0_i32_0 = arith.constant 0 : i32
    %c0_i32_1 = arith.constant 0 : i32
    return %arg0, %c0_i32, %c0_i32_0 : i32, i32, i32
  }
  func.func @transform_3(%arg0: i32) -> (i32, i32, i32) {
    %c0_i32 = arith.constant 0 : i32
    %c0_i32_0 = arith.constant 0 : i32
    %c0_i32_1 = arith.constant 0 : i32
    return %arg0, %c0_i32, %c0_i32_0 : i32, i32, i32
  }
  func.func @transform_4(%arg0: i32) -> (i32, i32, i32) {
    %c0_i32 = arith.constant 0 : i32
    %c0_i32_0 = arith.constant 0 : i32
    %c0_i32_1 = arith.constant 0 : i32
    return %arg0, %c0_i32, %c0_i32_0 : i32, i32, i32
  }
}

module attributes {stable_mosaic.version = 11 : i64} {
  func.func @_gmm_bn_relu_kernel(%arg0: i32, %arg1: memref<1x512x576xbf16, #tpu.memory_space<vmem>>, %arg2: memref<1x576x128xbf16, #tpu.memory_space<vmem>>, %arg3: memref<1x1x128xf32, #tpu.memory_space<vmem>>, %arg4: memref<1x1x128xf32, #tpu.memory_space<vmem>>, %arg5: memref<1x128x128xf32, #tpu.memory_space<vmem>>) attributes {dimension_semantics = [#tpu.dimension_semantics<parallel>], iteration_bounds = array<i64: 2>, scalar_prefetch = 0 : i64, scratch_operands = 0 : i64, tpu.core_type = #tpu.core_type<tc>, window_params = [{transform_indices = @transform_0, window_bounds = array<i64: 1, 512, 576>}, {transform_indices = @transform_1, window_bounds = array<i64: 1, 576, 128>}, {transform_indices = @transform_2, window_bounds = array<i64: 1, 1, 128>}, {transform_indices = @transform_3, window_bounds = array<i64: 1, 1, 128>}, {transform_indices = @transform_4, window_bounds = array<i64: 1, 128, 128>}]} {
    %c0 = arith.constant 0 : index
    %c0_0 = arith.constant 0 : index
    %c0_1 = arith.constant 0 : index
    %0 = vector.load %arg1[%c0, %c0_0, %c0_1] : memref<1x512x576xbf16, #tpu.memory_space<vmem>>, vector<1x512x576xbf16>
    %1 = vector.shape_cast %0 : vector<1x512x576xbf16> to vector<512x576xbf16>
    %c0_2 = arith.constant 0 : index
    %c0_3 = arith.constant 0 : index
    %c0_4 = arith.constant 0 : index
    %2 = vector.load %arg2[%c0_2, %c0_3, %c0_4] : memref<1x576x128xbf16, #tpu.memory_space<vmem>>, vector<1x576x128xbf16>
    %3 = vector.shape_cast %2 : vector<1x576x128xbf16> to vector<576x128xbf16>
    %cst = arith.constant dense<0.000000e+00> : vector<512x128xf32>
    %4 = tpu.matmul %1, %3, %cst {dimension_numbers = #tpu.dot_dimension_numbers<[1], [0], [0], [1], [0, 0, 1, 1], [], []>} : vector<512x576xbf16>, vector<576x128xbf16>, vector<512x128xf32> -> vector<512x128xf32>
    %c0_5 = arith.constant 0 : index
    %c0_6 = arith.constant 0 : index
    %c0_7 = arith.constant 0 : index
    %5 = vector.load %arg3[%c0_5, %c0_6, %c0_7] : memref<1x1x128xf32, #tpu.memory_space<vmem>>, vector<1x1x128xf32>
    %6 = vector.shape_cast %5 : vector<1x1x128xf32> to vector<1x128xf32>
    %7 = vector.broadcast %6 : vector<1x128xf32> to vector<512x128xf32>
    %8 = arith.mulf %4, %7 : vector<512x128xf32>
    %c0_8 = arith.constant 0 : index
    %c0_9 = arith.constant 0 : index
    %c0_10 = arith.constant 0 : index
    %9 = vector.load %arg4[%c0_8, %c0_9, %c0_10] : memref<1x1x128xf32, #tpu.memory_space<vmem>>, vector<1x1x128xf32>
    %10 = vector.shape_cast %9 : vector<1x1x128xf32> to vector<1x128xf32>
    %11 = vector.broadcast %10 : vector<1x128xf32> to vector<512x128xf32>
    %12 = arith.addf %8, %11 : vector<512x128xf32>
    %cst_11 = arith.constant 0.000000e+00 : f32
    %13 = vector.broadcast %cst_11 : f32 to vector<512x128xf32>
    %14 = arith.maximumf %12, %13 : vector<512x128xf32>
    %15 = vector.extract_strided_slice %14 {offsets = [0, 0], sizes = [128, 128], strides = [1, 1]} : vector<512x128xf32> to vector<128x128xf32>
    %16 = vector.extract_strided_slice %14 {offsets = [128, 0], sizes = [128, 128], strides = [1, 1]} : vector<512x128xf32> to vector<128x128xf32>
    %17 = arith.addf %15, %16 : vector<128x128xf32>
    %18 = vector.extract_strided_slice %14 {offsets = [256, 0], sizes = [128, 128], strides = [1, 1]} : vector<512x128xf32> to vector<128x128xf32>
    %19 = arith.addf %17, %18 : vector<128x128xf32>
    %20 = vector.extract_strided_slice %14 {offsets = [384, 0], sizes = [128, 128], strides = [1, 1]} : vector<512x128xf32> to vector<128x128xf32>
    %21 = arith.addf %19, %20 : vector<128x128xf32>
    %cst_12 = arith.constant 2.500000e-01 : f32
    %22 = vector.broadcast %cst_12 : f32 to vector<128x128xf32>
    %23 = arith.mulf %21, %22 : vector<128x128xf32>
    %c0_13 = arith.constant 0 : index
    %c0_14 = arith.constant 0 : index
    %c0_15 = arith.constant 0 : index
    %24 = vector.load %arg5[%c0_13, %c0_14, %c0_15] : memref<1x128x128xf32, #tpu.memory_space<vmem>>, vector<1x128x128xf32>
    %25 = vector.shape_cast %24 : vector<1x128x128xf32> to vector<128x128xf32>
    %26 = vector.shape_cast %23 : vector<128x128xf32> to vector<1x128x128xf32>
    tpu.vector_store %arg5[%c0_13, %c0_14, %c0_15], %26 {strides = array<i32>} : memref<1x128x128xf32, #tpu.memory_space<vmem>>, vector<1x128x128xf32>,
    return
  }
  func.func @transform_0(%arg0: i32) -> (i32, i32, i32) {
    %c0_i32 = arith.constant 0 : i32
    %c0_i32_0 = arith.constant 0 : i32
    %c0_i32_1 = arith.constant 0 : i32
    return %arg0, %c0_i32, %c0_i32_0 : i32, i32, i32
  }
  func.func @transform_1(%arg0: i32) -> (i32, i32, i32) {
    %c0_i32 = arith.constant 0 : i32
    %c0_i32_0 = arith.constant 0 : i32
    %c0_i32_1 = arith.constant 0 : i32
    return %arg0, %c0_i32, %c0_i32_0 : i32, i32, i32
  }
  func.func @transform_2(%arg0: i32) -> (i32, i32, i32) {
    %c0_i32 = arith.constant 0 : i32
    %c0_i32_0 = arith.constant 0 : i32
    %c0_i32_1 = arith.constant 0 : i32
    return %arg0, %c0_i32, %c0_i32_0 : i32, i32, i32
  }
  func.func @transform_3(%arg0: i32) -> (i32, i32, i32) {
    %c0_i32 = arith.constant 0 : i32
    %c0_i32_0 = arith.constant 0 : i32
    %c0_i32_1 = arith.constant 0 : i32
    return %arg0, %c0_i32, %c0_i32_0 : i32, i32, i32
  }
  func.func @transform_4(%arg0: i32) -> (i32, i32, i32) {
    %c0_i32 = arith.constant 0 : i32
    %c0_i32_0 = arith.constant 0 : i32
    %c0_i32_1 = arith.constant 0 : i32
    return %arg0, %c0_i32, %c0_i32_0 : i32, i32, i32
  }
}

module attributes {stable_mosaic.version = 11 : i64} {
  func.func @_gmm_bn_relu_kernel(%arg0: i32, %arg1: memref<1x128x288xbf16, #tpu.memory_space<vmem>>, %arg2: memref<1x288x128xbf16, #tpu.memory_space<vmem>>, %arg3: memref<1x1x128xf32, #tpu.memory_space<vmem>>, %arg4: memref<1x1x128xf32, #tpu.memory_space<vmem>>, %arg5: memref<1x32x128xf32, #tpu.memory_space<vmem>>) attributes {dimension_semantics = [#tpu.dimension_semantics<parallel>], iteration_bounds = array<i64: 8>, scalar_prefetch = 0 : i64, scratch_operands = 0 : i64, tpu.core_type = #tpu.core_type<tc>, window_params = [{transform_indices = @transform_0, window_bounds = array<i64: 1, 128, 288>}, {transform_indices = @transform_1, window_bounds = array<i64: 1, 288, 128>}, {transform_indices = @transform_2, window_bounds = array<i64: 1, 1, 128>}, {transform_indices = @transform_3, window_bounds = array<i64: 1, 1, 128>}, {transform_indices = @transform_4, window_bounds = array<i64: 1, 32, 128>}]} {
    %c0 = arith.constant 0 : index
    %c0_0 = arith.constant 0 : index
    %c0_1 = arith.constant 0 : index
    %0 = vector.load %arg1[%c0, %c0_0, %c0_1] : memref<1x128x288xbf16, #tpu.memory_space<vmem>>, vector<1x128x288xbf16>
    %1 = vector.shape_cast %0 : vector<1x128x288xbf16> to vector<128x288xbf16>
    %c0_2 = arith.constant 0 : index
    %c0_3 = arith.constant 0 : index
    %c0_4 = arith.constant 0 : index
    %2 = vector.load %arg2[%c0_2, %c0_3, %c0_4] : memref<1x288x128xbf16, #tpu.memory_space<vmem>>, vector<1x288x128xbf16>
    %3 = vector.shape_cast %2 : vector<1x288x128xbf16> to vector<288x128xbf16>
    %cst = arith.constant dense<0.000000e+00> : vector<128x128xf32>
    %4 = tpu.matmul %1, %3, %cst {dimension_numbers = #tpu.dot_dimension_numbers<[1], [0], [0], [1], [0, 0, 1, 1], [], []>} : vector<128x288xbf16>, vector<288x128xbf16>, vector<128x128xf32> -> vector<128x128xf32>
    %c0_5 = arith.constant 0 : index
    %c0_6 = arith.constant 0 : index
    %c0_7 = arith.constant 0 : index
    %5 = vector.load %arg3[%c0_5, %c0_6, %c0_7] : memref<1x1x128xf32, #tpu.memory_space<vmem>>, vector<1x1x128xf32>
    %6 = vector.shape_cast %5 : vector<1x1x128xf32> to vector<1x128xf32>
    %7 = vector.broadcast %6 : vector<1x128xf32> to vector<128x128xf32>
    %8 = arith.mulf %4, %7 : vector<128x128xf32>
    %c0_8 = arith.constant 0 : index
    %c0_9 = arith.constant 0 : index
    %c0_10 = arith.constant 0 : index
    %9 = vector.load %arg4[%c0_8, %c0_9, %c0_10] : memref<1x1x128xf32, #tpu.memory_space<vmem>>, vector<1x1x128xf32>
    %10 = vector.shape_cast %9 : vector<1x1x128xf32> to vector<1x128xf32>
    %11 = vector.broadcast %10 : vector<1x128xf32> to vector<128x128xf32>
    %12 = arith.addf %8, %11 : vector<128x128xf32>
    %cst_11 = arith.constant 0.000000e+00 : f32
    %13 = vector.broadcast %cst_11 : f32 to vector<128x128xf32>
    %14 = arith.maximumf %12, %13 : vector<128x128xf32>
    %15 = vector.extract_strided_slice %14 {offsets = [0, 0], sizes = [32, 128], strides = [1, 1]} : vector<128x128xf32> to vector<32x128xf32>
    %16 = vector.extract_strided_slice %14 {offsets = [32, 0], sizes = [32, 128], strides = [1, 1]} : vector<128x128xf32> to vector<32x128xf32>
    %17 = arith.addf %15, %16 : vector<32x128xf32>
    %18 = vector.extract_strided_slice %14 {offsets = [64, 0], sizes = [32, 128], strides = [1, 1]} : vector<128x128xf32> to vector<32x128xf32>
    %19 = arith.addf %17, %18 : vector<32x128xf32>
    %20 = vector.extract_strided_slice %14 {offsets = [96, 0], sizes = [32, 128], strides = [1, 1]} : vector<128x128xf32> to vector<32x128xf32>
    %21 = arith.addf %19, %20 : vector<32x128xf32>
    %cst_12 = arith.constant 2.500000e-01 : f32
    %22 = vector.broadcast %cst_12 : f32 to vector<32x128xf32>
    %23 = arith.mulf %21, %22 : vector<32x128xf32>
    %c0_13 = arith.constant 0 : index
    %c0_14 = arith.constant 0 : index
    %c0_15 = arith.constant 0 : index
    %24 = vector.load %arg5[%c0_13, %c0_14, %c0_15] : memref<1x32x128xf32, #tpu.memory_space<vmem>>, vector<1x32x128xf32>
    %25 = vector.shape_cast %24 : vector<1x32x128xf32> to vector<32x128xf32>
    %26 = vector.shape_cast %23 : vector<32x128xf32> to vector<1x32x128xf32>
    tpu.vector_store %arg5[%c0_13, %c0_14, %c0_15], %26 {strides = array<i32>} : memref<1x32x128xf32, #tpu.memory_space<vmem>>, vector<1x32x128xf32>,
    return
  }
  func.func @transform_0(%arg0: i32) -> (i32, i32, i32) {
    %c0_i32 = arith.constant 0 : i32
    %c0_i32_0 = arith.constant 0 : i32
    %c0_i32_1 = arith.constant 0 : i32
    return %arg0, %c0_i32, %c0_i32_0 : i32, i32, i32
  }
  func.func @transform_1(%arg0: i32) -> (i32, i32, i32) {
    %c0_i32 = arith.constant 0 : i32
    %c0_i32_0 = arith.constant 0 : i32
    %c0_i32_1 = arith.constant 0 : i32
    return %arg0, %c0_i32, %c0_i32_0 : i32, i32, i32
  }
  func.func @transform_2(%arg0: i32) -> (i32, i32, i32) {
    %c0_i32 = arith.constant 0 : i32
    %c0_i32_0 = arith.constant 0 : i32
    %c0_i32_1 = arith.constant 0 : i32
    return %arg0, %c0_i32, %c0_i32_0 : i32, i32, i32
  }
  func.func @transform_3(%arg0: i32) -> (i32, i32, i32) {
    %c0_i32 = arith.constant 0 : i32
    %c0_i32_0 = arith.constant 0 : i32
    %c0_i32_1 = arith.constant 0 : i32
    return %arg0, %c0_i32, %c0_i32_0 : i32, i32, i32
  }
  func.func @transform_4(%arg0: i32) -> (i32, i32, i32) {
    %c0_i32 = arith.constant 0 : i32
    %c0_i32_0 = arith.constant 0 : i32
    %c0_i32_1 = arith.constant 0 : i32
    return %arg0, %c0_i32, %c0_i32_0 : i32, i32, i32
  }
}

module attributes {stable_mosaic.version = 11 : i64} {
  func.func @_gmm_bn_relu_kernel(%arg0: i32, %arg1: memref<1x32x512xbf16, #tpu.memory_space<vmem>>, %arg2: memref<1x512x128xbf16, #tpu.memory_space<vmem>>, %arg3: memref<1x1x128xf32, #tpu.memory_space<vmem>>, %arg4: memref<1x1x128xf32, #tpu.memory_space<vmem>>, %arg5: memref<1x32x128xf32, #tpu.memory_space<vmem>>) attributes {dimension_semantics = [#tpu.dimension_semantics<parallel>], iteration_bounds = array<i64: 2>, scalar_prefetch = 0 : i64, scratch_operands = 0 : i64, tpu.core_type = #tpu.core_type<tc>, window_params = [{transform_indices = @transform_0, window_bounds = array<i64: 1, 32, 512>}, {transform_indices = @transform_1, window_bounds = array<i64: 1, 512, 128>}, {transform_indices = @transform_2, window_bounds = array<i64: 1, 1, 128>}, {transform_indices = @transform_3, window_bounds = array<i64: 1, 1, 128>}, {transform_indices = @transform_4, window_bounds = array<i64: 1, 32, 128>}]} {
    %c0 = arith.constant 0 : index
    %c0_0 = arith.constant 0 : index
    %c0_1 = arith.constant 0 : index
    %0 = vector.load %arg1[%c0, %c0_0, %c0_1] : memref<1x32x512xbf16, #tpu.memory_space<vmem>>, vector<1x32x512xbf16>
    %1 = vector.shape_cast %0 : vector<1x32x512xbf16> to vector<32x512xbf16>
    %c0_2 = arith.constant 0 : index
    %c0_3 = arith.constant 0 : index
    %c0_4 = arith.constant 0 : index
    %2 = vector.load %arg2[%c0_2, %c0_3, %c0_4] : memref<1x512x128xbf16, #tpu.memory_space<vmem>>, vector<1x512x128xbf16>
    %3 = vector.shape_cast %2 : vector<1x512x128xbf16> to vector<512x128xbf16>
    %cst = arith.constant dense<0.000000e+00> : vector<32x128xf32>
    %4 = tpu.matmul %1, %3, %cst {dimension_numbers = #tpu.dot_dimension_numbers<[1], [0], [0], [1], [0, 0, 1, 1], [], []>} : vector<32x512xbf16>, vector<512x128xbf16>, vector<32x128xf32> -> vector<32x128xf32>
    %c0_5 = arith.constant 0 : index
    %c0_6 = arith.constant 0 : index
    %c0_7 = arith.constant 0 : index
    %5 = vector.load %arg3[%c0_5, %c0_6, %c0_7] : memref<1x1x128xf32, #tpu.memory_space<vmem>>, vector<1x1x128xf32>
    %6 = vector.shape_cast %5 : vector<1x1x128xf32> to vector<1x128xf32>
    %7 = vector.broadcast %6 : vector<1x128xf32> to vector<32x128xf32>
    %8 = arith.mulf %4, %7 : vector<32x128xf32>
    %c0_8 = arith.constant 0 : index
    %c0_9 = arith.constant 0 : index
    %c0_10 = arith.constant 0 : index
    %9 = vector.load %arg4[%c0_8, %c0_9, %c0_10] : memref<1x1x128xf32, #tpu.memory_space<vmem>>, vector<1x1x128xf32>
    %10 = vector.shape_cast %9 : vector<1x1x128xf32> to vector<1x128xf32>
    %11 = vector.broadcast %10 : vector<1x128xf32> to vector<32x128xf32>
    %12 = arith.addf %8, %11 : vector<32x128xf32>
    %cst_11 = arith.constant 0.000000e+00 : f32
    %13 = vector.broadcast %cst_11 : f32 to vector<32x128xf32>
    %14 = arith.maximumf %12, %13 : vector<32x128xf32>
    %c0_12 = arith.constant 0 : index
    %c0_13 = arith.constant 0 : index
    %c0_14 = arith.constant 0 : index
    %15 = vector.load %arg5[%c0_12, %c0_13, %c0_14] : memref<1x32x128xf32, #tpu.memory_space<vmem>>, vector<1x32x128xf32>
    %16 = vector.shape_cast %15 : vector<1x32x128xf32> to vector<32x128xf32>
    %17 = vector.shape_cast %14 : vector<32x128xf32> to vector<1x32x128xf32>
    tpu.vector_store %arg5[%c0_12, %c0_13, %c0_14], %17 {strides = array<i32>} : memref<1x32x128xf32, #tpu.memory_space<vmem>>, vector<1x32x128xf32>,
    return
  }
  func.func @transform_0(%arg0: i32) -> (i32, i32, i32) {
    %c0_i32 = arith.constant 0 : i32
    %c0_i32_0 = arith.constant 0 : i32
    %c0_i32_1 = arith.constant 0 : i32
    return %arg0, %c0_i32, %c0_i32_0 : i32, i32, i32
  }
  func.func @transform_1(%arg0: i32) -> (i32, i32, i32) {
    %c0_i32 = arith.constant 0 : i32
    %c0_i32_0 = arith.constant 0 : i32
    %c0_i32_1 = arith.constant 0 : i32
    return %arg0, %c0_i32, %c0_i32_0 : i32, i32, i32
  }
  func.func @transform_2(%arg0: i32) -> (i32, i32, i32) {
    %c0_i32 = arith.constant 0 : i32
    %c0_i32_0 = arith.constant 0 : i32
    %c0_i32_1 = arith.constant 0 : i32
    return %arg0, %c0_i32, %c0_i32_0 : i32, i32, i32
  }
  func.func @transform_3(%arg0: i32) -> (i32, i32, i32) {
    %c0_i32 = arith.constant 0 : i32
    %c0_i32_0 = arith.constant 0 : i32
    %c0_i32_1 = arith.constant 0 : i32
    return %arg0, %c0_i32, %c0_i32_0 : i32, i32, i32
  }
  func.func @transform_4(%arg0: i32) -> (i32, i32, i32) {
    %c0_i32 = arith.constant 0 : i32
    %c0_i32_0 = arith.constant 0 : i32
    %c0_i32_1 = arith.constant 0 : i32
    return %arg0, %c0_i32, %c0_i32_0 : i32, i32, i32
  }
}

module attributes {stable_mosaic.version = 11 : i64} {
  func.func @_gmm_bn_relu_kernel(%arg0: i32, %arg1: memref<1x32x256xbf16, #tpu.memory_space<vmem>>, %arg2: memref<1x256x144xbf16, #tpu.memory_space<vmem>>, %arg3: memref<1x1x144xf32, #tpu.memory_space<vmem>>, %arg4: memref<1x1x144xf32, #tpu.memory_space<vmem>>, %arg5: memref<1x32x144xf32, #tpu.memory_space<vmem>>) attributes {dimension_semantics = [#tpu.dimension_semantics<parallel>], iteration_bounds = array<i64: 1>, scalar_prefetch = 0 : i64, scratch_operands = 0 : i64, tpu.core_type = #tpu.core_type<tc>, window_params = [{transform_indices = @transform_0, window_bounds = array<i64: 1, 32, 256>}, {transform_indices = @transform_1, window_bounds = array<i64: 1, 256, 144>}, {transform_indices = @transform_2, window_bounds = array<i64: 1, 1, 144>}, {transform_indices = @transform_3, window_bounds = array<i64: 1, 1, 144>}, {transform_indices = @transform_4, window_bounds = array<i64: 1, 32, 144>}]} {
    %c0 = arith.constant 0 : index
    %c0_0 = arith.constant 0 : index
    %c0_1 = arith.constant 0 : index
    %0 = vector.load %arg1[%c0, %c0_0, %c0_1] : memref<1x32x256xbf16, #tpu.memory_space<vmem>>, vector<1x32x256xbf16>
    %1 = vector.shape_cast %0 : vector<1x32x256xbf16> to vector<32x256xbf16>
    %c0_2 = arith.constant 0 : index
    %c0_3 = arith.constant 0 : index
    %c0_4 = arith.constant 0 : index
    %2 = vector.load %arg2[%c0_2, %c0_3, %c0_4] : memref<1x256x144xbf16, #tpu.memory_space<vmem>>, vector<1x256x144xbf16>
    %3 = vector.shape_cast %2 : vector<1x256x144xbf16> to vector<256x144xbf16>
    %cst = arith.constant dense<0.000000e+00> : vector<32x144xf32>
    %4 = tpu.matmul %1, %3, %cst {dimension_numbers = #tpu.dot_dimension_numbers<[1], [0], [0], [1], [0, 0, 1, 1], [], []>} : vector<32x256xbf16>, vector<256x144xbf16>, vector<32x144xf32> -> vector<32x144xf32>
    %c0_5 = arith.constant 0 : index
    %c0_6 = arith.constant 0 : index
    %c0_7 = arith.constant 0 : index
    %5 = vector.load %arg3[%c0_5, %c0_6, %c0_7] : memref<1x1x144xf32, #tpu.memory_space<vmem>>, vector<1x1x144xf32>
    %6 = vector.shape_cast %5 : vector<1x1x144xf32> to vector<1x144xf32>
    %7 = vector.broadcast %6 : vector<1x144xf32> to vector<32x144xf32>
    %8 = arith.mulf %4, %7 : vector<32x144xf32>
    %c0_8 = arith.constant 0 : index
    %c0_9 = arith.constant 0 : index
    %c0_10 = arith.constant 0 : index
    %9 = vector.load %arg4[%c0_8, %c0_9, %c0_10] : memref<1x1x144xf32, #tpu.memory_space<vmem>>, vector<1x1x144xf32>
    %10 = vector.shape_cast %9 : vector<1x1x144xf32> to vector<1x144xf32>
    %11 = vector.broadcast %10 : vector<1x144xf32> to vector<32x144xf32>
    %12 = arith.addf %8, %11 : vector<32x144xf32>
    %cst_11 = arith.constant 0.000000e+00 : f32
    %13 = vector.broadcast %cst_11 : f32 to vector<32x144xf32>
    %14 = arith.maximumf %12, %13 : vector<32x144xf32>
    %c0_12 = arith.constant 0 : index
    %c0_13 = arith.constant 0 : index
    %c0_14 = arith.constant 0 : index
    %15 = vector.load %arg5[%c0_12, %c0_13, %c0_14] : memref<1x32x144xf32, #tpu.memory_space<vmem>>, vector<1x32x144xf32>
    %16 = vector.shape_cast %15 : vector<1x32x144xf32> to vector<32x144xf32>
    %17 = vector.shape_cast %14 : vector<32x144xf32> to vector<1x32x144xf32>
    tpu.vector_store %arg5[%c0_12, %c0_13, %c0_14], %17 {strides = array<i32>} : memref<1x32x144xf32, #tpu.memory_space<vmem>>, vector<1x32x144xf32>,
    return
  }
  func.func @transform_0(%arg0: i32) -> (i32, i32, i32) {
    %c0_i32 = arith.constant 0 : i32
    %c0_i32_0 = arith.constant 0 : i32
    %c0_i32_1 = arith.constant 0 : i32
    return %arg0, %c0_i32, %c0_i32_0 : i32, i32, i32
  }
  func.func @transform_1(%arg0: i32) -> (i32, i32, i32) {
    %c0_i32 = arith.constant 0 : i32
    %c0_i32_0 = arith.constant 0 : i32
    %c0_i32_1 = arith.constant 0 : i32
    return %arg0, %c0_i32, %c0_i32_0 : i32, i32, i32
  }
  func.func @transform_2(%arg0: i32) -> (i32, i32, i32) {
    %c0_i32 = arith.constant 0 : i32
    %c0_i32_0 = arith.constant 0 : i32
    %c0_i32_1 = arith.constant 0 : i32
    return %arg0, %c0_i32, %c0_i32_0 : i32, i32, i32
  }
  func.func @transform_3(%arg0: i32) -> (i32, i32, i32) {
    %c0_i32 = arith.constant 0 : i32
    %c0_i32_0 = arith.constant 0 : i32
    %c0_i32_1 = arith.constant 0 : i32
    return %arg0, %c0_i32, %c0_i32_0 : i32, i32, i32
  }
  func.func @transform_4(%arg0: i32) -> (i32, i32, i32) {
    %c0_i32 = arith.constant 0 : i32
    %c0_i32_0 = arith.constant 0 : i32
    %c0_i32_1 = arith.constant 0 : i32
    return %arg0, %c0_i32, %c0_i32_0 : i32, i32, i32
  }
}

module attributes {stable_mosaic.version = 11 : i64} {
  func.func @_gmm_bn_relu_kernel(%arg0: i32, %arg1: memref<1x32x128xbf16, #tpu.memory_space<vmem>>, %arg2: memref<1x128x128xbf16, #tpu.memory_space<vmem>>, %arg3: memref<1x1x128xf32, #tpu.memory_space<vmem>>, %arg4: memref<1x1x128xf32, #tpu.memory_space<vmem>>, %arg5: memref<1x32x128xf32, #tpu.memory_space<vmem>>) attributes {dimension_semantics = [#tpu.dimension_semantics<parallel>], iteration_bounds = array<i64: 4>, scalar_prefetch = 0 : i64, scratch_operands = 0 : i64, tpu.core_type = #tpu.core_type<tc>, window_params = [{transform_indices = @transform_0, window_bounds = array<i64: 1, 32, 128>}, {transform_indices = @transform_1, window_bounds = array<i64: 1, 128, 128>}, {transform_indices = @transform_2, window_bounds = array<i64: 1, 1, 128>}, {transform_indices = @transform_3, window_bounds = array<i64: 1, 1, 128>}, {transform_indices = @transform_4, window_bounds = array<i64: 1, 32, 128>}]} {
    %c0 = arith.constant 0 : index
    %c0_0 = arith.constant 0 : index
    %c0_1 = arith.constant 0 : index
    %0 = vector.load %arg1[%c0, %c0_0, %c0_1] : memref<1x32x128xbf16, #tpu.memory_space<vmem>>, vector<1x32x128xbf16>
    %1 = vector.shape_cast %0 : vector<1x32x128xbf16> to vector<32x128xbf16>
    %c0_2 = arith.constant 0 : index
    %c0_3 = arith.constant 0 : index
    %c0_4 = arith.constant 0 : index
    %2 = vector.load %arg2[%c0_2, %c0_3, %c0_4] : memref<1x128x128xbf16, #tpu.memory_space<vmem>>, vector<1x128x128xbf16>
    %3 = vector.shape_cast %2 : vector<1x128x128xbf16> to vector<128x128xbf16>
    %cst = arith.constant dense<0.000000e+00> : vector<32x128xf32>
    %4 = tpu.matmul %1, %3, %cst {dimension_numbers = #tpu.dot_dimension_numbers<[1], [0], [0], [1], [0, 0, 1, 1], [], []>} : vector<32x128xbf16>, vector<128x128xbf16>, vector<32x128xf32> -> vector<32x128xf32>
    %c0_5 = arith.constant 0 : index
    %c0_6 = arith.constant 0 : index
    %c0_7 = arith.constant 0 : index
    %5 = vector.load %arg3[%c0_5, %c0_6, %c0_7] : memref<1x1x128xf32, #tpu.memory_space<vmem>>, vector<1x1x128xf32>
    %6 = vector.shape_cast %5 : vector<1x1x128xf32> to vector<1x128xf32>
    %7 = vector.broadcast %6 : vector<1x128xf32> to vector<32x128xf32>
    %8 = arith.mulf %4, %7 : vector<32x128xf32>
    %c0_8 = arith.constant 0 : index
    %c0_9 = arith.constant 0 : index
    %c0_10 = arith.constant 0 : index
    %9 = vector.load %arg4[%c0_8, %c0_9, %c0_10] : memref<1x1x128xf32, #tpu.memory_space<vmem>>, vector<1x1x128xf32>
    %10 = vector.shape_cast %9 : vector<1x1x128xf32> to vector<1x128xf32>
    %11 = vector.broadcast %10 : vector<1x128xf32> to vector<32x128xf32>
    %12 = arith.addf %8, %11 : vector<32x128xf32>
    %cst_11 = arith.constant 0.000000e+00 : f32
    %13 = vector.broadcast %cst_11 : f32 to vector<32x128xf32>
    %14 = arith.maximumf %12, %13 : vector<32x128xf32>
    %c0_12 = arith.constant 0 : index
    %c0_13 = arith.constant 0 : index
    %c0_14 = arith.constant 0 : index
    %15 = vector.load %arg5[%c0_12, %c0_13, %c0_14] : memref<1x32x128xf32, #tpu.memory_space<vmem>>, vector<1x32x128xf32>
    %16 = vector.shape_cast %15 : vector<1x32x128xf32> to vector<32x128xf32>
    %17 = vector.shape_cast %14 : vector<32x128xf32> to vector<1x32x128xf32>
    tpu.vector_store %arg5[%c0_12, %c0_13, %c0_14], %17 {strides = array<i32>} : memref<1x32x128xf32, #tpu.memory_space<vmem>>, vector<1x32x128xf32>,
    return
  }
  func.func @transform_0(%arg0: i32) -> (i32, i32, i32) {
    %c0_i32 = arith.constant 0 : i32
    %c0_i32_0 = arith.constant 0 : i32
    %c0_i32_1 = arith.constant 0 : i32
    return %arg0, %c0_i32, %c0_i32_0 : i32, i32, i32
  }
  func.func @transform_1(%arg0: i32) -> (i32, i32, i32) {
    %c0_i32 = arith.constant 0 : i32
    %c0_i32_0 = arith.constant 0 : i32
    %c0_i32_1 = arith.constant 0 : i32
    return %arg0, %c0_i32, %c0_i32_0 : i32, i32, i32
  }
  func.func @transform_2(%arg0: i32) -> (i32, i32, i32) {
    %c0_i32 = arith.constant 0 : i32
    %c0_i32_0 = arith.constant 0 : i32
    %c0_i32_1 = arith.constant 0 : i32
    return %arg0, %c0_i32, %c0_i32_0 : i32, i32, i32
  }
  func.func @transform_3(%arg0: i32) -> (i32, i32, i32) {
    %c0_i32 = arith.constant 0 : i32
    %c0_i32_0 = arith.constant 0 : i32
    %c0_i32_1 = arith.constant 0 : i32
    return %arg0, %c0_i32, %c0_i32_0 : i32, i32, i32
  }
  func.func @transform_4(%arg0: i32) -> (i32, i32, i32) {
    %c0_i32 = arith.constant 0 : i32
    %c0_i32_0 = arith.constant 0 : i32
    %c0_i32_1 = arith.constant 0 : i32
    return %arg0, %c0_i32, %c0_i32_0 : i32, i32, i32
  }
}

module attributes {stable_mosaic.version = 11 : i64} {
  func.func @_gmm_bn_relu_kernel(%arg0: i32, %arg1: memref<1x128x384xbf16, #tpu.memory_space<vmem>>, %arg2: memref<1x384x16xbf16, #tpu.memory_space<vmem>>, %arg3: memref<1x1x16xf32, #tpu.memory_space<vmem>>, %arg4: memref<1x1x16xf32, #tpu.memory_space<vmem>>, %arg5: memref<1x128x16xf32, #tpu.memory_space<vmem>>) attributes {dimension_semantics = [#tpu.dimension_semantics<parallel>], iteration_bounds = array<i64: 1>, scalar_prefetch = 0 : i64, scratch_operands = 0 : i64, tpu.core_type = #tpu.core_type<tc>, window_params = [{transform_indices = @transform_0, window_bounds = array<i64: 1, 128, 384>}, {transform_indices = @transform_1, window_bounds = array<i64: 1, 384, 16>}, {transform_indices = @transform_2, window_bounds = array<i64: 1, 1, 16>}, {transform_indices = @transform_3, window_bounds = array<i64: 1, 1, 16>}, {transform_indices = @transform_4, window_bounds = array<i64: 1, 128, 16>}]} {
    %c0 = arith.constant 0 : index
    %c0_0 = arith.constant 0 : index
    %c0_1 = arith.constant 0 : index
    %0 = vector.load %arg1[%c0, %c0_0, %c0_1] : memref<1x128x384xbf16, #tpu.memory_space<vmem>>, vector<1x128x384xbf16>
    %1 = vector.shape_cast %0 : vector<1x128x384xbf16> to vector<128x384xbf16>
    %c0_2 = arith.constant 0 : index
    %c0_3 = arith.constant 0 : index
    %c0_4 = arith.constant 0 : index
    %2 = vector.load %arg2[%c0_2, %c0_3, %c0_4] : memref<1x384x16xbf16, #tpu.memory_space<vmem>>, vector<1x384x16xbf16>
    %3 = vector.shape_cast %2 : vector<1x384x16xbf16> to vector<384x16xbf16>
    %cst = arith.constant dense<0.000000e+00> : vector<128x16xf32>
    %4 = tpu.matmul %1, %3, %cst {dimension_numbers = #tpu.dot_dimension_numbers<[1], [0], [0], [1], [0, 0, 1, 1], [], []>} : vector<128x384xbf16>, vector<384x16xbf16>, vector<128x16xf32> -> vector<128x16xf32>
    %c0_5 = arith.constant 0 : index
    %c0_6 = arith.constant 0 : index
    %c0_7 = arith.constant 0 : index
    %5 = vector.load %arg3[%c0_5, %c0_6, %c0_7] : memref<1x1x16xf32, #tpu.memory_space<vmem>>, vector<1x1x16xf32>
    %6 = vector.shape_cast %5 : vector<1x1x16xf32> to vector<1x16xf32>
    %7 = vector.broadcast %6 : vector<1x16xf32> to vector<128x16xf32>
    %8 = arith.mulf %4, %7 : vector<128x16xf32>
    %c0_8 = arith.constant 0 : index
    %c0_9 = arith.constant 0 : index
    %c0_10 = arith.constant 0 : index
    %9 = vector.load %arg4[%c0_8, %c0_9, %c0_10] : memref<1x1x16xf32, #tpu.memory_space<vmem>>, vector<1x1x16xf32>
    %10 = vector.shape_cast %9 : vector<1x1x16xf32> to vector<1x16xf32>
    %11 = vector.broadcast %10 : vector<1x16xf32> to vector<128x16xf32>
    %12 = arith.addf %8, %11 : vector<128x16xf32>
    %cst_11 = arith.constant 0.000000e+00 : f32
    %13 = vector.broadcast %cst_11 : f32 to vector<128x16xf32>
    %14 = arith.maximumf %12, %13 : vector<128x16xf32>
    %c0_12 = arith.constant 0 : index
    %c0_13 = arith.constant 0 : index
    %c0_14 = arith.constant 0 : index
    %15 = vector.load %arg5[%c0_12, %c0_13, %c0_14] : memref<1x128x16xf32, #tpu.memory_space<vmem>>, vector<1x128x16xf32>
    %16 = vector.shape_cast %15 : vector<1x128x16xf32> to vector<128x16xf32>
    %17 = vector.shape_cast %14 : vector<128x16xf32> to vector<1x128x16xf32>
    tpu.vector_store %arg5[%c0_12, %c0_13, %c0_14], %17 {strides = array<i32>} : memref<1x128x16xf32, #tpu.memory_space<vmem>>, vector<1x128x16xf32>,
    return
  }
  func.func @transform_0(%arg0: i32) -> (i32, i32, i32) {
    %c0_i32 = arith.constant 0 : i32
    %c0_i32_0 = arith.constant 0 : i32
    %c0_i32_1 = arith.constant 0 : i32
    return %arg0, %c0_i32, %c0_i32_0 : i32, i32, i32
  }
  func.func @transform_1(%arg0: i32) -> (i32, i32, i32) {
    %c0_i32 = arith.constant 0 : i32
    %c0_i32_0 = arith.constant 0 : i32
    %c0_i32_1 = arith.constant 0 : i32
    return %arg0, %c0_i32, %c0_i32_0 : i32, i32, i32
  }
  func.func @transform_2(%arg0: i32) -> (i32, i32, i32) {
    %c0_i32 = arith.constant 0 : i32
    %c0_i32_0 = arith.constant 0 : i32
    %c0_i32_1 = arith.constant 0 : i32
    return %arg0, %c0_i32, %c0_i32_0 : i32, i32, i32
  }
  func.func @transform_3(%arg0: i32) -> (i32, i32, i32) {
    %c0_i32 = arith.constant 0 : i32
    %c0_i32_0 = arith.constant 0 : i32
    %c0_i32_1 = arith.constant 0 : i32
    return %arg0, %c0_i32, %c0_i32_0 : i32, i32, i32
  }
  func.func @transform_4(%arg0: i32) -> (i32, i32, i32) {
    %c0_i32 = arith.constant 0 : i32
    %c0_i32_0 = arith.constant 0 : i32
    %c0_i32_1 = arith.constant 0 : i32
    return %arg0, %c0_i32, %c0_i32_0 : i32, i32, i32
  }
}

module attributes {stable_mosaic.version = 11 : i64} {
  func.func @_gmm_bn_relu_kernel(%arg0: i32, %arg1: memref<1x2x1280xbf16, #tpu.memory_space<vmem>>, %arg2: memref<1x1280x20xbf16, #tpu.memory_space<vmem>>, %arg3: memref<1x1x20xf32, #tpu.memory_space<vmem>>, %arg4: memref<1x1x20xf32, #tpu.memory_space<vmem>>, %arg5: memref<1x2x20xf32, #tpu.memory_space<vmem>>) attributes {dimension_semantics = [#tpu.dimension_semantics<parallel>], iteration_bounds = array<i64: 1>, scalar_prefetch = 0 : i64, scratch_operands = 0 : i64, tpu.core_type = #tpu.core_type<tc>, window_params = [{transform_indices = @transform_0, window_bounds = array<i64: 1, 2, 1280>}, {transform_indices = @transform_1, window_bounds = array<i64: 1, 1280, 20>}, {transform_indices = @transform_2, window_bounds = array<i64: 1, 1, 20>}, {transform_indices = @transform_3, window_bounds = array<i64: 1, 1, 20>}, {transform_indices = @transform_4, window_bounds = array<i64: 1, 2, 20>}]} {
    %c0 = arith.constant 0 : index
    %c0_0 = arith.constant 0 : index
    %c0_1 = arith.constant 0 : index
    %0 = vector.load %arg1[%c0, %c0_0, %c0_1] : memref<1x2x1280xbf16, #tpu.memory_space<vmem>>, vector<1x2x1280xbf16>
    %1 = vector.shape_cast %0 : vector<1x2x1280xbf16> to vector<2x1280xbf16>
    %c0_2 = arith.constant 0 : index
    %c0_3 = arith.constant 0 : index
    %c0_4 = arith.constant 0 : index
    %2 = vector.load %arg2[%c0_2, %c0_3, %c0_4] : memref<1x1280x20xbf16, #tpu.memory_space<vmem>>, vector<1x1280x20xbf16>
    %3 = vector.shape_cast %2 : vector<1x1280x20xbf16> to vector<1280x20xbf16>
    %cst = arith.constant dense<0.000000e+00> : vector<2x20xf32>
    %4 = tpu.matmul %1, %3, %cst {dimension_numbers = #tpu.dot_dimension_numbers<[1], [0], [0], [1], [0, 0, 1, 1], [], []>} : vector<2x1280xbf16>, vector<1280x20xbf16>, vector<2x20xf32> -> vector<2x20xf32>
    %c0_5 = arith.constant 0 : index
    %c0_6 = arith.constant 0 : index
    %c0_7 = arith.constant 0 : index
    %5 = vector.load %arg3[%c0_5, %c0_6, %c0_7] : memref<1x1x20xf32, #tpu.memory_space<vmem>>, vector<1x1x20xf32>
    %6 = vector.shape_cast %5 : vector<1x1x20xf32> to vector<1x20xf32>
    %7 = vector.broadcast %6 : vector<1x20xf32> to vector<2x20xf32>
    %8 = arith.mulf %4, %7 : vector<2x20xf32>
    %c0_8 = arith.constant 0 : index
    %c0_9 = arith.constant 0 : index
    %c0_10 = arith.constant 0 : index
    %9 = vector.load %arg4[%c0_8, %c0_9, %c0_10] : memref<1x1x20xf32, #tpu.memory_space<vmem>>, vector<1x1x20xf32>
    %10 = vector.shape_cast %9 : vector<1x1x20xf32> to vector<1x20xf32>
    %11 = vector.broadcast %10 : vector<1x20xf32> to vector<2x20xf32>
    %12 = arith.addf %8, %11 : vector<2x20xf32>
    %c0_11 = arith.constant 0 : index
    %c0_12 = arith.constant 0 : index
    %c0_13 = arith.constant 0 : index
    %13 = vector.load %arg5[%c0_11, %c0_12, %c0_13] : memref<1x2x20xf32, #tpu.memory_space<vmem>>, vector<1x2x20xf32>
    %14 = vector.shape_cast %13 : vector<1x2x20xf32> to vector<2x20xf32>
    %15 = vector.shape_cast %12 : vector<2x20xf32> to vector<1x2x20xf32>
    tpu.vector_store %arg5[%c0_11, %c0_12, %c0_13], %15 {strides = array<i32>} : memref<1x2x20xf32, #tpu.memory_space<vmem>>, vector<1x2x20xf32>,
    return
  }
  func.func @transform_0(%arg0: i32) -> (i32, i32, i32) {
    %c0_i32 = arith.constant 0 : i32
    %c0_i32_0 = arith.constant 0 : i32
    %c0_i32_1 = arith.constant 0 : i32
    return %arg0, %c0_i32, %c0_i32_0 : i32, i32, i32
  }
  func.func @transform_1(%arg0: i32) -> (i32, i32, i32) {
    %c0_i32 = arith.constant 0 : i32
    %c0_i32_0 = arith.constant 0 : i32
    %c0_i32_1 = arith.constant 0 : i32
    return %arg0, %c0_i32, %c0_i32_0 : i32, i32, i32
  }
  func.func @transform_2(%arg0: i32) -> (i32, i32, i32) {
    %c0_i32 = arith.constant 0 : i32
    %c0_i32_0 = arith.constant 0 : i32
    %c0_i32_1 = arith.constant 0 : i32
    return %arg0, %c0_i32, %c0_i32_0 : i32, i32, i32
  }
  func.func @transform_3(%arg0: i32) -> (i32, i32, i32) {
    %c0_i32 = arith.constant 0 : i32
    %c0_i32_0 = arith.constant 0 : i32
    %c0_i32_1 = arith.constant 0 : i32
    return %arg0, %c0_i32, %c0_i32_0 : i32, i32, i32
  }
  func.func @transform_4(%arg0: i32) -> (i32, i32, i32) {
    %c0_i32 = arith.constant 0 : i32
    %c0_i32_0 = arith.constant 0 : i32
    %c0_i32_1 = arith.constant 0 : i32
    return %arg0, %c0_i32, %c0_i32_0 : i32, i32, i32
  }
}

</mosaic_0001>

<bundles_post_ra>
// kernel: testnet0_forward.8
= control target key start
LH: loop header
LB: loop body
LE: loop exit
PB: predicated region body
PF: predicated region fallthrough
CT: control target
= control target key end

     0   :  { %vm1314_vm0 = vcmask 1044480   ;;  %vm1315_vm1 = vcmask 1045504   ;;  %vm929_vm2 = vcmask 220160   ;;  %v4273_v1 = vmov 65535   ;;  %s6686_s1 = inlined_call_operand.vmem [shape: bf16[1,27,128], index: 1, kind: input, shape index: {}]   ;;  %s6687_s0 = inlined_call_operand.vmem [shape: bf16[1,2048,27], index: 0, kind: input, shape index: {}]   ;;  %s6688_s2 = inlined_call_operand.vmem [shape: f32[1,1,128], index: 2, kind: input, shape index: {}]   ;;  %s6689_s3 = inlined_call_operand.vmem [shape: f32[1,1,128], index: 3, kind: input, shape index: {}]   ;;  %s6690_s4 = inlined_call_operand.vmem [shape: f32[1,512,128], index: 4, kind: output, shape index: {}]  }
   0x1   :  { %v4139_v0 = vld [vmem:[%s6686_s1] sm:$0xff]   ;;  %v1316_v2 = vsel %vm1314_vm0, 4294967295, %v4273_v1  ;;  %v4140_v3 = vld [vmem:[%s6686_s1 + $0x8] sm:$0x3f]   ;;  %v4145_v10 = vld [vmem:[%s6687_s0 + $0x10] sm:$0xff]  }
   0x2   :  { %3874 = vmatprep.subr.bf16.mxu0 %v4139_v0  ;;  %4134 = vmatprep.subr.bf16.mxu1 %v4139_v0  ;;  %v1317_v4 = vsel %vm1315_vm1, %v1316_v2, 0  ;;  %v4141_v5 = vld [vmem:[%s6687_s0] sm:$0xff]   ;;  %v4142_v8 = vld [vmem:[%s6687_s0 + $0x8] sm:$0xff]   ;;  %v4147_v11 = vld [vmem:[%s6687_s0 + $0x210] sm:$0xff]  }
   0x3   :  { %3875 = vmatpush3.bf16.msra.mxu0 %v4139_v0  ;;  %4136 = vmatpush3.bf16.msra.mxu1 %v4139_v0  ;;  %v1319_v6 = vand.u32 %v4140_v3, %v1317_v4  ;;  %v4143_v7 = vld [vmem:[%s6687_s0 + $0x200] sm:$0xff]   ;;  %v4144_v9 = vld [vmem:[%s6687_s0 + $0x208] sm:$0xff]   ;;  %v4146_v12 = vld [vmem:[%s6687_s0 + $0x18] sm:$0xff]  }
   0x4   :  { %3878 = vmatprep.mubr.msk.bf16.mxu0 %vm929_vm2, %v4141_v5  ;;  %4006 = vmatprep.mubr.msk.bf16.mxu1 %vm929_vm2, %v4143_v7  ;;  %v4148_v13 = vld [vmem:[%s6687_s0 + $0x218] sm:$0xff]   ;;  %v4149_v14 = vld [vmem:[%s6687_s0 + $0x20] sm:$0xff]   ;;  %v4150_v16 = vld [vmem:[%s6687_s0 + $0x28] sm:$0xff]  }
   0x5   :  { %3876 = vmatprep.subr.bf16.mxu0 %v1319_v6  ;;  %4135 = vmatprep.subr.bf16.mxu1 %v1319_v6  ;;  %v4151_v15 = vld [vmem:[%s6687_s0 + $0x220] sm:$0xff]   ;;  %v4152_v17 = vld [vmem:[%s6687_s0 + $0x228] sm:$0xff]   ;;  %v4153_v18 = vld [vmem:[%s6687_s0 + $0x30] sm:$0xff]  }
   0x6   :  { %v4155_v19 = vld [vmem:[%s6687_s0 + $0x230] sm:$0xff]   ;;  %v4154_v20 = vld [vmem:[%s6687_s0 + $0x38] sm:$0xff]   ;;  %v4157_v22 = vld [vmem:[%s6687_s0 + $0x40] sm:$0xff]  }
   0x7   :  { %3877 = vmatpush3.bf16.msra.mxu0 %v1319_v6  ;;  %4137 = vmatpush3.bf16.msra.mxu1 %v1319_v6  ;;  %v4156_v21 = vld [vmem:[%s6687_s0 + $0x238] sm:$0xff]   ;;  %v4159_v23 = vld [vmem:[%s6687_s0 + $0x240] sm:$0xff]   ;;  %v4158_v24 = vld [vmem:[%s6687_s0 + $0x48] sm:$0xff]  }
   0x8   :  { %v4160_v25 = vld [vmem:[%s6687_s0 + $0x248] sm:$0xff]   ;;  %v4161_v26 = vld [vmem:[%s6687_s0 + $0x50] sm:$0xff]   ;;  %v4162_v28 = vld [vmem:[%s6687_s0 + $0x58] sm:$0xff]  }
   0x9   :  { %v4163_v27 = vld [vmem:[%s6687_s0 + $0x250] sm:$0xff]   ;;  %v4164_v29 = vld [vmem:[%s6687_s0 + $0x258] sm:$0xff]   ;;  %v4165_v30 = vld [vmem:[%s6687_s0 + $0x60] sm:$0xff]  }
   0xa   :  { %3879 = vmatmul.mubr.msk.bf16.vlgmr.msra.gmra.mrb[0].mxu0 %vm929_vm2, %v4142_v8  ;;  %4007 = vmatmul.mubr.msk.bf16.vlgmr.msra.gmra.mrb[0].mxu1 %vm929_vm2, %v4144_v9  ;;  %v4167_v31 = vld [vmem:[%s6687_s0 + $0x260] sm:$0xff]   ;;  %v4166_v32 = vld [vmem:[%s6687_s0 + $0x68] sm:$0xff]   ;;  %v4169_v34 = vld [vmem:[%s6687_s0 + $0x70] sm:$0xff]  }
   0xb   :  { %3882 = vmatprep.mubr.msk.bf16.mxu0 %vm929_vm2, %v4145_v10  ;;  %4010 = vmatprep.mubr.msk.bf16.mxu1 %vm929_vm2, %v4147_v11  ;;  %v4168_v33 = vld [vmem:[%s6687_s0 + $0x268] sm:$0xff]   ;;  %v4171_v35 = vld [vmem:[%s6687_s0 + $0x270] sm:$0xff]   ;;  %v4170_v36 = vld [vmem:[%s6687_s0 + $0x78] sm:$0xff]  }
   0xc   :  { %v4172_v37 = vld [vmem:[%s6687_s0 + $0x278] sm:$0xff]   ;;  %v4173_v38 = vld [vmem:[%s6687_s0 + $0x80] sm:$0xff]   ;;  %v4174_v40 = vld [vmem:[%s6687_s0 + $0x88] sm:$0xff]  }
   0xd   :  { %v4175_v39 = vld [vmem:[%s6687_s0 + $0x280] sm:$0xff]   ;;  %v4176_v41 = vld [vmem:[%s6687_s0 + $0x288] sm:$0xff]   ;;  %v4177_v42 = vld [vmem:[%s6687_s0 + $0x90] sm:$0xff]  }
   0xe   :  { %v4179_v43 = vld [vmem:[%s6687_s0 + $0x290] sm:$0xff]   ;;  %v4178_v44 = vld [vmem:[%s6687_s0 + $0x98] sm:$0xff]   ;;  %v4181_v46 = vld [vmem:[%s6687_s0 + $0xa0] sm:$0xff]  }
   0xf   :  { %v4180_v45 = vld [vmem:[%s6687_s0 + $0x298] sm:$0xff]   ;;  %v4183_v47 = vld [vmem:[%s6687_s0 + $0x2a0] sm:$0xff]   ;;  %v4182_v48 = vld [vmem:[%s6687_s0 + $0xa8] sm:$0xff]  }
  0x10   :  { %v4184_v49 = vld [vmem:[%s6687_s0 + $0x2a8] sm:$0xff]   ;;  %v4185_v50 = vld [vmem:[%s6687_s0 + $0xb0] sm:$0xff]   ;;  %v4186_v52 = vld [vmem:[%s6687_s0 + $0xb8] sm:$0xff]  }
  0x11   :  { %v4187_v51 = vld [vmem:[%s6687_s0 + $0x2b0] sm:$0xff]   ;;  %v4188_v53 = vld [vmem:[%s6687_s0 + $0x2b8] sm:$0xff]   ;;  %v4189_v54 = vld [vmem:[%s6687_s0 + $0xc0] sm:$0xff]  }
  0x12   :  { %3883 = vmatmul.mubr.msk.bf16.gmra.mrb[4].mxu0 %vm929_vm2, %v4146_v12  ;;  %4011 = vmatmul.mubr.msk.bf16.gmra.mrb[4].mxu1 %vm929_vm2, %v4148_v13  ;;  %v4191_v55 = vld [vmem:[%s6687_s0 + $0x2c0] sm:$0xff]   ;;  %v4190_v56 = vld [vmem:[%s6687_s0 + $0xc8] sm:$0xff]   ;;  %v4193_v58 = vld [vmem:[%s6687_s0 + $0xd0] sm:$0xff]  }
  0x13   :  { %3886 = vmatprep.mubr.msk.bf16.mxu0 %vm929_vm2, %v4149_v14  ;;  %4014 = vmatprep.mubr.msk.bf16.mxu1 %vm929_vm2, %v4151_v15  ;;  %v4192_v57 = vld [vmem:[%s6687_s0 + $0x2c8] sm:$0xff]   ;;  %v4195_v59 = vld [vmem:[%s6687_s0 + $0x2d0] sm:$0xff]   ;;  %v4194_v60 = vld [vmem:[%s6687_s0 + $0xd8] sm:$0xff]  }
  0x14   :  { %v4196_v61 = vld [vmem:[%s6687_s0 + $0x2d8] sm:$0xff]   ;;  %v4197_v62 = vld [vmem:[%s6687_s0 + $0xe0] sm:$0xff]   ;;  %v4198_v0 = vld [vmem:[%s6687_s0 + $0xe8] sm:$0xff]  }
  0x15   :  { %v4199_v63 = vld [vmem:[%s6687_s0 + $0x2e0] sm:$0xff]   ;;  %v4200_v1 = vld [vmem:[%s6687_s0 + $0x2e8] sm:$0xff]   ;;  %v4201_v2 = vld [vmem:[%s6687_s0 + $0xf0] sm:$0xff]  }
  0x16   :  { %v4203_v3 = vld [vmem:[%s6687_s0 + $0x2f0] sm:$0xff]   ;;  %v4202_v4 = vld [vmem:[%s6687_s0 + $0xf8] sm:$0xff]   ;;  %v4205_v6 = vld [vmem:[%s6687_s0 + $0x100] sm:$0xff]  }
  0x17   :  { %v4204_v5 = vld [vmem:[%s6687_s0 + $0x2f8] sm:$0xff]   ;;  %v4207_v7 = vld [vmem:[%s6687_s0 + $0x300] sm:$0xff]   ;;  %v4206_v8 = vld [vmem:[%s6687_s0 + $0x108] sm:$0xff]  }
  0x18   :  { %v4208_v9 = vld [vmem:[%s6687_s0 + $0x308] sm:$0xff]   ;;  %v4209_v10 = vld [vmem:[%s6687_s0 + $0x110] sm:$0xff]   ;;  %v4210_v12 = vld [vmem:[%s6687_s0 + $0x118] sm:$0xff]  }
  0x19   :  { %v4211_v11 = vld [vmem:[%s6687_s0 + $0x310] sm:$0xff]   ;;  %v4212_v13 = vld [vmem:[%s6687_s0 + $0x318] sm:$0xff]   ;;  %v4213_v14 = vld [vmem:[%s6687_s0 + $0x120] sm:$0xff]  }
  0x1a   :  { %3887 = vmatmul.mubr.msk.bf16.gmra.mrb[8].mxu0 %vm929_vm2, %v4150_v16  ;;  %4015 = vmatmul.mubr.msk.bf16.gmra.mrb[8].mxu1 %vm929_vm2, %v4152_v17  ;;  %v4215_v15 = vld [vmem:[%s6687_s0 + $0x320] sm:$0xff]   ;;  %v4214_v16 = vld [vmem:[%s6687_s0 + $0x128] sm:$0xff]  }
  0x1b   :  { %3890 = vmatprep.mubr.msk.bf16.mxu0 %vm929_vm2, %v4153_v18  ;;  %4018 = vmatprep.mubr.msk.bf16.mxu1 %vm929_vm2, %v4155_v19  ;;  %v4216_v17 = vld [vmem:[%s6687_s0 + $0x328] sm:$0xff]   ;;  %v4217_v18 = vld [vmem:[%s6687_s0 + $0x130] sm:$0xff]  }
  0x1c   :  { %v4219_v19 = vld [vmem:[%s6687_s0 + $0x330] sm:$0xff]  }
  0x22   :  { %3891 = vmatmul.mubr.msk.bf16.gmra.mrb[12].mxu0 %vm929_vm2, %v4154_v20  ;;  %4019 = vmatmul.mubr.msk.bf16.gmra.mrb[12].mxu1 %vm929_vm2, %v4156_v21  ;;  %v4218_v20 = vld [vmem:[%s6687_s0 + $0x138] sm:$0xff]  }
  0x23   :  { %3894 = vmatprep.mubr.msk.bf16.mxu0 %vm929_vm2, %v4157_v22  ;;  %4022 = vmatprep.mubr.msk.bf16.mxu1 %vm929_vm2, %v4159_v23  ;;  %v4220_v21 = vld [vmem:[%s6687_s0 + $0x338] sm:$0xff]   ;;  %v4221_v22 = vld [vmem:[%s6687_s0 + $0x140] sm:$0xff]  }
  0x24   :  { %v4223_v23 = vld [vmem:[%s6687_s0 + $0x340] sm:$0xff]  }
  0x2a   :  { %3895 = vmatmul.mubr.msk.bf16.gmra.mrb[16].mxu0 %vm929_vm2, %v4158_v24  ;;  %4023 = vmatmul.mubr.msk.bf16.gmra.mrb[16].mxu1 %vm929_vm2, %v4160_v25  ;;  %v4222_v24 = vld [vmem:[%s6687_s0 + $0x148] sm:$0xff]  }
  0x2b   :  { %3898 = vmatprep.mubr.msk.bf16.mxu0 %vm929_vm2, %v4161_v26  ;;  %4026 = vmatprep.mubr.msk.bf16.mxu1 %vm929_vm2, %v4163_v27  ;;  %v4224_v25 = vld [vmem:[%s6687_s0 + $0x348] sm:$0xff]   ;;  %v4225_v26 = vld [vmem:[%s6687_s0 + $0x150] sm:$0xff]  }
  0x2c   :  { %v4227_v27 = vld [vmem:[%s6687_s0 + $0x350] sm:$0xff]  }
  0x32   :  { %3899 = vmatmul.mubr.msk.bf16.gmra.mrb[20].mxu0 %vm929_vm2, %v4162_v28  ;;  %4027 = vmatmul.mubr.msk.bf16.gmra.mrb[20].mxu1 %vm929_vm2, %v4164_v29  ;;  %v4226_v28 = vld [vmem:[%s6687_s0 + $0x158] sm:$0xff]  }
  0x33   :  { %3902 = vmatprep.mubr.msk.bf16.mxu0 %vm929_vm2, %v4165_v30  ;;  %4030 = vmatprep.mubr.msk.bf16.mxu1 %vm929_vm2, %v4167_v31  ;;  %v4228_v29 = vld [vmem:[%s6687_s0 + $0x358] sm:$0xff]   ;;  %v4229_v30 = vld [vmem:[%s6687_s0 + $0x160] sm:$0xff]  }
  0x34   :  { %v4231_v31 = vld [vmem:[%s6687_s0 + $0x360] sm:$0xff]  }
  0x3a   :  { %3903 = vmatmul.mubr.msk.bf16.gmra.mrb[24].mxu0 %vm929_vm2, %v4166_v32  ;;  %4031 = vmatmul.mubr.msk.bf16.gmra.mrb[24].mxu1 %vm929_vm2, %v4168_v33  ;;  %v4230_v32 = vld [vmem:[%s6687_s0 + $0x168] sm:$0xff]  }
  0x3b   :  { %3906 = vmatprep.mubr.msk.bf16.mxu0 %vm929_vm2, %v4169_v34  ;;  %4034 = vmatprep.mubr.msk.bf16.mxu1 %vm929_vm2, %v4171_v35  ;;  %v4232_v33 = vld [vmem:[%s6687_s0 + $0x368] sm:$0xff]   ;;  %v4233_v34 = vld [vmem:[%s6687_s0 + $0x170] sm:$0xff]  }
  0x3c   :  { %v4235_v35 = vld [vmem:[%s6687_s0 + $0x370] sm:$0xff]  }
  0x42   :  { %3907 = vmatmul.mubr.msk.bf16.gmra.mrb[28].mxu0 %vm929_vm2, %v4170_v36  ;;  %4035 = vmatmul.mubr.msk.bf16.gmra.mrb[28].mxu1 %vm929_vm2, %v4172_v37  ;;  %v4234_v36 = vld [vmem:[%s6687_s0 + $0x178] sm:$0xff]  }
  0x43   :  { %3910 = vmatprep.mubr.msk.bf16.mxu0 %vm929_vm2, %v4173_v38  ;;  %4038 = vmatprep.mubr.msk.bf16.mxu1 %vm929_vm2, %v4175_v39  ;;  %v4236_v37 = vld [vmem:[%s6687_s0 + $0x378] sm:$0xff]   ;;  %v4237_v38 = vld [vmem:[%s6687_s0 + $0x180] sm:$0xff]  }
  0x44   :  { %v4239_v39 = vld [vmem:[%s6687_s0 + $0x380] sm:$0xff]  }
  0x4a   :  { %3911 = vmatmul.mubr.msk.bf16.gmra.mrb[32].mxu0 %vm929_vm2, %v4174_v40  ;;  %4039 = vmatmul.mubr.msk.bf16.gmra.mrb[32].mxu1 %vm929_vm2, %v4176_v41  ;;  %v4238_v40 = vld [vmem:[%s6687_s0 + $0x188] sm:$0xff]  }
  0x4b   :  { %3914 = vmatprep.mubr.msk.bf16.mxu0 %vm929_vm2, %v4177_v42  ;;  %4042 = vmatprep.mubr.msk.bf16.mxu1 %vm929_vm2, %v4179_v43  ;;  %v4240_v41 = vld [vmem:[%s6687_s0 + $0x388] sm:$0xff]   ;;  %v4241_v42 = vld [vmem:[%s6687_s0 + $0x190] sm:$0xff]  }
  0x4c   :  { %v4243_v43 = vld [vmem:[%s6687_s0 + $0x390] sm:$0xff]  }
  0x52   :  { %3915 = vmatmul.mubr.msk.bf16.gmra.mrb[36].mxu0 %vm929_vm2, %v4178_v44  ;;  %4043 = vmatmul.mubr.msk.bf16.gmra.mrb[36].mxu1 %vm929_vm2, %v4180_v45  ;;  %v4242_v44 = vld [vmem:[%s6687_s0 + $0x198] sm:$0xff]  }
  0x53   :  { %3918 = vmatprep.mubr.msk.bf16.mxu0 %vm929_vm2, %v4181_v46  ;;  %4046 = vmatprep.mubr.msk.bf16.mxu1 %vm929_vm2, %v4183_v47  ;;  %v4244_v45 = vld [vmem:[%s6687_s0 + $0x398] sm:$0xff]   ;;  %v4245_v46 = vld [vmem:[%s6687_s0 + $0x1a0] sm:$0xff]  }
  0x54   :  { %v4247_v47 = vld [vmem:[%s6687_s0 + $0x3a0] sm:$0xff]  }
  0x5a   :  { %3919 = vmatmul.mubr.msk.bf16.gmra.mrb[40].mxu0 %vm929_vm2, %v4182_v48  ;;  %4047 = vmatmul.mubr.msk.bf16.gmra.mrb[40].mxu1 %vm929_vm2, %v4184_v49  ;;  %v4246_v48 = vld [vmem:[%s6687_s0 + $0x1a8] sm:$0xff]  }
  0x5b   :  { %3922 = vmatprep.mubr.msk.bf16.mxu0 %vm929_vm2, %v4185_v50  ;;  %4050 = vmatprep.mubr.msk.bf16.mxu1 %vm929_vm2, %v4187_v51  ;;  %v4248_v49 = vld [vmem:[%s6687_s0 + $0x3a8] sm:$0xff]   ;;  %v4249_v50 = vld [vmem:[%s6687_s0 + $0x1b0] sm:$0xff]  }
  0x5c   :  { %v4251_v51 = vld [vmem:[%s6687_s0 + $0x3b0] sm:$0xff]  }
  0x62   :  { %3923 = vmatmul.mubr.msk.bf16.gmra.mrb[44].mxu0 %vm929_vm2, %v4186_v52  ;;  %4051 = vmatmul.mubr.msk.bf16.gmra.mrb[44].mxu1 %vm929_vm2, %v4188_v53 }
  0x63   :  { %3926 = vmatprep.mubr.msk.bf16.mxu0 %vm929_vm2, %v4189_v54  ;;  %4054 = vmatprep.mubr.msk.bf16.mxu1 %vm929_vm2, %v4191_v55 }
  0x6a   :  { %3927 = vmatmul.mubr.msk.bf16.gmra.mrb[48].mxu0 %vm929_vm2, %v4190_v56  ;;  %4055 = vmatmul.mubr.msk.bf16.gmra.mrb[48].mxu1 %vm929_vm2, %v4192_v57  ;;  %v4250_v56 = vld [vmem:[%s6687_s0 + $0x1b8] sm:$0xff]  }
  0x6b   :  { %3930 = vmatprep.mubr.msk.bf16.mxu0 %vm929_vm2, %v4193_v58  ;;  %4058 = vmatprep.mubr.msk.bf16.mxu1 %vm929_vm2, %v4195_v59  ;;  %v4252_v57 = vld [vmem:[%s6687_s0 + $0x3b8] sm:$0xff]  }
  0x72   :  { %3931 = vmatmul.mubr.msk.bf16.gmra.mrb[52].mxu0 %vm929_vm2, %v4194_v60  ;;  %4059 = vmatmul.mubr.msk.bf16.gmra.mrb[52].mxu1 %vm929_vm2, %v4196_v61  ;;  %v4253_v60 = vld [vmem:[%s6687_s0 + $0x1c0] sm:$0xff]  }
  0x73   :  { %3934 = vmatprep.mubr.msk.bf16.mxu0 %vm929_vm2, %v4197_v62  ;;  %4062 = vmatprep.mubr.msk.bf16.mxu1 %vm929_vm2, %v4199_v63  ;;  %v4255_v61 = vld [vmem:[%s6687_s0 + $0x3c0] sm:$0xff]  }
  0x7a   :  { %3935 = vmatmul.mubr.msk.bf16.gmra.mrb[56].mxu0 %vm929_vm2, %v4198_v0  ;;  %4063 = vmatmul.mubr.msk.bf16.gmra.mrb[56].mxu1 %vm929_vm2, %v4200_v1 }
  0x7b   :  { %3938 = vmatprep.mubr.msk.bf16.mxu0 %vm929_vm2, %v4201_v2  ;;  %4066 = vmatprep.mubr.msk.bf16.mxu1 %vm929_vm2, %v4203_v3 }
  0x82   :  { %3939 = vmatmul.mubr.msk.bf16.gmra.mrb[60].mxu0 %vm929_vm2, %v4202_v4  ;;  %4067 = vmatmul.mubr.msk.bf16.gmra.mrb[60].mxu1 %vm929_vm2, %v4204_v5  ;;  %v4254_v4 = vld [vmem:[%s6687_s0 + $0x1c8] sm:$0xff]  }
  0x83   :  { %3942 = vmatprep.mubr.msk.bf16.mxu0 %vm929_vm2, %v4205_v6  ;;  %4070 = vmatprep.mubr.msk.bf16.mxu1 %vm929_vm2, %v4207_v7  ;;  %v4256_v5 = vld [vmem:[%s6687_s0 + $0x3c8] sm:$0xff]  }
  0x8a   :  { %3943 = vmatmul.mubr.msk.bf16.gmra.mrb[64].mxu0 %vm929_vm2, %v4206_v8  ;;  %4071 = vmatmul.mubr.msk.bf16.gmra.mrb[64].mxu1 %vm929_vm2, %v4208_v9  ;;  %v4257_v8 = vld [vmem:[%s6687_s0 + $0x1d0] sm:$0xff]  }
  0x8b   :  { %3946 = vmatprep.mubr.msk.bf16.mxu0 %vm929_vm2, %v4209_v10  ;;  %4074 = vmatprep.mubr.msk.bf16.mxu1 %vm929_vm2, %v4211_v11  ;;  %v4259_v9 = vld [vmem:[%s6687_s0 + $0x3d0] sm:$0xff]  }
  0x92   :  { %3947 = vmatmul.mubr.msk.bf16.gmra.mrb[68].mxu0 %vm929_vm2, %v4210_v12  ;;  %4075 = vmatmul.mubr.msk.bf16.gmra.mrb[68].mxu1 %vm929_vm2, %v4212_v13 }
  0x93   :  { %3950 = vmatprep.mubr.msk.bf16.mxu0 %vm929_vm2, %v4213_v14  ;;  %4078 = vmatprep.mubr.msk.bf16.mxu1 %vm929_vm2, %v4215_v15 }
  0x9a   :  { %3951 = vmatmul.mubr.msk.bf16.gmra.mrb[72].mxu0 %vm929_vm2, %v4214_v16  ;;  %4079 = vmatmul.mubr.msk.bf16.gmra.mrb[72].mxu1 %vm929_vm2, %v4216_v17  ;;  %v4258_v16 = vld [vmem:[%s6687_s0 + $0x1d8] sm:$0xff]  }
  0x9b   :  { %3954 = vmatprep.mubr.msk.bf16.mxu0 %vm929_vm2, %v4217_v18  ;;  %4082 = vmatprep.mubr.msk.bf16.mxu1 %vm929_vm2, %v4219_v19  ;;  %v4260_v17 = vld [vmem:[%s6687_s0 + $0x3d8] sm:$0xff]  }
  0xa2   :  { %3955 = vmatmul.mubr.msk.bf16.gmra.mrb[76].mxu0 %vm929_vm2, %v4218_v20  ;;  %4083 = vmatmul.mubr.msk.bf16.gmra.mrb[76].mxu1 %vm929_vm2, %v4220_v21  ;;  %v4261_v20 = vld [vmem:[%s6687_s0 + $0x1e0] sm:$0xff]  }
  0xa3   :  { %3958 = vmatprep.mubr.msk.bf16.mxu0 %vm929_vm2, %v4221_v22  ;;  %4086 = vmatprep.mubr.msk.bf16.mxu1 %vm929_vm2, %v4223_v23  ;;  %v4263_v21 = vld [vmem:[%s6687_s0 + $0x3e0] sm:$0xff]  }
  0xaa   :  { %3959 = vmatmul.mubr.msk.bf16.gmra.mrb[80].mxu0 %vm929_vm2, %v4222_v24  ;;  %4087 = vmatmul.mubr.msk.bf16.gmra.mrb[80].mxu1 %vm929_vm2, %v4224_v25 }
  0xab   :  { %3962 = vmatprep.mubr.msk.bf16.mxu0 %vm929_vm2, %v4225_v26  ;;  %4090 = vmatprep.mubr.msk.bf16.mxu1 %vm929_vm2, %v4227_v27 }
  0xb2   :  { %3963 = vmatmul.mubr.msk.bf16.gmra.mrb[84].mxu0 %vm929_vm2, %v4226_v28  ;;  %4091 = vmatmul.mubr.msk.bf16.gmra.mrb[84].mxu1 %vm929_vm2, %v4228_v29  ;;  %v4262_v28 = vld [vmem:[%s6687_s0 + $0x1e8] sm:$0xff]  }
  0xb3   :  { %3966 = vmatprep.mubr.msk.bf16.mxu0 %vm929_vm2, %v4229_v30  ;;  %4094 = vmatprep.mubr.msk.bf16.mxu1 %vm929_vm2, %v4231_v31  ;;  %v4264_v29 = vld [vmem:[%s6687_s0 + $0x3e8] sm:$0xff]  }
  0xba   :  { %3967 = vmatmul.mubr.msk.bf16.gmra.mrb[88].mxu0 %vm929_vm2, %v4230_v32  ;;  %4095 = vmatmul.mubr.msk.bf16.gmra.mrb[88].mxu1 %vm929_vm2, %v4232_v33  ;;  %v4265_v32 = vld [vmem:[%s6687_s0 + $0x1f0] sm:$0xff]  }
  0xbb   :  { %3970 = vmatprep.mubr.msk.bf16.mxu0 %vm929_vm2, %v4233_v34  ;;  %4098 = vmatprep.mubr.msk.bf16.mxu1 %vm929_vm2, %v4235_v35  ;;  %v4267_v33 = vld [vmem:[%s6687_s0 + $0x3f0] sm:$0xff]  }
  0xc2   :  { %3971 = vmatmul.mubr.msk.bf16.gmra.mrb[92].mxu0 %vm929_vm2, %v4234_v36  ;;  %4099 = vmatmul.mubr.msk.bf16.gmra.mrb[92].mxu1 %vm929_vm2, %v4236_v37  ;;  %v4872_v36 = vld [vmem:[%s6688_s2] ss:$0 sm:$0xff] }
  0xc3   :  { %3974 = vmatprep.mubr.msk.bf16.mxu0 %vm929_vm2, %v4237_v38  ;;  %4102 = vmatprep.mubr.msk.bf16.mxu1 %vm929_vm2, %v4239_v39 }
  0xca   :  { %3975 = vmatmul.mubr.msk.bf16.gmra.mrb[96].mxu0 %vm929_vm2, %v4238_v40  ;;  %4103 = vmatmul.mubr.msk.bf16.gmra.mrb[96].mxu1 %vm929_vm2, %v4240_v41  ;;  %v4887_v40 = vld [vmem:[%s6689_s3] ss:$0 sm:$0xff] }
  0xcb   :  { %3978 = vmatprep.mubr.msk.bf16.mxu0 %vm929_vm2, %v4241_v42  ;;  %4106 = vmatprep.mubr.msk.bf16.mxu1 %vm929_vm2, %v4243_v43 }
  0xd2   :  { %3979 = vmatmul.mubr.msk.bf16.gmra.mrb[100].mxu0 %vm929_vm2, %v4242_v44  ;;  %4107 = vmatmul.mubr.msk.bf16.gmra.mrb[100].mxu1 %vm929_vm2, %v4244_v45  ;;  %v4266_v44 = vld [vmem:[%s6687_s0 + $0x1f8] sm:$0xff]  }
  0xd3   :  { %3982 = vmatprep.mubr.msk.bf16.mxu0 %vm929_vm2, %v4245_v46  ;;  %4110 = vmatprep.mubr.msk.bf16.mxu1 %vm929_vm2, %v4247_v47  ;;  %v4268_v45 = vld [vmem:[%s6687_s0 + $0x3f8] sm:$0xff]  }
  0xda   :  { %3983 = vmatmul.mubr.msk.bf16.gmra.mrb[104].mxu0 %vm929_vm2, %v4246_v48  ;;  %4111 = vmatmul.mubr.msk.bf16.gmra.mrb[104].mxu1 %vm929_vm2, %v4248_v49 }
  0xdb   :  { %3986 = vmatprep.mubr.msk.bf16.mxu0 %vm929_vm2, %v4249_v50  ;;  %4114 = vmatprep.mubr.msk.bf16.mxu1 %vm929_vm2, %v4251_v51 }
  0xdd   :  { %v4745_v52 = vpop.f32.mrb[0].mxu0  ;;  %v4747_v53 = vpop.f32.mrb[0].mxu1 }
  0xde   :  { %v4749_v54 = vpop.f32.mrb[1].mxu0  ;;  %v4751_v55 = vpop.f32.mrb[1].mxu1  ;;  %v2387_v37 = vmul.f32 %v4745_v52, %v4872_v36  ;;  %v2515_v41 = vmul.f32 %v4747_v53, %v4872_v36 }
  0xdf   :  { %v4759_v58 = vpop.f32.mrb[2].mxu0  ;;  %v4761_v59 = vpop.f32.mrb[2].mxu1  ;;  %v2385_v46 = vmul.f32 %v4872_v36, %v4749_v54  ;;  %v2513_v47 = vmul.f32 %v4872_v36, %v4751_v55 }
  0xe0   :  { %v4769_v62 = vpop.f32.mrb[3].mxu0  ;;  %v4771_v63 = vpop.f32.mrb[3].mxu1  ;;  %v2388_v50 = vmul.f32 %v4759_v58, %v4872_v36  ;;  %v2516_v52 = vmul.f32 %v4761_v59, %v4872_v36  ;;  %v4922_v55 = vadd.f32 %v4887_v40, %v2387_v37 }
  0xe1   :  { %v2386_v51 = vmul.f32 %v4872_v36, %v4769_v62  ;;  %v2514_v53 = vmul.f32 %v4872_v36, %v4771_v63  ;;  %v4934_v59 = vadd.f32 %v4887_v40, %v2385_v46 }
  0xe2   :  { %3987 = vmatmul.mubr.msk.bf16.gmra.mrb[108].mxu0 %vm929_vm2, %v4250_v56  ;;  %4115 = vmatmul.mubr.msk.bf16.gmra.mrb[108].mxu1 %vm929_vm2, %v4252_v57  ;;  %v4925_v57 = vadd.f32 %v4887_v40, %v2515_v41 }
  0xe3   :  { %3990 = vmatprep.mubr.msk.bf16.mxu0 %vm929_vm2, %v4253_v60  ;;  %4118 = vmatprep.mubr.msk.bf16.mxu1 %vm929_vm2, %v4255_v61  ;;  %v4937_v61 = vadd.f32 %v4887_v40, %v2513_v47 }
  0xe5   :  { %v4777_v0 = vpop.f32.mrb[4].mxu0  ;;  %v4779_v1 = vpop.f32.mrb[4].mxu1 }
  0xe6   :  { %v4781_v2 = vpop.f32.mrb[5].mxu0  ;;  %v4783_v3 = vpop.f32.mrb[5].mxu1  ;;  %v2391_v58 = vmul.f32 %v4777_v0, %v4872_v36  ;;  %v2519_v60 = vmul.f32 %v4779_v1, %v4872_v36  ;;  %v4944_v0 = vadd.f32 %v4887_v40, %v2388_v50  ;;  %v4947_v1 = vadd.f32 %v4887_v40, %v2386_v51 }
  0xe7   :  { %v4791_v6 = vpop.f32.mrb[6].mxu0  ;;  %v4793_v7 = vpop.f32.mrb[6].mxu1  ;;  %v2389_v62 = vmul.f32 %v4872_v36, %v4781_v2  ;;  %v2517_v63 = vmul.f32 %v4872_v36, %v4783_v3 }
  0xe8   :  { %v4801_v10 = vpop.f32.mrb[7].mxu0  ;;  %v4803_v11 = vpop.f32.mrb[7].mxu1  ;;  %v2520_v3 = vmul.f32 %v4793_v7, %v4872_v36 }
  0xe9   :  { %v2390_v2 = vmul.f32 %v4872_v36, %v4801_v10 }
  0xea   :  { %3991 = vmatmul.mubr.msk.bf16.gmra.mrb[112].mxu0 %vm929_vm2, %v4254_v4  ;;  %4119 = vmatmul.mubr.msk.bf16.gmra.mrb[112].mxu1 %vm929_vm2, %v4256_v5  ;;  %v4950_v4 = vadd.f32 %v4887_v40, %v2516_v52  ;;  %v4953_v5 = vadd.f32 %v4887_v40, %v2514_v53 }
  0xeb   :  { %3994 = vmatprep.mubr.msk.bf16.mxu0 %vm929_vm2, %v4257_v8  ;;  %4122 = vmatprep.mubr.msk.bf16.mxu1 %vm929_vm2, %v4259_v9  ;;  %v2392_v8 = vmul.f32 %v4791_v6, %v4872_v36  ;;  %v5001_v53 = vadd.f32 %v4887_v40, %v2390_v2 }
  0xed   :  { %v4809_v12 = vpop.f32.mrb[8].mxu0  ;;  %v4811_v13 = vpop.f32.mrb[8].mxu1  ;;  %v4998_v52 = vadd.f32 %v4887_v40, %v2392_v8  ;;  %6777 = vst [vmem:[#allocation2_spill] sm:$0xff] %v5001_v53 }
  0xee   :  { %v4813_v14 = vpop.f32.mrb[9].mxu0  ;;  %v4815_v15 = vpop.f32.mrb[9].mxu1  ;;  %v2395_v47 = vmul.f32 %v4809_v12, %v4872_v36  ;;  %v2523_v8 = vmul.f32 %v4811_v13, %v4872_v36 }
  0xef   :  { %v4823_v18 = vpop.f32.mrb[10].mxu0  ;;  %v4825_v19 = vpop.f32.mrb[10].mxu1 }
  0xf0   :  { %v4833_v22 = vpop.f32.mrb[11].mxu0  ;;  %v4835_v23 = vpop.f32.mrb[11].mxu1  ;;  %v2524_v12 = vmul.f32 %v4825_v19, %v4872_v36  ;;  %v5042_v19 = vadd.f32 %v4887_v40, %v2523_v8 }
  0xf1   :  { %v2522_v13 = vmul.f32 %v4872_v36, %v4835_v23 }
  0xf2   :  { %3995 = vmatmul.mubr.msk.bf16.gmra.mrb[116].mxu0 %vm929_vm2, %v4258_v16  ;;  %4123 = vmatmul.mubr.msk.bf16.gmra.mrb[116].mxu1 %vm929_vm2, %v4260_v17 }
  0xf3   :  { %3998 = vmatprep.mubr.msk.bf16.mxu0 %vm929_vm2, %v4261_v20  ;;  %4126 = vmatprep.mubr.msk.bf16.mxu1 %vm929_vm2, %v4263_v21  ;;  %v4968_v21 = vadd.f32 %v4887_v40, %v2391_v58  ;;  %v5004_v58 = vadd.f32 %v4887_v40, %v2520_v3  ;;  %v2393_v3 = vmul.f32 %v4872_v36, %v4813_v14 }
  0xf5   :  { %v4841_v24 = vpop.f32.mrb[12].mxu0  ;;  %v4843_v25 = vpop.f32.mrb[12].mxu1  ;;  %6778 = vst [vmem:[#allocation3_spill] sm:$0xff] %v5004_v58  ;;  %v5053_v2 = vadd.f32 %v4887_v40, %v2393_v3  ;;  %v5073_v3 = vadd.f32 %v4887_v40, %v2524_v12 }
  0xf6   :  { %v4845_v26 = vpop.f32.mrb[13].mxu0  ;;  %v4847_v27 = vpop.f32.mrb[13].mxu1  ;;  %v2399_v23 = vmul.f32 %v4841_v24, %v4872_v36  ;;  %v2527_v46 = vmul.f32 %v4843_v25, %v4872_v36 }
  0xf7   :  { %v4855_v30 = vpop.f32.mrb[14].mxu0  ;;  %v4857_v31 = vpop.f32.mrb[14].mxu1  ;;  %v2525_v8 = vmul.f32 %v4872_v36, %v4847_v27  ;;  %6781 = vst [vmem:[#allocation6_spill] sm:$0xff] %v5073_v3 }
  0xf8   :  { %v4865_v34 = vpop.f32.mrb[15].mxu0  ;;  %v4867_v35 = vpop.f32.mrb[15].mxu1  ;;  %v2400_v17 = vmul.f32 %v4855_v30, %v4872_v36  ;;  %v5092_v53 = vadd.f32 %v4887_v40, %v2399_v23  ;;  %v5095_v58 = vadd.f32 %v4887_v40, %v2527_v46 }
  0xfa   :  { %3999 = vmatmul.mubr.msk.bf16.gmra.mrb[120].mxu0 %vm929_vm2, %v4262_v28  ;;  %4127 = vmatmul.mubr.msk.bf16.gmra.mrb[120].mxu1 %vm929_vm2, %v4264_v29  ;;  %v4971_v28 = vadd.f32 %v4887_v40, %v2519_v60  ;;  %v2518_v60 = vmul.f32 %v4872_v36, %v4803_v11  ;;  %v2521_v11 = vmul.f32 %v4872_v36, %v4815_v15 }
  0xfb   :  { %4002 = vmatprep.mubr.msk.bf16.mxu0 %vm929_vm2, %v4265_v32  ;;  %4130 = vmatprep.mubr.msk.bf16.mxu1 %vm929_vm2, %v4267_v33  ;;  %v4980_v32 = vadd.f32 %v4887_v40, %v2389_v62  ;;  %v4983_v33 = vadd.f32 %v4887_v40, %v2517_v63  ;;  %v2396_v62 = vmul.f32 %v4823_v18, %v4872_v36 }
  0xfc   :  { %v2394_v63 = vmul.f32 %v4872_v36, %v4833_v22  ;;  %v5032_v15 = vadd.f32 %v4887_v40, %v2518_v60  ;;  %v5039_v22 = vadd.f32 %v4887_v40, %v2395_v47  ;;  %v5056_v29 = vadd.f32 %v4887_v40, %v2521_v11  ;;  %6783 = vst [vmem:[#allocation8_spill] sm:$0xff] %v5092_v53 }
  0xfd   :  { %v4880_v38 = vpop.f32.mrb[16].mxu0  ;;  %v4882_v39 = vpop.f32.mrb[16].mxu1  ;;  %v2397_v47 = vmul.f32 %v4872_v36, %v4845_v26  ;;  %v5067_v25 = vadd.f32 %v4887_v40, %v2396_v62  ;;  %v5076_v11 = vadd.f32 %v4887_v40, %v2522_v13  ;;  %v2398_v62 = vmul.f32 %v4872_v36, %v4865_v34  ;;  %6784 = vst [vmem:[#allocation9_spill] sm:$0xff] %v5095_v58 }
  0xfe   :  { %v4891_v42 = vpop.f32.mrb[17].mxu0  ;;  %v4893_v43 = vpop.f32.mrb[17].mxu1  ;;  %6779 = vst [vmem:[#allocation4_spill] sm:$0xff] %v5032_v15  ;;  %v5070_v20 = vadd.f32 %v4887_v40, %v2394_v63  ;;  %v2528_v63 = vmul.f32 %v4857_v31, %v4872_v36  ;;  %v5103_v34 = vadd.f32 %v4887_v40, %v2525_v8  ;;  %v5110_v46 = vadd.f32 %v4887_v40, %v2400_v17 }
  0xff   :  { %v4905_v48 = vpop.f32.mrb[18].mxu0  ;;  %v4907_v49 = vpop.f32.mrb[18].mxu1  ;;  %6782 = vst [vmem:[#allocation7_spill] sm:$0xff] %v5076_v11  ;;  %v5100_v15 = vadd.f32 %v4887_v40, %v2397_v47  ;;  %v5113_v27 = vadd.f32 %v4887_v40, %v2398_v62  ;;  %v2526_v8 = vmul.f32 %v4872_v36, %v4867_v35  ;;  %v2403_v17 = vmul.f32 %v4880_v38, %v4872_v36 }
 0x100   :  { %v4917_v54 = vpop.f32.mrb[19].mxu0  ;;  %v4919_v56 = vpop.f32.mrb[19].mxu1  ;;  %6780 = vst [vmem:[#allocation5_spill] sm:$0xff] %v5070_v20  ;;  %6786 = vst [vmem:[#allocation11_spill] sm:$0xff] %v5103_v34  ;;  %v5116_v47 = vadd.f32 %v4887_v40, %v2528_v63  ;;  %v2531_v62 = vmul.f32 %v4882_v39, %v4872_v36  ;;  %v2401_v3 = vmul.f32 %v4872_v36, %v4891_v42 }
 0x101   :  { %6785 = vst [vmem:[#allocation10_spill] sm:$0xff] %v5100_v15  ;;  %6787 = vst [vmem:[#allocation12_spill] sm:$0xff] %v5113_v27  ;;  %v2529_v12 = vmul.f32 %v4872_v36, %v4893_v43  ;;  %v2404_v39 = vmul.f32 %v4905_v48, %v4872_v36  ;;  %v2402_v58 = vmul.f32 %v4872_v36, %v4917_v54 }
 0x102   :  { %4003 = vmatmul.mubr.msk.bf16.gmra.mrb[124].mxu0 %vm929_vm2, %v4266_v44  ;;  %4131 = vmatmul.mubr.msk.bf16.gmra.mrb[124].mxu1 %vm929_vm2, %v4268_v45  ;;  %6788 = vst [vmem:[#allocation13_spill] sm:$0xff] %v5116_v47  ;;  %v2532_v35 = vmul.f32 %v4907_v49, %v4872_v36  ;;  %v2530_v11 = vmul.f32 %v4872_v36, %v4919_v56 }
 0x103   :  { %v5160_v48 = vadd.f32 %v4887_v40, %v2526_v8  ;;  %v5163_v54 = vadd.f32 %v4887_v40, %v2403_v17  ;;  %v5166_v49 = vadd.f32 %v4887_v40, %v2531_v62  ;;  %v5173_v43 = vadd.f32 %v4887_v40, %v2401_v3 }
 0x104   :  { %v5176_v53 = vadd.f32 %v4887_v40, %v2529_v12  ;;  %v5183_v62 = vadd.f32 %v4887_v40, %v2404_v39  ;;  %v5192_v3 = vadd.f32 %v4887_v40, %v2530_v11 }
 0x105   :  { %v4961_v9 = vpop.f32.mrb[20].mxu0  ;;  %v4963_v16 = vpop.f32.mrb[20].mxu1  ;;  %6789 = vst [vmem:[#allocation14_spill] sm:$0xff] %v5160_v48  ;;  %6790 = vst [vmem:[#allocation15_spill] sm:$0xff] %v5163_v54 }
 0x106   :  { %v4973_v6 = vpop.f32.mrb[21].mxu0  ;;  %v4975_v10 = vpop.f32.mrb[21].mxu1  ;;  %6791 = vst [vmem:[#allocation16_spill] sm:$0xff] %v5166_v49  ;;  %v2407_v56 = vmul.f32 %v4961_v9, %v4872_v36  ;;  %v2535_v20 = vmul.f32 %v4963_v16, %v4872_v36  ;;  %6792 = vst [vmem:[#allocation17_spill] sm:$0xff] %v5173_v43  ;;  %v5186_v9 = vadd.f32 %v4887_v40, %v2402_v58 }
 0x107   :  { %v4985_v37 = vpop.f32.mrb[22].mxu0  ;;  %v4987_v41 = vpop.f32.mrb[22].mxu1  ;;  %6793 = vst [vmem:[#allocation18_spill] sm:$0xff] %v5176_v53  ;;  %v2405_v8 = vmul.f32 %v4872_v36, %v4973_v6  ;;  %v2533_v17 = vmul.f32 %v4872_v36, %v4975_v10  ;;  %v5189_v16 = vadd.f32 %v4887_v40, %v2532_v35  ;;  %6795 = vst [vmem:[#allocation20_spill] sm:$0xff] %v5192_v3 }
 0x108   :  { %v4993_v50 = vpop.f32.mrb[23].mxu0  ;;  %v4995_v51 = vpop.f32.mrb[23].mxu1  ;;  %v2408_v6 = vmul.f32 %v4985_v37, %v4872_v36  ;;  %v2536_v39 = vmul.f32 %v4987_v41, %v4872_v36  ;;  %v5208_v47 = vadd.f32 %v4887_v40, %v2407_v56  ;;  %v5211_v12 = vadd.f32 %v4887_v40, %v2535_v20 }
 0x109   :  { %6794 = vst [vmem:[#allocation19_spill] sm:$0xff] %v5189_v16  ;;  %v2406_v10 = vmul.f32 %v4872_v36, %v4993_v50  ;;  %v5220_v27 = vadd.f32 %v4887_v40, %v2405_v8  ;;  %v5223_v35 = vadd.f32 %v4887_v40, %v2533_v17  ;;  %v2534_v49 = vmul.f32 %v4872_v36, %v4995_v51 }
 0x10a   :  { %6796 = vst [vmem:[#allocation21_spill] sm:$0xff] %v5208_v47  ;;  %6797 = vst [vmem:[#allocation22_spill] sm:$0xff] %v5211_v12  ;;  %v5238_v8 = vadd.f32 %v4887_v40, %v2408_v6  ;;  %v5244_v53 = vadd.f32 %v4887_v40, %v2536_v39 }
 0x10b   :  { %6798 = vst [vmem:[#allocation23_spill] sm:$0xff] %v5220_v27  ;;  %6799 = vst [vmem:[#allocation24_spill] sm:$0xff] %v5223_v35  ;;  %v5241_v17 = vadd.f32 %v4887_v40, %v2406_v10 }
 0x10c   :  { %6800 = vst [vmem:[#allocation25_spill] sm:$0xff] %v5238_v8  ;;  %6802 = vst [vmem:[#allocation27_spill] sm:$0xff] %v5244_v53 }
 0x10d   :  { %v5034_v45 = vpop.f32.mrb[24].mxu0  ;;  %v5036_v18 = vpop.f32.mrb[24].mxu1  ;;  %6801 = vst [vmem:[#allocation26_spill] sm:$0xff] %v5241_v17 }
 0x10e   :  { %v5048_v14 = vpop.f32.mrb[25].mxu0  ;;  %v5050_v60 = vpop.f32.mrb[25].mxu1  ;;  %v2411_v20 = vmul.f32 %v5034_v45, %v4872_v36  ;;  %v2539_v6 = vmul.f32 %v5036_v18, %v4872_v36 }
 0x10f   :  { %v5062_v24 = vpop.f32.mrb[26].mxu0  ;;  %v5064_v44 = vpop.f32.mrb[26].mxu1  ;;  %v2409_v39 = vmul.f32 %v4872_v36, %v5048_v14  ;;  %v2537_v51 = vmul.f32 %v4872_v36, %v5050_v60  ;;  %v5272_v60 = vadd.f32 %v4887_v40, %v2534_v49 }
 0x110   :  { %v5078_v26 = vpop.f32.mrb[27].mxu0  ;;  %v5080_v7 = vpop.f32.mrb[27].mxu1  ;;  %v2412_v54 = vmul.f32 %v5062_v24, %v4872_v36  ;;  %v2540_v45 = vmul.f32 %v5064_v44, %v4872_v36  ;;  %v5282_v44 = vadd.f32 %v4887_v40, %v2539_v6 }
 0x111   :  { %v2410_v41 = vmul.f32 %v4872_v36, %v5078_v26  ;;  %v2538_v18 = vmul.f32 %v4872_v36, %v5080_v7  ;;  %6803 = vst [vmem:[#allocation28_spill] sm:$0xff] %v5272_v60  ;;  %v5279_v26 = vadd.f32 %v4887_v40, %v2411_v20  ;;  %v5293_v10 = vadd.f32 %v4887_v40, %v2409_v39 }
 0x112   :  { %v5296_v53 = vadd.f32 %v4887_v40, %v2537_v51  ;;  %v5313_v39 = vadd.f32 %v4887_v40, %v2540_v45 }
 0x113   :  { %v5310_v8 = vadd.f32 %v4887_v40, %v2410_v41  ;;  %v5316_v51 = vadd.f32 %v4887_v40, %v2538_v18 }
 0x114   :  { %6806 = vst [vmem:[#allocation31_spill] sm:$0xff] %v5313_v39 }
 0x115   :  { %v5120_v30 = vpop.f32.mrb[28].mxu0  ;;  %v5122_v31 = vpop.f32.mrb[28].mxu1  ;;  %6805 = vst [vmem:[#allocation30_spill] sm:$0xff] %v5310_v8  ;;  %6807 = vst [vmem:[#allocation32_spill] sm:$0xff] %v5316_v51 }
 0x116   :  { %v5130_v13 = vpop.f32.mrb[29].mxu0  ;;  %v5132_v63 = vpop.f32.mrb[29].mxu1  ;;  %v2415_v7 = vmul.f32 %v5120_v30, %v4872_v36  ;;  %v2543_v3 = vmul.f32 %v5122_v31, %v4872_v36  ;;  %v5307_v31 = vadd.f32 %v4887_v40, %v2412_v54 }
 0x117   :  { %v5140_v23 = vpop.f32.mrb[30].mxu0  ;;  %v5142_v38 = vpop.f32.mrb[30].mxu1  ;;  %v2413_v20 = vmul.f32 %v4872_v36, %v5130_v13  ;;  %v2541_v6 = vmul.f32 %v4872_v36, %v5132_v63 }
 0x118   :  { %v5152_v42 = vpop.f32.mrb[31].mxu0  ;;  %v5154_v34 = vpop.f32.mrb[31].mxu1  ;;  %6804 = vst [vmem:[#allocation29_spill] sm:$0xff] %v5307_v31  ;;  %v2416_v27 = vmul.f32 %v5140_v23, %v4872_v36  ;;  %v2544_v41 = vmul.f32 %v5142_v38, %v4872_v36  ;;  %v5330_v18 = vadd.f32 %v4887_v40, %v2415_v7  ;;  %v5333_v16 = vadd.f32 %v4887_v40, %v2543_v3 }
 0x119   :  { %v2414_v54 = vmul.f32 %v4872_v36, %v5152_v42  ;;  %v5338_v60 = vadd.f32 %v4887_v40, %v2413_v20  ;;  %v5341_v42 = vadd.f32 %v4887_v40, %v2541_v6  ;;  %v2542_v6 = vmul.f32 %v4872_v36, %v5154_v34 }
 0x11a   :  { %6808 = vst [vmem:[#allocation33_spill] sm:$0xff] %v5330_v18  ;;  %6809 = vst [vmem:[#allocation34_spill] sm:$0xff] %v5333_v16  ;;  %v5348_v3 = vadd.f32 %v4887_v40, %v2416_v27  ;;  %v5354_v20 = vadd.f32 %v4887_v40, %v2544_v41 }
 0x11b   :  { %6810 = vst [vmem:[#allocation35_spill] sm:$0xff] %v5338_v60  ;;  %6811 = vst [vmem:[#allocation36_spill] sm:$0xff] %v5341_v42  ;;  %v5351_v63 = vadd.f32 %v4887_v40, %v2414_v54  ;;  %v5390_v8 = vadd.f32 %v4887_v40, %v2542_v6 }
 0x11c   :  { %6812 = vst [vmem:[#allocation37_spill] sm:$0xff] %v5348_v3  ;;  %6814 = vst [vmem:[#allocation39_spill] sm:$0xff] %v5354_v20 }
 0x11d   :  { %v5201_v15 = vpop.f32.mrb[32].mxu0  ;;  %v5203_v58 = vpop.f32.mrb[32].mxu1  ;;  %6813 = vst [vmem:[#allocation38_spill] sm:$0xff] %v5351_v63  ;;  %6815 = vst [vmem:[#allocation40_spill] sm:$0xff] %v5390_v8 }
 0x11e   :  { %v5213_v37 = vpop.f32.mrb[33].mxu0  ;;  %v5215_v50 = vpop.f32.mrb[33].mxu1  ;;  %v2419_v27 = vmul.f32 %v5201_v15, %v4872_v36  ;;  %v2547_v54 = vmul.f32 %v5203_v58, %v4872_v36 }
 0x11f   :  { %v5225_v11 = vpop.f32.mrb[34].mxu0  ;;  %v5227_v56 = vpop.f32.mrb[34].mxu1  ;;  %v2417_v39 = vmul.f32 %v4872_v36, %v5213_v37  ;;  %v2545_v45 = vmul.f32 %v4872_v36, %v5215_v50 }
 0x120   :  { %v5233_v43 = vpop.f32.mrb[35].mxu0  ;;  %v5235_v48 = vpop.f32.mrb[35].mxu1  ;;  %v2420_v15 = vmul.f32 %v5225_v11, %v4872_v36  ;;  %v2548_v18 = vmul.f32 %v5227_v56, %v4872_v36  ;;  %v5393_v11 = vadd.f32 %v4887_v40, %v2419_v27 }
 0x121   :  { %v2418_v58 = vmul.f32 %v4872_v36, %v5233_v43  ;;  %v2546_v51 = vmul.f32 %v4872_v36, %v5235_v48  ;;  %v5396_v43 = vadd.f32 %v4887_v40, %v2547_v54  ;;  %v5403_v37 = vadd.f32 %v4887_v40, %v2417_v39 }
 0x122   :  { %6816 = vst [vmem:[#allocation41_spill] sm:$0xff] %v5393_v11  ;;  %v5406_v60 = vadd.f32 %v4887_v40, %v2545_v45  ;;  %v5413_v54 = vadd.f32 %v4887_v40, %v2420_v15 }
 0x123   :  { %6817 = vst [vmem:[#allocation42_spill] sm:$0xff] %v5396_v43  ;;  %v5422_v39 = vadd.f32 %v4887_v40, %v2546_v51 }
 0x125   :  { %v5274_v35 = vpop.f32.mrb[36].mxu0  ;;  %v5276_v24 = vpop.f32.mrb[36].mxu1  ;;  %6820 = vst [vmem:[#allocation45_spill] sm:$0xff] %v5422_v39 }
 0x126   :  { %v5288_v14 = vpop.f32.mrb[37].mxu0  ;;  %v5290_v49 = vpop.f32.mrb[37].mxu1  ;;  %v2423_v48 = vmul.f32 %v5274_v35, %v4872_v36  ;;  %v2551_v56 = vmul.f32 %v5276_v24, %v4872_v36  ;;  %v5416_v35 = vadd.f32 %v4887_v40, %v2418_v58  ;;  %v5419_v24 = vadd.f32 %v4887_v40, %v2548_v18 }
 0x127   :  { %v5302_v30 = vpop.f32.mrb[38].mxu0  ;;  %v5304_v17 = vpop.f32.mrb[38].mxu1  ;;  %v2421_v6 = vmul.f32 %v4872_v36, %v5288_v14  ;;  %v2549_v27 = vmul.f32 %v4872_v36, %v5290_v49 }
 0x128   :  { %v1502_v13 = vpop.f32.mrb[39].mxu0  ;;  %v5318_v12 = vpop.f32.mrb[39].mxu1  ;;  %6818 = vst [vmem:[#allocation43_spill] sm:$0xff] %v5416_v35  ;;  %6819 = vst [vmem:[#allocation44_spill] sm:$0xff] %v5419_v24  ;;  %v2424_v14 = vmul.f32 %v5302_v30, %v4872_v36  ;;  %v2552_v49 = vmul.f32 %v5304_v17, %v4872_v36  ;;  %v5433_v63 = vadd.f32 %v4887_v40, %v2423_v48 }
 0x129   :  { %v2422_v50 = vmul.f32 %v4872_v36, %v1502_v13  ;;  %v5436_v51 = vadd.f32 %v4887_v40, %v2551_v56  ;;  %v5441_v17 = vadd.f32 %v4887_v40, %v2421_v6  ;;  %v5444_v3 = vadd.f32 %v4887_v40, %v2549_v27 }
 0x12a   :  { %6821 = vst [vmem:[#allocation46_spill] sm:$0xff] %v5433_v63  ;;  %v5451_v13 = vadd.f32 %v4887_v40, %v2424_v14  ;;  %v5457_v27 = vadd.f32 %v4887_v40, %v2552_v49  ;;  %v2550_v48 = vmul.f32 %v4872_v36, %v5318_v12 }
 0x12b   :  { %6822 = vst [vmem:[#allocation47_spill] sm:$0xff] %v5436_v51  ;;  %6823 = vst [vmem:[#allocation48_spill] sm:$0xff] %v5441_v17  ;;  %v5454_v6 = vadd.f32 %v4887_v40, %v2422_v50 }
 0x12c   :  { %6824 = vst [vmem:[#allocation49_spill] sm:$0xff] %v5444_v3  ;;  %6825 = vst [vmem:[#allocation50_spill] sm:$0xff] %v5451_v13  ;;  %v5481_v3 = vadd.f32 %v4887_v40, %v2550_v48 }
 0x12d   :  { %v5358_v23 = vpop.f32.mrb[40].mxu0  ;;  %v5360_v38 = vpop.f32.mrb[40].mxu1  ;;  %6826 = vst [vmem:[#allocation51_spill] sm:$0xff] %v5454_v6  ;;  %6827 = vst [vmem:[#allocation52_spill] sm:$0xff] %v5457_v27 }
 0x12e   :  { %v5368_v47 = vpop.f32.mrb[41].mxu0  ;;  %v5370_v41 = vpop.f32.mrb[41].mxu1  ;;  %v2427_v11 = vmul.f32 %v5358_v23, %v4872_v36  ;;  %v2555_v14 = vmul.f32 %v5360_v38, %v4872_v36 }
 0x12f   :  { %v3921_v7 = vpop.f32.mrb[42].mxu0  ;;  %v4049_v16 = vpop.f32.mrb[42].mxu1  ;;  %v2425_v49 = vmul.f32 %v4872_v36, %v5368_v47  ;;  %v2553_v12 = vmul.f32 %v4872_v36, %v5370_v41 }
 0x130   :  { %v1518_v34 = vpop.f32.mrb[43].mxu0  ;;  %v2030_v42 = vpop.f32.mrb[43].mxu1  ;;  %v2428_v43 = vmul.f32 %v3921_v7, %v4872_v36  ;;  %v2556_v51 = vmul.f32 %v4049_v16, %v4872_v36  ;;  %v5484_v41 = vadd.f32 %v4887_v40, %v2427_v11  ;;  %v5487_v7 = vadd.f32 %v4887_v40, %v2555_v14 }
 0x131   :  { %v2426_v56 = vmul.f32 %v4872_v36, %v1518_v34  ;;  %v2554_v23 = vmul.f32 %v4872_v36, %v2030_v42  ;;  %v5492_v39 = vadd.f32 %v4887_v40, %v2425_v49  ;;  %v5495_v48 = vadd.f32 %v4887_v40, %v2553_v12 }
 0x132   :  { %v5500_v14 = vadd.f32 %v4887_v40, %v2428_v43 }
 0x133   :  { %6828 = vst [vmem:[#allocation53_spill] sm:$0xff] %v5495_v48  ;;  %v5509_v49 = vadd.f32 %v4887_v40, %v2554_v23 }
 0x134   :  { %6829 = vst [vmem:[#allocation54_spill] sm:$0xff] %v5500_v14 }
 0x135   :  { %v3924_v15 = vpop.f32.mrb[44].mxu0  ;;  %v4052_v20 = vpop.f32.mrb[44].mxu1  ;;  %6832 = vst [vmem:[#allocation57_spill] sm:$0xff] %v5509_v49 }
 0x136   :  { %v1531_v45 = vpop.f32.mrb[45].mxu0  ;;  %v2043_v8 = vpop.f32.mrb[45].mxu1  ;;  %v2431_v16 = vmul.f32 %v3924_v15, %v4872_v36  ;;  %v2559_v42 = vmul.f32 %v4052_v20, %v4872_v36  ;;  %v5503_v15 = vadd.f32 %v4887_v40, %v2426_v56  ;;  %v5506_v20 = vadd.f32 %v4887_v40, %v2556_v51 }
 0x137   :  { %v3925_v58 = vpop.f32.mrb[46].mxu0  ;;  %v4053_v18 = vpop.f32.mrb[46].mxu1  ;;  %v2429_v50 = vmul.f32 %v4872_v36, %v1531_v45  ;;  %v2557_v11 = vmul.f32 %v4872_v36, %v2043_v8 }
 0x138   :  { %v1534_v31 = vpop.f32.mrb[47].mxu0  ;;  %v2046_v30 = vpop.f32.mrb[47].mxu1  ;;  %6830 = vst [vmem:[#allocation55_spill] sm:$0xff] %v5503_v15  ;;  %6831 = vst [vmem:[#allocation56_spill] sm:$0xff] %v5506_v20  ;;  %v2432_v8 = vmul.f32 %v3925_v58, %v4872_v36  ;;  %v2560_v43 = vmul.f32 %v4053_v18, %v4872_v36  ;;  %v5518_v51 = vadd.f32 %v4887_v40, %v2431_v16 }
 0x139   :  { %v2430_v63 = vmul.f32 %v4872_v36, %v1534_v31  ;;  %v5521_v23 = vadd.f32 %v4887_v40, %v2559_v42  ;;  %v5526_v58 = vadd.f32 %v4887_v40, %v2429_v50  ;;  %v5529_v31 = vadd.f32 %v4887_v40, %v2557_v11 }
 0x13a   :  { %6833 = vst [vmem:[#allocation58_spill] sm:$0xff] %v5518_v51  ;;  %v5536_v42 = vadd.f32 %v4887_v40, %v2432_v8  ;;  %v5542_v50 = vadd.f32 %v4887_v40, %v2560_v43  ;;  %v2558_v11 = vmul.f32 %v4872_v36, %v2046_v30 }
 0x13b   :  { %6834 = vst [vmem:[#allocation59_spill] sm:$0xff] %v5521_v23  ;;  %6835 = vst [vmem:[#allocation60_spill] sm:$0xff] %v5529_v31  ;;  %v5539_v35 = vadd.f32 %v4887_v40, %v2430_v63 }
 0x13c   :  { %6836 = vst [vmem:[#allocation61_spill] sm:$0xff] %v5536_v42  ;;  %6838 = vst [vmem:[#allocation63_spill] sm:$0xff] %v5542_v50 }
 0x13d   :  { %v3928_v47 = vpop.f32.mrb[48].mxu0  ;;  %v4056_v17 = vpop.f32.mrb[48].mxu1  ;;  %6837 = vst [vmem:[#allocation62_spill] sm:$0xff] %v5539_v35 }
 0x13e   :  { %v1547_v34 = vpop.f32.mrb[49].mxu0  ;;  %v2059_v38 = vpop.f32.mrb[49].mxu1  ;;  %v2435_v16 = vmul.f32 %v3928_v47, %v4872_v36  ;;  %v2563_v24 = vmul.f32 %v4056_v17, %v4872_v36 }
 0x13f   :  { %v3929_v27 = vpop.f32.mrb[50].mxu0  ;;  %v4057_v6 = vpop.f32.mrb[50].mxu1  ;;  %v2433_v43 = vmul.f32 %v4872_v36, %v1547_v34  ;;  %v2561_v30 = vmul.f32 %v4872_v36, %v2059_v38  ;;  %v5561_v38 = vadd.f32 %v4887_v40, %v2558_v11 }
 0x140   :  { %v1550_v12 = vpop.f32.mrb[51].mxu0  ;;  %v2062_v13 = vpop.f32.mrb[51].mxu1  ;;  %v2436_v18 = vmul.f32 %v3929_v27, %v4872_v36  ;;  %v2564_v47 = vmul.f32 %v4057_v6, %v4872_v36  ;;  %v5564_v31 = vadd.f32 %v4887_v40, %v2435_v16  ;;  %v5567_v27 = vadd.f32 %v4887_v40, %v2563_v24 }
 0x141   :  { %v2434_v56 = vmul.f32 %v4872_v36, %v1550_v12  ;;  %v2562_v17 = vmul.f32 %v4872_v36, %v2062_v13  ;;  %6839 = vst [vmem:[#allocation64_spill] sm:$0xff] %v5561_v38  ;;  %v5572_v12 = vadd.f32 %v4887_v40, %v2433_v43  ;;  %v5575_v20 = vadd.f32 %v4887_v40, %v2561_v30 }
 0x142   :  { %6840 = vst [vmem:[#allocation65_spill] sm:$0xff] %v5564_v31  ;;  %6841 = vst [vmem:[#allocation66_spill] sm:$0xff] %v5567_v27  ;;  %v5580_v16 = vadd.f32 %v4887_v40, %v2436_v18 }
 0x143   :  { %6842 = vst [vmem:[#allocation67_spill] sm:$0xff] %v5575_v20  ;;  %v5583_v24 = vadd.f32 %v4887_v40, %v2434_v56 }
 0x145   :  { %v3932_v45 = vpop.f32.mrb[52].mxu0  ;;  %v4060_v48 = vpop.f32.mrb[52].mxu1 }
 0x146   :  { %v1563_v8 = vpop.f32.mrb[53].mxu0  ;;  %v2075_v49 = vpop.f32.mrb[53].mxu1  ;;  %v2439_v6 = vmul.f32 %v3932_v45, %v4872_v36  ;;  %v2567_v13 = vmul.f32 %v4060_v48, %v4872_v36  ;;  %v5586_v45 = vadd.f32 %v4887_v40, %v2564_v47  ;;  %v5589_v48 = vadd.f32 %v4887_v40, %v2562_v17 }
 0x147   :  { %v3933_v15 = vpop.f32.mrb[54].mxu0  ;;  %v4061_v14 = vpop.f32.mrb[54].mxu1  ;;  %v2437_v34 = vmul.f32 %v4872_v36, %v1563_v8  ;;  %v2565_v11 = vmul.f32 %v4872_v36, %v2075_v49 }
 0x148   :  { %v1566_v23 = vpop.f32.mrb[55].mxu0  ;;  %v2078_v51 = vpop.f32.mrb[55].mxu1  ;;  %6843 = vst [vmem:[#allocation68_spill] sm:$0xff] %v5586_v45  ;;  %6844 = vst [vmem:[#allocation69_spill] sm:$0xff] %v5589_v48  ;;  %v2440_v30 = vmul.f32 %v3933_v15, %v4872_v36  ;;  %v2568_v49 = vmul.f32 %v4061_v14, %v4872_v36  ;;  %v5598_v47 = vadd.f32 %v4887_v40, %v2439_v6 }
 0x149   :  { %v2438_v8 = vmul.f32 %v4872_v36, %v1566_v23  ;;  %v5601_v17 = vadd.f32 %v4887_v40, %v2567_v13  ;;  %v5606_v14 = vadd.f32 %v4887_v40, %v2437_v34  ;;  %v5609_v38 = vadd.f32 %v4887_v40, %v2565_v11 }
 0x14a   :  { %6845 = vst [vmem:[#allocation70_spill] sm:$0xff] %v5598_v47  ;;  %v5616_v23 = vadd.f32 %v4887_v40, %v2440_v30  ;;  %v5622_v11 = vadd.f32 %v4887_v40, %v2568_v49  ;;  %v2566_v20 = vmul.f32 %v4872_v36, %v2078_v51 }
 0x14b   :  { %6846 = vst [vmem:[#allocation71_spill] sm:$0xff] %v5601_v17  ;;  %6847 = vst [vmem:[#allocation72_spill] sm:$0xff] %v5606_v14  ;;  %v5619_v34 = vadd.f32 %v4887_v40, %v2438_v8 }
 0x14c   :  { %6848 = vst [vmem:[#allocation73_spill] sm:$0xff] %v5609_v38  ;;  %6849 = vst [vmem:[#allocation74_spill] sm:$0xff] %v5616_v23  ;;  %v5641_v30 = vadd.f32 %v4887_v40, %v2566_v20 }
 0x14d   :  { %v3936_v63 = vpop.f32.mrb[56].mxu0  ;;  %v4064_v18 = vpop.f32.mrb[56].mxu1  ;;  %6850 = vst [vmem:[#allocation75_spill] sm:$0xff] %v5619_v34  ;;  %6851 = vst [vmem:[#allocation76_spill] sm:$0xff] %v5622_v11 }
 0x14e   :  { %v1579_v35 = vpop.f32.mrb[57].mxu0  ;;  %v2091_v43 = vpop.f32.mrb[57].mxu1  ;;  %v2443_v13 = vmul.f32 %v3936_v63, %v4872_v36  ;;  %v2571_v31 = vmul.f32 %v4064_v18, %v4872_v36 }
 0x14f   :  { %v3937_v50 = vpop.f32.mrb[58].mxu0  ;;  %v4065_v56 = vpop.f32.mrb[58].mxu1  ;;  %v2441_v8 = vmul.f32 %v4872_v36, %v1579_v35  ;;  %v2569_v45 = vmul.f32 %v4872_v36, %v2091_v43 }
 0x150   :  { %v1582_v42 = vpop.f32.mrb[59].mxu0  ;;  %v2094_v15 = vpop.f32.mrb[59].mxu1  ;;  %v2444_v49 = vmul.f32 %v3937_v50, %v4872_v36  ;;  %v2572_v6 = vmul.f32 %v4065_v56, %v4872_v36  ;;  %v5644_v43 = vadd.f32 %v4887_v40, %v2443_v13 }
 0x151   :  { %v2442_v51 = vmul.f32 %v4872_v36, %v1582_v42  ;;  %v2570_v27 = vmul.f32 %v4872_v36, %v2094_v15  ;;  %v5647_v42 = vadd.f32 %v4887_v40, %v2571_v31  ;;  %v5652_v18 = vadd.f32 %v4887_v40, %v2441_v8 }
 0x152   :  { %v5655_v20 = vadd.f32 %v4887_v40, %v2569_v45  ;;  %v5660_v31 = vadd.f32 %v4887_v40, %v2444_v49 }
 0x153   :  { %6852 = vst [vmem:[#allocation77_spill] sm:$0xff] %v5647_v42  ;;  %6853 = vst [vmem:[#allocation78_spill] sm:$0xff] %v5652_v18  ;;  %v5669_v8 = vadd.f32 %v4887_v40, %v2570_v27 }
 0x154   :  { %6854 = vst [vmem:[#allocation79_spill] sm:$0xff] %v5655_v20  ;;  %6855 = vst [vmem:[#allocation80_spill] sm:$0xff] %v5660_v31 }
 0x155   :  { %v3940_v35 = vpop.f32.mrb[60].mxu0  ;;  %v4068_v38 = vpop.f32.mrb[60].mxu1  ;;  %6858 = vst [vmem:[#allocation83_spill] sm:$0xff] %v5669_v8 }
 0x156   :  { %v2447_v50 = vmul.f32 %v3940_v35, %v4872_v36  ;;  %v1595_v56 = vpop.f32.mrb[61].mxu0  ;;  %v2575_v15 = vmul.f32 %v4068_v38, %v4872_v36  ;;  %v2107_v63 = vpop.f32.mrb[61].mxu1  ;;  %v5663_v35 = vadd.f32 %v4887_v40, %v2442_v51  ;;  %v5666_v38 = vadd.f32 %v4887_v40, %v2572_v6 }
 0x157   :  { %v2445_v48 = vmul.f32 %v4872_v36, %v1595_v56  ;;  %v3941_v11 = vpop.f32.mrb[62].mxu0  ;;  %v2573_v13 = vmul.f32 %v4872_v36, %v2107_v63  ;;  %v4069_v34 = vpop.f32.mrb[62].mxu1 }
 0x158   :  { %6856 = vst [vmem:[#allocation81_spill] sm:$0xff] %v5663_v35  ;;  %6857 = vst [vmem:[#allocation82_spill] sm:$0xff] %v5666_v38  ;;  %v1598_v45 = vpop.f32.mrb[63].mxu0  ;;  %v2110_v23 = vpop.f32.mrb[63].mxu1  ;;  %v5673_v17 = vadd.f32 %v4887_v40, %v2447_v50  ;;  %v5676_v63 = vadd.f32 %v4887_v40, %v2575_v15  ;;  %v2448_v49 = vmul.f32 %v3941_v11, %v4872_v36 }
 0x159   :  { %v5682_v14 = vadd.f32 %v4887_v40, %v2445_v48  ;;  %v2576_v27 = vmul.f32 %v4069_v34, %v4872_v36  ;;  %v5688_v50 = vadd.f32 %v4887_v40, %v2573_v13  ;;  %v2446_v15 = vmul.f32 %v4872_v36, %v1598_v45 }
 0x15a   :  { %6859 = vst [vmem:[#allocation84_spill] sm:$0xff] %v5673_v17  ;;  %6860 = vst [vmem:[#allocation85_spill] sm:$0xff] %v5676_v63  ;;  %v5698_v47 = vadd.f32 %v4887_v40, %v2448_v49  ;;  %v2574_v13 = vmul.f32 %v4872_v36, %v2110_v23 }
 0x15b   :  { %6861 = vst [vmem:[#allocation86_spill] sm:$0xff] %v5682_v14  ;;  %6862 = vst [vmem:[#allocation87_spill] sm:$0xff] %v5688_v50  ;;  %v5703_v11 = vadd.f32 %v4887_v40, %v2576_v27  ;;  %v5709_v49 = vadd.f32 %v4887_v40, %v2446_v15 }
 0x15d   :  { %v3944_v56 = vpop.f32.mrb[64].mxu0  ;;  %v4072_v20 = vpop.f32.mrb[64].mxu1  ;;  %6863 = vst [vmem:[#allocation88_spill] sm:$0xff] %v5703_v11  ;;  %6864 = vst [vmem:[#allocation89_spill] sm:$0xff] %v5709_v49 }
 0x15e   :  { %v2451_v6 = vmul.f32 %v3944_v56, %v4872_v36  ;;  %v1611_v51 = vpop.f32.mrb[65].mxu0  ;;  %v2579_v48 = vmul.f32 %v4072_v20, %v4872_v36  ;;  %v2123_v42 = vpop.f32.mrb[65].mxu1 }
 0x15f   :  { %v2449_v23 = vmul.f32 %v4872_v36, %v1611_v51  ;;  %v3945_v63 = vpop.f32.mrb[66].mxu0  ;;  %v2577_v17 = vmul.f32 %v4872_v36, %v2123_v42  ;;  %v4073_v45 = vpop.f32.mrb[66].mxu1  ;;  %v5722_v42 = vadd.f32 %v4887_v40, %v2574_v13  ;;  %v6867_v13 = vmax.f32 %v4934_v59, 0.0 }
 0x160   :  { %v2714_v27 = vadd.f32 %v4887_v40, %v2451_v6  ;;  %v2842_v11 = vadd.f32 %v4887_v40, %v2579_v48  ;;  %v2452_v56 = vmul.f32 %v3945_v63, %v4872_v36  ;;  %v1614_v14 = vpop.f32.mrb[67].mxu0  ;;  %v2580_v20 = vmul.f32 %v4073_v45, %v4872_v36  ;;  %v2126_v8 = vpop.f32.mrb[67].mxu1 }
 0x161   :  { %v2712_v34 = vadd.f32 %v4887_v40, %v2449_v23  ;;  %v2840_v15 = vadd.f32 %v4887_v40, %v2577_v17  ;;  %v2450_v51 = vmul.f32 %v4872_v36, %v1614_v14  ;;  %v2578_v49 = vmul.f32 %v4872_v36, %v2126_v8  ;;  %6865 = vst [vmem:[#allocation90_spill] sm:$0xff] %v5722_v42 }
 0x162   :  { %v2970_v6 = vmax.f32 %v2714_v27, 0.0  ;;  %v2715_v48 = vadd.f32 %v4887_v40, %v2452_v56  ;;  %v2843_v63 = vadd.f32 %v4887_v40, %v2580_v20  ;;  %v6866_v17 = vmax.f32 %v4922_v55, 0.0  ;;  %v5740_v55 = vld [vmem:[%s6688_s2] ss:$0 sm:$0xff] }
 0x163   :  { %v2968_v45 = vmax.f32 %v2712_v34, 0.0  ;;  %v2713_v38 = vadd.f32 %v4887_v40, %v2450_v51  ;;  %v2841_v23 = vadd.f32 %v4887_v40, %v2578_v49  ;;  %v3098_v35 = vmax.f32 %v2842_v11, 0.0 }
 0x164   :  { %v3162_v14 = vadd.f32 %v2970_v6, %v6866_v17  ;;  %v2971_v36 = vmax.f32 %v2715_v48, 0.0  ;;  %v3096_v8 = vmax.f32 %v2840_v15, 0.0  ;;  %v3099_v56 = vmax.f32 %v2843_v63, 0.0 }
 0x165   :  { %v3160_v27 = vadd.f32 %v2968_v45, %v6867_v13  ;;  %v2969_v42 = vmax.f32 %v2713_v38, 0.0  ;;  %v3097_v31 = vmax.f32 %v2841_v23, 0.0  ;;  %v3948_v20 = vpop.f32.mrb[68].mxu0  ;;  %v4076_v18 = vpop.f32.mrb[68].mxu1  ;;  %v6868_v34 = vmax.f32 %v4925_v57, 0.0 }
 0x166   :  { %v6869_v51 = vmax.f32 %v4944_v0, 0.0  ;;  %v2455_v11 = vmul.f32 %v5740_v55, %v3948_v20  ;;  %v1627_v59 = vpop.f32.mrb[69].mxu0  ;;  %v2583_v38 = vmul.f32 %v5740_v55, %v4076_v18  ;;  %v2139_v49 = vpop.f32.mrb[69].mxu1  ;;  %v6870_v15 = vmax.f32 %v4937_v61, 0.0  ;;  %v5755_v18 = vld [vmem:[%s6689_s3] ss:$0 sm:$0xff] }
 0x167   :  { %v3226_v50 = vadd.f32 %v3162_v14, %v6868_v34  ;;  %v6871_v57 = vmax.f32 %v4947_v1, 0.0  ;;  %v2453_v0 = vmul.f32 %v5740_v55, %v1627_v59  ;;  %v3949_v63 = vpop.f32.mrb[70].mxu0  ;;  %v2581_v45 = vmul.f32 %v5740_v55, %v2139_v49  ;;  %v4077_v23 = vpop.f32.mrb[70].mxu1 }
 0x168   :  { %v3163_v40 = vadd.f32 %v2971_v36, %v6869_v51  ;;  %v3224_v6 = vadd.f32 %v3160_v27, %v6870_v15  ;;  %v6872_v14 = vmax.f32 %v4950_v4, 0.0  ;;  %v2718_v61 = vadd.f32 %v5755_v18, %v2455_v11  ;;  %v2142_v13 = vpop.f32.mrb[71].mxu1 }
 0x169   :  { %v3161_v48 = vadd.f32 %v2969_v42, %v6871_v57  ;;  %v3290_v17 = vadd.f32 %v3226_v50, %v3098_v35  ;;  %v2846_v1 = vadd.f32 %v5755_v18, %v2583_v38  ;;  %v1630_v42 = vpop.f32.mrb[71].mxu0  ;;  %v6873_v20 = vmax.f32 %v4953_v5, 0.0 }
 0x16a   :  { %v3227_v36 = vadd.f32 %v3163_v40, %v6872_v14  ;;  %v3288_v27 = vadd.f32 %v3224_v6, %v3096_v8  ;;  %v2716_v35 = vadd.f32 %v5755_v18, %v2453_v0  ;;  %v2456_v4 = vmul.f32 %v5740_v55, %v3949_v63 }
 0x16b   :  { %v3225_v34 = vadd.f32 %v3161_v48, %v6873_v20  ;;  %v3354_v50 = vmul.f32 0.25, %v3290_v17  ;;  %v2974_v40 = vmax.f32 %v2718_v61, 0.0  ;;  %v3102_v59 = vmax.f32 %v2846_v1, 0.0 }
 0x16c   :  { %v3291_v51 = vadd.f32 %v3227_v36, %v3099_v56  ;;  %v3352_v49 = vmul.f32 0.25, %v3288_v27  ;;  %v2972_v57 = vmax.f32 %v2716_v35, 0.0  ;;  %v2719_v11 = vadd.f32 %v5755_v18, %v2456_v4 }
 0x16d   :  { %v3289_v15 = vadd.f32 %v3225_v34, %v3097_v31  ;;  %3418 = vst [vmem:[%s6690_s4 + $0x10] sm:$0xff] %v3354_v50  ;;  %v6874_v5 = vmax.f32 %v4968_v21, 0.0  ;;  %v2844_v6 = vadd.f32 %v5755_v18, %v2581_v45  ;;  %v2454_v48 = vmul.f32 %v5740_v55, %v1630_v42  ;;  %v3952_v14 = vpop.f32.mrb[72].mxu0  ;;  %v4080_v36 = vpop.f32.mrb[72].mxu1 }
 0x16e   :  { %v3355_v8 = vmul.f32 0.25, %v3291_v51  ;;  %3416 = vst [vmem:[%s6690_s4] sm:$0xff] %v3352_v49  ;;  %v6875_v56 = vmax.f32 %v4980_v32, 0.0  ;;  %v2975_v63 = vmax.f32 %v2719_v11, 0.0  ;;  %v2584_v17 = vmul.f32 %v5740_v55, %v4077_v23  ;;  %v1643_v27 = vpop.f32.mrb[73].mxu0  ;;  %v2155_v32 = vpop.f32.mrb[73].mxu1 }
 0x16f   :  { %v3166_v38 = vadd.f32 %v2974_v40, %v6874_v5  ;;  %v3353_v31 = vmul.f32 0.25, %v3289_v15  ;;  %v6876_v21 = vmax.f32 %v4971_v28, 0.0  ;;  %v3100_v61 = vmax.f32 %v2844_v6, 0.0  ;;  %v3953_v50 = vpop.f32.mrb[74].mxu0  ;;  %v4081_v51 = vpop.f32.mrb[74].mxu1  ;;  %v6879_v5 = vld [vmem:[#allocation3_spill] sm:$0xff] }
 0x170   :  { %v3164_v0 = vadd.f32 %v2972_v57, %v6875_v56  ;;  %3419 = vst [vmem:[%s6690_s4 + $0x18] sm:$0xff] %v3355_v8  ;;  %v2717_v1 = vadd.f32 %v5755_v18, %v2454_v48  ;;  %v2582_v42 = vmul.f32 %v5740_v55, %v2142_v13  ;;  %v6877_v23 = vmax.f32 %v4998_v52, 0.0  ;;  %v1646_v57 = vpop.f32.mrb[75].mxu0  ;;  %v2158_v11 = vpop.f32.mrb[75].mxu1 }
 0x171   :  { %v3230_v45 = vadd.f32 %v3166_v38, %v6876_v21  ;;  %3417 = vst [vmem:[%s6690_s4 + $0x8] sm:$0xff] %v3353_v31  ;;  %v6878_v34 = vmax.f32 %v4983_v33, 0.0  ;;  %v2847_v28 = vadd.f32 %v5755_v18, %v2584_v17  ;;  %v2459_v4 = vmul.f32 %v5740_v55, %v3952_v14  ;;  %v6881_v31 = vld [vmem:[#allocation2_spill] sm:$0xff] }
 0x172   :  { %v3167_v20 = vadd.f32 %v2975_v63, %v6877_v23  ;;  %v2973_v13 = vmax.f32 %v2717_v1, 0.0  ;;  %v2845_v49 = vadd.f32 %v5755_v18, %v2582_v42  ;;  %v2457_v15 = vmul.f32 %v5740_v55, %v1643_v27 }
 0x173   :  { %v3228_v35 = vadd.f32 %v3164_v0, %v6878_v34  ;;  %v3294_v40 = vadd.f32 %v3230_v45, %v3102_v59  ;;  %v3103_v52 = vmax.f32 %v2847_v28, 0.0  ;;  %v6880_v38 = vmax.f32 %v6879_v5, 0.0 }
 0x174   :  { %v2722_v6 = vadd.f32 %v5755_v18, %v2459_v4  ;;  %v6882_v56 = vmax.f32 %v6881_v31, 0.0  ;;  %v3101_v63 = vmax.f32 %v2845_v49, 0.0  ;;  %v2720_v59 = vadd.f32 %v5755_v18, %v2457_v15 }
 0x175   :  { %v3292_v8 = vadd.f32 %v3228_v35, %v3100_v61  ;;  %v3231_v33 = vadd.f32 %v3167_v20, %v6880_v38  ;;  %v3358_v48 = vmul.f32 0.25, %v3294_v40  ;;  %v2587_v45 = vmul.f32 %v5740_v55, %v4080_v36  ;;  %v6883_v61 = vld [vmem:[#allocation4_spill] sm:$0xff]  ;;  %v3956_v40 = vpop.f32.mrb[76].mxu0 }
 0x176   :  { %v3165_v0 = vadd.f32 %v2973_v13, %v6882_v56  ;;  %v2978_v21 = vmax.f32 %v2722_v6, 0.0  ;;  %v6884_v1 = vmax.f32 %v6883_v61, 0.0  ;;  %v2976_v27 = vmax.f32 %v2720_v59, 0.0  ;;  %v4084_v13 = vpop.f32.mrb[76].mxu1 }
 0x177   :  { %v3356_v17 = vmul.f32 0.25, %v3292_v8  ;;  %v3295_v14 = vadd.f32 %v3231_v33, %v3103_v52  ;;  %3422 = vst [vmem:[%s6690_s4 + $0x30] sm:$0xff] %v3358_v48  ;;  %v2460_v23 = vmul.f32 %v5740_v55, %v3953_v50  ;;  %v2585_v20 = vmul.f32 %v5740_v55, %v2155_v32  ;;  %v1659_v52 = vpop.f32.mrb[77].mxu0  ;;  %v2171_v5 = vpop.f32.mrb[77].mxu1 }
 0x178   :  { %v3229_v42 = vadd.f32 %v3165_v0, %v6884_v1  ;;  %v6885_v35 = vmax.f32 %v5039_v22, 0.0  ;;  %v2850_v28 = vadd.f32 %v5755_v18, %v2587_v45  ;;  %v2458_v4 = vmul.f32 %v5740_v55, %v1646_v57  ;;  %v4085_v48 = vpop.f32.mrb[78].mxu1 }
 0x179   :  { %3420 = vst [vmem:[%s6690_s4 + $0x20] sm:$0xff] %v3356_v17  ;;  %v3359_v34 = vmul.f32 0.25, %v3295_v14  ;;  %v6886_v15 = vmax.f32 %v5053_v2, 0.0  ;;  %v2723_v32 = vadd.f32 %v5755_v18, %v2460_v23  ;;  %v2848_v8 = vadd.f32 %v5755_v18, %v2585_v20  ;;  %v3957_v2 = vpop.f32.mrb[78].mxu0  ;;  %v2174_v14 = vpop.f32.mrb[79].mxu1  ;;  %v6890_v20 = vld [vmem:[#allocation5_spill] sm:$0xff] }
 0x17a   :  { %v3170_v36 = vadd.f32 %v2978_v21, %v6885_v35  ;;  %v3293_v49 = vadd.f32 %v3229_v42, %v3101_v63  ;;  %v3106_v22 = vmax.f32 %v2850_v28, 0.0  ;;  %v6887_v38 = vmax.f32 %v5042_v19, 0.0  ;;  %v1662_v17 = vpop.f32.mrb[79].mxu0 }
 0x17b   :  { %v3168_v50 = vadd.f32 %v2976_v27, %v6886_v15  ;;  %3423 = vst [vmem:[%s6690_s4 + $0x38] sm:$0xff] %v3359_v34  ;;  %v2721_v33 = vadd.f32 %v5755_v18, %v2458_v4  ;;  %v2588_v6 = vmul.f32 %v5740_v55, %v4081_v51  ;;  %v2979_v56 = vmax.f32 %v2723_v32, 0.0  ;;  %v6892_v4 = vld [vmem:[#allocation6_spill] sm:$0xff]  ;;  %v6894_v32 = vld [vmem:[#allocation7_spill] sm:$0xff] }
 0x17c   :  { %v3234_v57 = vadd.f32 %v3170_v36, %v6887_v38  ;;  %v3357_v31 = vmul.f32 0.25, %v3293_v49  ;;  %v3104_v0 = vmax.f32 %v2848_v8, 0.0  ;;  %v6888_v63 = vmax.f32 %v5056_v29, 0.0 }
 0x17d   :  { %v2977_v45 = vmax.f32 %v2721_v33, 0.0  ;;  %v2851_v61 = vadd.f32 %v5755_v18, %v2588_v6  ;;  %v2586_v19 = vmul.f32 %v5740_v55, %v2158_v11  ;;  %v6889_v51 = vmax.f32 %v5067_v25, 0.0  ;;  %v4088_v33 = vpop.f32.mrb[80].mxu1 }
 0x17e   :  { %v3232_v59 = vadd.f32 %v3168_v50, %v6888_v63  ;;  %v3298_v21 = vadd.f32 %v3234_v57, %v3106_v22  ;;  %3421 = vst [vmem:[%s6690_s4 + $0x28] sm:$0xff] %v3357_v31  ;;  %v2463_v27 = vmul.f32 %v5740_v55, %v3956_v40  ;;  %v2461_v29 = vmul.f32 %v5740_v55, %v1659_v52  ;;  %v3960_v57 = vpop.f32.mrb[80].mxu0 }
 0x17f   :  { %v3171_v1 = vadd.f32 %v2979_v56, %v6889_v51  ;;  %v6891_v34 = vmax.f32 %v6890_v20, 0.0  ;;  %v3107_v36 = vmax.f32 %v2851_v61, 0.0  ;;  %v2849_v28 = vadd.f32 %v5755_v18, %v2586_v19  ;;  %v1675_v63 = vpop.f32.mrb[81].mxu0 }
 0x180   :  { %v3296_v42 = vadd.f32 %v3232_v59, %v3104_v0  ;;  %v3362_v23 = vmul.f32 0.25, %v3298_v21  ;;  %v6893_v49 = vmax.f32 %v6892_v4, 0.0  ;;  %v2726_v50 = vadd.f32 %v5755_v18, %v2463_v27  ;;  %v2187_v59 = vpop.f32.mrb[81].mxu1  ;;  %v3961_v61 = vpop.f32.mrb[82].mxu0  ;;  %v6900_v4 = vld [vmem:[#allocation9_spill] sm:$0xff] }
 0x181   :  { %v3169_v35 = vadd.f32 %v2977_v45, %v6891_v34  ;;  %v2724_v25 = vadd.f32 %v5755_v18, %v2461_v29  ;;  %v3105_v40 = vmax.f32 %v2849_v28, 0.0  ;;  %v6895_v8 = vmax.f32 %v6894_v32, 0.0  ;;  %v5859_v19 = vpop.f32.mrb[82].mxu1  ;;  %v6898_v29 = vld [vmem:[#allocation10_spill] sm:$0xff]  ;;  %v1678_v34 = vpop.f32.mrb[83].mxu0 }
 0x182   :  { %v3360_v11 = vmul.f32 0.25, %v3296_v42  ;;  %v3235_v15 = vadd.f32 %v3171_v1, %v6893_v49  ;;  %3426 = vst [vmem:[%s6690_s4 + $0x50] sm:$0xff] %v3362_v23  ;;  %v2591_v22 = vmul.f32 %v5740_v55, %v4084_v13  ;;  %v2464_v38 = vmul.f32 %v5740_v55, %v3957_v2  ;;  %v6896_v1 = vld [vmem:[#allocation8_spill] sm:$0xff] }
 0x183   :  { %v3233_v52 = vadd.f32 %v3169_v35, %v6895_v8  ;;  %v2982_v31 = vmax.f32 %v2726_v50, 0.0  ;;  %v2980_v56 = vmax.f32 %v2724_v25, 0.0  ;;  %v2589_v0 = vmul.f32 %v5740_v55, %v2171_v5  ;;  %v5866_v35 = vpop.f32.mrb[83].mxu1  ;;  %v6902_v25 = vld [vmem:[#allocation11_spill] sm:$0xff] }
 0x184   :  { %3424 = vst [vmem:[%s6690_s4 + $0x40] sm:$0xff] %v3360_v11  ;;  %v3299_v6 = vadd.f32 %v3235_v15, %v3107_v36  ;;  %v2854_v45 = vadd.f32 %v5755_v18, %v2591_v22  ;;  %v2727_v13 = vadd.f32 %v5755_v18, %v2464_v38  ;;  %v2462_v2 = vmul.f32 %v5740_v55, %v1662_v17 }
 0x185   :  { %v3297_v21 = vadd.f32 %v3233_v52, %v3105_v40  ;;  %v6897_v42 = vmax.f32 %v6896_v1, 0.0  ;;  %v6899_v23 = vmax.f32 %v6898_v29, 0.0  ;;  %v2852_v5 = vadd.f32 %v5755_v18, %v2589_v0  ;;  %v3964_v29 = vpop.f32.mrb[84].mxu0 }
 0x186   :  { %v3363_v51 = vmul.f32 0.25, %v3299_v6  ;;  %v3110_v28 = vmax.f32 %v2854_v45, 0.0  ;;  %v2983_v11 = vmax.f32 %v2727_v13, 0.0  ;;  %v2725_v17 = vadd.f32 %v5755_v18, %v2462_v2  ;;  %v6905_v13 = vld [vmem:[#allocation12_spill] sm:$0xff] }
 0x187   :  { %v3174_v27 = vadd.f32 %v2982_v31, %v6897_v42  ;;  %v3172_v20 = vadd.f32 %v2980_v56, %v6899_v23  ;;  %v3361_v36 = vmul.f32 0.25, %v3297_v21  ;;  %v6901_v49 = vmax.f32 %v6900_v4, 0.0 }
 0x188   :  { %3427 = vst [vmem:[%s6690_s4 + $0x58] sm:$0xff] %v3363_v51  ;;  %v3108_v50 = vmax.f32 %v2852_v5, 0.0  ;;  %v6903_v40 = vmax.f32 %v6902_v25, 0.0  ;;  %v2592_v8 = vmul.f32 %v5740_v55, %v4085_v48  ;;  %v6904_v52 = vmax.f32 %v5110_v46, 0.0  ;;  %v6907_v51 = vld [vmem:[#allocation13_spill] sm:$0xff] }
 0x189   :  { %v3238_v15 = vadd.f32 %v3174_v27, %v6901_v49  ;;  %3425 = vst [vmem:[%s6690_s4 + $0x48] sm:$0xff] %v3361_v36  ;;  %v2981_v38 = vmax.f32 %v2725_v17, 0.0  ;;  %v2590_v6 = vmul.f32 %v5740_v55, %v2174_v14  ;;  %v2467_v31 = vmul.f32 %v5740_v55, %v3960_v57  ;;  %v5892_v14 = vpop.f32.mrb[84].mxu1  ;;  %v1691_v36 = vpop.f32.mrb[85].mxu0 }
 0x18a   :  { %v3236_v32 = vadd.f32 %v3172_v20, %v6903_v40  ;;  %v3175_v22 = vadd.f32 %v2983_v11, %v6904_v52  ;;  %v2855_v21 = vadd.f32 %v5755_v18, %v2592_v8  ;;  %v2465_v45 = vmul.f32 %v5740_v55, %v1675_v63  ;;  %v5895_v63 = vpop.f32.mrb[85].mxu1  ;;  %v6909_v11 = vld [vmem:[#allocation14_spill] sm:$0xff] }
 0x18b   :  { %v3302_v56 = vadd.f32 %v3238_v15, %v3110_v28  ;;  %v6906_v48 = vmax.f32 %v6905_v13, 0.0  ;;  %v6908_v1 = vmax.f32 %v6907_v51, 0.0  ;;  %v2853_v46 = vadd.f32 %v5755_v18, %v2590_v6  ;;  %v5900_v25 = vpop.f32.mrb[86].mxu1  ;;  %v6911_v6 = vld [vmem:[#allocation15_spill] sm:$0xff]  ;;  %v6913_v13 = vld [vmem:[#allocation17_spill] sm:$0xff] }
 0x18c   :  { %v3300_v0 = vadd.f32 %v3236_v32, %v3108_v50  ;;  %v2730_v27 = vadd.f32 %v5755_v18, %v2467_v31  ;;  %v3111_v20 = vmax.f32 %v2855_v21, 0.0  ;;  %v2728_v5 = vadd.f32 %v5755_v18, %v2465_v45  ;;  %v3965_v50 = vpop.f32.mrb[86].mxu0 }
 0x18d   :  { %v3173_v2 = vadd.f32 %v2981_v38, %v6906_v48  ;;  %v3239_v42 = vadd.f32 %v3175_v22, %v6908_v1  ;;  %v3366_v57 = vmul.f32 0.25, %v3302_v56  ;;  %v3109_v28 = vmax.f32 %v2853_v46, 0.0  ;;  %v1694_v22 = vpop.f32.mrb[87].mxu0  ;;  %v5910_v38 = vpop.f32.mrb[87].mxu1 }
 0x18e   :  { %v3364_v23 = vmul.f32 0.25, %v3300_v0  ;;  %v6910_v17 = vmax.f32 %v6909_v11, 0.0  ;;  %v2986_v49 = vmax.f32 %v2730_v27, 0.0  ;;  %v2595_v15 = vmul.f32 %v5740_v55, %v4088_v33 }
 0x18f   :  { %3430 = vst [vmem:[%s6690_s4 + $0x70] sm:$0xff] %v3366_v57  ;;  %v3303_v40 = vadd.f32 %v3239_v42, %v3111_v20  ;;  %v2984_v32 = vmax.f32 %v2728_v5, 0.0  ;;  %v2468_v8 = vmul.f32 %v5740_v55, %v3961_v61  ;;  %v2593_v52 = vmul.f32 %v5740_v55, %v2187_v59  ;;  %v6915_v42 = vld [vmem:[#allocation16_spill] sm:$0xff]  ;;  %v6917_v20 = vld [vmem:[#allocation18_spill] sm:$0xff] }
 0x190   :  { %v3237_v4 = vadd.f32 %v3173_v2, %v6910_v17  ;;  %3428 = vst [vmem:[%s6690_s4 + $0x60] sm:$0xff] %v3364_v23  ;;  %v6912_v31 = vmax.f32 %v6911_v6, 0.0  ;;  %v2858_v0 = vadd.f32 %v5755_v18, %v2595_v15  ;;  %v2466_v21 = vmul.f32 %v5740_v55, %v1678_v34 }
 0x191   :  { %v3367_v45 = vmul.f32 0.25, %v3303_v40  ;;  %v6914_v48 = vmax.f32 %v6913_v13, 0.0  ;;  %v2731_v51 = vadd.f32 %v5755_v18, %v2468_v8  ;;  %v2856_v61 = vadd.f32 %v5755_v18, %v2593_v52  ;;  %v3968_v40 = vpop.f32.mrb[88].mxu0 }
 0x192   :  { %v3301_v33 = vadd.f32 %v3237_v4, %v3109_v28  ;;  %v3178_v56 = vadd.f32 %v2986_v49, %v6912_v31  ;;  %v3114_v1 = vmax.f32 %v2858_v0, 0.0  ;;  %v6916_v46 = vmax.f32 %v6915_v42, 0.0  ;;  %v1707_v31 = vpop.f32.mrb[89].mxu0 }
 0x193   :  { %v3176_v2 = vadd.f32 %v2984_v32, %v6914_v48  ;;  %v2729_v57 = vadd.f32 %v5755_v18, %v2466_v21  ;;  %3431 = vst [vmem:[%s6690_s4 + $0x78] sm:$0xff] %v3367_v45  ;;  %v2987_v34 = vmax.f32 %v2731_v51, 0.0  ;;  %v3112_v23 = vmax.f32 %v2856_v61, 0.0  ;;  %v5936_v32 = vpop.f32.mrb[88].mxu1  ;;  %v5948_v13 = vpop.f32.mrb[90].mxu0  ;;  %v6921_v51 = vld [vmem:[#allocation19_spill] sm:$0xff] }
 0x194   :  { %v3365_v59 = vmul.f32 0.25, %v3301_v33  ;;  %v3242_v27 = vadd.f32 %v3178_v56, %v6916_v46  ;;  %v6918_v5 = vmax.f32 %v6917_v20, 0.0  ;;  %v2596_v11 = vmul.f32 %v5740_v55, %v5859_v19  ;;  %v5942_v56 = vpop.f32.mrb[89].mxu1  ;;  %v6923_v46 = vld [vmem:[#allocation20_spill] sm:$0xff] }
 0x195   :  { %v2985_v4 = vmax.f32 %v2729_v57, 0.0  ;;  %v2594_v49 = vmul.f32 %v5740_v55, %v5866_v35  ;;  %v2471_v15 = vmul.f32 %v5740_v55, %v3964_v29  ;;  %v6919_v8 = vmax.f32 %v5183_v62, 0.0  ;;  %v5950_v62 = vpop.f32.mrb[90].mxu1 }
 0x196   :  { %v3240_v28 = vadd.f32 %v3176_v2, %v6918_v5  ;;  %3429 = vst [vmem:[%s6690_s4 + $0x68] sm:$0xff] %v3365_v59  ;;  %v3306_v17 = vadd.f32 %v3242_v27, %v3114_v1  ;;  %v2859_v19 = vadd.f32 %v5755_v18, %v2596_v11  ;;  %v2469_v6 = vmul.f32 %v5740_v55, %v1691_v36  ;;  %v5955_v1 = vpop.f32.mrb[91].mxu0  ;;  %v5957_v42 = vpop.f32.mrb[91].mxu1 }
 0x197   :  { %v3179_v52 = vadd.f32 %v2987_v34, %v6919_v8  ;;  %v6920_v21 = vmax.f32 %v5186_v9, 0.0  ;;  %v2857_v29 = vadd.f32 %v5755_v18, %v2594_v49  ;;  %v2734_v45 = vadd.f32 %v5755_v18, %v2471_v15 }
 0x198   :  { %v3304_v33 = vadd.f32 %v3240_v28, %v3112_v23  ;;  %v3370_v0 = vmul.f32 0.25, %v3306_v17  ;;  %v3115_v2 = vmax.f32 %v2859_v19, 0.0  ;;  %v6922_v61 = vmax.f32 %v6921_v51, 0.0  ;;  %v5985_v51 = vpop.f32.mrb[92].mxu1 }
 0x199   :  { %v3177_v35 = vadd.f32 %v2985_v4, %v6920_v21  ;;  %v2732_v59 = vadd.f32 %v5755_v18, %v2469_v6  ;;  %v3113_v9 = vmax.f32 %v2857_v29, 0.0  ;;  %v6924_v27 = vmax.f32 %v6923_v46, 0.0  ;;  %v6925_v4 = vld [vmem:[#allocation21_spill] sm:$0xff]  ;;  %v6929_v29 = vld [vmem:[#allocation22_spill] sm:$0xff] }
 0x19a   :  { %v3368_v48 = vmul.f32 0.25, %v3304_v33  ;;  %v3243_v36 = vadd.f32 %v3179_v52, %v6922_v61  ;;  %3434 = vst [vmem:[%s6690_s4 + $0x90] sm:$0xff] %v3370_v0  ;;  %v2990_v34 = vmax.f32 %v2734_v45, 0.0  ;;  %v2599_v23 = vmul.f32 %v5740_v55, %v5892_v14  ;;  %v6927_v33 = vld [vmem:[#allocation23_spill] sm:$0xff] }
 0x19b   :  { %v3241_v57 = vadd.f32 %v3177_v35, %v6924_v27  ;;  %v2988_v5 = vmax.f32 %v2732_v59, 0.0  ;;  %v2472_v28 = vmul.f32 %v5740_v55, %v3965_v50  ;;  %v2597_v11 = vmul.f32 %v5740_v55, %v5895_v63 }
 0x19c   :  { %3432 = vst [vmem:[%s6690_s4 + $0x80] sm:$0xff] %v3368_v48  ;;  %v3307_v20 = vadd.f32 %v3243_v36, %v3115_v2  ;;  %v6926_v49 = vmax.f32 %v6925_v4, 0.0  ;;  %v2862_v8 = vadd.f32 %v5755_v18, %v2599_v23  ;;  %v2470_v52 = vmul.f32 %v5740_v55, %v1694_v22  ;;  %v5983_v2 = vpop.f32.mrb[92].mxu0  ;;  %v6931_v36 = vld [vmem:[#allocation24_spill] sm:$0xff] }
 0x19d   :  { %v3305_v17 = vadd.f32 %v3241_v57, %v3113_v9  ;;  %v6928_v19 = vmax.f32 %v6927_v33, 0.0  ;;  %v2735_v0 = vadd.f32 %v5755_v18, %v2472_v28  ;;  %v2860_v21 = vadd.f32 %v5755_v18, %v2597_v11  ;;  %v5994_v27 = vpop.f32.mrb[93].mxu0  ;;  %v5996_v57 = vpop.f32.mrb[93].mxu1 }
 0x19e   :  { %v3182_v15 = vadd.f32 %v2990_v34, %v6926_v49  ;;  %v3371_v14 = vmul.f32 0.25, %v3307_v20  ;;  %v3118_v35 = vmax.f32 %v2862_v8, 0.0  ;;  %v6930_v63 = vmax.f32 %v6929_v29, 0.0  ;;  %v6004_v28 = vpop.f32.mrb[94].mxu0  ;;  %v6006_v11 = vpop.f32.mrb[94].mxu1 }
 0x19f   :  { %v3180_v6 = vadd.f32 %v2988_v5, %v6928_v19  ;;  %v3369_v50 = vmul.f32 0.25, %v3305_v17  ;;  %v2733_v48 = vadd.f32 %v5755_v18, %v2470_v52  ;;  %v2991_v22 = vmax.f32 %v2735_v0, 0.0  ;;  %v6012_v52 = vpop.f32.mrb[95].mxu0 }
 0x1a0   :  { %v3246_v45 = vadd.f32 %v3182_v15, %v6930_v63  ;;  %3435 = vst [vmem:[%s6690_s4 + $0x98] sm:$0xff] %v3371_v14  ;;  %v3116_v61 = vmax.f32 %v2860_v21, 0.0  ;;  %v6932_v59 = vmax.f32 %v6931_v36, 0.0  ;;  %v2600_v46 = vmul.f32 %v5740_v55, %v5900_v25  ;;  %v6933_v25 = vld [vmem:[#allocation25_spill] sm:$0xff]  ;;  %v6014_v14 = vpop.f32.mrb[95].mxu1 }
 0x1a1   :  { %3433 = vst [vmem:[%s6690_s4 + $0x88] sm:$0xff] %v3369_v50  ;;  %v2989_v23 = vmax.f32 %v2733_v48, 0.0  ;;  %v2598_v20 = vmul.f32 %v5740_v55, %v5910_v38  ;;  %v2475_v5 = vmul.f32 %v5740_v55, %v3968_v40  ;;  %v6934_v17 = vmax.f32 %v6933_v25, 0.0  ;;  %v6935_v38 = vld [vmem:[#allocation26_spill] sm:$0xff]  ;;  %v6939_v48 = vld [vmem:[#allocation28_spill] sm:$0xff] }
 0x1a2   :  { %v3244_v9 = vadd.f32 %v3180_v6, %v6932_v59  ;;  %v3310_v34 = vadd.f32 %v3246_v45, %v3118_v35  ;;  %v2863_v15 = vadd.f32 %v5755_v18, %v2600_v46  ;;  %v2473_v8 = vmul.f32 %v5740_v55, %v1707_v31  ;;  %v6937_v35 = vld [vmem:[#allocation27_spill] sm:$0xff] }
 0x1a3   :  { %v3183_v4 = vadd.f32 %v2991_v22, %v6934_v17  ;;  %v6936_v19 = vmax.f32 %v6935_v38, 0.0  ;;  %v2861_v6 = vadd.f32 %v5755_v18, %v2598_v20  ;;  %v2738_v0 = vadd.f32 %v5755_v18, %v2475_v5 }
 0x1a4   :  { %v3308_v49 = vadd.f32 %v3244_v9, %v3116_v61  ;;  %v3374_v33 = vmul.f32 0.25, %v3310_v34  ;;  %v3119_v50 = vmax.f32 %v2863_v15, 0.0  ;;  %v6938_v29 = vmax.f32 %v6937_v35, 0.0 }
 0x1a5   :  { %v3181_v40 = vadd.f32 %v2989_v23, %v6936_v19  ;;  %v2736_v45 = vadd.f32 %v5755_v18, %v2473_v8  ;;  %v3117_v31 = vmax.f32 %v2861_v6, 0.0  ;;  %v6940_v22 = vmax.f32 %v6939_v48, 0.0 }
 0x1a6   :  { %v3372_v21 = vmul.f32 0.25, %v3308_v49  ;;  %v3247_v63 = vadd.f32 %v3183_v4, %v6938_v29  ;;  %3438 = vst [vmem:[%s6690_s4 + $0xb0] sm:$0xff] %v3374_v33  ;;  %v2994_v36 = vmax.f32 %v2738_v0, 0.0  ;;  %v2603_v59 = vmul.f32 %v5740_v55, %v5936_v32  ;;  %v6042_v4 = vpop.f32.mrb[96].mxu0  ;;  %v6044_v49 = vpop.f32.mrb[96].mxu1 }
 0x1a7   :  { %v3245_v61 = vadd.f32 %v3181_v40, %v6940_v22  ;;  %v2992_v46 = vmax.f32 %v2736_v45, 0.0  ;;  %v2476_v34 = vmul.f32 %v5740_v55, %v5948_v13  ;;  %v2601_v23 = vmul.f32 %v5740_v55, %v5942_v56  ;;  %v6050_v38 = vpop.f32.mrb[97].mxu0 }
 0x1a8   :  { %3436 = vst [vmem:[%s6690_s4 + $0xa0] sm:$0xff] %v3372_v21  ;;  %v3311_v9 = vadd.f32 %v3247_v63, %v3119_v50  ;;  %v6941_v5 = vmax.f32 %v5279_v26, 0.0  ;;  %v2866_v17 = vadd.f32 %v5755_v18, %v2603_v59  ;;  %v2474_v32 = vmul.f32 %v5740_v55, %v5955_v1  ;;  %v6052_v26 = vpop.f32.mrb[97].mxu1  ;;  %v6057_v21 = vpop.f32.mrb[98].mxu0 }
 0x1a9   :  { %v3309_v20 = vadd.f32 %v3245_v61, %v3117_v31  ;;  %v6942_v8 = vmax.f32 %v5293_v10, 0.0  ;;  %v2739_v33 = vadd.f32 %v5755_v18, %v2476_v34  ;;  %v2864_v56 = vadd.f32 %v5755_v18, %v2601_v23  ;;  %v6059_v50 = vpop.f32.mrb[98].mxu1 }
 0x1aa   :  { %v3186_v25 = vadd.f32 %v2994_v36, %v6941_v5  ;;  %v3375_v15 = vmul.f32 0.25, %v3311_v9  ;;  %v3122_v40 = vmax.f32 %v2866_v17, 0.0  ;;  %v6943_v1 = vmax.f32 %v5282_v44, 0.0  ;;  %v6068_v44 = vpop.f32.mrb[99].mxu0  ;;  %v6070_v31 = vpop.f32.mrb[99].mxu1  ;;  %v6945_v36 = vld [vmem:[#allocation29_spill] sm:$0xff] }
 0x1ab   :  { %v3184_v13 = vadd.f32 %v2992_v46, %v6942_v8  ;;  %v3373_v19 = vmul.f32 0.25, %v3309_v20  ;;  %v2737_v0 = vadd.f32 %v5755_v18, %v2474_v32  ;;  %v2995_v10 = vmax.f32 %v2739_v33, 0.0  ;;  %v6947_v20 = vld [vmem:[#allocation30_spill] sm:$0xff] }
 0x1ac   :  { %v3250_v6 = vadd.f32 %v3186_v25, %v6943_v1  ;;  %3439 = vst [vmem:[%s6690_s4 + $0xb8] sm:$0xff] %v3375_v15  ;;  %v3120_v35 = vmax.f32 %v2864_v56, 0.0  ;;  %v6944_v29 = vmax.f32 %v5296_v53, 0.0  ;;  %v2604_v45 = vmul.f32 %v5740_v55, %v5950_v62  ;;  %v6951_v56 = vld [vmem:[#allocation32_spill] sm:$0xff] }
 0x1ad   :  { %3437 = vst [vmem:[%s6690_s4 + $0xa8] sm:$0xff] %v3373_v19  ;;  %v2993_v22 = vmax.f32 %v2737_v0, 0.0  ;;  %v2602_v61 = vmul.f32 %v5740_v55, %v5957_v42  ;;  %v2479_v53 = vmul.f32 %v5740_v55, %v5983_v2  ;;  %v6946_v59 = vmax.f32 %v6945_v36, 0.0  ;;  %v6949_v2 = vld [vmem:[#allocation31_spill] sm:$0xff]  ;;  %v6098_v0 = vpop.f32.mrb[100].mxu0 }
 0x1ae   :  { %v3248_v63 = vadd.f32 %v3184_v13, %v6944_v29  ;;  %v3314_v48 = vadd.f32 %v3250_v6, %v3122_v40  ;;  %v2867_v46 = vadd.f32 %v5755_v18, %v2604_v45  ;;  %v2477_v34 = vmul.f32 %v5740_v55, %v5994_v27 }
 0x1af   :  { %v3187_v9 = vadd.f32 %v2995_v10, %v6946_v59  ;;  %v6948_v5 = vmax.f32 %v6947_v20, 0.0  ;;  %v2865_v17 = vadd.f32 %v5755_v18, %v2602_v61  ;;  %v2742_v42 = vadd.f32 %v5755_v18, %v2479_v53  ;;  %v6100_v10 = vpop.f32.mrb[100].mxu1  ;;  %v6953_v61 = vld [vmem:[#allocation33_spill] sm:$0xff] }
 0x1b0   :  { %v3312_v62 = vadd.f32 %v3248_v63, %v3120_v35  ;;  %v3378_v23 = vmul.f32 0.25, %v3314_v48  ;;  %v3123_v15 = vmax.f32 %v2867_v46, 0.0  ;;  %v6950_v8 = vmax.f32 %v6949_v2, 0.0  ;;  %v6109_v48 = vpop.f32.mrb[101].mxu0 }
 0x1b1   :  { %v3185_v25 = vadd.f32 %v2993_v22, %v6948_v5  ;;  %v2740_v33 = vadd.f32 %v5755_v18, %v2477_v34  ;;  %v3121_v27 = vmax.f32 %v2865_v17, 0.0  ;;  %v6952_v19 = vmax.f32 %v6951_v56, 0.0  ;;  %v6111_v22 = vpop.f32.mrb[101].mxu1  ;;  %v6955_v34 = vld [vmem:[#allocation35_spill] sm:$0xff] }
 0x1b2   :  { %v3376_v32 = vmul.f32 0.25, %v3312_v62  ;;  %v3251_v13 = vadd.f32 %v3187_v9, %v6950_v8  ;;  %3442 = vst [vmem:[%s6690_s4 + $0xd0] sm:$0xff] %v3378_v23  ;;  %v2998_v1 = vmax.f32 %v2742_v42, 0.0  ;;  %v2607_v6 = vmul.f32 %v5740_v55, %v5985_v51  ;;  %v6118_v62 = vpop.f32.mrb[102].mxu0  ;;  %v6120_v46 = vpop.f32.mrb[102].mxu1 }
 0x1b3   :  { %v3249_v40 = vadd.f32 %v3185_v25, %v6952_v19  ;;  %v2996_v29 = vmax.f32 %v2740_v33, 0.0  ;;  %v2480_v63 = vmul.f32 %v5740_v55, %v6004_v28  ;;  %v2605_v45 = vmul.f32 %v5740_v55, %v5996_v57  ;;  %v6126_v25 = vpop.f32.mrb[103].mxu0  ;;  %v6128_v17 = vpop.f32.mrb[103].mxu1 }
 0x1b4   :  { %3440 = vst [vmem:[%s6690_s4 + $0xc0] sm:$0xff] %v3376_v32  ;;  %v3315_v35 = vadd.f32 %v3251_v13, %v3123_v15  ;;  %v6954_v53 = vmax.f32 %v6953_v61, 0.0  ;;  %v2870_v59 = vadd.f32 %v5755_v18, %v2607_v6  ;;  %v2478_v9 = vmul.f32 %v5740_v55, %v6012_v52  ;;  %v6957_v15 = vld [vmem:[#allocation34_spill] sm:$0xff] }
 0x1b5   :  { %v3313_v51 = vadd.f32 %v3249_v40, %v3121_v27  ;;  %v6956_v57 = vmax.f32 %v6955_v34, 0.0  ;;  %v2743_v20 = vadd.f32 %v5755_v18, %v2480_v63  ;;  %v2868_v5 = vadd.f32 %v5755_v18, %v2605_v45  ;;  %v6959_v27 = vld [vmem:[#allocation36_spill] sm:$0xff]  ;;  %v6961_v63 = vld [vmem:[#allocation37_spill] sm:$0xff] }
 0x1b6   :  { %v3190_v36 = vadd.f32 %v2998_v1, %v6954_v53  ;;  %v3379_v28 = vmul.f32 0.25, %v3315_v35  ;;  %v3126_v32 = vmax.f32 %v2870_v59, 0.0  ;;  %v6958_v52 = vmax.f32 %v6957_v15, 0.0  ;;  %v6963_v59 = vld [vmem:[#allocation38_spill] sm:$0xff] }
 0x1b7   :  { %v3188_v23 = vadd.f32 %v2996_v29, %v6956_v57  ;;  %v3377_v42 = vmul.f32 0.25, %v3313_v51  ;;  %v2741_v8 = vadd.f32 %v5755_v18, %v2478_v9  ;;  %v2999_v13 = vmax.f32 %v2743_v20, 0.0  ;;  %v6156_v57 = vpop.f32.mrb[104].mxu0 }
 0x1b8   :  { %v3254_v2 = vadd.f32 %v3190_v36, %v6958_v52  ;;  %3443 = vst [vmem:[%s6690_s4 + $0xd8] sm:$0xff] %v3379_v28  ;;  %v3124_v33 = vmax.f32 %v2868_v5, 0.0  ;;  %v6960_v56 = vmax.f32 %v6959_v27, 0.0  ;;  %v2608_v40 = vmul.f32 %v5740_v55, %v6006_v11  ;;  %v6965_v5 = vld [vmem:[#allocation39_spill] sm:$0xff] }
 0x1b9   :  { %3441 = vst [vmem:[%s6690_s4 + $0xc8] sm:$0xff] %v3377_v42  ;;  %v2997_v6 = vmax.f32 %v2741_v8, 0.0  ;;  %v2606_v35 = vmul.f32 %v5740_v55, %v6014_v14  ;;  %v2483_v29 = vmul.f32 %v5740_v55, %v6042_v4  ;;  %v6962_v45 = vmax.f32 %v6961_v63, 0.0  ;;  %v6158_v4 = vpop.f32.mrb[104].mxu1  ;;  %v6967_v8 = vld [vmem:[#allocation40_spill] sm:$0xff] }
 0x1ba   :  { %v3252_v19 = vadd.f32 %v3188_v23, %v6960_v56  ;;  %v3318_v1 = vadd.f32 %v3254_v2, %v3126_v32  ;;  %v2871_v53 = vadd.f32 %v5755_v18, %v2608_v40  ;;  %v2481_v11 = vmul.f32 %v5740_v55, %v6050_v38  ;;  %v6163_v38 = vpop.f32.mrb[105].mxu0  ;;  %v6165_v52 = vpop.f32.mrb[105].mxu1 }
 0x1bb   :  { %v3191_v51 = vadd.f32 %v2999_v13, %v6962_v45  ;;  %v6964_v9 = vmax.f32 %v6963_v59, 0.0  ;;  %v2869_v34 = vadd.f32 %v5755_v18, %v2606_v35  ;;  %v2746_v14 = vadd.f32 %v5755_v18, %v2483_v29  ;;  %v6176_v40 = vpop.f32.mrb[106].mxu1 }
 0x1bc   :  { %v3316_v61 = vadd.f32 %v3252_v19, %v3124_v33  ;;  %v3382_v36 = vmul.f32 0.25, %v3318_v1  ;;  %v3127_v20 = vmax.f32 %v2871_v53, 0.0  ;;  %v6966_v42 = vmax.f32 %v6965_v5, 0.0  ;;  %v6174_v19 = vpop.f32.mrb[106].mxu0  ;;  %v6187_v45 = vpop.f32.mrb[107].mxu1 }
 0x1bd   :  { %v3189_v28 = vadd.f32 %v2997_v6, %v6964_v9  ;;  %v2744_v15 = vadd.f32 %v5755_v18, %v2481_v11  ;;  %v3125_v2 = vmax.f32 %v2869_v34, 0.0  ;;  %v6968_v13 = vmax.f32 %v6967_v8, 0.0  ;;  %v6185_v63 = vpop.f32.mrb[107].mxu0 }
 0x1be   :  { %v3380_v23 = vmul.f32 0.25, %v3316_v61  ;;  %v3255_v32 = vadd.f32 %v3191_v51, %v6966_v42  ;;  %3446 = vst [vmem:[%s6690_s4 + $0xf0] sm:$0xff] %v3382_v36  ;;  %v3002_v27 = vmax.f32 %v2746_v14, 0.0  ;;  %v2611_v56 = vmul.f32 %v5740_v55, %v6044_v49  ;;  %v6969_v51 = vld [vmem:[#allocation41_spill] sm:$0xff] }
 0x1bf   :  { %v3253_v33 = vadd.f32 %v3189_v28, %v6968_v13  ;;  %v3000_v6 = vmax.f32 %v2744_v15, 0.0  ;;  %v2484_v35 = vmul.f32 %v5740_v55, %v6057_v21  ;;  %v2609_v29 = vmul.f32 %v5740_v55, %v6052_v26 }
 0x1c0   :  { %3444 = vst [vmem:[%s6690_s4 + $0xe0] sm:$0xff] %v3380_v23  ;;  %v3319_v1 = vadd.f32 %v3255_v32, %v3127_v20  ;;  %v6970_v61 = vmax.f32 %v6969_v51, 0.0  ;;  %v2874_v11 = vadd.f32 %v5755_v18, %v2611_v56  ;;  %v2482_v36 = vmul.f32 %v5740_v55, %v6068_v44  ;;  %v6972_v23 = vld [vmem:[#allocation42_spill] sm:$0xff]  ;;  %v6215_v56 = vpop.f32.mrb[108].mxu0 }
 0x1c1   :  { %v3317_v49 = vadd.f32 %v3253_v33, %v3125_v2  ;;  %v6971_v9 = vmax.f32 %v5403_v37, 0.0  ;;  %v2747_v28 = vadd.f32 %v5755_v18, %v2484_v35  ;;  %v2872_v26 = vadd.f32 %v5755_v18, %v2609_v29 }
 0x1c2   :  { %v3194_v53 = vadd.f32 %v3002_v27, %v6970_v61  ;;  %v3383_v59 = vmul.f32 0.25, %v3319_v1  ;;  %v3130_v14 = vmax.f32 %v2874_v11, 0.0  ;;  %v6973_v20 = vmax.f32 %v6972_v23, 0.0  ;;  %v6217_v1 = vpop.f32.mrb[108].mxu1  ;;  %v6976_v61 = vld [vmem:[#allocation43_spill] sm:$0xff] }
 0x1c3   :  { %v3192_v21 = vadd.f32 %v3000_v6, %v6971_v9  ;;  %v3381_v34 = vmul.f32 0.25, %v3317_v49  ;;  %v2745_v42 = vadd.f32 %v5755_v18, %v2482_v36  ;;  %v3003_v44 = vmax.f32 %v2747_v28, 0.0  ;;  %v6224_v49 = vpop.f32.mrb[109].mxu0  ;;  %v6226_v51 = vpop.f32.mrb[109].mxu1  ;;  %v6978_v28 = vld [vmem:[#allocation44_spill] sm:$0xff] }
 0x1c4   :  { %v3258_v5 = vadd.f32 %v3194_v53, %v6973_v20  ;;  %3447 = vst [vmem:[%s6690_s4 + $0xf8] sm:$0xff] %v3383_v59  ;;  %v3128_v32 = vmax.f32 %v2872_v26, 0.0  ;;  %v6974_v37 = vmax.f32 %v5406_v60, 0.0  ;;  %v2612_v2 = vmul.f32 %v5740_v55, %v6059_v50  ;;  %v6234_v59 = vpop.f32.mrb[110].mxu1 }
 0x1c5   :  { %3445 = vst [vmem:[%s6690_s4 + $0xe8] sm:$0xff] %v3381_v34  ;;  %v3001_v13 = vmax.f32 %v2745_v42, 0.0  ;;  %v2610_v33 = vmul.f32 %v5740_v55, %v6070_v31  ;;  %v2487_v27 = vmul.f32 %v5740_v55, %v6098_v0  ;;  %v6975_v60 = vmax.f32 %v5413_v54, 0.0  ;;  %v6232_v54 = vpop.f32.mrb[110].mxu0  ;;  %v6241_v23 = vpop.f32.mrb[111].mxu1 }
 0x1c6   :  { %v3256_v15 = vadd.f32 %v3192_v21, %v6974_v37  ;;  %v3322_v8 = vadd.f32 %v3258_v5, %v3130_v14  ;;  %v2875_v35 = vadd.f32 %v5755_v18, %v2612_v2  ;;  %v2485_v29 = vmul.f32 %v5740_v55, %v6109_v48  ;;  %v6239_v14 = vpop.f32.mrb[111].mxu0  ;;  %v6980_v5 = vld [vmem:[#allocation45_spill] sm:$0xff] }
 0x1c7   :  { %v3195_v6 = vadd.f32 %v3003_v44, %v6975_v60  ;;  %v6977_v0 = vmax.f32 %v6976_v61, 0.0  ;;  %v2873_v11 = vadd.f32 %v5755_v18, %v2610_v33  ;;  %v2750_v36 = vadd.f32 %v5755_v18, %v2487_v27  ;;  %v6982_v27 = vld [vmem:[#allocation46_spill] sm:$0xff] }
 0x1c8   :  { %v3320_v50 = vadd.f32 %v3256_v15, %v3128_v32  ;;  %v3386_v31 = vmul.f32 0.25, %v3322_v8  ;;  %v3131_v21 = vmax.f32 %v2875_v35, 0.0  ;;  %v6979_v48 = vmax.f32 %v6978_v28, 0.0  ;;  %v6269_v28 = vpop.f32.mrb[112].mxu0 }
 0x1c9   :  { %v3193_v53 = vadd.f32 %v3001_v13, %v6977_v0  ;;  %v2748_v34 = vadd.f32 %v5755_v18, %v2485_v29  ;;  %v3129_v20 = vmax.f32 %v2873_v11, 0.0  ;;  %v6981_v42 = vmax.f32 %v6980_v5, 0.0  ;;  %v6984_v29 = vld [vmem:[#allocation48_spill] sm:$0xff] }
 0x1ca   :  { %v3384_v9 = vmul.f32 0.25, %v3320_v50  ;;  %v3259_v26 = vadd.f32 %v3195_v6, %v6979_v48  ;;  %3450 = vst [vmem:[%s6690_s4 + $0x110] sm:$0xff] %v3386_v31  ;;  %v3006_v32 = vmax.f32 %v2750_v36, 0.0  ;;  %v2615_v37 = vmul.f32 %v5740_v55, %v6100_v10  ;;  %v6271_v48 = vpop.f32.mrb[112].mxu1 }
 0x1cb   :  { %v3257_v44 = vadd.f32 %v3193_v53, %v6981_v42  ;;  %v3004_v2 = vmax.f32 %v2748_v34, 0.0  ;;  %v2488_v8 = vmul.f32 %v5740_v55, %v6118_v62  ;;  %v2613_v13 = vmul.f32 %v5740_v55, %v6111_v22  ;;  %v6986_v22 = vld [vmem:[#allocation47_spill] sm:$0xff]  ;;  %v6988_v34 = vld [vmem:[#allocation49_spill] sm:$0xff] }
 0x1cc   :  { %3448 = vst [vmem:[%s6690_s4 + $0x100] sm:$0xff] %v3384_v9  ;;  %v3323_v15 = vadd.f32 %v3259_v26, %v3131_v21  ;;  %v6983_v60 = vmax.f32 %v6982_v27, 0.0  ;;  %v2878_v50 = vadd.f32 %v5755_v18, %v2615_v37  ;;  %v2486_v10 = vmul.f32 %v5740_v55, %v6126_v25 }
 0x1cd   :  { %v3321_v33 = vadd.f32 %v3257_v44, %v3129_v20  ;;  %v6985_v31 = vmax.f32 %v6984_v29, 0.0  ;;  %v2751_v0 = vadd.f32 %v5755_v18, %v2488_v8  ;;  %v2876_v62 = vadd.f32 %v5755_v18, %v2613_v13  ;;  %v6280_v44 = vpop.f32.mrb[113].mxu0 }
 0x1ce   :  { %v3198_v6 = vadd.f32 %v3006_v32, %v6983_v60  ;;  %v3387_v35 = vmul.f32 0.25, %v3323_v15  ;;  %v3134_v11 = vmax.f32 %v2878_v50, 0.0  ;;  %v6987_v36 = vmax.f32 %v6986_v22, 0.0  ;;  %v6282_v32 = vpop.f32.mrb[113].mxu1  ;;  %v6291_v13 = vpop.f32.mrb[114].mxu0  ;;  %v6994_v22 = vld [vmem:[#allocation52_spill] sm:$0xff] }
 0x1cf   :  { %v3196_v61 = vadd.f32 %v3004_v2, %v6985_v31  ;;  %v3385_v53 = vmul.f32 0.25, %v3321_v33  ;;  %v2749_v21 = vadd.f32 %v5755_v18, %v2486_v10  ;;  %v3007_v25 = vmax.f32 %v2751_v0, 0.0  ;;  %v6293_v33 = vpop.f32.mrb[114].mxu1  ;;  %v6992_v31 = vld [vmem:[#allocation51_spill] sm:$0xff] }
 0x1d0   :  { %v3262_v9 = vadd.f32 %v3198_v6, %v6987_v36  ;;  %3451 = vst [vmem:[%s6690_s4 + $0x118] sm:$0xff] %v3387_v35  ;;  %v3132_v26 = vmax.f32 %v2876_v62, 0.0  ;;  %v6989_v20 = vmax.f32 %v6988_v34, 0.0  ;;  %v2616_v42 = vmul.f32 %v5740_v55, %v6120_v46  ;;  %v6990_v46 = vld [vmem:[#allocation50_spill] sm:$0xff]  ;;  %v6300_v35 = vpop.f32.mrb[115].mxu0  ;;  %v6302_v29 = vpop.f32.mrb[115].mxu1 }
 0x1d1   :  { %3449 = vst [vmem:[%s6690_s4 + $0x108] sm:$0xff] %v3385_v53  ;;  %v3005_v15 = vmax.f32 %v2749_v21, 0.0  ;;  %v2614_v2 = vmul.f32 %v5740_v55, %v6128_v17  ;;  %v2491_v8 = vmul.f32 %v5740_v55, %v6156_v57  ;;  %v6991_v27 = vmax.f32 %v6990_v46, 0.0 }
 0x1d2   :  { %v3260_v5 = vadd.f32 %v3196_v61, %v6989_v20  ;;  %v3326_v37 = vadd.f32 %v3262_v9, %v3134_v11  ;;  %v2879_v50 = vadd.f32 %v5755_v18, %v2616_v42  ;;  %v2489_v10 = vmul.f32 %v5740_v55, %v6163_v38 }
 0x1d3   :  { %v3199_v60 = vadd.f32 %v3007_v25, %v6991_v27  ;;  %v6993_v57 = vmax.f32 %v6992_v31, 0.0  ;;  %v2877_v0 = vadd.f32 %v5755_v18, %v2614_v2  ;;  %v2754_v62 = vadd.f32 %v5755_v18, %v2491_v8 }
 0x1d4   :  { %v3324_v6 = vadd.f32 %v3260_v5, %v3132_v26  ;;  %v3390_v17 = vmul.f32 0.25, %v3326_v37  ;;  %v3135_v11 = vmax.f32 %v2879_v50, 0.0  ;;  %v6995_v36 = vmax.f32 %v6994_v22, 0.0  ;;  %v7000_v22 = vld [vmem:[#allocation53_spill] sm:$0xff] }
 0x1d5   :  { %v3197_v61 = vadd.f32 %v3005_v15, %v6993_v57  ;;  %v2752_v21 = vadd.f32 %v5755_v18, %v2489_v10  ;;  %v3133_v38 = vmax.f32 %v2877_v0, 0.0  ;;  %v6996_v25 = vmax.f32 %v5481_v3, 0.0  ;;  %v6352_v0 = vld [vmem:[%s6689_s3] ss:$0 sm:$0xff] }
 0x1d6   :  { %v3388_v53 = vmul.f32 0.25, %v3324_v6  ;;  %v3263_v9 = vadd.f32 %v3199_v60, %v6995_v36  ;;  %3454 = vst [vmem:[%s6690_s4 + $0x130] sm:$0xff] %v3390_v17  ;;  %v3010_v34 = vmax.f32 %v2754_v62, 0.0  ;;  %v2619_v20 = vmul.f32 %v5740_v55, %v6158_v4  ;;  %v6331_v4 = vld [vmem:[%s6688_s2] ss:$0 sm:$0xff]  ;;  %v6335_v60 = vpop.f32.mrb[116].mxu0 }
 0x1d7   :  { %v3261_v26 = vadd.f32 %v3197_v61, %v6996_v25  ;;  %v3008_v42 = vmax.f32 %v2752_v21, 0.0  ;;  %v2492_v37 = vmul.f32 %v5740_v55, %v6174_v19  ;;  %v2617_v15 = vmul.f32 %v5740_v55, %v6165_v52  ;;  %v6337_v19 = vpop.f32.mrb[116].mxu1  ;;  %v6343_v10 = vpop.f32.mrb[117].mxu0 }
 0x1d8   :  { %3452 = vst [vmem:[%s6690_s4 + $0x120] sm:$0xff] %v3388_v53  ;;  %v3327_v5 = vadd.f32 %v3263_v9, %v3135_v11  ;;  %v6997_v3 = vmax.f32 %v5484_v41, 0.0  ;;  %v2882_v46 = vadd.f32 %v5755_v18, %v2619_v20  ;;  %v2490_v27 = vmul.f32 %v6331_v4, %v6185_v63  ;;  %v6345_v17 = vpop.f32.mrb[117].mxu1  ;;  %v6355_v62 = vpop.f32.mrb[118].mxu0 }
 0x1d9   :  { %v3325_v2 = vadd.f32 %v3261_v26, %v3133_v38  ;;  %v6998_v55 = vmax.f32 %v5492_v39, 0.0  ;;  %v2755_v41 = vadd.f32 %v5755_v18, %v2492_v37  ;;  %v2880_v50 = vadd.f32 %v5755_v18, %v2617_v15  ;;  %v6357_v53 = vpop.f32.mrb[118].mxu1  ;;  %v6366_v21 = vpop.f32.mrb[119].mxu0 }
 0x1da   :  { %v3202_v8 = vadd.f32 %v3010_v34, %v6997_v3  ;;  %v3391_v6 = vmul.f32 0.25, %v3327_v5  ;;  %v3138_v57 = vmax.f32 %v2882_v46, 0.0  ;;  %v6999_v63 = vmax.f32 %v5487_v7, 0.0  ;;  %v6368_v38 = vpop.f32.mrb[119].mxu1  ;;  %v7002_v5 = vld [vmem:[#allocation54_spill] sm:$0xff] }
 0x1db   :  { %v3200_v52 = vadd.f32 %v3008_v42, %v6998_v55  ;;  %v3389_v31 = vmul.f32 0.25, %v3325_v2  ;;  %v2753_v39 = vadd.f32 %v6352_v0, %v2490_v27  ;;  %v3011_v18 = vmax.f32 %v2755_v41, 0.0 }
 0x1dc   :  { %v3266_v61 = vadd.f32 %v3202_v8, %v6999_v63  ;;  %3455 = vst [vmem:[%s6690_s4 + $0x138] sm:$0xff] %v3391_v6  ;;  %v3136_v11 = vmax.f32 %v2880_v50, 0.0  ;;  %v7001_v7 = vmax.f32 %v7000_v22, 0.0  ;;  %v2620_v9 = vmul.f32 %v6331_v4, %v6176_v40  ;;  %v7004_v8 = vld [vmem:[#allocation55_spill] sm:$0xff]  ;;  %v6398_v22 = vpop.f32.mrb[120].mxu1 }
 0x1dd   :  { %3453 = vst [vmem:[%s6690_s4 + $0x128] sm:$0xff] %v3389_v31  ;;  %v3009_v26 = vmax.f32 %v2753_v39, 0.0  ;;  %v2618_v34 = vmul.f32 %v6331_v4, %v6187_v45  ;;  %v2495_v20 = vmul.f32 %v6331_v4, %v6215_v56  ;;  %v7003_v42 = vmax.f32 %v7002_v5, 0.0  ;;  %v7006_v56 = vld [vmem:[#allocation56_spill] sm:$0xff] }
 0x1de   :  { %v3264_v36 = vadd.f32 %v3200_v52, %v7001_v7  ;;  %v3330_v25 = vadd.f32 %v3266_v61, %v3138_v57  ;;  %v2883_v15 = vadd.f32 %v6352_v0, %v2620_v9  ;;  %v2493_v2 = vmul.f32 %v6331_v4, %v6224_v49  ;;  %v7008_v57 = vld [vmem:[#allocation57_spill] sm:$0xff] }
 0x1df   :  { %v3203_v37 = vadd.f32 %v3011_v18, %v7003_v42  ;;  %v7005_v46 = vmax.f32 %v7004_v8, 0.0  ;;  %v2881_v6 = vadd.f32 %v6352_v0, %v2618_v34  ;;  %v2758_v45 = vadd.f32 %v6352_v0, %v2495_v20  ;;  %v6409_v34 = vpop.f32.mrb[121].mxu1  ;;  %v7010_v20 = vld [vmem:[#allocation58_spill] sm:$0xff] }
 0x1e0   :  { %v3328_v40 = vadd.f32 %v3264_v36, %v3136_v11  ;;  %v3394_v3 = vmul.f32 0.25, %v3330_v25  ;;  %v3139_v52 = vmax.f32 %v2883_v15, 0.0  ;;  %v7007_v41 = vmax.f32 %v7006_v56, 0.0  ;;  %v6396_v11 = vpop.f32.mrb[120].mxu0 }
 0x1e1   :  { %v3201_v27 = vadd.f32 %v3009_v26, %v7005_v46  ;;  %v2756_v31 = vadd.f32 %v6352_v0, %v2493_v2  ;;  %v3137_v49 = vmax.f32 %v2881_v6, 0.0  ;;  %v7009_v63 = vmax.f32 %v7008_v57, 0.0  ;;  %v6407_v26 = vpop.f32.mrb[121].mxu0  ;;  %v6418_v2 = vpop.f32.mrb[122].mxu1 }
 0x1e2   :  { %v3392_v55 = vmul.f32 0.25, %v3328_v40  ;;  %v3267_v50 = vadd.f32 %v3203_v37, %v7007_v41  ;;  %3458 = vst [vmem:[%s6690_s4 + $0x150] sm:$0xff] %v3394_v3  ;;  %v3014_v39 = vmax.f32 %v2758_v45, 0.0  ;;  %v2623_v18 = vmul.f32 %v6331_v4, %v6217_v1  ;;  %v6416_v15 = vpop.f32.mrb[122].mxu0  ;;  %v6426_v6 = vpop.f32.mrb[123].mxu1 }
 0x1e3   :  { %v3265_v61 = vadd.f32 %v3201_v27, %v7009_v63  ;;  %v3012_v36 = vmax.f32 %v2756_v31, 0.0  ;;  %v2496_v9 = vmul.f32 %v6331_v4, %v6232_v54  ;;  %v2621_v25 = vmul.f32 %v6331_v4, %v6226_v51  ;;  %v6424_v27 = vpop.f32.mrb[123].mxu0  ;;  %v7015_v31 = vld [vmem:[#allocation60_spill] sm:$0xff] }
 0x1e4   :  { %3456 = vst [vmem:[%s6690_s4 + $0x140] sm:$0xff] %v3392_v55  ;;  %v3331_v7 = vadd.f32 %v3267_v50, %v3139_v52  ;;  %v7011_v5 = vmax.f32 %v7010_v20, 0.0  ;;  %v2886_v37 = vadd.f32 %v6352_v0, %v2623_v18  ;;  %v2494_v40 = vmul.f32 %v6331_v4, %v6239_v14  ;;  %v7013_v52 = vld [vmem:[#allocation59_spill] sm:$0xff] }
 0x1e5   :  { %v3329_v1 = vadd.f32 %v3265_v61, %v3137_v49  ;;  %v7012_v51 = vmax.f32 %v5526_v58, 0.0  ;;  %v2759_v8 = vadd.f32 %v6352_v0, %v2496_v9  ;;  %v2884_v46 = vadd.f32 %v6352_v0, %v2621_v25 }
 0x1e6   :  { %v3206_v42 = vadd.f32 %v3014_v39, %v7011_v5  ;;  %v3395_v54 = vmul.f32 0.25, %v3331_v7  ;;  %v3142_v55 = vmax.f32 %v2886_v37, 0.0  ;;  %v7014_v14 = vmax.f32 %v7013_v52, 0.0 }
 0x1e7   :  { %v3204_v3 = vadd.f32 %v3012_v36, %v7012_v51  ;;  %v3393_v45 = vmul.f32 0.25, %v3329_v1  ;;  %v2757_v41 = vadd.f32 %v6352_v0, %v2494_v40  ;;  %v3015_v58 = vmax.f32 %v2759_v8, 0.0  ;;  %v7017_v36 = vld [vmem:[#allocation61_spill] sm:$0xff]  ;;  %v6454_v51 = vpop.f32.mrb[124].mxu0 }
 0x1e8   :  { %v3270_v56 = vadd.f32 %v3206_v42, %v7014_v14  ;;  %3459 = vst [vmem:[%s6690_s4 + $0x158] sm:$0xff] %v3395_v54  ;;  %v3140_v50 = vmax.f32 %v2884_v46, 0.0  ;;  %v7016_v49 = vmax.f32 %v7015_v31, 0.0  ;;  %v2624_v63 = vmul.f32 %v6331_v4, %v6234_v59  ;;  %v7019_v42 = vld [vmem:[#allocation62_spill] sm:$0xff]  ;;  %v7021_v46 = vld [vmem:[#allocation63_spill] sm:$0xff] }
 0x1e9   :  { %3457 = vst [vmem:[%s6690_s4 + $0x148] sm:$0xff] %v3393_v45  ;;  %v3013_v39 = vmax.f32 %v2757_v41, 0.0  ;;  %v2622_v18 = vmul.f32 %v6331_v4, %v6241_v23  ;;  %v2499_v7 = vmul.f32 %v6331_v4, %v6269_v28  ;;  %v7018_v9 = vmax.f32 %v7017_v36, 0.0  ;;  %v6456_v28 = vpop.f32.mrb[124].mxu1  ;;  %v7023_v41 = vld [vmem:[#allocation64_spill] sm:$0xff] }
 0x1ea   :  { %v3268_v57 = vadd.f32 %v3204_v3, %v7016_v49  ;;  %v3334_v61 = vadd.f32 %v3270_v56, %v3142_v55  ;;  %v2887_v20 = vadd.f32 %v6352_v0, %v2624_v63  ;;  %v2497_v59 = vmul.f32 %v6331_v4, %v6280_v44  ;;  %v6461_v44 = vpop.f32.mrb[125].mxu0  ;;  %v6463_v14 = vpop.f32.mrb[125].mxu1 }
 0x1eb   :  { %v3207_v25 = vadd.f32 %v3015_v58, %v7018_v9  ;;  %v7020_v37 = vmax.f32 %v7019_v42, 0.0  ;;  %v2885_v54 = vadd.f32 %v6352_v0, %v2622_v18  ;;  %v2762_v23 = vadd.f32 %v6352_v0, %v2499_v7  ;;  %v6474_v63 = vpop.f32.mrb[126].mxu1 }
 0x1ec   :  { %v3332_v1 = vadd.f32 %v3268_v57, %v3140_v50  ;;  %v3398_v5 = vmul.f32 0.25, %v3334_v61  ;;  %v3143_v8 = vmax.f32 %v2887_v20, 0.0  ;;  %v7022_v45 = vmax.f32 %v7021_v46, 0.0  ;;  %v6472_v57 = vpop.f32.mrb[126].mxu0  ;;  %v6485_v9 = vpop.f32.mrb[127].mxu1 }
 0x1ed   :  { %v3205_v40 = vadd.f32 %v3013_v39, %v7020_v37  ;;  %v2760_v52 = vadd.f32 %v6352_v0, %v2497_v59  ;;  %v3141_v56 = vmax.f32 %v2885_v54, 0.0  ;;  %v7024_v58 = vmax.f32 %v7023_v41, 0.0  ;;  %v6483_v36 = vpop.f32.mrb[127].mxu0 }
 0x1ee   :  { %v3396_v3 = vmul.f32 0.25, %v3332_v1  ;;  %v3271_v55 = vadd.f32 %v3207_v25, %v7022_v45  ;;  %3462 = vst [vmem:[%s6690_s4 + $0x170] sm:$0xff] %v3398_v5  ;;  %v3018_v31 = vmax.f32 %v2762_v23, 0.0  ;;  %v2627_v49 = vmul.f32 %v6331_v4, %v6271_v48  ;;  %v7025_v25 = vld [vmem:[#allocation65_spill] sm:$0xff] }
 0x1ef   :  { %v3269_v50 = vadd.f32 %v3205_v40, %v7024_v58  ;;  %v3016_v39 = vmax.f32 %v2760_v52, 0.0  ;;  %v2500_v18 = vmul.f32 %v6331_v4, %v6291_v13  ;;  %v2625_v7 = vmul.f32 %v6331_v4, %v6282_v32  ;;  %v7030_v52 = vld [vmem:[#allocation67_spill] sm:$0xff] }
 0x1f0   :  { %3460 = vst [vmem:[%s6690_s4 + $0x160] sm:$0xff] %v3396_v3  ;;  %v3335_v61 = vadd.f32 %v3271_v55, %v3143_v8  ;;  %v7026_v1 = vmax.f32 %v7025_v25, 0.0  ;;  %v2890_v59 = vadd.f32 %v6352_v0, %v2627_v49  ;;  %v2498_v5 = vmul.f32 %v6331_v4, %v6300_v35  ;;  %v7028_v3 = vld [vmem:[#allocation66_spill] sm:$0xff] }
 0x1f1   :  { %v3333_v48 = vadd.f32 %v3269_v50, %v3141_v56  ;;  %v7027_v37 = vmax.f32 %v5572_v12, 0.0  ;;  %v2763_v40 = vadd.f32 %v6352_v0, %v2500_v18  ;;  %v2888_v32 = vadd.f32 %v6352_v0, %v2625_v7 }
 0x1f2   :  { %v3210_v20 = vadd.f32 %v3018_v31, %v7026_v1  ;;  %v3399_v42 = vmul.f32 0.25, %v3335_v61  ;;  %v3146_v23 = vmax.f32 %v2890_v59, 0.0  ;;  %v7029_v8 = vmax.f32 %v7028_v3, 0.0 }
 0x1f3   :  { %v3208_v13 = vadd.f32 %v3016_v39, %v7027_v37  ;;  %v3397_v54 = vmul.f32 0.25, %v3333_v48  ;;  %v2761_v45 = vadd.f32 %v6352_v0, %v2498_v5  ;;  %v3019_v35 = vmax.f32 %v2763_v40, 0.0 }
 0x1f4   :  { %v3274_v46 = vadd.f32 %v3210_v20, %v7029_v8  ;;  %3463 = vst [vmem:[%s6690_s4 + $0x178] sm:$0xff] %v3399_v42  ;;  %v3144_v55 = vmax.f32 %v2888_v32, 0.0  ;;  %v7031_v12 = vmax.f32 %v7030_v52, 0.0  ;;  %v2628_v41 = vmul.f32 %v6331_v4, %v6293_v33 }
 0x1f5   :  { %3461 = vst [vmem:[%s6690_s4 + $0x168] sm:$0xff] %v3397_v54  ;;  %v3017_v50 = vmax.f32 %v2761_v45, 0.0  ;;  %v2626_v31 = vmul.f32 %v6331_v4, %v6302_v29  ;;  %v2503_v49 = vmul.f32 %v6331_v4, %v6335_v60  ;;  %v7032_v61 = vmax.f32 %v5580_v16, 0.0  ;;  %v7034_v60 = vld [vmem:[#allocation68_spill] sm:$0xff] }
 0x1f6   :  { %v3272_v56 = vadd.f32 %v3208_v13, %v7031_v12  ;;  %v3338_v58 = vadd.f32 %v3274_v46, %v3146_v23  ;;  %v2891_v7 = vadd.f32 %v6352_v0, %v2628_v41  ;;  %v2501_v33 = vmul.f32 %v6331_v4, %v6343_v10  ;;  %v7036_v13 = vld [vmem:[#allocation69_spill] sm:$0xff]  ;;  %v7040_v41 = vld [vmem:[#allocation72_spill] sm:$0xff] }
 0x1f7   :  { %v3211_v39 = vadd.f32 %v3019_v35, %v7032_v61  ;;  %v7033_v25 = vmax.f32 %v5583_v24, 0.0  ;;  %v2889_v20 = vadd.f32 %v6352_v0, %v2626_v31  ;;  %v2766_v29 = vadd.f32 %v6352_v0, %v2503_v49  ;;  %v7038_v35 = vld [vmem:[#allocation70_spill] sm:$0xff] }
 0x1f8   :  { %v3336_v18 = vadd.f32 %v3272_v56, %v3144_v55  ;;  %v3402_v48 = vmul.f32 0.25, %v3338_v58  ;;  %v3147_v5 = vmax.f32 %v2891_v7, 0.0  ;;  %v7035_v42 = vmax.f32 %v7034_v60, 0.0 }
 0x1f9   :  { %v3209_v1 = vadd.f32 %v3017_v50, %v7033_v25  ;;  %v2764_v37 = vadd.f32 %v6352_v0, %v2501_v33  ;;  %v3145_v10 = vmax.f32 %v2889_v20, 0.0  ;;  %v7037_v40 = vmax.f32 %v7036_v13, 0.0 }
 0x1fa   :  { %v3400_v59 = vmul.f32 0.25, %v3336_v18  ;;  %v3275_v16 = vadd.f32 %v3211_v39, %v7035_v42  ;;  %3466 = vst [vmem:[%s6690_s4 + $0x190] sm:$0xff] %v3402_v48  ;;  %v3022_v32 = vmax.f32 %v2766_v29, 0.0  ;;  %v2631_v54 = vmul.f32 %v6331_v4, %v6337_v19  ;;  %v7044_v48 = vld [vmem:[#allocation73_spill] sm:$0xff]  ;;  %v7046_v42 = vld [vmem:[#allocation74_spill] sm:$0xff] }
 0x1fb   :  { %v3273_v24 = vadd.f32 %v3209_v1, %v7037_v40  ;;  %v3020_v3 = vmax.f32 %v2764_v37, 0.0  ;;  %v2504_v8 = vmul.f32 %v6331_v4, %v6355_v62  ;;  %v2629_v46 = vmul.f32 %v6331_v4, %v6345_v17  ;;  %v7042_v17 = vld [vmem:[#allocation71_spill] sm:$0xff] }
 0x1fc   :  { %3464 = vst [vmem:[%s6690_s4 + $0x180] sm:$0xff] %v3400_v59  ;;  %v3339_v23 = vadd.f32 %v3275_v16, %v3147_v5  ;;  %v7039_v55 = vmax.f32 %v7038_v35, 0.0  ;;  %v2894_v12 = vadd.f32 %v6352_v0, %v2631_v54  ;;  %v2502_v19 = vmul.f32 %v6331_v4, %v6366_v21 }
 0x1fd   :  { %v3337_v45 = vadd.f32 %v3273_v24, %v3145_v10  ;;  %v7041_v58 = vmax.f32 %v7040_v41, 0.0  ;;  %v2767_v31 = vadd.f32 %v6352_v0, %v2504_v8  ;;  %v2892_v62 = vadd.f32 %v6352_v0, %v2629_v46  ;;  %v7048_v24 = vld [vmem:[#allocation75_spill] sm:$0xff] }
 0x1fe   :  { %v3214_v52 = vadd.f32 %v3022_v32, %v7039_v55  ;;  %v3403_v56 = vmul.f32 0.25, %v3339_v23  ;;  %v3150_v61 = vmax.f32 %v2894_v12, 0.0  ;;  %v7043_v39 = vmax.f32 %v7042_v17, 0.0  ;;  %v7054_v17 = vld [vmem:[#allocation78_spill] sm:$0xff] }
 0x1ff   :  { %v3212_v50 = vadd.f32 %v3020_v3, %v7041_v58  ;;  %v3401_v49 = vmul.f32 0.25, %v3337_v45  ;;  %v2765_v7 = vadd.f32 %v6352_v0, %v2502_v19  ;;  %v3023_v21 = vmax.f32 %v2767_v31, 0.0 }
 0x200   :  { %v3278_v18 = vadd.f32 %v3214_v52, %v7043_v39  ;;  %3467 = vst [vmem:[%s6690_s4 + $0x198] sm:$0xff] %v3403_v56  ;;  %v3148_v33 = vmax.f32 %v2892_v62, 0.0  ;;  %v7045_v25 = vmax.f32 %v7044_v48, 0.0  ;;  %v2632_v20 = vmul.f32 %v6331_v4, %v6357_v53 }
 0x201   :  { %3465 = vst [vmem:[%s6690_s4 + $0x188] sm:$0xff] %v3401_v49  ;;  %v3021_v59 = vmax.f32 %v2765_v7, 0.0  ;;  %v2630_v5 = vmul.f32 %v6331_v4, %v6368_v38  ;;  %v2507_v60 = vmul.f32 %v6331_v4, %v6396_v11  ;;  %v7047_v16 = vmax.f32 %v7046_v42, 0.0  ;;  %v7050_v11 = vld [vmem:[#allocation76_spill] sm:$0xff] }
 0x202   :  { %v3276_v1 = vadd.f32 %v3212_v50, %v7045_v25  ;;  %v3342_v29 = vadd.f32 %v3278_v18, %v3150_v61  ;;  %v2895_v13 = vadd.f32 %v6352_v0, %v2632_v20  ;;  %v2505_v53 = vmul.f32 %v6331_v4, %v6407_v26  ;;  %v7058_v20 = vld [vmem:[#allocation79_spill] sm:$0xff] }
 0x203   :  { %v3215_v37 = vadd.f32 %v3023_v21, %v7047_v16  ;;  %v7049_v32 = vmax.f32 %v7048_v24, 0.0  ;;  %v2893_v23 = vadd.f32 %v6352_v0, %v2630_v5  ;;  %v2770_v38 = vadd.f32 %v6352_v0, %v2507_v60 }
 0x204   :  { %v3340_v10 = vadd.f32 %v3276_v1, %v3148_v33  ;;  %v3406_v40 = vmul.f32 0.25, %v3342_v29  ;;  %v3151_v8 = vmax.f32 %v2895_v13, 0.0  ;;  %v7051_v46 = vmax.f32 %v7050_v11, 0.0 }
 0x205   :  { %v3213_v54 = vadd.f32 %v3021_v59, %v7049_v32  ;;  %v2768_v35 = vadd.f32 %v6352_v0, %v2505_v53  ;;  %v3149_v26 = vmax.f32 %v2893_v23, 0.0  ;;  %v7052_v55 = vmax.f32 %v5641_v30, 0.0 }
 0x206   :  { %v3404_v3 = vmul.f32 0.25, %v3340_v10  ;;  %v3279_v45 = vadd.f32 %v3215_v37, %v7051_v46  ;;  %3470 = vst [vmem:[%s6690_s4 + $0x1b0] sm:$0xff] %v3406_v40  ;;  %v3026_v12 = vmax.f32 %v2770_v38, 0.0  ;;  %v2635_v19 = vmul.f32 %v6331_v4, %v6398_v22  ;;  %v7060_v10 = vld [vmem:[#allocation80_spill] sm:$0xff] }
 0x207   :  { %v3277_v52 = vadd.f32 %v3213_v54, %v7052_v55  ;;  %v3024_v41 = vmax.f32 %v2768_v35, 0.0  ;;  %v2508_v58 = vmul.f32 %v6331_v4, %v6416_v15  ;;  %v2633_v50 = vmul.f32 %v6331_v4, %v6409_v34  ;;  %v7056_v34 = vld [vmem:[#allocation77_spill] sm:$0xff] }
 0x208   :  { %3468 = vst [vmem:[%s6690_s4 + $0x1a0] sm:$0xff] %v3404_v3  ;;  %v3343_v56 = vadd.f32 %v3279_v45, %v3151_v8  ;;  %v7053_v30 = vmax.f32 %v5644_v43, 0.0  ;;  %v2898_v49 = vadd.f32 %v6352_v0, %v2635_v19  ;;  %v2506_v22 = vmul.f32 %v6331_v4, %v6424_v27  ;;  %v7062_v54 = vld [vmem:[#allocation81_spill] sm:$0xff] }
 0x209   :  { %v3341_v31 = vadd.f32 %v3277_v52, %v3149_v26  ;;  %v7055_v39 = vmax.f32 %v7054_v17, 0.0  ;;  %v2771_v7 = vadd.f32 %v6352_v0, %v2508_v58  ;;  %v2896_v15 = vadd.f32 %v6352_v0, %v2633_v50  ;;  %v7066_v26 = vld [vmem:[#allocation83_spill] sm:$0xff]  ;;  %v7070_v17 = vld [vmem:[#allocation86_spill] sm:$0xff] }
 0x20a   :  { %v3218_v62 = vadd.f32 %v3026_v12, %v7053_v30  ;;  %v3407_v61 = vmul.f32 0.25, %v3343_v56  ;;  %v3154_v33 = vmax.f32 %v2898_v49, 0.0  ;;  %v7057_v48 = vmax.f32 %v7056_v34, 0.0  ;;  %v7068_v30 = vld [vmem:[#allocation84_spill] sm:$0xff] }
 0x20b   :  { %v3216_v18 = vadd.f32 %v3024_v41, %v7055_v39  ;;  %v3405_v21 = vmul.f32 0.25, %v3341_v31  ;;  %v2769_v43 = vadd.f32 %v6352_v0, %v2506_v22  ;;  %v3027_v27 = vmax.f32 %v2771_v7, 0.0 }
 0x20c   :  { %v3282_v25 = vadd.f32 %v3218_v62, %v7057_v48  ;;  %3471 = vst [vmem:[%s6690_s4 + $0x1b8] sm:$0xff] %v3407_v61  ;;  %v3152_v1 = vmax.f32 %v2896_v15, 0.0  ;;  %v7059_v29 = vmax.f32 %v7058_v20, 0.0  ;;  %v2636_v5 = vmul.f32 %v6331_v4, %v6418_v2 }
 0x20d   :  { %3469 = vst [vmem:[%s6690_s4 + $0x1a8] sm:$0xff] %v3405_v21  ;;  %v3025_v42 = vmax.f32 %v2769_v43, 0.0  ;;  %v2634_v16 = vmul.f32 %v6331_v4, %v6426_v6  ;;  %v2511_v37 = vmul.f32 %v6331_v4, %v6454_v51  ;;  %v7061_v13 = vmax.f32 %v7060_v10, 0.0  ;;  %v7064_v51 = vld [vmem:[#allocation82_spill] sm:$0xff]  ;;  %v7074_v43 = vld [vmem:[#allocation87_spill] sm:$0xff] }
 0x20e   :  { %v3280_v59 = vadd.f32 %v3216_v18, %v7059_v29  ;;  %v3346_v60 = vadd.f32 %v3282_v25, %v3154_v33  ;;  %v2899_v24 = vadd.f32 %v6352_v0, %v2636_v5  ;;  %v2509_v2 = vmul.f32 %v6331_v4, %v6461_v44  ;;  %v7076_v29 = vld [vmem:[#allocation89_spill] sm:$0xff] }
 0x20f   :  { %v3219_v53 = vadd.f32 %v3027_v27, %v7061_v13  ;;  %v7063_v23 = vmax.f32 %v7062_v54, 0.0  ;;  %v2897_v3 = vadd.f32 %v6352_v0, %v2634_v16  ;;  %v2774_v6 = vadd.f32 %v6352_v0, %v2511_v37  ;;  %v7077_v16 = vld [vmem:[#allocation88_spill] sm:$0xff] }
 0x210   :  { %v3344_v40 = vadd.f32 %v3280_v59, %v3152_v1  ;;  %v3410_v32 = vmul.f32 0.25, %v3346_v60  ;;  %v3155_v11 = vmax.f32 %v2899_v24, 0.0  ;;  %v7065_v46 = vmax.f32 %v7064_v51, 0.0 }
 0x211   :  { %v3217_v38 = vadd.f32 %v3025_v42, %v7063_v23  ;;  %v2772_v35 = vadd.f32 %v6352_v0, %v2509_v2  ;;  %v3153_v44 = vmax.f32 %v2897_v3, 0.0  ;;  %v7067_v55 = vmax.f32 %v7066_v26, 0.0 }
 0x212   :  { %v3408_v8 = vmul.f32 0.25, %v3344_v40  ;;  %v3283_v45 = vadd.f32 %v3219_v53, %v7065_v46  ;;  %3474 = vst [vmem:[%s6690_s4 + $0x1d0] sm:$0xff] %v3410_v32  ;;  %v3030_v12 = vmax.f32 %v2774_v6, 0.0  ;;  %v2639_v19 = vmul.f32 %v6331_v4, %v6456_v28 }
 0x213   :  { %v3281_v52 = vadd.f32 %v3217_v38, %v7067_v55  ;;  %v3028_v41 = vmax.f32 %v2772_v35, 0.0  ;;  %v2512_v58 = vmul.f32 %v6331_v4, %v6472_v57  ;;  %v2637_v50 = vmul.f32 %v6331_v4, %v6463_v14  ;;  %v7072_v14 = vld [vmem:[#allocation85_spill] sm:$0xff] }
 0x214   :  { %3472 = vst [vmem:[%s6690_s4 + $0x1c0] sm:$0xff] %v3408_v8  ;;  %v3347_v56 = vadd.f32 %v3283_v45, %v3155_v11  ;;  %v7069_v62 = vmax.f32 %v7068_v30, 0.0  ;;  %v2902_v22 = vadd.f32 %v6352_v0, %v2639_v19  ;;  %v2510_v28 = vmul.f32 %v6331_v4, %v6483_v36 }
 0x215   :  { %v3345_v31 = vadd.f32 %v3281_v52, %v3153_v44  ;;  %v7071_v39 = vmax.f32 %v7070_v17, 0.0  ;;  %v2775_v7 = vadd.f32 %v6352_v0, %v2512_v58  ;;  %v2900_v57 = vadd.f32 %v6352_v0, %v2637_v50 }
 0x216   :  { %v3222_v49 = vadd.f32 %v3030_v12, %v7069_v62  ;;  %v3411_v61 = vmul.f32 0.25, %v3347_v56  ;;  %v3158_v21 = vmax.f32 %v2902_v22, 0.0  ;;  %v7073_v33 = vmax.f32 %v7072_v14, 0.0 }
 0x217   :  { %v3220_v18 = vadd.f32 %v3028_v41, %v7071_v39  ;;  %v3409_v15 = vmul.f32 0.25, %v3345_v31  ;;  %v2773_v48 = vadd.f32 %v6352_v0, %v2510_v28  ;;  %v3031_v36 = vmax.f32 %v2775_v7, 0.0 }
 0x218   :  { %v3286_v34 = vadd.f32 %v3222_v49, %v7073_v33  ;;  %3475 = vst [vmem:[%s6690_s4 + $0x1d8] sm:$0xff] %v3411_v61  ;;  %v3156_v25 = vmax.f32 %v2900_v57, 0.0  ;;  %v7075_v27 = vmax.f32 %v7074_v43, 0.0  ;;  %v2640_v20 = vmul.f32 %v6331_v4, %v6474_v63  ;;  %v7079_v63 = vld [vmem:[#allocation90_spill] sm:$0xff] }
 0x219   :  { %v2965_v59 = vmax.f32 %v7076_v29, 0.0  ;;  %3473 = vst [vmem:[%s6690_s4 + $0x1c8] sm:$0xff] %v3409_v15  ;;  %v3029_v60 = vmax.f32 %v2773_v48, 0.0  ;;  %v2638_v42 = vmul.f32 %v6331_v4, %v6485_v9  ;;  %v3095_v37 = vmax.f32 %v7077_v16, 0.0 }
 0x21a   :  { %v3284_v1 = vadd.f32 %v3220_v18, %v7075_v27  ;;  %v3350_v5 = vadd.f32 %v3286_v34, %v3158_v21  ;;  %v7078_v10 = vmax.f32 %v5698_v47, 0.0  ;;  %v2903_v40 = vadd.f32 %v6352_v0, %v2640_v20 }
 0x21b   :  { %v3093_v24 = vmax.f32 %v7079_v63, 0.0  ;;  %v3221_v32 = vadd.f32 %v3029_v60, %v2965_v59  ;;  %v2901_v54 = vadd.f32 %v6352_v0, %v2638_v42 }
 0x21c   :  { %v3223_v13 = vadd.f32 %v3031_v36, %v7078_v10  ;;  %v3348_v53 = vadd.f32 %v3284_v1, %v3156_v25  ;;  %v3414_v2 = vmul.f32 0.25, %v3350_v5  ;;  %v3159_v38 = vmax.f32 %v2903_v40, 0.0 }
 0x21d   :  { %v3157_v4 = vmax.f32 %v2901_v54, 0.0  ;;  %v3285_v9 = vadd.f32 %v3221_v32, %v3093_v24 }
 0x21e   :  { %v3412_v23 = vmul.f32 0.25, %v3348_v53  ;;  %v3287_v3 = vadd.f32 %v3223_v13, %v3095_v37  ;;  %3478 = vst [vmem:[%s6690_s4 + $0x1f0] sm:$0xff] %v3414_v2 }
 0x21f   :  { %v3349_v6 = vadd.f32 %v3285_v9, %v3157_v4 }
 0x220   :  { %3476 = vst [vmem:[%s6690_s4 + $0x1e0] sm:$0xff] %v3412_v23  ;;  %v3351_v47 = vadd.f32 %v3287_v3, %v3159_v38 }
 0x221   :  { %v3413_v11 = vmul.f32 0.25, %v3349_v6 }
 0x222   :  { %v3415_v8 = vmul.f32 0.25, %v3351_v47 }
 0x223   :  { %3477 = vst [vmem:[%s6690_s4 + $0x1e8] sm:$0xff] %v3413_v11 }
 0x224   :  { %3479 = vst [vmem:[%s6690_s4 + $0x1f8] sm:$0xff] %v3415_v8 }

// kernel: testnet0_forward.9
= control target key start
LH: loop header
LB: loop body
LE: loop exit
PB: predicated region body
PF: predicated region fallthrough
CT: control target
= control target key end

     0   :  { %s3629_s15 = smov 0   ;;  %s4536_s0 = inlined_call_operand.vmem [shape: bf16[2,512,576], index: 0, kind: input, shape index: {}]   ;;  %s4537_s1 = inlined_call_operand.vmem [shape: bf16[2,576,128], index: 1, kind: input, shape index: {}]   ;;  %s4538_s2 = inlined_call_operand.vmem [shape: f32[2,1,128], index: 2, kind: input, shape index: {}]   ;;  %s4539_s3 = inlined_call_operand.vmem [shape: f32[2,1,128], index: 3, kind: input, shape index: {}]   ;;  %s4540_s4 = inlined_call_operand.vmem [shape: f32[2,128,128], index: 4, kind: output, shape index: {}]  }
   0x1 LB: > { %s2862_s16 = sadd.s32 4294967295, %s3601_s15   ;;  %p2866_p0 = scmp.ge.s32.totalorder %s3601_s15, 1  ;;  %s3601_s15 = sphi %s3629_s15, %s14_s15  }
   0x2   : > { %p188_p1 = scmp.lt.s32.totalorder %s3601_s15, 3 }
   0x4   : > { %p189_p2 = pnand %p2866_p0, %p188_p1 }
   0x6   : > { %192 = sbr.rel (%p189_p2) target bundleno = 624 (0x270), region = 36 }
   0xd   : > { %p225_p3 = scmp.lt.s32.totalorder %s2862_s16, 1  ;;  %v3603_v0 = vmov 0   ;;  %vm1527_vm0 = vcmask 523264  }
   0xe   : > { %1624 = vmatprep.subr.bf16.mxu0 %v3603_v0  ;;  %3212 = vmatprep.subr.bf16.mxu1 %v3603_v0 }
   0xf   : > { %s4576_s16 = smov (!%p225_p3, %s2862_s16), 1 }
  0x10   : > { %s3325_s17 = smul.u32 288, %s4576_s16  ;;  %s237_s27 = scalar_lea.vmem %s4538_s2, %s4576_s16 }
  0x11   : > { %s3324_s21 = smul.u32 1280, %s4576_s16  ;;  %s240_s30 = scalar_lea.vmem %s4539_s3, %s4576_s16 }
  0x12   : > { %s3645_s20 = scalar_lea.vmem %s4537_s1, %s3325_s17  ;;  %s3103_s5 = sshll.u32 %s4576_s16, 7 }
  0x13   : > { %v3335_v1 = vld [vmem:[%s3645_s20] sm:$0xff]   ;;  %v3336_v2 = vld [vmem:[%s3645_s20 + $0x8] sm:$0xff]   ;;  %v3337_v3 = vld [vmem:[%s3645_s20 + $0x10] sm:$0xff]   ;;  %s3662_s24 = scalar_lea.vmem %s4536_s0, %s3324_s21  ;;  %s4466_s8 = scalar_lea.vmem %s4540_s4, %s3103_s5 }
  0x14   : > { %1625 = vmatpush1.bf16.msra.mxu0 %v3335_v1  ;;  %3228 = vmatpush1.bf16.msra.mxu1 %v3335_v1  ;;  %v3338_v4 = vld [vmem:[%s3645_s20 + $0x18] sm:$0xff]   ;;  %v3339_v5 = vld [vmem:[%s3645_s20 + $0x20] sm:$0xff]   ;;  %v3340_v7 = vld [vmem:[%s3645_s20 + $0x28] sm:$0xff]  }
  0x15   : > { %1626 = vmatprep.subr.bf16.mxu0 %v3603_v0  ;;  %3213 = vmatprep.subr.bf16.mxu1 %v3603_v0  ;;  %v3353_v6 = vld [vmem:[%s3662_s24 + $0x4] ss:$20 sps:$4 sm:$0xff]   ;;  %v3341_v9 = vld [vmem:[%s3645_s20 + $0x30] sm:$0xff]   ;;  %v3344_v12 = vld [vmem:[%s3645_s20 + $0x48] sm:$0xff]  }
  0x16   : > { %v3356_v8 = vld [vmem:[%s3662_s24 + $0x144] ss:$20 sps:$4 sm:$0xff]   ;;  %1656 = vmatprep.mubr.bf16.mxu0 %v3353_v6  ;;  %v3345_v13 = vld [vmem:[%s3645_s20 + $0x50] sm:$0xff]   ;;  %v3348_v16 = vld [vmem:[%s3645_s20 + $0x68] sm:$0xff]  }
  0x17   : > { %1720 = vmatprep.mubr.bf16.mxu1 %v3356_v8  ;;  %v3342_v10 = vld [vmem:[%s3645_s20 + $0x38] sm:$0xff]   ;;  %v3343_v11 = vld [vmem:[%s3645_s20 + $0x40] sm:$0xff]   ;;  %v3349_v17 = vld [vmem:[%s3645_s20 + $0x70] sm:$0xff]  }
  0x18   : > { %1627 = vmatpush1.bf16.msra.mxu0 %v3336_v2  ;;  %3229 = vmatpush1.bf16.msra.mxu1 %v3336_v2  ;;  %v3346_v14 = vld [vmem:[%s3645_s20 + $0x58] sm:$0xff]   ;;  %v3347_v15 = vld [vmem:[%s3645_s20 + $0x60] sm:$0xff]   ;;  %v3407_v25 = vld [vmem:[%s3645_s20 + $0x108] sm:$0xff]  }
  0x19   : > { %1628 = vmatprep.subr.bf16.mxu0 %v3603_v0  ;;  %3214 = vmatprep.subr.bf16.mxu1 %v3603_v0  ;;  %v3350_v18 = vld [vmem:[%s3645_s20 + $0x78] sm:$0xff]   ;;  %v3358_v19 = vld [vmem:[%s3645_s20 + $0x100] sm:$0xff]   ;;  %v3359_v26 = vld [vmem:[%s3645_s20 + $0x88] sm:$0xff]  }
  0x1a   : > { %v3351_v20 = vld [vmem:[%s3662_s24] ss:$20 sps:$4 sm:$0xff]   ;;  %v3364_v27 = vld [vmem:[%s3662_s24 + $0x28] ss:$20 sps:$4 sm:$0xff]   ;;  %v3372_v34 = vld [vmem:[%s3662_s24 + $0x50] ss:$20 sps:$4 sm:$0xff]  }
  0x1b   : > { %v3354_v21 = vld [vmem:[%s3662_s24 + $0x140] ss:$20 sps:$4 sm:$0xff]   ;;  %v3365_v28 = vld [vmem:[%s3662_s24 + $0x168] ss:$20 sps:$4 sm:$0xff]   ;;  %v3373_v35 = vld [vmem:[%s3662_s24 + $0x190] ss:$20 sps:$4 sm:$0xff]  }
  0x1c   : > { %1629 = vmatpush1.bf16.msra.mxu0 %v3337_v3  ;;  %3230 = vmatpush1.bf16.msra.mxu1 %v3337_v3  ;;  %v3357_v22 = vld [vmem:[%s3645_s20 + $0x80] sm:$0xff]   ;;  %v3366_v29 = vld [vmem:[%s3645_s20 + $0x90] sm:$0xff]   ;;  %v3367_v33 = vld [vmem:[%s3645_s20 + $0x98] sm:$0xff]  }
  0x1d   : > { %1630 = vmatprep.subr.bf16.mxu0 %v3603_v0  ;;  %3215 = vmatprep.subr.bf16.mxu1 %v3603_v0  ;;  %v3360_v23 = vld [vmem:[%s3662_s24 + $0x2c] ss:$20 sps:$4 sm:$0xff]   ;;  %v3447_v30 = vld [vmem:[%s3645_s20 + $0x110] sm:$0xff]   ;;  %v3384_v43 = vld [vmem:[%s3662_s24 + $0xa4] ss:$20 sps:$4 sm:$0xff]  }
  0x1e   : > { %v3362_v24 = vld [vmem:[%s3662_s24 + $0x16c] ss:$20 sps:$4 sm:$0xff]   ;;  %v3368_v31 = vld [vmem:[%s3662_s24 + $0x54] ss:$20 sps:$4 sm:$0xff]   ;;  %v3376_v37 = vld [vmem:[%s3662_s24 + $0x7c] ss:$20 sps:$4 sm:$0xff]  }
  0x1f   : > { %v3370_v32 = vld [vmem:[%s3662_s24 + $0x194] ss:$20 sps:$4 sm:$0xff]   ;;  %v3374_v36 = vld [vmem:[%s3645_s20 + $0xa0] sm:$0xff]   ;;  %v3378_v38 = vld [vmem:[%s3662_s24 + $0x1bc] ss:$20 sps:$4 sm:$0xff]  }
  0x20   : > { %1631 = vmatpush1.bf16.msra.mxu0 %v3338_v4  ;;  %3231 = vmatpush1.bf16.msra.mxu1 %v3338_v4  ;;  %v3375_v39 = vld [vmem:[%s3645_s20 + $0xa8] sm:$0xff]   ;;  %v3382_v42 = vld [vmem:[%s3645_s20 + $0xb0] sm:$0xff]   ;;  %v3484_v44 = vld [vmem:[%s3645_s20 + $0x118] sm:$0xff]  }
  0x21   : > { %1632 = vmatprep.subr.bf16.mxu0 %v3603_v0  ;;  %3216 = vmatprep.subr.bf16.mxu1 %v3603_v0  ;;  %v3380_v40 = vld [vmem:[%s3662_s24 + $0x78] ss:$20 sps:$4 sm:$0xff]   ;;  %v3388_v47 = vld [vmem:[%s3662_s24 + $0xa0] ss:$20 sps:$4 sm:$0xff]   ;;  %v3396_v53 = vld [vmem:[%s3662_s24 + $0xc8] ss:$20 sps:$4 sm:$0xff]  }
  0x22   : > { %v3381_v41 = vld [vmem:[%s3662_s24 + $0x1b8] ss:$20 sps:$4 sm:$0xff]   ;;  %v3389_v48 = vld [vmem:[%s3662_s24 + $0x1e0] ss:$20 sps:$4 sm:$0xff]   ;;  %v3397_v54 = vld [vmem:[%s3662_s24 + $0x208] ss:$20 sps:$4 sm:$0xff]  }
  0x23   : > { %v3386_v45 = vld [vmem:[%s3662_s24 + $0x1e4] ss:$20 sps:$4 sm:$0xff]   ;;  %v3392_v50 = vld [vmem:[%s3662_s24 + $0xcc] ss:$20 sps:$4 sm:$0xff]   ;;  %v3398_v55 = vld [vmem:[%s3645_s20 + $0xd0] sm:$0xff]  }
  0x24   : > { %1633 = vmatpush1.bf16.msra.mxu0 %v3339_v5  ;;  %3232 = vmatpush1.bf16.msra.mxu1 %v3339_v5  ;;  %v3383_v46 = vld [vmem:[%s3645_s20 + $0xb8] sm:$0xff]   ;;  %v3390_v49 = vld [vmem:[%s3645_s20 + $0xc0] sm:$0xff]   ;;  %v3391_v52 = vld [vmem:[%s3645_s20 + $0xc8] sm:$0xff]  }
  0x25   : > { %1634 = vmatprep.subr.bf16.mxu0 %v3603_v0  ;;  %3217 = vmatprep.subr.bf16.mxu1 %v3603_v0  ;;  %v3394_v51 = vld [vmem:[%s3662_s24 + $0x20c] ss:$20 sps:$4 sm:$0xff]   ;;  %v3400_v56 = vld [vmem:[%s3662_s24 + $0xf4] ss:$20 sps:$4 sm:$0xff]   ;;  %v3399_v58 = vld [vmem:[%s3645_s20 + $0xd8] sm:$0xff]  }
  0x26   : > { %v3402_v57 = vld [vmem:[%s3662_s24 + $0x234] ss:$20 sps:$4 sm:$0xff]   ;;  %v3404_v59 = vld [vmem:[%s3662_s24 + $0xf0] ss:$20 sps:$4 sm:$0xff]   ;;  %v3413_v2 = vld [vmem:[%s3662_s24 + $0x118] ss:$20 sps:$4 sm:$0xff]  }
  0x27   : > { %v3405_v60 = vld [vmem:[%s3662_s24 + $0x230] ss:$20 sps:$4 sm:$0xff]   ;;  %v3408_v1 = vld [vmem:[%s3645_s20 + $0xe8] sm:$0xff]  }
  0x28   : > { %1635 = vmatpush1.bf16.msra.mxu0 %v3340_v7  ;;  %3233 = vmatpush1.bf16.msra.mxu1 %v3340_v7  ;;  %v3406_v61 = vld [vmem:[%s3645_s20 + $0xe0] sm:$0xff]   ;;  %v3409_v62 = vld [vmem:[%s3662_s24 + $0x11c] ss:$20 sps:$4 sm:$0xff]   ;;  %v3414_v3 = vld [vmem:[%s3662_s24 + $0x258] ss:$20 sps:$4 sm:$0xff]  }
  0x29   : > { %1636 = vmatprep.subr.bf16.mxu0 %v3603_v0  ;;  %3218 = vmatprep.subr.bf16.mxu1 %v3603_v0  ;;  %v3411_v63 = vld [vmem:[%s3662_s24 + $0x25c] ss:$20 sps:$4 sm:$0xff]   ;;  %v3417_v5 = vld [vmem:[%s3662_s24 + $0x284] ss:$20 sps:$4 sm:$0xff]   ;;  %v3421_v6 = vld [vmem:[%s3662_s24 + $0xc] ss:$20 sps:$4 sm:$0xff]  }
  0x2a   : > { %v3415_v4 = vld [vmem:[%s3645_s20 + $0xf0] sm:$0xff]   ;;  %v3416_v7 = vld [vmem:[%s3645_s20 + $0xf8] sm:$0xff]  }
  0x2b   : > { %v3419_v8 = vld [vmem:[%s3662_s24 + $0x8] ss:$20 sps:$4 sm:$0xff]  }
  0x2c   : > { %1637 = vmatpush1.bf16.msra.mxu0 %v3341_v9  ;;  %3234 = vmatpush1.bf16.msra.mxu1 %v3341_v9  ;;  %v3422_v9 = vld [vmem:[%s3662_s24 + $0x280] ss:$20 sps:$4 sm:$0xff]  }
  0x2d   : > { %1638 = vmatprep.subr.bf16.mxu0 %v3603_v0  ;;  %3219 = vmatprep.subr.bf16.mxu1 %v3603_v0 }
  0x30   : > { %1639 = vmatpush1.bf16.msra.mxu0 %v3342_v10  ;;  %3235 = vmatpush1.bf16.msra.mxu1 %v3342_v10  ;;  %v3423_v10 = vld [vmem:[%s3662_s24 + $0x2ac] ss:$20 sps:$4 sm:$0xff]  }
  0x31   : > { %1640 = vmatprep.subr.bf16.mxu0 %v3603_v0  ;;  %3220 = vmatprep.subr.bf16.mxu1 %v3603_v0 }
  0x34   : > { %1641 = vmatpush1.bf16.msra.mxu0 %v3343_v11  ;;  %3236 = vmatpush1.bf16.msra.mxu1 %v3343_v11  ;;  %v3425_v11 = vld [vmem:[%s3662_s24 + $0x34] ss:$20 sps:$4 sm:$0xff]  }
  0x35   : > { %1642 = vmatprep.subr.bf16.mxu0 %v3603_v0  ;;  %3221 = vmatprep.subr.bf16.mxu1 %v3603_v0 }
  0x38   : > { %1643 = vmatpush1.bf16.msra.mxu0 %v3344_v12  ;;  %3237 = vmatpush1.bf16.msra.mxu1 %v3344_v12  ;;  %v3427_v12 = vld [vmem:[%s3662_s24 + $0x2a8] ss:$20 sps:$4 sm:$0xff]  }
  0x39   : > { %1644 = vmatprep.subr.bf16.mxu0 %v3603_v0  ;;  %3222 = vmatprep.subr.bf16.mxu1 %v3603_v0 }
  0x3c   : > { %1645 = vmatpush1.bf16.msra.mxu0 %v3345_v13  ;;  %3238 = vmatpush1.bf16.msra.mxu1 %v3345_v13  ;;  %v3428_v13 = vld [vmem:[%s3662_s24 + $0x30] ss:$20 sps:$4 sm:$0xff]  }
  0x3d   : > { %1646 = vmatprep.subr.bf16.mxu0 %v3603_v0  ;;  %3223 = vmatprep.subr.bf16.mxu1 %v3603_v0 }
  0x40   : > { %1647 = vmatpush1.bf16.msra.mxu0 %v3346_v14  ;;  %3239 = vmatpush1.bf16.msra.mxu1 %v3346_v14  ;;  %v3429_v14 = vld [vmem:[%s3662_s24 + $0x2d4] ss:$20 sps:$4 sm:$0xff]  }
  0x41   : > { %1648 = vmatprep.subr.bf16.mxu0 %v3603_v0  ;;  %3224 = vmatprep.subr.bf16.mxu1 %v3603_v0 }
  0x44   : > { %1649 = vmatpush1.bf16.msra.mxu0 %v3347_v15  ;;  %3240 = vmatpush1.bf16.msra.mxu1 %v3347_v15  ;;  %v3433_v15 = vld [vmem:[%s3662_s24 + $0x2d0] ss:$20 sps:$4 sm:$0xff]  }
  0x45   : > { %1650 = vmatprep.subr.bf16.mxu0 %v3603_v0  ;;  %3225 = vmatprep.subr.bf16.mxu1 %v3603_v0 }
  0x48   : > { %1651 = vmatpush1.bf16.msra.mxu0 %v3348_v16  ;;  %3241 = vmatpush1.bf16.msra.mxu1 %v3348_v16  ;;  %v3434_v16 = vld [vmem:[%s3662_s24 + $0x58] ss:$20 sps:$4 sm:$0xff]  }
  0x49   : > { %1652 = vmatprep.subr.bf16.mxu0 %v3603_v0  ;;  %3226 = vmatprep.subr.bf16.mxu1 %v3603_v0 }
  0x4c   : > { %1653 = vmatpush1.bf16.msra.mxu0 %v3349_v17  ;;  %3242 = vmatpush1.bf16.msra.mxu1 %v3349_v17  ;;  %v3435_v17 = vld [vmem:[%s3662_s24 + $0x2fc] ss:$20 sps:$4 sm:$0xff]  }
  0x4d   : > { %1654 = vmatprep.subr.bf16.mxu0 %v3603_v0  ;;  %3227 = vmatprep.subr.bf16.mxu1 %v3603_v0 }
  0x50   : > { %1655 = vmatpush1.bf16.msra.mxu0 %v3350_v18  ;;  %3243 = vmatpush1.bf16.msra.mxu1 %v3350_v18  ;;  %v3437_v18 = vld [vmem:[%s3662_s24 + $0x84] ss:$20 sps:$4 sm:$0xff]  }
  0x51   : > { %1913 = vmatprep.subr.bf16.mxu0 %v3603_v0  ;;  %3140 = vmatprep.subr.bf16.mxu1 %v3358_v19 }
  0x53   : > { %1657 = vmatmul.mubr.bf16.vlgmr.msra.gmra.mrb[0].mxu0 %v3351_v20  ;;  %1721 = vmatmul.mubr.bf16.vlgmr.msra.gmra.mrb[0].mxu1 %v3354_v21  ;;  %v3440_v20 = vld [vmem:[%s3662_s24 + $0x80] ss:$20 sps:$4 sm:$0xff]   ;;  %v3441_v21 = vld [vmem:[%s3662_s24 + $0x324] ss:$20 sps:$4 sm:$0xff]  }
  0x54   : > { %1914 = vmatpush1.bf16.msra.mxu0 %v3357_v22  ;;  %3141 = vmatpush3.bf16.msra.mxu1 %v3358_v19  ;;  %v3439_v19 = vld [vmem:[%s3662_s24 + $0x2f8] ss:$20 sps:$4 sm:$0xff]  }
  0x55   : > { %1915 = vmatprep.subr.bf16.mxu0 %v3603_v0  ;;  %1664 = vmatprep.mubr.bf16.mxu0 %v3360_v23  ;;  %v3443_v22 = vld [vmem:[%s3662_s24 + $0xac] ss:$20 sps:$4 sm:$0xff]  }
  0x56   : > { %1728 = vmatprep.mubr.bf16.mxu1 %v3362_v24  ;;  %3142 = vmatprep.subr.bf16.mxu1 %v3407_v25  ;;  %v3445_v23 = vld [vmem:[%s3662_s24 + $0x320] ss:$20 sps:$4 sm:$0xff]   ;;  %v3446_v24 = vld [vmem:[%s3662_s24 + $0xa8] ss:$20 sps:$4 sm:$0xff]  }
  0x58   : > { %1916 = vmatpush1.bf16.msra.mxu0 %v3359_v26  ;;  %3143 = vmatpush3.bf16.msra.mxu1 %v3407_v25  ;;  %v3448_v25 = vld [vmem:[%s3662_s24 + $0x34c] ss:$20 sps:$4 sm:$0xff]   ;;  %v3450_v26 = vld [vmem:[%s3662_s24 + $0xd4] ss:$20 sps:$4 sm:$0xff]  }
  0x59   : > { %1917 = vmatprep.subr.bf16.mxu0 %v3603_v0  ;;  %3144 = vmatprep.subr.bf16.mxu1 %v3447_v30 }
  0x5b   : > { %1665 = vmatmul.mubr.bf16.gmra.mrb[4].mxu0 %v3364_v27  ;;  %1729 = vmatmul.mubr.bf16.gmra.mrb[4].mxu1 %v3365_v28  ;;  %v3452_v27 = vld [vmem:[%s3662_s24 + $0x348] ss:$20 sps:$4 sm:$0xff]   ;;  %v3453_v28 = vld [vmem:[%s3662_s24 + $0xd0] ss:$20 sps:$4 sm:$0xff]  }
  0x5c   : > { %1918 = vmatpush1.bf16.msra.mxu0 %v3366_v29  ;;  %1672 = vmatprep.mubr.bf16.mxu0 %v3368_v31  ;;  %v3454_v29 = vld [vmem:[%s3662_s24 + $0x374] ss:$20 sps:$4 sm:$0xff]   ;;  %v3458_v31 = vld [vmem:[%s3662_s24 + $0x370] ss:$20 sps:$4 sm:$0xff]  }
  0x5d   : > { %1919 = vmatprep.subr.bf16.mxu0 %v3603_v0  ;;  %1736 = vmatprep.mubr.bf16.mxu1 %v3370_v32  ;;  %v3459_v32 = vld [vmem:[%s3662_s24 + $0xf8] ss:$20 sps:$4 sm:$0xff]  }
  0x5e   : > { %3145 = vmatpush3.bf16.msra.mxu1 %v3447_v30  ;;  %v3456_v30 = vld [vmem:[%s3662_s24 + $0xfc] ss:$20 sps:$4 sm:$0xff]  }
  0x5f   : > { %3146 = vmatprep.subr.bf16.mxu1 %v3484_v44 }
  0x60   : > { %1920 = vmatpush1.bf16.msra.mxu0 %v3367_v33  ;;  %v3460_v33 = vld [vmem:[%s3662_s24 + $0x39c] ss:$20 sps:$4 sm:$0xff]  }
  0x61   : > { %1921 = vmatprep.subr.bf16.mxu0 %v3603_v0 }
  0x62   : > { %3147 = vmatpush3.bf16.msra.mxu1 %v3484_v44  ;;  %v3477_v44 = vld [vmem:[%s3662_s24 + $0x170] ss:$20 sps:$4 sm:$0xff]  }
  0x63   : > { %1673 = vmatmul.mubr.bf16.gmra.mrb[8].mxu0 %v3372_v34  ;;  %1737 = vmatmul.mubr.bf16.gmra.mrb[8].mxu1 %v3373_v35  ;;  %v3462_v34 = vld [vmem:[%s3662_s24 + $0x124] ss:$20 sps:$4 sm:$0xff]  }
  0x64   : > { %1922 = vmatpush1.bf16.msra.mxu0 %v3374_v36  ;;  %1680 = vmatprep.mubr.bf16.mxu0 %v3376_v37  ;;  %v3464_v35 = vld [vmem:[%s3662_s24 + $0x398] ss:$20 sps:$4 sm:$0xff]   ;;  %v3465_v36 = vld [vmem:[%s3662_s24 + $0x120] ss:$20 sps:$4 sm:$0xff]  }
  0x65   : > { %1923 = vmatprep.subr.bf16.mxu0 %v3603_v0  ;;  %1744 = vmatprep.mubr.bf16.mxu1 %v3378_v38  ;;  %v3466_v37 = vld [vmem:[%s3662_s24 + $0x3c4] ss:$20 sps:$4 sm:$0xff]   ;;  %v3468_v38 = vld [vmem:[%s3662_s24 + $0x14c] ss:$20 sps:$4 sm:$0xff]  }
  0x68   : > { %1924 = vmatpush1.bf16.msra.mxu0 %v3375_v39  ;;  %v3470_v39 = vld [vmem:[%s3662_s24 + $0x3c0] ss:$20 sps:$4 sm:$0xff]  }
  0x69   : > { %1925 = vmatprep.subr.bf16.mxu0 %v3603_v0 }
  0x6b   : > { %1681 = vmatmul.mubr.bf16.gmra.mrb[12].mxu0 %v3380_v40  ;;  %1745 = vmatmul.mubr.bf16.gmra.mrb[12].mxu1 %v3381_v41  ;;  %v3471_v40 = vld [vmem:[%s3662_s24 + $0x148] ss:$20 sps:$4 sm:$0xff]   ;;  %v3472_v41 = vld [vmem:[%s3662_s24 + $0x3ec] ss:$20 sps:$4 sm:$0xff]  }
  0x6c   : > { %1926 = vmatpush1.bf16.msra.mxu0 %v3382_v42  ;;  %1688 = vmatprep.mubr.bf16.mxu0 %v3384_v43  ;;  %v3474_v42 = vld [vmem:[%s3662_s24 + $0x174] ss:$20 sps:$4 sm:$0xff]  }
  0x6d   : > { %1927 = vmatprep.subr.bf16.mxu0 %v3603_v0  ;;  %1752 = vmatprep.mubr.bf16.mxu1 %v3386_v45  ;;  %v3476_v43 = vld [vmem:[%s3662_s24 + $0x3e8] ss:$20 sps:$4 sm:$0xff]  }
  0x6e   : > { %v3478_v45 = vld [vmem:[%s3662_s24 + $0x414] ss:$20 sps:$4 sm:$0xff]  }
  0x70   : > { %1928 = vmatpush1.bf16.msra.mxu0 %v3383_v46  ;;  %v3480_v46 = vld [vmem:[%s3662_s24 + $0x19c] ss:$20 sps:$4 sm:$0xff]  }
  0x71   : > { %1929 = vmatprep.subr.bf16.mxu0 %v3603_v0 }
  0x73   : > { %1689 = vmatmul.mubr.bf16.gmra.mrb[16].mxu0 %v3388_v47  ;;  %1753 = vmatmul.mubr.bf16.gmra.mrb[16].mxu1 %v3389_v48  ;;  %v3482_v47 = vld [vmem:[%s3662_s24 + $0x410] ss:$20 sps:$4 sm:$0xff]   ;;  %v3483_v48 = vld [vmem:[%s3662_s24 + $0x198] ss:$20 sps:$4 sm:$0xff]  }
  0x74   : > { %1930 = vmatpush1.bf16.msra.mxu0 %v3390_v49  ;;  %1696 = vmatprep.mubr.bf16.mxu0 %v3392_v50  ;;  %v3485_v49 = vld [vmem:[%s3662_s24 + $0x43c] ss:$20 sps:$4 sm:$0xff]   ;;  %v3487_v50 = vld [vmem:[%s3662_s24 + $0x1c4] ss:$20 sps:$4 sm:$0xff]  }
  0x75   : > { %1931 = vmatprep.subr.bf16.mxu0 %v3603_v0  ;;  %1760 = vmatprep.mubr.bf16.mxu1 %v3394_v51  ;;  %v3489_v51 = vld [vmem:[%s3662_s24 + $0x438] ss:$20 sps:$4 sm:$0xff]  }
  0x78   : > { %1932 = vmatpush1.bf16.msra.mxu0 %v3391_v52  ;;  %v3490_v52 = vld [vmem:[%s3662_s24 + $0x1c0] ss:$20 sps:$4 sm:$0xff]  }
  0x79   : > { %1933 = vmatprep.subr.bf16.mxu0 %v3603_v0 }
  0x7b   : > { %1697 = vmatmul.mubr.bf16.gmra.mrb[20].mxu0 %v3396_v53  ;;  %1761 = vmatmul.mubr.bf16.gmra.mrb[20].mxu1 %v3397_v54  ;;  %v3491_v53 = vld [vmem:[%s3662_s24 + $0x464] ss:$20 sps:$4 sm:$0xff]   ;;  %v3493_v54 = vld [vmem:[%s3662_s24 + $0x1ec] ss:$20 sps:$4 sm:$0xff]  }
  0x7c   : > { %1934 = vmatpush1.bf16.msra.mxu0 %v3398_v55  ;;  %1704 = vmatprep.mubr.bf16.mxu0 %v3400_v56  ;;  %v3495_v55 = vld [vmem:[%s3662_s24 + $0x460] ss:$20 sps:$4 sm:$0xff]   ;;  %v3496_v56 = vld [vmem:[%s3662_s24 + $0x1e8] ss:$20 sps:$4 sm:$0xff]  }
  0x7d   : > { %1935 = vmatprep.subr.bf16.mxu0 %v3603_v0  ;;  %1768 = vmatprep.mubr.bf16.mxu1 %v3402_v57  ;;  %v3497_v57 = vld [vmem:[%s3662_s24 + $0x48c] ss:$20 sps:$4 sm:$0xff]  }
  0x80   : > { %1936 = vmatpush1.bf16.msra.mxu0 %v3399_v58  ;;  %v3499_v58 = vld [vmem:[%s3662_s24 + $0x214] ss:$20 sps:$4 sm:$0xff]  }
  0x81   : > { %1937 = vmatprep.subr.bf16.mxu0 %v3603_v0 }
  0x83   : > { %1705 = vmatmul.mubr.bf16.gmra.mrb[24].mxu0 %v3404_v59  ;;  %1769 = vmatmul.mubr.bf16.gmra.mrb[24].mxu1 %v3405_v60  ;;  %v3501_v59 = vld [vmem:[%s3662_s24 + $0x488] ss:$20 sps:$4 sm:$0xff]   ;;  %v3502_v60 = vld [vmem:[%s3662_s24 + $0x210] ss:$20 sps:$4 sm:$0xff]  }
  0x84   : > { %1938 = vmatpush1.bf16.msra.mxu0 %v3406_v61  ;;  %1712 = vmatprep.mubr.bf16.mxu0 %v3409_v62  ;;  %v3503_v61 = vld [vmem:[%s3662_s24 + $0x4b4] ss:$20 sps:$4 sm:$0xff]   ;;  %v3505_v62 = vld [vmem:[%s3662_s24 + $0x23c] ss:$20 sps:$4 sm:$0xff]  }
  0x85   : > { %1939 = vmatprep.subr.bf16.mxu0 %v3603_v0  ;;  %1776 = vmatprep.mubr.bf16.mxu1 %v3411_v63  ;;  %v3507_v63 = vld [vmem:[%s3662_s24 + $0x4b0] ss:$20 sps:$4 sm:$0xff]  }
  0x88   : > { %1940 = vmatpush1.bf16.msra.mxu0 %v3408_v1  ;;  %v3508_v1 = vld [vmem:[%s3662_s24 + $0x238] ss:$20 sps:$4 sm:$0xff]  }
  0x89   : > { %1941 = vmatprep.subr.bf16.mxu0 %v3603_v0 }
  0x8b   : > { %1713 = vmatmul.mubr.bf16.gmra.mrb[28].mxu0 %v3413_v2  ;;  %1777 = vmatmul.mubr.bf16.gmra.mrb[28].mxu1 %v3414_v3  ;;  %v3509_v2 = vld [vmem:[%s3662_s24 + $0x4dc] ss:$20 sps:$4 sm:$0xff]   ;;  %v3511_v3 = vld [vmem:[%s3662_s24 + $0x264] ss:$20 sps:$4 sm:$0xff]  }
  0x8c   : > { %1942 = vmatpush1.bf16.msra.mxu0 %v3415_v4  ;;  %1784 = vmatprep.mubr.bf16.mxu1 %v3417_v5  ;;  %v3513_v4 = vld [vmem:[%s3662_s24 + $0x4d8] ss:$20 sps:$4 sm:$0xff]   ;;  %v3514_v5 = vld [vmem:[%s3662_s24 + $0x260] ss:$20 sps:$4 sm:$0xff]  }
  0x8d   : > { %1943 = vmatprep.subr.bf16.mxu0 %v3603_v0  ;;  %1945 = vmatprep.mubr.bf16.mxu0 %v3421_v6  ;;  %v3431_v0 = vld [vmem:[%s3662_s24 + $0x5c] ss:$20 sps:$4 sm:$0xff]   ;;  %v3515_v6 = vld [vmem:[%s3662_s24 + $0x28c] ss:$20 sps:$4 sm:$0xff]  }
  0x90   : > { %1944 = vmatpush1.bf16.msra.mxu0 %v3416_v7  ;;  %v3517_v7 = vld [vmem:[%s3662_s24 + $0x10] ss:$20 sps:$4 sm:$0xff]  }
  0x93   : > { %1785 = vmatmul.mubr.bf16.gmra.mrb[32].mxu1 %v3422_v9  ;;  %1946 = vmatmul.mubr.bf16.vlgmr.msra.gmra.mrb[0].mxu0 %v3419_v8  ;;  %v3518_v8 = vld [vmem:[%s3662_s24 + $0x288] ss:$20 sps:$4 sm:$0xff]   ;;  %v3519_v9 = vld [vmem:[%s3662_s24 + $0x38] ss:$20 sps:$4 sm:$0xff]  }
  0x94   : > { %1792 = vmatprep.mubr.bf16.mxu1 %v3423_v10  ;;  %1953 = vmatprep.mubr.bf16.mxu0 %v3425_v11  ;;  %v3520_v10 = vld [vmem:[%s3662_s24 + $0x2b4] ss:$20 sps:$4 sm:$0xff]  }
  0x95   : > { %v3522_v11 = vld [vmem:[%s3662_s24 + $0x60] ss:$20 sps:$4 sm:$0xff]  }
  0x9b   : > { %1793 = vmatmul.mubr.bf16.gmra.mrb[36].mxu1 %v3427_v12  ;;  %1954 = vmatmul.mubr.bf16.gmra.mrb[4].mxu0 %v3428_v13  ;;  %v3523_v12 = vld [vmem:[%s3662_s24 + $0x2b0] ss:$20 sps:$4 sm:$0xff]   ;;  %v3524_v13 = vld [vmem:[%s3662_s24 + $0x88] ss:$20 sps:$4 sm:$0xff]  }
  0x9c   : > { %1800 = vmatprep.mubr.bf16.mxu1 %v3429_v14  ;;  %1961 = vmatprep.mubr.bf16.mxu0 %v3431_v0  ;;  %v3525_v14 = vld [vmem:[%s3662_s24 + $0x2dc] ss:$20 sps:$4 sm:$0xff]  }
  0x9d   : > { %v3527_v0 = vld [vmem:[%s3662_s24 + $0xb0] ss:$20 sps:$4 sm:$0xff]  }
  0xa3   : > { %1801 = vmatmul.mubr.bf16.gmra.mrb[40].mxu1 %v3433_v15  ;;  %1962 = vmatmul.mubr.bf16.gmra.mrb[8].mxu0 %v3434_v16  ;;  %v3528_v15 = vld [vmem:[%s3662_s24 + $0x2d8] ss:$20 sps:$4 sm:$0xff]  }
  0xa4   : > { %1808 = vmatprep.mubr.bf16.mxu1 %v3435_v17  ;;  %1969 = vmatprep.mubr.bf16.mxu0 %v3437_v18  ;;  %v3529_v16 = vld [vmem:[%s3662_s24 + $0xd8] ss:$20 sps:$4 sm:$0xff]   ;;  %v3532_v18 = vld [vmem:[%s3662_s24 + $0x100] ss:$20 sps:$4 sm:$0xff]  }
  0xa5   : > { %v3530_v17 = vld [vmem:[%s3662_s24 + $0x304] ss:$20 sps:$4 sm:$0xff]  }
  0xab   : > { %1809 = vmatmul.mubr.bf16.gmra.mrb[44].mxu1 %v3439_v19  ;;  %1970 = vmatmul.mubr.bf16.gmra.mrb[12].mxu0 %v3440_v20 }
  0xac   : > { %1816 = vmatprep.mubr.bf16.mxu1 %v3441_v21  ;;  %1977 = vmatprep.mubr.bf16.mxu0 %v3443_v22  ;;  %v3533_v21 = vld [vmem:[%s3662_s24 + $0x300] ss:$20 sps:$4 sm:$0xff]   ;;  %v3534_v22 = vld [vmem:[%s3662_s24 + $0x128] ss:$20 sps:$4 sm:$0xff]  }
  0xb3   : > { %1817 = vmatmul.mubr.bf16.gmra.mrb[48].mxu1 %v3445_v23  ;;  %1978 = vmatmul.mubr.bf16.gmra.mrb[16].mxu0 %v3446_v24  ;;  %v3535_v24 = vld [vmem:[%s3662_s24 + $0x32c] ss:$20 sps:$4 sm:$0xff]  }
  0xb4   : > { %1824 = vmatprep.mubr.bf16.mxu1 %v3448_v25  ;;  %1985 = vmatprep.mubr.bf16.mxu0 %v3450_v26  ;;  %v3537_v25 = vld [vmem:[%s3662_s24 + $0x150] ss:$20 sps:$4 sm:$0xff]  }
  0xbb   : > { %1825 = vmatmul.mubr.bf16.gmra.mrb[52].mxu1 %v3452_v27  ;;  %1986 = vmatmul.mubr.bf16.gmra.mrb[20].mxu0 %v3453_v28 }
  0xbc   : > { %1832 = vmatprep.mubr.bf16.mxu1 %v3454_v29  ;;  %1993 = vmatprep.mubr.bf16.mxu0 %v3456_v30  ;;  %v3538_v29 = vld [vmem:[%s3662_s24 + $0x328] ss:$20 sps:$4 sm:$0xff]   ;;  %v3539_v30 = vld [vmem:[%s3662_s24 + $0x178] ss:$20 sps:$4 sm:$0xff]  }
  0xc3   : > { %1833 = vmatmul.mubr.bf16.gmra.mrb[56].mxu1 %v3458_v31  ;;  %1994 = vmatmul.mubr.bf16.gmra.mrb[24].mxu0 %v3459_v32  ;;  %v3540_v32 = vld [vmem:[%s3662_s24 + $0x354] ss:$20 sps:$4 sm:$0xff]  }
  0xc4   : > { %1840 = vmatprep.mubr.bf16.mxu1 %v3460_v33  ;;  %2001 = vmatprep.mubr.bf16.mxu0 %v3462_v34  ;;  %v3542_v33 = vld [vmem:[%s3662_s24 + $0x1a0] ss:$20 sps:$4 sm:$0xff]  }
  0xcb   : > { %1841 = vmatmul.mubr.bf16.gmra.mrb[60].mxu1 %v3464_v35  ;;  %2002 = vmatmul.mubr.bf16.gmra.mrb[28].mxu0 %v3465_v36 }
  0xcc   : > { %1848 = vmatprep.mubr.bf16.mxu1 %v3466_v37  ;;  %2009 = vmatprep.mubr.bf16.mxu0 %v3468_v38  ;;  %v3543_v37 = vld [vmem:[%s3662_s24 + $0x350] ss:$20 sps:$4 sm:$0xff]   ;;  %v3544_v38 = vld [vmem:[%s3662_s24 + $0x1c8] ss:$20 sps:$4 sm:$0xff]  }
  0xd3   : > { %1849 = vmatmul.mubr.bf16.gmra.mrb[64].mxu1 %v3470_v39  ;;  %2010 = vmatmul.mubr.bf16.gmra.mrb[32].mxu0 %v3471_v40  ;;  %v3545_v40 = vld [vmem:[%s3662_s24 + $0x37c] ss:$20 sps:$4 sm:$0xff]  }
  0xd4   : > { %1856 = vmatprep.mubr.bf16.mxu1 %v3472_v41  ;;  %2017 = vmatprep.mubr.bf16.mxu0 %v3474_v42  ;;  %v3547_v41 = vld [vmem:[%s3662_s24 + $0x1f0] ss:$20 sps:$4 sm:$0xff]  }
  0xdb   : > { %1857 = vmatmul.mubr.bf16.gmra.mrb[68].mxu1 %v3476_v43  ;;  %2018 = vmatmul.mubr.bf16.gmra.mrb[36].mxu0 %v3477_v44 }
  0xdc   : > { %1864 = vmatprep.mubr.bf16.mxu1 %v3478_v45  ;;  %2025 = vmatprep.mubr.bf16.mxu0 %v3480_v46  ;;  %v3548_v45 = vld [vmem:[%s3662_s24 + $0x378] ss:$20 sps:$4 sm:$0xff]  }
  0xdd   : > { %v3549_v46 = vld [vmem:[%s3662_s24 + $0x218] ss:$20 sps:$4 sm:$0xff]  }
  0xe3   : > { %1865 = vmatmul.mubr.bf16.gmra.mrb[72].mxu1 %v3482_v47  ;;  %2026 = vmatmul.mubr.bf16.gmra.mrb[40].mxu0 %v3483_v48  ;;  %v3550_v48 = vld [vmem:[%s3662_s24 + $0x3a4] ss:$20 sps:$4 sm:$0xff]  }
  0xe4   : > { %1872 = vmatprep.mubr.bf16.mxu1 %v3485_v49  ;;  %2033 = vmatprep.mubr.bf16.mxu0 %v3487_v50  ;;  %v3552_v49 = vld [vmem:[%s3662_s24 + $0x240] ss:$20 sps:$4 sm:$0xff]  }
  0xeb   : > { %1873 = vmatmul.mubr.bf16.gmra.mrb[76].mxu1 %v3489_v51  ;;  %2034 = vmatmul.mubr.bf16.gmra.mrb[44].mxu0 %v3490_v52 }
  0xec   : > { %1880 = vmatprep.mubr.bf16.mxu1 %v3491_v53  ;;  %2041 = vmatprep.mubr.bf16.mxu0 %v3493_v54  ;;  %v3553_v53 = vld [vmem:[%s3662_s24 + $0x3a0] ss:$20 sps:$4 sm:$0xff]   ;;  %v3554_v54 = vld [vmem:[%s3662_s24 + $0x268] ss:$20 sps:$4 sm:$0xff]  }
  0xf3   : > { %1881 = vmatmul.mubr.bf16.gmra.mrb[80].mxu1 %v3495_v55  ;;  %2042 = vmatmul.mubr.bf16.gmra.mrb[48].mxu0 %v3496_v56  ;;  %v3555_v56 = vld [vmem:[%s3662_s24 + $0x3cc] ss:$20 sps:$4 sm:$0xff]  }
  0xf4   : > { %1888 = vmatprep.mubr.bf16.mxu1 %v3497_v57  ;;  %2049 = vmatprep.mubr.bf16.mxu0 %v3499_v58  ;;  %v3557_v57 = vld [vmem:[%s3662_s24 + $0x290] ss:$20 sps:$4 sm:$0xff]  }
  0xfb   : > { %1889 = vmatmul.mubr.bf16.gmra.mrb[84].mxu1 %v3501_v59  ;;  %2050 = vmatmul.mubr.bf16.gmra.mrb[52].mxu0 %v3502_v60 }
  0xfc   : > { %1896 = vmatprep.mubr.bf16.mxu1 %v3503_v61  ;;  %2057 = vmatprep.mubr.bf16.mxu0 %v3505_v62  ;;  %v3558_v61 = vld [vmem:[%s3662_s24 + $0x3c8] ss:$20 sps:$4 sm:$0xff]   ;;  %v3559_v62 = vld [vmem:[%s3662_s24 + $0x2b8] ss:$20 sps:$4 sm:$0xff]  }
 0x103   : > { %1897 = vmatmul.mubr.bf16.gmra.mrb[88].mxu1 %v3507_v63  ;;  %2058 = vmatmul.mubr.bf16.gmra.mrb[56].mxu0 %v3508_v1  ;;  %v3560_v1 = vld [vmem:[%s3662_s24 + $0x3f4] ss:$20 sps:$4 sm:$0xff]  }
 0x104   : > { %1904 = vmatprep.mubr.bf16.mxu1 %v3509_v2  ;;  %2065 = vmatprep.mubr.bf16.mxu0 %v3511_v3  ;;  %v3562_v2 = vld [vmem:[%s3662_s24 + $0x2e0] ss:$20 sps:$4 sm:$0xff]  }
 0x10b   : > { %1905 = vmatmul.mubr.bf16.gmra.mrb[92].mxu1 %v3513_v4  ;;  %2066 = vmatmul.mubr.bf16.gmra.mrb[60].mxu0 %v3514_v5 }
 0x10c   : > { %2073 = vmatprep.mubr.bf16.mxu0 %v3515_v6  ;;  %3148 = vmatprep.mubr.msk.bf16.mxu1 %vm1527_vm0, %v3517_v7  ;;  %v3563_v6 = vld [vmem:[%s3662_s24 + $0x3f0] ss:$20 sps:$4 sm:$0xff]   ;;  %v3564_v7 = vld [vmem:[%s3662_s24 + $0x308] ss:$20 sps:$4 sm:$0xff]  }
 0x113   : > { %2074 = vmatmul.mubr.bf16.gmra.mrb[64].mxu0 %v3518_v8  ;;  %3149 = vmatmul.mubr.msk.bf16.vlgmr.msra.gmra.mrb[96].mxu1 %vm1527_vm0, %v3519_v9  ;;  %v3565_v9 = vld [vmem:[%s3662_s24 + $0x41c] ss:$20 sps:$4 sm:$0xff]  }
 0x114   : > { %2081 = vmatprep.mubr.bf16.mxu0 %v3520_v10  ;;  %3152 = vmatprep.mubr.msk.bf16.mxu1 %vm1527_vm0, %v3522_v11  ;;  %v3567_v10 = vld [vmem:[%s3662_s24 + $0x330] ss:$20 sps:$4 sm:$0xff]  }
 0x11b   : > { %2082 = vmatmul.mubr.bf16.gmra.mrb[68].mxu0 %v3523_v12  ;;  %3153 = vmatmul.mubr.msk.bf16.gmra.mrb[100].mxu1 %vm1527_vm0, %v3524_v13 }
 0x11c   : > { %2089 = vmatprep.mubr.bf16.mxu0 %v3525_v14  ;;  %3156 = vmatprep.mubr.msk.bf16.mxu1 %vm1527_vm0, %v3527_v0  ;;  %v3568_v14 = vld [vmem:[%s3662_s24 + $0x418] ss:$20 sps:$4 sm:$0xff]  }
 0x11d   : > { %v3569_v0 = vld [vmem:[%s3662_s24 + $0x358] ss:$20 sps:$4 sm:$0xff]  }
 0x123   : > { %2090 = vmatmul.mubr.bf16.gmra.mrb[72].mxu0 %v3528_v15  ;;  %3157 = vmatmul.mubr.msk.bf16.gmra.mrb[104].mxu1 %vm1527_vm0, %v3529_v16  ;;  %v3570_v16 = vld [vmem:[%s3662_s24 + $0x444] ss:$20 sps:$4 sm:$0xff]  }
 0x124   : > { %2097 = vmatprep.mubr.bf16.mxu0 %v3530_v17  ;;  %3160 = vmatprep.mubr.msk.bf16.mxu1 %vm1527_vm0, %v3532_v18  ;;  %v3572_v17 = vld [vmem:[%s3662_s24 + $0x380] ss:$20 sps:$4 sm:$0xff]  }
 0x126   : > { %v3852_v19 = vpop.f32.mrb[0].mxu1 }
 0x127   : > { %v1724_v20 = vpop.f32.mrb[1].mxu1 }
 0x128   : > { %v3856_v23 = vpop.f32.mrb[2].mxu1 }
 0x129   : > { %v1727_v26 = vpop.f32.mrb[3].mxu1 }
 0x12a   : > { %v3574_v26 = vld [vmem:[%s3662_s24 + $0x3a8] ss:$20 sps:$4 sm:$0xff]  }
 0x12b   : > { %2098 = vmatmul.mubr.bf16.gmra.mrb[76].mxu0 %v3533_v21  ;;  %3161 = vmatmul.mubr.msk.bf16.gmra.mrb[108].mxu1 %vm1527_vm0, %v3534_v22 }
 0x12c   : > { %2105 = vmatprep.mubr.bf16.mxu0 %v3535_v24  ;;  %3164 = vmatprep.mubr.msk.bf16.mxu1 %vm1527_vm0, %v3537_v25  ;;  %v3573_v25 = vld [vmem:[%s3662_s24 + $0x440] ss:$20 sps:$4 sm:$0xff]  }
 0x12e   : > { %v3862_v27 = vpop.f32.mrb[4].mxu1 }
 0x12f   : > { %v1732_v28 = vpop.f32.mrb[5].mxu1 }
 0x130   : > { %v3866_v31 = vpop.f32.mrb[6].mxu1 }
 0x131   : > { %v1735_v34 = vpop.f32.mrb[7].mxu1 }
 0x133   : > { %2106 = vmatmul.mubr.bf16.gmra.mrb[80].mxu0 %v3538_v29  ;;  %3165 = vmatmul.mubr.msk.bf16.gmra.mrb[112].mxu1 %vm1527_vm0, %v3539_v30  ;;  %v3575_v30 = vld [vmem:[%s3662_s24 + $0x46c] ss:$20 sps:$4 sm:$0xff]  }
 0x134   : > { %2113 = vmatprep.mubr.bf16.mxu0 %v3540_v32  ;;  %3168 = vmatprep.mubr.msk.bf16.mxu1 %vm1527_vm0, %v3542_v33  ;;  %v3577_v32 = vld [vmem:[%s3662_s24 + $0x3d0] ss:$20 sps:$4 sm:$0xff]  }
 0x136   : > { %v3872_v35 = vpop.f32.mrb[8].mxu1 }
 0x137   : > { %v1740_v36 = vpop.f32.mrb[9].mxu1 }
 0x138   : > { %v3876_v39 = vpop.f32.mrb[10].mxu1 }
 0x139   : > { %v1743_v42 = vpop.f32.mrb[11].mxu1 }
 0x13a   : > { %v3579_v42 = vld [vmem:[%s3662_s24 + $0x3f8] ss:$20 sps:$4 sm:$0xff]  }
 0x13b   : > { %2114 = vmatmul.mubr.bf16.gmra.mrb[84].mxu0 %v3543_v37  ;;  %3169 = vmatmul.mubr.msk.bf16.gmra.mrb[116].mxu1 %vm1527_vm0, %v3544_v38 }
 0x13c   : > { %2121 = vmatprep.mubr.bf16.mxu0 %v3545_v40  ;;  %3172 = vmatprep.mubr.msk.bf16.mxu1 %vm1527_vm0, %v3547_v41  ;;  %v3578_v41 = vld [vmem:[%s3662_s24 + $0x468] ss:$20 sps:$4 sm:$0xff]  }
 0x13e   : > { %v3882_v43 = vpop.f32.mrb[12].mxu1 }
 0x13f   : > { %v1748_v44 = vpop.f32.mrb[13].mxu1 }
 0x140   : > { %v3886_v47 = vpop.f32.mrb[14].mxu1 }
 0x141   : > { %v1751_v50 = vpop.f32.mrb[15].mxu1 }
 0x143   : > { %2122 = vmatmul.mubr.bf16.gmra.mrb[88].mxu0 %v3548_v45  ;;  %3173 = vmatmul.mubr.msk.bf16.gmra.mrb[120].mxu1 %vm1527_vm0, %v3549_v46  ;;  %v3580_v46 = vld [vmem:[%s3662_s24 + $0x494] ss:$20 sps:$4 sm:$0xff]  }
 0x144   : > { %2129 = vmatprep.mubr.bf16.mxu0 %v3550_v48  ;;  %3176 = vmatprep.mubr.msk.bf16.mxu1 %vm1527_vm0, %v3552_v49  ;;  %v3582_v48 = vld [vmem:[%s3662_s24 + $0x420] ss:$20 sps:$4 sm:$0xff]  }
 0x146   : > { %v3892_v51 = vpop.f32.mrb[16].mxu1 }
 0x147   : > { %v1756_v52 = vpop.f32.mrb[17].mxu1 }
 0x148   : > { %v3896_v55 = vpop.f32.mrb[18].mxu1 }
 0x149   : > { %v1759_v58 = vpop.f32.mrb[19].mxu1 }
 0x14a   : > { %v3584_v58 = vld [vmem:[%s3662_s24 + $0x448] ss:$20 sps:$4 sm:$0xff]  }
 0x14b   : > { %2130 = vmatmul.mubr.bf16.gmra.mrb[92].mxu0 %v3553_v53  ;;  %3177 = vmatmul.mubr.msk.bf16.gmra.mrb[124].mxu1 %vm1527_vm0, %v3554_v54 }
 0x14c   : > { %2137 = vmatprep.mubr.bf16.mxu0 %v3555_v56  ;;  %3180 = vmatprep.mubr.msk.bf16.mxu1 %vm1527_vm0, %v3557_v57  ;;  %v3583_v57 = vld [vmem:[%s3662_s24 + $0x490] ss:$20 sps:$4 sm:$0xff]  }
 0x14e   : > { %v3902_v59 = vpop.f32.mrb[20].mxu1 }
 0x14f   : > { %v1764_v60 = vpop.f32.mrb[21].mxu1 }
 0x150   : > { %v3906_v63 = vpop.f32.mrb[22].mxu1 }
 0x151   : > { %v1767_v3 = vpop.f32.mrb[23].mxu1 }
 0x153   : > { %2138 = vmatmul.mubr.bf16.gmra.mrb[96].mxu0 %v3558_v61  ;;  %3181 = vmatmul.mubr.msk.bf16.gmra.mrb[128].mxu1 %vm1527_vm0, %v3559_v62  ;;  %v3585_v62 = vld [vmem:[%s3662_s24 + $0x4bc] ss:$20 sps:$4 sm:$0xff]  }
 0x154   : > { %2145 = vmatprep.mubr.bf16.mxu0 %v3560_v1  ;;  %3184 = vmatprep.mubr.msk.bf16.mxu1 %vm1527_vm0, %v3562_v2  ;;  %v3587_v1 = vld [vmem:[%s3662_s24 + $0x470] ss:$20 sps:$4 sm:$0xff]  }
 0x156   : > { %v3912_v4 = vpop.f32.mrb[24].mxu1 }
 0x157   : > { %v1772_v5 = vpop.f32.mrb[25].mxu1 }
 0x158   : > { %v3916_v8 = vpop.f32.mrb[26].mxu1 }
 0x159   : > { %v1775_v11 = vpop.f32.mrb[27].mxu1 }
 0x15a   : > { %v3589_v11 = vld [vmem:[%s3662_s24 + $0x498] ss:$20 sps:$4 sm:$0xff]  }
 0x15b   : > { %2146 = vmatmul.mubr.bf16.gmra.mrb[100].mxu0 %v3563_v6  ;;  %3185 = vmatmul.mubr.msk.bf16.gmra.mrb[132].mxu1 %vm1527_vm0, %v3564_v7 }
 0x15c   : > { %2153 = vmatprep.mubr.bf16.mxu0 %v3565_v9  ;;  %3188 = vmatprep.mubr.msk.bf16.mxu1 %vm1527_vm0, %v3567_v10  ;;  %v3588_v10 = vld [vmem:[%s3662_s24 + $0x4b8] ss:$20 sps:$4 sm:$0xff]  }
 0x15e   : > { %v3922_v12 = vpop.f32.mrb[28].mxu1 }
 0x15f   : > { %v1780_v13 = vpop.f32.mrb[29].mxu1 }
 0x160   : > { %v3926_v15 = vpop.f32.mrb[30].mxu1 }
 0x161   : > { %v1783_v18 = vpop.f32.mrb[31].mxu1 }
 0x163   : > { %2154 = vmatmul.mubr.bf16.gmra.mrb[104].mxu0 %v3568_v14  ;;  %3189 = vmatmul.mubr.msk.bf16.gmra.mrb[136].mxu1 %vm1527_vm0, %v3569_v0  ;;  %v3590_v0 = vld [vmem:[%s3662_s24 + $0x4e4] ss:$20 sps:$4 sm:$0xff]  }
 0x164   : > { %2161 = vmatprep.mubr.bf16.mxu0 %v3570_v16  ;;  %3192 = vmatprep.mubr.msk.bf16.mxu1 %vm1527_vm0, %v3572_v17  ;;  %v3592_v16 = vld [vmem:[%s3662_s24 + $0x4c0] ss:$20 sps:$4 sm:$0xff]  }
 0x166   : > { %v3932_v20 = vpop.f32.mrb[32].mxu1  ;;  %v3934_v21 = vpop.f32.mrb[0].mxu0 }
 0x167   : > { %v1788_v22 = vpop.f32.mrb[33].mxu1  ;;  %v1949_v24 = vpop.f32.mrb[1].mxu0 }
 0x168   : > { %v3938_v28 = vpop.f32.mrb[34].mxu1  ;;  %v3940_v29 = vpop.f32.mrb[2].mxu0 }
 0x169   : > { %v1791_v33 = vpop.f32.mrb[35].mxu1  ;;  %v1952_v34 = vpop.f32.mrb[3].mxu0 }
 0x16b   : > { %2162 = vmatmul.mubr.bf16.gmra.mrb[108].mxu0 %v3573_v25  ;;  %3193 = vmatmul.mubr.msk.bf16.gmra.mrb[140].mxu1 %vm1527_vm0, %v3574_v26 }
 0x16c   : > { %2169 = vmatprep.mubr.bf16.mxu0 %v3575_v30  ;;  %3196 = vmatprep.mubr.msk.bf16.mxu1 %vm1527_vm0, %v3577_v32  ;;  %v3593_v30 = vld [vmem:[%s3662_s24 + $0x4e0] ss:$20 sps:$4 sm:$0xff]   ;;  %v3594_v32 = vld [vmem:[%s3662_s24 + $0x4e8] ss:$20 sps:$4 sm:$0xff]  }
 0x16e   : > { %v3946_v36 = vpop.f32.mrb[36].mxu1  ;;  %v3948_v37 = vpop.f32.mrb[4].mxu0 }
 0x16f   : > { %v1796_v38 = vpop.f32.mrb[37].mxu1  ;;  %v1957_v40 = vpop.f32.mrb[5].mxu0 }
 0x170   : > { %v3952_v44 = vpop.f32.mrb[38].mxu1  ;;  %v3954_v45 = vpop.f32.mrb[6].mxu0 }
 0x171   : > { %v1799_v49 = vpop.f32.mrb[39].mxu1  ;;  %v1960_v50 = vpop.f32.mrb[7].mxu0 }
 0x173   : > { %2170 = vmatmul.mubr.bf16.gmra.mrb[112].mxu0 %v3578_v41  ;;  %3197 = vmatmul.mubr.msk.bf16.gmra.mrb[144].mxu1 %vm1527_vm0, %v3579_v42 }
 0x174   : > { %2177 = vmatprep.mubr.bf16.mxu0 %v3580_v46  ;;  %3200 = vmatprep.mubr.msk.bf16.mxu1 %vm1527_vm0, %v3582_v48 }
 0x176   : > { %v3960_v52 = vpop.f32.mrb[40].mxu1  ;;  %v3962_v53 = vpop.f32.mrb[8].mxu0 }
 0x177   : > { %v1804_v54 = vpop.f32.mrb[41].mxu1  ;;  %v1965_v56 = vpop.f32.mrb[9].mxu0 }
 0x178   : > { %v3966_v60 = vpop.f32.mrb[42].mxu1  ;;  %v3968_v61 = vpop.f32.mrb[10].mxu0 }
 0x179   : > { %v1807_v2 = vpop.f32.mrb[43].mxu1  ;;  %v1968_v3 = vpop.f32.mrb[11].mxu0 }
 0x17b   : > { %2178 = vmatmul.mubr.bf16.gmra.mrb[116].mxu0 %v3583_v57  ;;  %3201 = vmatmul.mubr.msk.bf16.gmra.mrb[148].mxu1 %vm1527_vm0, %v3584_v58 }
 0x17c   : > { %2185 = vmatprep.mubr.bf16.mxu0 %v3585_v62  ;;  %3204 = vmatprep.mubr.msk.bf16.mxu1 %vm1527_vm0, %v3587_v1 }
 0x17e   : > { %v3974_v5 = vpop.f32.mrb[44].mxu1  ;;  %v3976_v6 = vpop.f32.mrb[12].mxu0 }
 0x17f   : > { %v1812_v7 = vpop.f32.mrb[45].mxu1  ;;  %v1973_v9 = vpop.f32.mrb[13].mxu0 }
 0x180   : > { %v3980_v13 = vpop.f32.mrb[46].mxu1  ;;  %v3982_v14 = vpop.f32.mrb[14].mxu0 }
 0x181   : > { %v1815_v17 = vpop.f32.mrb[47].mxu1  ;;  %v1976_v18 = vpop.f32.mrb[15].mxu0 }
 0x183   : > { %2186 = vmatmul.mubr.bf16.gmra.mrb[120].mxu0 %v3588_v10  ;;  %3205 = vmatmul.mubr.msk.bf16.gmra.mrb[152].mxu1 %vm1527_vm0, %v3589_v11 }
 0x184   : > { %2193 = vmatprep.mubr.bf16.mxu0 %v3590_v0  ;;  %3208 = vmatprep.mubr.msk.bf16.mxu1 %vm1527_vm0, %v3592_v16 }
 0x186   : > { %v3988_v22 = vpop.f32.mrb[48].mxu1  ;;  %v3990_v24 = vpop.f32.mrb[16].mxu0 }
 0x187   : > { %v1820_v25 = vpop.f32.mrb[49].mxu1  ;;  %v1981_v26 = vpop.f32.mrb[17].mxu0 }
 0x188   : > { %v3994_v33 = vpop.f32.mrb[50].mxu1  ;;  %v3996_v34 = vpop.f32.mrb[18].mxu0 }
 0x189   : > { %v1823_v38 = vpop.f32.mrb[51].mxu1  ;;  %v1984_v40 = vpop.f32.mrb[19].mxu0 }
 0x18b   : > { %2194 = vmatmul.mubr.bf16.gmra.mrb[124].mxu0 %v3593_v30  ;;  %3209 = vmatmul.mubr.msk.bf16.gmra.mrb[156].mxu1 %vm1527_vm0, %v3594_v32 }
 0x18e   : > { %v3999_v41 = vpop.f32.mrb[52].mxu1  ;;  %v4001_v42 = vpop.f32.mrb[20].mxu0 }
 0x18f   : > { %v1828_v46 = vpop.f32.mrb[53].mxu1  ;;  %v1989_v48 = vpop.f32.mrb[21].mxu0 }
 0x190   : > { %v4003_v49 = vpop.f32.mrb[54].mxu1  ;;  %v4005_v50 = vpop.f32.mrb[22].mxu0 }
 0x191   : > { %v1831_v54 = vpop.f32.mrb[55].mxu1  ;;  %v1992_v56 = vpop.f32.mrb[23].mxu0 }
 0x196   : > { %v4007_v57 = vpop.f32.mrb[56].mxu1  ;;  %v4009_v58 = vpop.f32.mrb[24].mxu0 }
 0x197   : > { %v1836_v62 = vpop.f32.mrb[57].mxu1  ;;  %v1997_v1 = vpop.f32.mrb[25].mxu0 }
 0x198   : > { %v4011_v2 = vpop.f32.mrb[58].mxu1  ;;  %v4013_v3 = vpop.f32.mrb[26].mxu0 }
 0x199   : > { %v1839_v7 = vpop.f32.mrb[59].mxu1  ;;  %v2000_v9 = vpop.f32.mrb[27].mxu0 }
 0x19e   : > { %v4015_v10 = vpop.f32.mrb[60].mxu1  ;;  %v4017_v11 = vpop.f32.mrb[28].mxu0 }
 0x19f   : > { %v1844_v0 = vpop.f32.mrb[61].mxu1  ;;  %v2005_v16 = vpop.f32.mrb[29].mxu0 }
 0x1a0   : > { %v4019_v17 = vpop.f32.mrb[62].mxu1  ;;  %v4021_v18 = vpop.f32.mrb[30].mxu0 }
 0x1a1   : > { %v1847_v25 = vpop.f32.mrb[63].mxu1  ;;  %v2008_v26 = vpop.f32.mrb[31].mxu0 }
 0x1a6   : > { %v4023_v30 = vpop.f32.mrb[64].mxu1  ;;  %v2011_v32 = vpop.f32.mrb[32].mxu0 }
 0x1a7   : > { %v4026_v38 = vadd.f32 %v2011_v32, %v3852_v19  ;;  %v1852_v40 = vpop.f32.mrb[65].mxu1  ;;  %v2013_v46 = vpop.f32.mrb[33].mxu0 }
 0x1a8   : > { %v4028_v48 = vpop.f32.mrb[66].mxu1  ;;  %v2014_v54 = vpop.f32.mrb[34].mxu0 }
 0x1a9   : > { %4541 = vst [vmem:[#allocation2_spill] sm:$0xff] %v4028_v48  ;;  %v4031_v56 = vadd.f32 %v2014_v54, %v3856_v23  ;;  %v1855_v62 = vpop.f32.mrb[67].mxu1  ;;  %v2016_v1 = vpop.f32.mrb[35].mxu0 }
 0x1ae   : > { %v4033_v7 = vpop.f32.mrb[68].mxu1  ;;  %v2019_v9 = vpop.f32.mrb[36].mxu0 }
 0x1af   : > { %4542 = vst [vmem:[#allocation3_spill] sm:$0xff] %v4033_v7  ;;  %v4036_v0 = vadd.f32 %v2019_v9, %v3862_v27  ;;  %v1860_v16 = vpop.f32.mrb[69].mxu1  ;;  %v2021_v25 = vpop.f32.mrb[37].mxu0 }
 0x1b0   : > { %v4038_v19 = vpop.f32.mrb[70].mxu1  ;;  %v2022_v26 = vpop.f32.mrb[38].mxu0 }
 0x1b1   : > { %4543 = vst [vmem:[#allocation4_spill] sm:$0xff] %v4038_v19  ;;  %v4041_v32 = vadd.f32 %v2022_v26, %v3866_v31  ;;  %v1863_v40 = vpop.f32.mrb[71].mxu1  ;;  %v2024_v46 = vpop.f32.mrb[39].mxu0 }
 0x1b6   : > { %v4043_v23 = vpop.f32.mrb[72].mxu1  ;;  %v2027_v54 = vpop.f32.mrb[40].mxu0 }
 0x1b7   : > { %4544 = vst [vmem:[#allocation5_spill] sm:$0xff] %v4043_v23  ;;  %v4046_v62 = vadd.f32 %v2027_v54, %v3872_v35  ;;  %v1868_v1 = vpop.f32.mrb[73].mxu1  ;;  %v2029_v7 = vpop.f32.mrb[41].mxu0 }
 0x1b8   : > { %v4048_v27 = vpop.f32.mrb[74].mxu1  ;;  %v2030_v9 = vpop.f32.mrb[42].mxu0 }
 0x1b9   : > { %4545 = vst [vmem:[#allocation6_spill] sm:$0xff] %v4048_v27  ;;  %v4051_v16 = vadd.f32 %v2030_v9, %v3876_v39  ;;  %v1871_v25 = vpop.f32.mrb[75].mxu1  ;;  %v2032_v19 = vpop.f32.mrb[43].mxu0 }
 0x1be   : > { %v4053_v31 = vpop.f32.mrb[76].mxu1  ;;  %v2035_v26 = vpop.f32.mrb[44].mxu0 }
 0x1bf   : > { %4546 = vst [vmem:[#allocation7_spill] sm:$0xff] %v4053_v31  ;;  %v4056_v40 = vadd.f32 %v2035_v26, %v3882_v43  ;;  %v1876_v46 = vpop.f32.mrb[77].mxu1  ;;  %v2037_v23 = vpop.f32.mrb[45].mxu0 }
 0x1c0   : > { %v4058_v35 = vpop.f32.mrb[78].mxu1  ;;  %v2038_v54 = vpop.f32.mrb[46].mxu0 }
 0x1c1   : > { %4547 = vst [vmem:[#allocation8_spill] sm:$0xff] %v4058_v35  ;;  %v4061_v7 = vadd.f32 %v2038_v54, %v3886_v47  ;;  %v1879_v1 = vpop.f32.mrb[79].mxu1  ;;  %v2040_v27 = vpop.f32.mrb[47].mxu0 }
 0x1c6   : > { %v4063_v39 = vpop.f32.mrb[80].mxu1  ;;  %v2043_v9 = vpop.f32.mrb[48].mxu0 }
 0x1c7   : > { %4548 = vst [vmem:[#allocation9_spill] sm:$0xff] %v4063_v39  ;;  %v4066_v19 = vadd.f32 %v2043_v9, %v3892_v51  ;;  %v1884_v25 = vpop.f32.mrb[81].mxu1  ;;  %v2045_v31 = vpop.f32.mrb[49].mxu0 }
 0x1c8   : > { %v4068_v43 = vpop.f32.mrb[82].mxu1  ;;  %v2046_v26 = vpop.f32.mrb[50].mxu0 }
 0x1c9   : > { %4549 = vst [vmem:[#allocation10_spill] sm:$0xff] %v4068_v43  ;;  %v4071_v23 = vadd.f32 %v2046_v26, %v3896_v55  ;;  %v1887_v46 = vpop.f32.mrb[83].mxu1  ;;  %v2048_v35 = vpop.f32.mrb[51].mxu0 }
 0x1ce   : > { %v4073_v47 = vpop.f32.mrb[84].mxu1  ;;  %v2051_v54 = vpop.f32.mrb[52].mxu0 }
 0x1cf   : > { %4550 = vst [vmem:[#allocation11_spill] sm:$0xff] %v4073_v47  ;;  %v4076_v27 = vadd.f32 %v2051_v54, %v3902_v59  ;;  %v1892_v1 = vpop.f32.mrb[85].mxu1  ;;  %v2053_v39 = vpop.f32.mrb[53].mxu0 }
 0x1d0   : > { %v4078_v51 = vpop.f32.mrb[86].mxu1  ;;  %v2054_v9 = vpop.f32.mrb[54].mxu0 }
 0x1d1   : > { %4551 = vst [vmem:[#allocation12_spill] sm:$0xff] %v4078_v51  ;;  %v4081_v31 = vadd.f32 %v2054_v9, %v3906_v63  ;;  %v1895_v25 = vpop.f32.mrb[87].mxu1  ;;  %v2056_v43 = vpop.f32.mrb[55].mxu0 }
 0x1d6   : > { %v4083_v55 = vpop.f32.mrb[88].mxu1  ;;  %v2059_v26 = vpop.f32.mrb[56].mxu0 }
 0x1d7   : > { %4552 = vst [vmem:[#allocation13_spill] sm:$0xff] %v4083_v55  ;;  %v4086_v35 = vadd.f32 %v2059_v26, %v3912_v4  ;;  %v1900_v46 = vpop.f32.mrb[89].mxu1  ;;  %v2061_v47 = vpop.f32.mrb[57].mxu0 }
 0x1d8   : > { %v4088_v59 = vpop.f32.mrb[90].mxu1  ;;  %v2062_v54 = vpop.f32.mrb[58].mxu0 }
 0x1d9   : > { %4553 = vst [vmem:[#allocation14_spill] sm:$0xff] %v4088_v59  ;;  %v4091_v39 = vadd.f32 %v2062_v54, %v3916_v8  ;;  %v1903_v1 = vpop.f32.mrb[91].mxu1  ;;  %v2064_v51 = vpop.f32.mrb[59].mxu0 }
 0x1de   : > { %v4093_v63 = vpop.f32.mrb[92].mxu1  ;;  %v2067_v9 = vpop.f32.mrb[60].mxu0 }
 0x1df   : > { %4554 = vst [vmem:[#allocation15_spill] sm:$0xff] %v4093_v63  ;;  %v4096_v43 = vadd.f32 %v2067_v9, %v3922_v12  ;;  %v1908_v25 = vpop.f32.mrb[93].mxu1  ;;  %v2069_v55 = vpop.f32.mrb[61].mxu0 }
 0x1e0   : > { %v4098_v4 = vpop.f32.mrb[94].mxu1  ;;  %v2070_v26 = vpop.f32.mrb[62].mxu0 }
 0x1e1   : > { %4555 = vst [vmem:[#allocation16_spill] sm:$0xff] %v4098_v4  ;;  %v4101_v47 = vadd.f32 %v2070_v26, %v3926_v15  ;;  %v1911_v46 = vpop.f32.mrb[95].mxu1  ;;  %v2072_v59 = vpop.f32.mrb[63].mxu0 }
 0x1e6   : > { %v2075_v8 = vpop.f32.mrb[64].mxu0  ;;  %v3150_v54 = vpop.f32.mrb[96].mxu1 }
 0x1e7   : > { %v4104_v51 = vadd.f32 %v2075_v8, %v3932_v20  ;;  %v2245_v1 = vadd.f32 %v3150_v54, %v3948_v37  ;;  %v2077_v63 = vpop.f32.mrb[65].mxu0  ;;  %v2236_v12 = vpop.f32.mrb[97].mxu1 }
 0x1e8   : > { %v2237_v9 = vadd.f32 %v2236_v12, %v3934_v21  ;;  %v2078_v55 = vpop.f32.mrb[66].mxu0  ;;  %v3151_v25 = vpop.f32.mrb[98].mxu1 }
 0x1e9   : > { %v4109_v4 = vadd.f32 %v2078_v55, %v3938_v28  ;;  %v2248_v15 = vadd.f32 %v3151_v25, %v3954_v45  ;;  %v2080_v26 = vpop.f32.mrb[67].mxu0  ;;  %v2239_v59 = vpop.f32.mrb[99].mxu1 }
 0x1ea   : > { %v2240_v46 = vadd.f32 %v2239_v59, %v3940_v29 }
 0x1ee   : > { %v2083_v48 = vpop.f32.mrb[68].mxu0  ;;  %v3154_v20 = vpop.f32.mrb[100].mxu1 }
 0x1ef   : > { %v4114_v8 = vadd.f32 %v2083_v48, %v3946_v36  ;;  %v2261_v37 = vadd.f32 %v3154_v20, %v3976_v6  ;;  %v2085_v63 = vpop.f32.mrb[69].mxu0  ;;  %v2252_v21 = vpop.f32.mrb[101].mxu1 }
 0x1f0   : > { %v2253_v54 = vadd.f32 %v2252_v21, %v3962_v53  ;;  %v2086_v12 = vpop.f32.mrb[70].mxu0  ;;  %v3155_v28 = vpop.f32.mrb[102].mxu1 }
 0x1f1   : > { %v4119_v55 = vadd.f32 %v2086_v12, %v3952_v44  ;;  %v2264_v45 = vadd.f32 %v3155_v28, %v3982_v14  ;;  %v2088_v25 = vpop.f32.mrb[71].mxu0  ;;  %v2255_v29 = vpop.f32.mrb[103].mxu1 }
 0x1f2   : > { %v2256_v26 = vadd.f32 %v2255_v29, %v3968_v61  ;;  %v4145_v25 = vld [vmem:[%s237_s27] ss:$0 sm:$0xff] }
 0x1f6   : > { %v2091_v36 = vpop.f32.mrb[72].mxu0  ;;  %v3158_v48 = vpop.f32.mrb[104].mxu1 }
 0x1f7   : > { %v4124_v6 = vadd.f32 %v2091_v36, %v3960_v52  ;;  %v4127_v59 = vadd.f32 %v3158_v48, %v4001_v42  ;;  %v2093_v53 = vpop.f32.mrb[73].mxu0  ;;  %v2268_v20 = vpop.f32.mrb[105].mxu1 }
 0x1f8   : > { %v4130_v44 = vadd.f32 %v2268_v20, %v3990_v24  ;;  %v2094_v14 = vpop.f32.mrb[74].mxu0  ;;  %v3159_v63 = vpop.f32.mrb[106].mxu1 }
 0x1f9   : > { %v4133_v21 = vadd.f32 %v2094_v14, %v3966_v60  ;;  %v4136_v61 = vadd.f32 %v3159_v63, %v4005_v50  ;;  %v2096_v12 = vpop.f32.mrb[75].mxu0  ;;  %v2271_v52 = vpop.f32.mrb[107].mxu1  ;;  %v2500_v63 = vmul.f32 %v4145_v25, %v2245_v1 }
 0x1fa   : > { %v4139_v28 = vadd.f32 %v2271_v52, %v3996_v34  ;;  %v2498_v12 = vmul.f32 %v4145_v25, %v2237_v9 }
 0x1fb   : > { %4556 = vst [vmem:[#allocation17_spill] sm:$0xff] %v4133_v21 }
 0x1fe   : > { %v2099_v24 = vpop.f32.mrb[76].mxu0  ;;  %v3162_v42 = vpop.f32.mrb[108].mxu1 }
 0x1ff   : > { %v4148_v29 = vadd.f32 %v2099_v24, %v3974_v5  ;;  %v4151_v60 = vadd.f32 %v3162_v42, %v4017_v11  ;;  %v2101_v50 = vpop.f32.mrb[77].mxu0  ;;  %v2284_v36 = vpop.f32.mrb[109].mxu1  ;;  %v4171_v24 = vld [vmem:[%s240_s30] ss:$0 sm:$0xff]  ;;  %v2499_v42 = vmul.f32 %v4145_v25, %v2240_v46  ;;  %v2502_v46 = vmul.f32 %v4145_v25, %v2253_v54 }
 0x200   : > { %v4158_v34 = vadd.f32 %v2284_v36, %v4009_v58  ;;  %v2102_v48 = vpop.f32.mrb[78].mxu0  ;;  %v3163_v53 = vpop.f32.mrb[110].mxu1  ;;  %v2501_v58 = vmul.f32 %v4145_v25, %v2248_v15  ;;  %v2504_v15 = vmul.f32 %v4145_v25, %v2261_v37 }
 0x201   : > { %v4161_v20 = vadd.f32 %v2102_v48, %v3980_v13  ;;  %v4164_v5 = vadd.f32 %v3163_v53, %v4021_v18  ;;  %v2104_v14 = vpop.f32.mrb[79].mxu0  ;;  %v2287_v11 = vpop.f32.mrb[111].mxu1  ;;  %v2571_v13 = vadd.f32 %v4171_v24, %v2500_v63  ;;  %v2569_v18 = vadd.f32 %v4171_v24, %v2498_v12 }
 0x202   : > { %v4169_v52 = vadd.f32 %v2287_v11, %v4013_v3  ;;  %v2572_v48 = vadd.f32 %v4171_v24, %v2501_v58  ;;  %v2570_v1 = vadd.f32 %v4171_v24, %v2499_v42  ;;  %v2505_v11 = vmul.f32 %v4145_v25, %v2264_v45 }
 0x203   : > { %v2503_v58 = vmul.f32 %v4145_v25, %v2256_v26  ;;  %v2635_v37 = vmax.f32 %v2571_v13, 0.0 }
 0x204   : > { %v4202_v13 = vadd.f32 %v4171_v24, %v2505_v11 }
 0x206   : > { %v2107_v50 = vpop.f32.mrb[80].mxu0  ;;  %v3166_v36 = vpop.f32.mrb[112].mxu1 }
 0x207   : > { %v4180_v9 = vadd.f32 %v2107_v50, %v3988_v22  ;;  %v2309_v3 = vadd.f32 %v3166_v36, %v4036_v0  ;;  %v2109_v53 = vpop.f32.mrb[81].mxu0  ;;  %v2300_v14 = vpop.f32.mrb[113].mxu1 }
 0x208   : > { %v2301_v63 = vadd.f32 %v2300_v14, %v4026_v38  ;;  %v2110_v12 = vpop.f32.mrb[82].mxu0  ;;  %v3167_v21 = vpop.f32.mrb[114].mxu1  ;;  %v2633_v53 = vmax.f32 %v2569_v18, 0.0  ;;  %v2636_v38 = vmax.f32 %v2572_v48, 0.0  ;;  %v2634_v14 = vmax.f32 %v2570_v1, 0.0 }
 0x209   : > { %4557 = vst [vmem:[#allocation18_spill] sm:$0xff] %v4180_v9  ;;  %v2516_v42 = vmul.f32 %v4145_v25, %v2309_v3  ;;  %v4190_v22 = vadd.f32 %v2110_v12, %v3994_v33  ;;  %v2312_v0 = vadd.f32 %v3167_v21, %v4041_v32  ;;  %v2112_v50 = vpop.f32.mrb[83].mxu0  ;;  %v2303_v36 = vpop.f32.mrb[115].mxu1  ;;  %v2575_v3 = vadd.f32 %v4171_v24, %v2504_v15 }
 0x20a   : > { %v2514_v54 = vmul.f32 %v4145_v25, %v2301_v63  ;;  %v2304_v45 = vadd.f32 %v2303_v36, %v4031_v56  ;;  %v2573_v33 = vadd.f32 %v4171_v24, %v2502_v46  ;;  %v4205_v18 = vadd.f32 %v4171_v24, %v2503_v58 }
 0x20b   : > { %v2587_v9 = vadd.f32 %v4171_v24, %v2516_v42  ;;  %v2517_v26 = vmul.f32 %v4145_v25, %v2312_v0  ;;  %v2508_v1 = vmul.f32 %v4145_v25, %v4127_v59  ;;  %v2506_v15 = vmul.f32 %v4145_v25, %v4130_v44 }
 0x20c   : > { %v2585_v32 = vadd.f32 %v4171_v24, %v2514_v54  ;;  %v2515_v21 = vmul.f32 %v4145_v25, %v2304_v45  ;;  %v2509_v59 = vmul.f32 %v4145_v25, %v4136_v61  ;;  %v2507_v61 = vmul.f32 %v4145_v25, %v4139_v28 }
 0x20d   : > { %v2651_v56 = vmax.f32 %v2587_v9, 0.0  ;;  %v2588_v48 = vadd.f32 %v4171_v24, %v2517_v26 }
 0x20e   : > { %v2649_v46 = vmax.f32 %v2585_v32, 0.0  ;;  %v2586_v63 = vadd.f32 %v4171_v24, %v2515_v21  ;;  %v2115_v12 = vpop.f32.mrb[84].mxu0  ;;  %v3170_v42 = vpop.f32.mrb[116].mxu1 }
 0x20f   : > { %v4213_v0 = vadd.f32 %v2651_v56, %v2635_v37  ;;  %v2652_v11 = vmax.f32 %v2588_v48, 0.0  ;;  %v4216_v58 = vadd.f32 %v2115_v12, %v3999_v41  ;;  %v2325_v9 = vadd.f32 %v3170_v42, %v4056_v40  ;;  %v2117_v50 = vpop.f32.mrb[85].mxu0  ;;  %v2316_v36 = vpop.f32.mrb[117].mxu1 }
 0x210   : > { %v4221_v54 = vadd.f32 %v2649_v46, %v2633_v53  ;;  %v2650_v44 = vmax.f32 %v2586_v63, 0.0  ;;  %v2317_v45 = vadd.f32 %v2316_v36, %v4046_v62  ;;  %v2118_v26 = vpop.f32.mrb[86].mxu0  ;;  %v3171_v32 = vpop.f32.mrb[118].mxu1  ;;  %v2637_v63 = vmax.f32 %v2573_v33, 0.0 }
 0x211   : > { %v4224_v37 = vadd.f32 %v2652_v11, %v2636_v38  ;;  %v2520_v21 = vmul.f32 %v4145_v25, %v2325_v9  ;;  %v4228_v41 = vadd.f32 %v2118_v26, %v4003_v49  ;;  %v2328_v40 = vadd.f32 %v3171_v32, %v4061_v7  ;;  %v2120_v56 = vpop.f32.mrb[87].mxu0  ;;  %v2319_v48 = vpop.f32.mrb[119].mxu1 }
 0x212   : > { %v4233_v53 = vadd.f32 %v2650_v44, %v2634_v14  ;;  %v2518_v62 = vmul.f32 %v4145_v25, %v2317_v45  ;;  %v2320_v46 = vadd.f32 %v2319_v48, %v4051_v16  ;;  %v2639_v38 = vmax.f32 %v2575_v3, 0.0 }
 0x213   : > { %v2591_v12 = vadd.f32 %v4171_v24, %v2520_v21  ;;  %v2521_v49 = vmul.f32 %v4145_v25, %v2328_v40  ;;  %v2640_v42 = vmax.f32 %v4202_v13, 0.0  ;;  %v2638_v7 = vmax.f32 %v4205_v18, 0.0 }
 0x214   : > { %v2589_v11 = vadd.f32 %v4171_v24, %v2518_v62  ;;  %v2519_v28 = vmul.f32 %v4145_v25, %v2320_v46  ;;  %v2579_v14 = vadd.f32 %v4171_v24, %v2508_v1  ;;  %v2577_v9 = vadd.f32 %v4171_v24, %v2506_v15 }
 0x215   : > { %v2655_v50 = vmax.f32 %v2591_v12, 0.0  ;;  %v2592_v16 = vadd.f32 %v4171_v24, %v2521_v49  ;;  %v2580_v3 = vadd.f32 %v4171_v24, %v2509_v59  ;;  %v4248_v33 = vadd.f32 %v4171_v24, %v2507_v61 }
 0x216   : > { %v2653_v36 = vmax.f32 %v2589_v11, 0.0  ;;  %v2590_v13 = vadd.f32 %v4171_v24, %v2519_v28  ;;  %v2123_v18 = vpop.f32.mrb[88].mxu0  ;;  %v3174_v44 = vpop.f32.mrb[120].mxu1  ;;  %v2512_v59 = vmul.f32 %v4145_v25, %v4151_v60  ;;  %v2510_v60 = vmul.f32 %v4145_v25, %v4158_v34 }
 0x217   : > { %v4251_v45 = vadd.f32 %v2655_v50, %v2639_v38  ;;  %v2656_v26 = vmax.f32 %v2592_v16, 0.0  ;;  %v4254_v1 = vadd.f32 %v2123_v18, %v4007_v57  ;;  %v2341_v15 = vadd.f32 %v3174_v44, %v4076_v27  ;;  %v2125_v32 = vpop.f32.mrb[89].mxu0  ;;  %v2332_v21 = vpop.f32.mrb[121].mxu1 }
 0x218   : > { %v4259_v40 = vadd.f32 %v2653_v36, %v2637_v63  ;;  %v2654_v56 = vmax.f32 %v2590_v13, 0.0  ;;  %v2333_v48 = vadd.f32 %v2332_v21, %v4066_v19  ;;  %v2126_v61 = vpop.f32.mrb[90].mxu0  ;;  %v3175_v62 = vpop.f32.mrb[122].mxu1  ;;  %v2644_v16 = vmax.f32 %v2580_v3, 0.0 }
 0x219   : > { %v4262_v46 = vadd.f32 %v2656_v26, %v2640_v42  ;;  %v2524_v38 = vmul.f32 %v4145_v25, %v2341_v15  ;;  %v4266_v57 = vadd.f32 %v2126_v61, %v4011_v2  ;;  %v2344_v27 = vadd.f32 %v3175_v62, %v4081_v31  ;;  %v2128_v12 = vpop.f32.mrb[91].mxu0  ;;  %v2335_v49 = vpop.f32.mrb[123].mxu1 }
 0x21a   : > { %v4271_v63 = vadd.f32 %v2654_v56, %v2638_v7  ;;  %v2522_v19 = vmul.f32 %v4145_v25, %v2333_v48  ;;  %v2336_v11 = vadd.f32 %v2335_v49, %v4071_v23  ;;  %v2643_v42 = vmax.f32 %v2579_v14, 0.0 }
 0x21b   : > { %v2595_v28 = vadd.f32 %v4171_v24, %v2524_v38  ;;  %v2525_v50 = vmul.f32 %v4145_v25, %v2344_v27  ;;  %v2641_v2 = vmax.f32 %v2577_v9, 0.0  ;;  %v2642_v13 = vmax.f32 %v4248_v33, 0.0 }
 0x21c   : > { %v2593_v31 = vadd.f32 %v4171_v24, %v2522_v19  ;;  %v2523_v36 = vmul.f32 %v4145_v25, %v2336_v11  ;;  %v2583_v34 = vadd.f32 %v4171_v24, %v2512_v59  ;;  %v2581_v23 = vadd.f32 %v4171_v24, %v2510_v60 }
 0x21d   : > { %v2659_v7 = vmax.f32 %v2595_v28, 0.0  ;;  %v2596_v18 = vadd.f32 %v4171_v24, %v2525_v50  ;;  %v2513_v14 = vmul.f32 %v4145_v25, %v4164_v5  ;;  %v2511_v48 = vmul.f32 %v4145_v25, %v4169_v52 }
 0x21e   : > { %v2657_v44 = vmax.f32 %v2593_v31, 0.0  ;;  %v2594_v9 = vadd.f32 %v4171_v24, %v2523_v36  ;;  %v2131_v3 = vpop.f32.mrb[92].mxu0  ;;  %v3178_v26 = vpop.f32.mrb[124].mxu1 }
 0x21f   : > { %v4286_v15 = vadd.f32 %v2659_v7, %v2643_v42  ;;  %v2660_v32 = vmax.f32 %v2596_v18, 0.0  ;;  %v4289_v33 = vadd.f32 %v2131_v3, %v4015_v10  ;;  %v2357_v21 = vadd.f32 %v3178_v26, %v4096_v43  ;;  %v2133_v59 = vpop.f32.mrb[93].mxu0  ;;  %v2348_v56 = vpop.f32.mrb[125].mxu1 }
 0x220   : > { %v4294_v61 = vadd.f32 %v2657_v44, %v2641_v2  ;;  %v2658_v5 = vmax.f32 %v2594_v9, 0.0  ;;  %v2349_v62 = vadd.f32 %v2348_v56, %v4086_v35  ;;  %v2134_v38 = vpop.f32.mrb[94].mxu0  ;;  %v3179_v27 = vpop.f32.mrb[126].mxu1  ;;  %v2584_v52 = vadd.f32 %v4171_v24, %v2513_v14 }
 0x221   : > { %v4297_v12 = vadd.f32 %v2660_v32, %v2644_v16  ;;  %v2528_v49 = vmul.f32 %v4145_v25, %v2357_v21  ;;  %v4301_v10 = vadd.f32 %v2134_v38, %v4019_v17  ;;  %v2360_v43 = vadd.f32 %v3179_v27, %v4101_v47  ;;  %v2136_v60 = vpop.f32.mrb[95].mxu0  ;;  %v2351_v19 = vpop.f32.mrb[127].mxu1 }
 0x222   : > { %v4305_v11 = vadd.f32 %v2658_v5, %v2642_v13  ;;  %v2526_v42 = vmul.f32 %v4145_v25, %v2349_v62  ;;  %v2352_v35 = vadd.f32 %v2351_v19, %v4091_v39  ;;  %v2582_v2 = vadd.f32 %v4171_v24, %v2511_v48 }
 0x223   : > { %v2599_v28 = vadd.f32 %v4171_v24, %v2528_v49  ;;  %v2529_v50 = vmul.f32 %v4145_v25, %v2360_v43  ;;  %v2647_v16 = vmax.f32 %v2583_v34, 0.0  ;;  %v2645_v13 = vmax.f32 %v2581_v23, 0.0  ;;  %v4558_v49 = vld [vmem:[#allocation2_spill] sm:$0xff] }
 0x224   : > { %v2597_v17 = vadd.f32 %v4171_v24, %v2526_v42  ;;  %v2527_v47 = vmul.f32 %v4145_v25, %v2352_v35  ;;  %v2648_v7 = vmax.f32 %v2584_v52, 0.0  ;;  %v2646_v59 = vmax.f32 %v2582_v2, 0.0 }
 0x225   : > { %v2663_v31 = vmax.f32 %v2599_v28, 0.0  ;;  %v2600_v36 = vadd.f32 %v4171_v24, %v2529_v50 }
 0x226   : > { %v2661_v18 = vmax.f32 %v2597_v17, 0.0  ;;  %v2598_v14 = vadd.f32 %v4171_v24, %v2527_v47  ;;  %v2139_v39 = vpop.f32.mrb[96].mxu0  ;;  %v3182_v44 = vpop.f32.mrb[128].mxu1 }
 0x227   : > { %v4316_v9 = vadd.f32 %v2663_v31, %v2647_v16  ;;  %v2664_v3 = vmax.f32 %v2600_v36, 0.0  ;;  %v4319_v26 = vadd.f32 %v2139_v39, %v4023_v30  ;;  %v2373_v32 = vadd.f32 %v3182_v44, %v4114_v8  ;;  %v2141_v21 = vpop.f32.mrb[97].mxu0  ;;  %v2364_v34 = vpop.f32.mrb[129].mxu1 }
 0x228   : > { %v4322_v56 = vadd.f32 %v2661_v18, %v2645_v13  ;;  %v2662_v23 = vmax.f32 %v2598_v14, 0.0  ;;  %v2365_v48 = vadd.f32 %v2364_v34, %v4104_v51  ;;  %v2142_v5 = vpop.f32.mrb[98].mxu0  ;;  %v3183_v62 = vpop.f32.mrb[130].mxu1  ;;  %v4559_v13 = vld [vmem:[#allocation3_spill] sm:$0xff] }
 0x229   : > { %v4325_v38 = vadd.f32 %v2664_v3, %v2648_v7  ;;  %v2532_v27 = vmul.f32 %v4145_v25, %v2373_v32  ;;  %v4329_v43 = vadd.f32 %v2142_v5, %v4558_v49  ;;  %v2376_v30 = vadd.f32 %v3183_v62, %v4119_v55  ;;  %v2144_v8 = vpop.f32.mrb[99].mxu0  ;;  %v2367_v60 = vpop.f32.mrb[131].mxu1 }
 0x22a   : > { %v4332_v19 = vadd.f32 %v2662_v23, %v2646_v59  ;;  %v2530_v52 = vmul.f32 %v4145_v25, %v2365_v48  ;;  %v2368_v42 = vadd.f32 %v2367_v60, %v4109_v4  ;;  %v4560_v23 = vld [vmem:[#allocation4_spill] sm:$0xff] }
 0x22b   : > { %v2603_v51 = vadd.f32 %v4171_v24, %v2532_v27  ;;  %v2533_v35 = vmul.f32 %v4145_v25, %v2376_v30 }
 0x22c   : > { %v2601_v28 = vadd.f32 %v4171_v24, %v2530_v52  ;;  %v2531_v50 = vmul.f32 %v4145_v25, %v2368_v42 }
 0x22d   : > { %v2667_v2 = vmax.f32 %v2603_v51, 0.0  ;;  %v2604_v17 = vadd.f32 %v4171_v24, %v2533_v35 }
 0x22e   : > { %v2665_v55 = vmax.f32 %v2601_v28, 0.0  ;;  %v2602_v47 = vadd.f32 %v4171_v24, %v2531_v50  ;;  %v2147_v16 = vpop.f32.mrb[100].mxu0  ;;  %v3186_v31 = vpop.f32.mrb[132].mxu1 }
 0x22f   : > { %v4343_v36 = vadd.f32 %v4213_v0, %v2667_v2  ;;  %v2668_v4 = vmax.f32 %v2604_v17, 0.0  ;;  %v4346_v7 = vadd.f32 %v2147_v16, %v4559_v13  ;;  %v2389_v18 = vadd.f32 %v3186_v31, %v4148_v29  ;;  %v2149_v14 = vpop.f32.mrb[101].mxu0  ;;  %v2380_v39 = vpop.f32.mrb[133].mxu1  ;;  %v4562_v2 = vld [vmem:[#allocation5_spill] sm:$0xff]  ;;  %v4563_v13 = vld [vmem:[#allocation18_spill] sm:$0xff] }
 0x230   : > { %v4350_v44 = vadd.f32 %v4221_v54, %v2665_v55  ;;  %v2666_v3 = vmax.f32 %v2602_v47, 0.0  ;;  %v2381_v32 = vadd.f32 %v2380_v39, %v4124_v6  ;;  %v2150_v21 = vpop.f32.mrb[102].mxu0  ;;  %v3187_v34 = vpop.f32.mrb[134].mxu1  ;;  %v4561_v6 = vld [vmem:[#allocation17_spill] sm:$0xff] }
 0x231   : > { %v4354_v59 = vadd.f32 %v4224_v37, %v2668_v4  ;;  %v2536_v0 = vmul.f32 %v4145_v25, %v2389_v18  ;;  %v4358_v48 = vadd.f32 %v2150_v21, %v4560_v23  ;;  %v2392_v29 = vadd.f32 %v3187_v34, %v4161_v20  ;;  %v2152_v5 = vpop.f32.mrb[103].mxu0  ;;  %v2383_v62 = vpop.f32.mrb[135].mxu1 }
 0x232   : > { %v4362_v54 = vadd.f32 %v4233_v53, %v2666_v3  ;;  %v2534_v27 = vmul.f32 %v4145_v25, %v2381_v32  ;;  %v2384_v49 = vadd.f32 %v2383_v62, %v4561_v6  ;;  %v4564_v32 = vld [vmem:[#allocation6_spill] sm:$0xff] }
 0x233   : > { %v2607_v30 = vadd.f32 %v4171_v24, %v2536_v0  ;;  %v2537_v37 = vmul.f32 %v4145_v25, %v2392_v29 }
 0x234   : > { %v2605_v8 = vadd.f32 %v4171_v24, %v2534_v27  ;;  %v2535_v60 = vmul.f32 %v4145_v25, %v2384_v49 }
 0x235   : > { %v2671_v52 = vmax.f32 %v2607_v30, 0.0  ;;  %v2608_v20 = vadd.f32 %v4171_v24, %v2537_v37 }
 0x236   : > { %v2669_v42 = vmax.f32 %v2605_v8, 0.0  ;;  %v2606_v51 = vadd.f32 %v4171_v24, %v2535_v60  ;;  %v2155_v53 = vpop.f32.mrb[104].mxu0  ;;  %v3190_v35 = vpop.f32.mrb[136].mxu1  ;;  %v4565_v60 = vld [vmem:[#allocation7_spill] sm:$0xff] }
 0x237   : > { %v4373_v28 = vadd.f32 %v4251_v45, %v2671_v52  ;;  %v2672_v50 = vmax.f32 %v2608_v20, 0.0  ;;  %v4376_v17 = vadd.f32 %v2155_v53, %v4562_v2  ;;  %v2405_v55 = vadd.f32 %v3190_v35, %v4216_v58  ;;  %v2157_v47 = vpop.f32.mrb[105].mxu0  ;;  %v2396_v16 = vpop.f32.mrb[137].mxu1 }
 0x238   : > { %v4380_v31 = vadd.f32 %v4259_v40, %v2669_v42  ;;  %v2670_v4 = vmax.f32 %v2606_v51, 0.0  ;;  %v2397_v18 = vadd.f32 %v2396_v16, %v4563_v13  ;;  %v2158_v14 = vpop.f32.mrb[106].mxu0  ;;  %v3191_v39 = vpop.f32.mrb[138].mxu1  ;;  %v4566_v16 = vld [vmem:[#allocation8_spill] sm:$0xff] }
 0x239   : > { %v4384_v3 = vadd.f32 %v4262_v46, %v2672_v50  ;;  %v2540_v45 = vmul.f32 %v4145_v25, %v2405_v55  ;;  %v4388_v21 = vadd.f32 %v2158_v14, %v4564_v32  ;;  %v2408_v58 = vadd.f32 %v3191_v39, %v4228_v41  ;;  %v2160_v34 = vpop.f32.mrb[107].mxu0  ;;  %v2399_v0 = vpop.f32.mrb[139].mxu1 }
 0x23a   : > { %v4392_v40 = vadd.f32 %v4271_v63, %v2670_v4  ;;  %v2538_v23 = vmul.f32 %v4145_v25, %v2397_v18  ;;  %v2400_v29 = vadd.f32 %v2399_v0, %v4190_v22 }
 0x23b   : > { %v2611_v5 = vadd.f32 %v4171_v24, %v2540_v45  ;;  %v2541_v46 = vmul.f32 %v4145_v25, %v2408_v58 }
 0x23c   : > { %v2609_v62 = vadd.f32 %v4171_v24, %v2538_v23  ;;  %v2539_v27 = vmul.f32 %v4145_v25, %v2400_v29 }
 0x23d   : > { %v2675_v6 = vmax.f32 %v2611_v5, 0.0  ;;  %v2612_v41 = vadd.f32 %v4171_v24, %v2541_v46  ;;  %v4567_v5 = vld [vmem:[#allocation9_spill] sm:$0xff] }
 0x23e   : > { %v2673_v49 = vmax.f32 %v2609_v62, 0.0  ;;  %v2610_v30 = vadd.f32 %v4171_v24, %v2539_v27  ;;  %v2163_v63 = vpop.f32.mrb[108].mxu0  ;;  %v3194_v37 = vpop.f32.mrb[140].mxu1 }
 0x23f   : > { %v4403_v8 = vadd.f32 %v4286_v15, %v2675_v6  ;;  %v2676_v22 = vmax.f32 %v2612_v41, 0.0  ;;  %v2164_v52 = vadd.f32 %v2163_v63, %v4565_v60  ;;  %v2421_v20 = vadd.f32 %v3194_v37, %v4289_v33  ;;  %v2165_v42 = vpop.f32.mrb[109].mxu0  ;;  %v2412_v51 = vpop.f32.mrb[141].mxu1  ;;  %v4568_v60 = vld [vmem:[#allocation10_spill] sm:$0xff] }
 0x240   : > { %v4408_v53 = vadd.f32 %v4294_v61, %v2673_v49  ;;  %v2674_v35 = vmax.f32 %v2610_v30, 0.0  ;;  %v2413_v50 = vadd.f32 %v2412_v51, %v4254_v1  ;;  %v2166_v2 = vpop.f32.mrb[110].mxu0  ;;  %v3195_v55 = vpop.f32.mrb[142].mxu1 }
 0x241   : > { %v4412_v47 = vadd.f32 %v4297_v12, %v2676_v22  ;;  %v2544_v15 = vmul.f32 %v4145_v25, %v2421_v20  ;;  %v4416_v4 = vadd.f32 %v2166_v2, %v4566_v16  ;;  %v2424_v33 = vadd.f32 %v3195_v55, %v4301_v10  ;;  %v2168_v13 = vpop.f32.mrb[111].mxu0  ;;  %v2415_v18 = vpop.f32.mrb[143].mxu1 }
 0x242   : > { %v4420_v61 = vadd.f32 %v4305_v11, %v2674_v35  ;;  %v2542_v14 = vmul.f32 %v4145_v25, %v2413_v50  ;;  %v2416_v1 = vadd.f32 %v2415_v18, %v4266_v57 }
 0x243   : > { %v2615_v39 = vadd.f32 %v4171_v24, %v2544_v15  ;;  %v2545_v12 = vmul.f32 %v4145_v25, %v2424_v33 }
 0x244   : > { %v2613_v45 = vadd.f32 %v4171_v24, %v2542_v14  ;;  %v2543_v32 = vmul.f32 %v4145_v25, %v2416_v1  ;;  %v4569_v14 = vld [vmem:[#allocation11_spill] sm:$0xff] }
 0x245   : > { %v2679_v58 = vmax.f32 %v2615_v39, 0.0  ;;  %v2616_v10 = vadd.f32 %v4171_v24, %v2545_v12 }
 0x246   : > { %v2677_v34 = vmax.f32 %v2613_v45, 0.0  ;;  %v2614_v0 = vadd.f32 %v4171_v24, %v2543_v32  ;;  %v2171_v11 = vpop.f32.mrb[112].mxu0  ;;  %v3198_v23 = vpop.f32.mrb[144].mxu1 }
 0x247   : > { %v4431_v29 = vadd.f32 %v4316_v9, %v2679_v58  ;;  %v2680_v57 = vmax.f32 %v2616_v10, 0.0  ;;  %v4434_v46 = vadd.f32 %v2171_v11, %v4567_v5  ;;  %v2437_v62 = vadd.f32 %v3198_v23, %v4346_v7  ;;  %v2173_v27 = vpop.f32.mrb[113].mxu0  ;;  %v2428_v6 = vpop.f32.mrb[145].mxu1  ;;  %v4570_v23 = vld [vmem:[#allocation12_spill] sm:$0xff] }
 0x248   : > { %v4438_v41 = vadd.f32 %v4322_v56, %v2677_v34  ;;  %v2678_v49 = vmax.f32 %v2614_v0, 0.0  ;;  %v2429_v30 = vadd.f32 %v2428_v6, %v4319_v26  ;;  %v2174_v63 = vpop.f32.mrb[114].mxu0  ;;  %v3199_v37 = vpop.f32.mrb[146].mxu1 }
 0x249   : > { %v4442_v9 = vadd.f32 %v4325_v38, %v2680_v57  ;;  %v2548_v22 = vmul.f32 %v4145_v25, %v2437_v62  ;;  %v4446_v20 = vadd.f32 %v2174_v63, %v4568_v60  ;;  %v2440_v7 = vadd.f32 %v3199_v37, %v4358_v48  ;;  %v2176_v42 = vpop.f32.mrb[115].mxu0  ;;  %v2431_v51 = vpop.f32.mrb[147].mxu1 }
 0x24a   : > { %v4450_v56 = vadd.f32 %v4332_v19, %v2678_v49  ;;  %v2546_v26 = vmul.f32 %v4145_v25, %v2429_v30  ;;  %v2432_v35 = vadd.f32 %v2431_v51, %v4329_v43 }
 0x24b   : > { %v2619_v50 = vadd.f32 %v4171_v24, %v2548_v22  ;;  %v2549_v38 = vmul.f32 %v4145_v25, %v2440_v7 }
 0x24c   : > { %v2617_v2 = vadd.f32 %v4171_v24, %v2546_v26  ;;  %v2547_v55 = vmul.f32 %v4145_v25, %v2432_v35  ;;  %v4571_v35 = vld [vmem:[#allocation13_spill] sm:$0xff] }
 0x24d   : > { %v2683_v15 = vmax.f32 %v2619_v50, 0.0  ;;  %v2620_v48 = vadd.f32 %v4171_v24, %v2549_v38 }
 0x24e   : > { %v2681_v16 = vmax.f32 %v2617_v2, 0.0  ;;  %v2618_v19 = vadd.f32 %v4171_v24, %v2547_v55  ;;  %v2179_v33 = vpop.f32.mrb[116].mxu0  ;;  %v3202_v13 = vpop.f32.mrb[148].mxu1 }
 0x24f   : > { %v2731_v18 = vadd.f32 %v4343_v36, %v2683_v15  ;;  %v2684_v43 = vmax.f32 %v2620_v48, 0.0  ;;  %v2180_v1 = vadd.f32 %v2179_v33, %v4569_v14  ;;  %v2453_v39 = vadd.f32 %v3202_v13, %v2164_v52  ;;  %v2181_v12 = vpop.f32.mrb[117].mxu0  ;;  %v2444_v45 = vpop.f32.mrb[149].mxu1 }
 0x250   : > { %v2729_v32 = vadd.f32 %v4350_v44, %v2681_v16  ;;  %v2682_v58 = vmax.f32 %v2618_v19, 0.0  ;;  %v2445_v10 = vadd.f32 %v2444_v45, %v4376_v17  ;;  %v2182_v34 = vpop.f32.mrb[118].mxu0  ;;  %v3203_v36 = vpop.f32.mrb[150].mxu1 }
 0x251   : > { %v2747_v0 = vmul.f32 0.25, %v2731_v18  ;;  %v2732_v11 = vadd.f32 %v4354_v59, %v2684_v43  ;;  %v2552_v52 = vmul.f32 %v4145_v25, %v2453_v39  ;;  %v2183_v57 = vadd.f32 %v2182_v34, %v4570_v23  ;;  %v2184_v5 = vpop.f32.mrb[119].mxu0  ;;  %v2447_v62 = vpop.f32.mrb[151].mxu1  ;;  %v4572_v43 = vld [vmem:[#allocation14_spill] sm:$0xff] }
 0x252   : > { %v2745_v27 = vmul.f32 0.25, %v2729_v32  ;;  %v2730_v44 = vadd.f32 %v4362_v54, %v2682_v58  ;;  %v2550_v6 = vmul.f32 %v4145_v25, %v2445_v10  ;;  %v2456_v17 = vadd.f32 %v3203_v36, %v4416_v4 }
 0x253   : > { %2763 = vst [vmem:[%s4466_s8 + $0x10] sm:$0xff] %v2747_v0  ;;  %v2748_v49 = vmul.f32 0.25, %v2732_v11  ;;  %v2623_v30 = vadd.f32 %v4171_v24, %v2552_v52  ;;  %v2448_v59 = vadd.f32 %v2447_v62, %v4388_v21 }
 0x254   : > { %2761 = vst [vmem:[%s4466_s8] sm:$0xff] %v2745_v27  ;;  %v2746_v63 = vmul.f32 0.25, %v2730_v44  ;;  %v2621_v37 = vadd.f32 %v4171_v24, %v2550_v6  ;;  %v2553_v22 = vmul.f32 %v4145_v25, %v2456_v17  ;;  %v4573_v27 = vld [vmem:[#allocation15_spill] sm:$0xff] }
 0x255   : > { %2764 = vst [vmem:[%s4466_s8 + $0x18] sm:$0xff] %v2748_v49  ;;  %v2687_v60 = vmax.f32 %v2623_v30, 0.0  ;;  %v2551_v54 = vmul.f32 %v4145_v25, %v2448_v59 }
 0x256   : > { %2762 = vst [vmem:[%s4466_s8 + $0x8] sm:$0xff] %v2746_v63  ;;  %v2685_v7 = vmax.f32 %v2621_v37, 0.0  ;;  %v2624_v4 = vadd.f32 %v4171_v24, %v2553_v22  ;;  %v2187_v42 = vpop.f32.mrb[120].mxu0  ;;  %v3206_v51 = vpop.f32.mrb[152].mxu1 }
 0x257   : > { %v2735_v26 = vadd.f32 %v4373_v28, %v2687_v60  ;;  %v2622_v21 = vadd.f32 %v4171_v24, %v2551_v54  ;;  %v2188_v50 = vadd.f32 %v2187_v42, %v4571_v35  ;;  %v2469_v38 = vadd.f32 %v3206_v51, %v2180_v1  ;;  %v2189_v2 = vpop.f32.mrb[121].mxu0  ;;  %v2460_v55 = vpop.f32.mrb[153].mxu1 }
 0x258   : > { %v2733_v15 = vadd.f32 %v4380_v31, %v2685_v7  ;;  %v2688_v48 = vmax.f32 %v2624_v4, 0.0  ;;  %v2461_v16 = vadd.f32 %v2460_v55, %v4434_v46  ;;  %v2190_v19 = vpop.f32.mrb[122].mxu0  ;;  %v3207_v33 = vpop.f32.mrb[154].mxu1  ;;  %v4574_v7 = vld [vmem:[#allocation16_spill] sm:$0xff] }
 0x259   : > { %v2751_v13 = vmul.f32 0.25, %v2735_v26  ;;  %v2686_v18 = vmax.f32 %v2622_v21, 0.0  ;;  %v2556_v28 = vmul.f32 %v4145_v25, %v2469_v38  ;;  %v2191_v14 = vadd.f32 %v2190_v19, %v4572_v43  ;;  %v2192_v39 = vpop.f32.mrb[123].mxu0  ;;  %v2463_v12 = vpop.f32.mrb[155].mxu1 }
 0x25a   : > { %v2749_v1 = vmul.f32 0.25, %v2733_v15  ;;  %v2736_v45 = vadd.f32 %v4384_v3, %v2688_v48  ;;  %v2554_v31 = vmul.f32 %v4145_v25, %v2461_v16  ;;  %v2472_v32 = vadd.f32 %v3207_v33, %v2183_v57 }
 0x25b   : > { %2767 = vst [vmem:[%s4466_s8 + $0x30] sm:$0xff] %v2751_v13  ;;  %v2734_v46 = vadd.f32 %v4392_v40, %v2686_v18  ;;  %v2627_v58 = vadd.f32 %v4171_v24, %v2556_v28  ;;  %v2464_v10 = vadd.f32 %v2463_v12, %v4446_v20 }
 0x25c   : > { %2765 = vst [vmem:[%s4466_s8 + $0x20] sm:$0xff] %v2749_v1  ;;  %v2752_v34 = vmul.f32 0.25, %v2736_v45  ;;  %v2625_v36 = vadd.f32 %v4171_v24, %v2554_v31  ;;  %v2557_v0 = vmul.f32 %v4145_v25, %v2472_v32 }
 0x25d   : > { %v2750_v11 = vmul.f32 0.25, %v2734_v46  ;;  %v2691_v52 = vmax.f32 %v2627_v58, 0.0  ;;  %v2555_v3 = vmul.f32 %v4145_v25, %v2464_v10 }
 0x25e   : > { %2768 = vst [vmem:[%s4466_s8 + $0x38] sm:$0xff] %v2752_v34  ;;  %v2689_v23 = vmax.f32 %v2625_v36, 0.0  ;;  %v2628_v57 = vadd.f32 %v4171_v24, %v2557_v0  ;;  %v2195_v5 = vpop.f32.mrb[124].mxu0  ;;  %v3210_v40 = vpop.f32.mrb[156].mxu1 }
 0x25f   : > { %2766 = vst [vmem:[%s4466_s8 + $0x28] sm:$0xff] %v2750_v11  ;;  %v2739_v62 = vadd.f32 %v4403_v8, %v2691_v52  ;;  %v2626_v20 = vadd.f32 %v4171_v24, %v2555_v3  ;;  %v2196_v44 = vadd.f32 %v2195_v5, %v4573_v27  ;;  %v2197_v6 = vpop.f32.mrb[125].mxu0  ;;  %v2476_v17 = vpop.f32.mrb[157].mxu1 }
 0x260   : > { %v2737_v49 = vadd.f32 %v4408_v53, %v2689_v23  ;;  %v2692_v30 = vmax.f32 %v2628_v57, 0.0  ;;  %v2477_v59 = vadd.f32 %v2476_v17, %v2188_v50  ;;  %v2198_v63 = vpop.f32.mrb[126].mxu0  ;;  %v3211_v37 = vpop.f32.mrb[158].mxu1 }
 0x261   : > { %v2755_v22 = vmul.f32 0.25, %v2739_v62  ;;  %v2690_v60 = vmax.f32 %v2626_v20, 0.0  ;;  %v2485_v54 = vadd.f32 %v3210_v40, %v2196_v44  ;;  %v2199_v4 = vadd.f32 %v2198_v63, %v4574_v7  ;;  %v2200_v8 = vpop.f32.mrb[127].mxu0  ;;  %v2479_v42 = vpop.f32.mrb[159].mxu1 }
 0x262   : > { %v2753_v51 = vmul.f32 0.25, %v2737_v49  ;;  %v2740_v26 = vadd.f32 %v4412_v47, %v2692_v30  ;;  %v2558_v21 = vmul.f32 %v4145_v25, %v2477_v59  ;;  %v2480_v53 = vadd.f32 %v2479_v42, %v2191_v14 }
 0x263   : > { %2771 = vst [vmem:[%s4466_s8 + $0x50] sm:$0xff] %v2755_v22  ;;  %v2738_v35 = vadd.f32 %v4420_v61, %v2690_v60  ;;  %v2560_v50 = vmul.f32 %v4145_v25, %v2485_v54  ;;  %v2488_v38 = vadd.f32 %v3211_v37, %v2199_v4 }
 0x264   : > { %2769 = vst [vmem:[%s4466_s8 + $0x40] sm:$0xff] %v2753_v51  ;;  %v2756_v2 = vmul.f32 0.25, %v2740_v26  ;;  %v2629_v55 = vadd.f32 %v4171_v24, %v2558_v21  ;;  %v2559_v15 = vmul.f32 %v4145_v25, %v2480_v53 }
 0x265   : > { %v2754_v48 = vmul.f32 0.25, %v2738_v35  ;;  %v2631_v16 = vadd.f32 %v4171_v24, %v2560_v50  ;;  %v2561_v47 = vmul.f32 %v4145_v25, %v2488_v38 }
 0x266   : > { %2772 = vst [vmem:[%s4466_s8 + $0x58] sm:$0xff] %v2756_v2  ;;  %v2693_v19 = vmax.f32 %v2629_v55, 0.0  ;;  %v2630_v61 = vadd.f32 %v4171_v24, %v2559_v15 }
 0x267   : > { %2770 = vst [vmem:[%s4466_s8 + $0x48] sm:$0xff] %v2754_v48  ;;  %v2695_v33 = vmax.f32 %v2631_v16, 0.0  ;;  %v2632_v13 = vadd.f32 %v4171_v24, %v2561_v47 }
 0x268   : > { %v2741_v18 = vadd.f32 %v4438_v41, %v2693_v19  ;;  %v2694_v28 = vmax.f32 %v2630_v61, 0.0 }
 0x269   : > { %v2743_v43 = vadd.f32 %v4431_v29, %v2695_v33  ;;  %v2696_v14 = vmax.f32 %v2632_v13, 0.0 }
 0x26a   : > { %v2757_v39 = vmul.f32 0.25, %v2741_v18  ;;  %v2742_v25 = vadd.f32 %v4450_v56, %v2694_v28 }
 0x26b   : > { %v2759_v12 = vmul.f32 0.25, %v2743_v43  ;;  %v2744_v1 = vadd.f32 %v4442_v9, %v2696_v14 }
 0x26c   : > { %2773 = vst [vmem:[%s4466_s8 + $0x60] sm:$0xff] %v2757_v39  ;;  %v2758_v45 = vmul.f32 0.25, %v2742_v25 }
 0x26d   : > { %2775 = vst [vmem:[%s4466_s8 + $0x70] sm:$0xff] %v2759_v12  ;;  %v2760_v31 = vmul.f32 0.25, %v2744_v1 }
 0x26e   : > { %2774 = vst [vmem:[%s4466_s8 + $0x68] sm:$0xff] %v2758_v45 }
 0x26f   : > { %2776 = vst [vmem:[%s4466_s8 + $0x78] sm:$0xff] %v2760_v31 }
 0x270 PF: > { %s14_s15 = sadd.s32 1, %s3601_s15  }
 0x271   : > { %p11_p4 = scmp.ge.s32.totalorder %s14_s15, 4  }
 0x273   :  { %13 = sbr.rel (!%p11_p4) target bundleno = 1 (0x1), region = 75 }

// kernel: testnet0_forward.10
= control target key start
LH: loop header
LB: loop body
LE: loop exit
PB: predicated region body
PF: predicated region fallthrough
CT: control target
= control target key end

     0   :  { %s1196_s15 = smov 0   ;;  %s1331_s0 = inlined_call_operand.vmem [shape: bf16[8,128,288], index: 0, kind: input, shape index: {}]   ;;  %s1332_s1 = inlined_call_operand.vmem [shape: bf16[8,288,128], index: 1, kind: input, shape index: {}]   ;;  %s1333_s2 = inlined_call_operand.vmem [shape: f32[8,1,128], index: 2, kind: input, shape index: {}]   ;;  %s1334_s3 = inlined_call_operand.vmem [shape: f32[8,1,128], index: 3, kind: input, shape index: {}]   ;;  %s1335_s4 = inlined_call_operand.vmem [shape: f32[8,32,128], index: 4, kind: output, shape index: {}]  }
   0x1 LB: > { %s929_s16 = sadd.s32 4294967295, %s1169_s15   ;;  %p933_p0 = scmp.ge.s32.totalorder %s1169_s15, 1  ;;  %s1169_s15 = sphi %s1196_s15, %s14_s15  }
   0x2   : > { %p188_p1 = scmp.lt.s32.totalorder %s1169_s15, 9 }
   0x4   : > { %p189_p2 = pnand %p933_p0, %p188_p1 }
   0x5   : > { %p225_p3 = scmp.lt.s32.totalorder (!%p189_p2), %s929_s16, 7  ;;  %vm543_vm0 = vcmask (!%p189_p2), 261120  }
   0x6   : > { %192 = sbr.rel (%p189_p2) target bundleno = 322 (0x142), region = 36 }
   0xd   : > { %s1337_s16 = smov (!%p225_p3, %s929_s16), 7 }
   0xe   : > { %s1104_s17 = smul.u32 144, %s1337_s16  ;;  %s237_s27 = scalar_lea.vmem %s1333_s2, %s1337_s16 }
   0xf   : > { %s1103_s21 = smul.u32 192, %s1337_s16  ;;  %s240_s30 = scalar_lea.vmem %s1334_s3, %s1337_s16 }
  0x10   : > { %s1210_s20 = scalar_lea.vmem %s1332_s1, %s1104_s17  ;;  %s992_s5 = sshll.u32 %s1337_s16, 5 }
  0x11   : > { %v1113_v0 = vld [vmem:[%s1210_s20 + $0x40] sm:$0xff]   ;;  %v1115_v2 = vld [vmem:[%s1210_s20 + $0x48] sm:$0xff]   ;;  %v1117_v4 = vld [vmem:[%s1210_s20 + $0x50] sm:$0xff]   ;;  %s1225_s24 = scalar_lea.vmem %s1331_s0, %s1103_s21  ;;  %s245_s8 = scalar_lea.vmem %s1335_s4, %s992_s5 }
  0x12   : > { %v1114_v1 = vld [vmem:[%s1210_s20] sm:$0xff]   ;;  %993 = vmatprep.subr.bf16.mxu0 %v1113_v0  ;;  %1087 = vmatprep.subr.bf16.mxu1 %v1113_v0  ;;  %v1116_v3 = vld [vmem:[%s1210_s20 + $0x8] sm:$0xff]   ;;  %v1118_v5 = vld [vmem:[%s1210_s20 + $0x10] sm:$0xff]  }
  0x13   : > { %994 = vmatpush3.bf16.msra.mxu0 %v1114_v1  ;;  %1095 = vmatpush3.bf16.msra.mxu1 %v1114_v1  ;;  %v1119_v6 = vld [vmem:[%s1210_s20 + $0x58] sm:$0xff]   ;;  %v1121_v8 = vld [vmem:[%s1210_s20 + $0x60] sm:$0xff]   ;;  %v1123_v10 = vld [vmem:[%s1210_s20 + $0x68] sm:$0xff]  }
  0x14   : > { %995 = vmatprep.subr.bf16.mxu0 %v1115_v2  ;;  %1088 = vmatprep.subr.bf16.mxu1 %v1115_v2  ;;  %v1120_v7 = vld [vmem:[%s1210_s20 + $0x18] sm:$0xff]   ;;  %v1122_v9 = vld [vmem:[%s1210_s20 + $0x20] sm:$0xff]   ;;  %v1124_v13 = vld [vmem:[%s1210_s20 + $0x28] sm:$0xff]  }
  0x15   : > { %v1131_v11 = vld [vmem:[%s1225_s24 + $0x4] ss:$12 sps:$4 sm:$0xff]   ;;  %v1134_v12 = vld [vmem:[%s1225_s24 + $0x94] ss:$12 sps:$4 sm:$0xff]   ;;  %v1127_v16 = vld [vmem:[%s1210_s20 + $0x78] sm:$0xff]  }
  0x16   : > { %v1125_v14 = vld [vmem:[%s1210_s20 + $0x70] sm:$0xff]   ;;  %600 = vmatprep.mubr.bf16.mxu0 %v1131_v11  ;;  %648 = vmatprep.mubr.bf16.mxu1 %v1134_v12  ;;  %v1128_v17 = vld [vmem:[%s1210_s20 + $0x38] sm:$0xff]   ;;  %v1129_v18 = vld [vmem:[%s1225_s24] ss:$12 sps:$4 sm:$0xff]  }
  0x17   : > { %996 = vmatpush3.bf16.msra.mxu0 %v1116_v3  ;;  %1096 = vmatpush3.bf16.msra.mxu1 %v1116_v3  ;;  %v1126_v15 = vld [vmem:[%s1210_s20 + $0x30] sm:$0xff]   ;;  %v1135_v19 = vld [vmem:[%s1210_s20 + $0x80] sm:$0xff]   ;;  %v1136_v21 = vld [vmem:[%s1225_s24 + $0x1c] ss:$12 sps:$4 sm:$0xff]  }
  0x18   : > { %997 = vmatprep.subr.bf16.mxu0 %v1117_v4  ;;  %1089 = vmatprep.subr.bf16.mxu1 %v1117_v4  ;;  %v1132_v20 = vld [vmem:[%s1225_s24 + $0x90] ss:$12 sps:$4 sm:$0xff]   ;;  %v1138_v22 = vld [vmem:[%s1225_s24 + $0xac] ss:$12 sps:$4 sm:$0xff]   ;;  %v1141_v25 = vld [vmem:[%s1225_s24 + $0xa8] ss:$12 sps:$4 sm:$0xff]  }
  0x19   : > { %v1142_v23 = vld [vmem:[%s1210_s20 + $0x88] sm:$0xff]   ;;  %v1140_v24 = vld [vmem:[%s1225_s24 + $0x18] ss:$12 sps:$4 sm:$0xff]   ;;  %v1143_v26 = vld [vmem:[%s1225_s24 + $0x34] ss:$12 sps:$4 sm:$0xff]  }
  0x1a   : > { %v1145_v27 = vld [vmem:[%s1225_s24 + $0x8] ss:$12 sps:$4 sm:$0xff]   ;;  %v1146_v28 = vld [vmem:[%s1225_s24 + $0x30] ss:$12 sps:$4 sm:$0xff]   ;;  %v1147_v29 = vld [vmem:[%s1225_s24 + $0x20] ss:$12 sps:$4 sm:$0xff]  }
  0x1b   : > { %998 = vmatpush3.bf16.msra.mxu0 %v1118_v5  ;;  %1097 = vmatpush3.bf16.msra.mxu1 %v1118_v5  ;;  %v1148_v30 = vld [vmem:[%s1225_s24 + $0x4c] ss:$12 sps:$4 sm:$0xff]   ;;  %v1151_v32 = vld [vmem:[%s1225_s24 + $0x48] ss:$12 sps:$4 sm:$0xff]   ;;  %v1152_v33 = vld [vmem:[%s1225_s24 + $0x50] ss:$12 sps:$4 sm:$0xff]  }
  0x1c   : > { %999 = vmatprep.subr.bf16.mxu0 %v1119_v6  ;;  %1090 = vmatprep.subr.bf16.mxu1 %v1119_v6  ;;  %v1150_v31 = vld [vmem:[%s1225_s24 + $0x38] ss:$12 sps:$4 sm:$0xff]   ;;  %v1155_v35 = vld [vmem:[%s1225_s24 + $0x68] ss:$12 sps:$4 sm:$0xff]   ;;  %v1156_v36 = vld [vmem:[%s1225_s24 + $0x60] ss:$12 sps:$4 sm:$0xff]  }
  0x1d   : > { %v1153_v34 = vld [vmem:[%s1225_s24 + $0x64] ss:$12 sps:$4 sm:$0xff]   ;;  %v1157_v37 = vld [vmem:[%s1225_s24 + $0x80] ss:$12 sps:$4 sm:$0xff]   ;;  %v1158_v38 = vld [vmem:[%s1225_s24 + $0x7c] ss:$12 sps:$4 sm:$0xff]  }
  0x1e   : > { %v1160_v39 = vld [vmem:[%s1225_s24 + $0x98] ss:$12 sps:$4 sm:$0xff]   ;;  %v1162_v41 = vld [vmem:[%s1225_s24 + $0xb0] ss:$12 sps:$4 sm:$0xff]  }
  0x1f   : > { %1000 = vmatpush3.bf16.msra.mxu0 %v1120_v7  ;;  %1098 = vmatpush3.bf16.msra.mxu1 %v1120_v7  ;;  %v1161_v40 = vld [vmem:[%s1225_s24 + $0x78] ss:$12 sps:$4 sm:$0xff]  }
  0x20   : > { %1001 = vmatprep.subr.bf16.mxu0 %v1121_v8  ;;  %1091 = vmatprep.subr.bf16.mxu1 %v1121_v8 }
  0x23   : > { %1002 = vmatpush3.bf16.msra.mxu0 %v1122_v9  ;;  %1099 = vmatpush3.bf16.msra.mxu1 %v1122_v9 }
  0x24   : > { %1003 = vmatprep.subr.bf16.mxu0 %v1123_v10  ;;  %1092 = vmatprep.subr.bf16.mxu1 %v1123_v10 }
  0x27   : > { %1004 = vmatpush3.bf16.msra.mxu0 %v1124_v13  ;;  %1100 = vmatpush3.bf16.msra.mxu1 %v1124_v13 }
  0x28   : > { %1005 = vmatprep.subr.bf16.mxu0 %v1125_v14  ;;  %1093 = vmatprep.subr.bf16.mxu1 %v1125_v14  ;;  %v1280_v14 = vld [vmem:[%s237_s27] ss:$0 sm:$0xff] }
  0x2b   : > { %1006 = vmatpush3.bf16.msra.mxu0 %v1126_v15  ;;  %1101 = vmatpush3.bf16.msra.mxu1 %v1126_v15 }
  0x2c   : > { %1007 = vmatprep.subr.bf16.mxu0 %v1127_v16  ;;  %1094 = vmatprep.subr.bf16.mxu1 %v1127_v16 }
  0x2f   : > { %1008 = vmatpush3.bf16.msra.mxu0 %v1128_v17  ;;  %1102 = vmatpush3.bf16.msra.mxu1 %v1128_v17 }
  0x30   : > { %1067 = vmatprep.subr.bf16.mxu1 %v1135_v19 }
  0x32   : > { %601 = vmatmul.mubr.bf16.vlgmr.msra.gmra.mrb[0].mxu0 %v1129_v18  ;;  %649 = vmatmul.mubr.bf16.vlgmr.msra.gmra.mrb[0].mxu1 %v1132_v20  ;;  %v1287_v18 = vld [vmem:[%s240_s30] ss:$0 sm:$0xff] }
  0x33   : > { %1068 = vmatpush3.bf16.msra.mxu1 %v1135_v19  ;;  %608 = vmatprep.mubr.bf16.mxu0 %v1136_v21 }
  0x34   : > { %656 = vmatprep.mubr.bf16.mxu1 %v1138_v22  ;;  %1069 = vmatprep.subr.bf16.mxu1 %v1142_v23 }
  0x37   : > { %1070 = vmatpush3.bf16.msra.mxu1 %v1142_v23 }
  0x3a   : > { %609 = vmatmul.mubr.bf16.gmra.mrb[4].mxu0 %v1140_v24  ;;  %657 = vmatmul.mubr.bf16.gmra.mrb[4].mxu1 %v1141_v25 }
  0x3b   : > { %616 = vmatprep.mubr.bf16.mxu0 %v1143_v26  ;;  %1071 = vmatprep.mubr.msk.bf16.mxu1 %vm543_vm0, %v1145_v27 }
  0x42   : > { %617 = vmatmul.mubr.bf16.gmra.mrb[8].mxu0 %v1146_v28  ;;  %1072 = vmatmul.mubr.msk.bf16.vlgmr.msra.gmra.mrb[8].mxu1 %vm543_vm0, %v1147_v29 }
  0x43   : > { %624 = vmatprep.mubr.bf16.mxu0 %v1148_v30  ;;  %1075 = vmatprep.mubr.msk.bf16.mxu1 %vm543_vm0, %v1150_v31 }
  0x4a   : > { %625 = vmatmul.mubr.bf16.gmra.mrb[12].mxu0 %v1151_v32  ;;  %1076 = vmatmul.mubr.msk.bf16.gmra.mrb[12].mxu1 %vm543_vm0, %v1152_v33 }
  0x4b   : > { %632 = vmatprep.mubr.bf16.mxu0 %v1153_v34  ;;  %1079 = vmatprep.mubr.msk.bf16.mxu1 %vm543_vm0, %v1155_v35 }
  0x52   : > { %633 = vmatmul.mubr.bf16.gmra.mrb[16].mxu0 %v1156_v36  ;;  %1080 = vmatmul.mubr.msk.bf16.gmra.mrb[16].mxu1 %vm543_vm0, %v1157_v37 }
  0x53   : > { %640 = vmatprep.mubr.bf16.mxu0 %v1158_v38  ;;  %1083 = vmatprep.mubr.msk.bf16.mxu1 %vm543_vm0, %v1160_v39 }
  0x5a   : > { %641 = vmatmul.mubr.bf16.gmra.mrb[20].mxu0 %v1161_v40  ;;  %1084 = vmatmul.mubr.msk.bf16.gmra.mrb[20].mxu1 %vm543_vm0, %v1162_v41 }
 0x105   : > { %v1009_v42 = vpop.f32.mrb[0].mxu0  ;;  %v1045_v43 = vpop.f32.mrb[0].mxu1 }
 0x106   : > { %v1010_v44 = vpop.f32.mrb[1].mxu0  ;;  %v1046_v45 = vpop.f32.mrb[1].mxu1 }
 0x107   : > { %v1011_v46 = vadd.f32 %v1010_v44, %v1009_v42  ;;  %v1012_v47 = vpop.f32.mrb[2].mxu0  ;;  %v1268_v48 = vadd.f32 %v1046_v45, %v1045_v43  ;;  %v1048_v49 = vpop.f32.mrb[2].mxu1 }
 0x108   : > { %v1013_v50 = vpop.f32.mrb[3].mxu0  ;;  %v1049_v51 = vpop.f32.mrb[3].mxu1 }
 0x109   : > { %v1014_v52 = vadd.f32 %v1013_v50, %v1012_v47  ;;  %v1270_v53 = vadd.f32 %v1049_v51, %v1048_v49 }
 0x10d   : > { %v1015_v54 = vpop.f32.mrb[4].mxu0  ;;  %v1051_v55 = vpop.f32.mrb[4].mxu1 }
 0x10e   : > { %v1016_v56 = vpop.f32.mrb[5].mxu0  ;;  %v1052_v57 = vpop.f32.mrb[5].mxu1 }
 0x10f   : > { %v1017_v58 = vadd.f32 %v1016_v56, %v1015_v54  ;;  %v1018_v59 = vpop.f32.mrb[6].mxu0  ;;  %v1272_v60 = vadd.f32 %v1052_v57, %v1051_v55  ;;  %v1054_v61 = vpop.f32.mrb[6].mxu1 }
 0x110   : > { %v1019_v62 = vpop.f32.mrb[7].mxu0  ;;  %v1055_v63 = vpop.f32.mrb[7].mxu1 }
 0x111   : > { %v1020_v0 = vadd.f32 %v1019_v62, %v1018_v59  ;;  %v1274_v1 = vadd.f32 %v1055_v63, %v1054_v61 }
 0x115   : > { %v1021_v2 = vpop.f32.mrb[8].mxu0  ;;  %v1073_v3 = vpop.f32.mrb[8].mxu1 }
 0x116   : > { %v708_v4 = vadd.f32 %v1073_v3, %v1017_v58  ;;  %v1022_v5 = vpop.f32.mrb[9].mxu0  ;;  %v699_v6 = vpop.f32.mrb[9].mxu1 }
 0x117   : > { %v1023_v7 = vadd.f32 %v1022_v5, %v1021_v2  ;;  %v700_v8 = vadd.f32 %v1011_v46, %v699_v6  ;;  %v1024_v9 = vpop.f32.mrb[10].mxu0  ;;  %v1074_v10 = vpop.f32.mrb[10].mxu1 }
 0x118   : > { %v711_v11 = vadd.f32 %v1074_v10, %v1020_v0  ;;  %v1025_v12 = vpop.f32.mrb[11].mxu0  ;;  %v702_v13 = vpop.f32.mrb[11].mxu1  ;;  %v771_v21 = vmul.f32 %v1280_v14, %v708_v4 }
 0x119   : > { %v1026_v15 = vadd.f32 %v1025_v12, %v1024_v9  ;;  %v703_v16 = vadd.f32 %v1014_v52, %v702_v13  ;;  %v769_v17 = vmul.f32 %v1280_v14, %v700_v8 }
 0x11a   : > { %v772_v30 = vmul.f32 %v1280_v14, %v711_v11  ;;  %v794_v37 = vadd.f32 %v1287_v18, %v771_v21 }
 0x11b   : > { %v770_v22 = vmul.f32 %v1280_v14, %v703_v16  ;;  %v792_v29 = vadd.f32 %v1287_v18, %v769_v17 }
 0x11c   : > { %v795_v44 = vadd.f32 %v1287_v18, %v772_v30  ;;  %v810_v52 = vmax.f32 %v794_v37, 0.0 }
 0x11d   : > { %v1027_v19 = vpop.f32.mrb[12].mxu0  ;;  %v1077_v20 = vpop.f32.mrb[12].mxu1  ;;  %v793_v38 = vadd.f32 %v1287_v18, %v770_v22  ;;  %v808_v43 = vmax.f32 %v792_v29, 0.0 }
 0x11e   : > { %v1028_v23 = vpop.f32.mrb[13].mxu0  ;;  %v715_v24 = vpop.f32.mrb[13].mxu1  ;;  %v811_v0 = vmax.f32 %v795_v44, 0.0 }
 0x11f   : > { %v1029_v25 = vadd.f32 %v1028_v23, %v1027_v19  ;;  %v716_v26 = vadd.f32 %v1023_v7, %v715_v24  ;;  %v1030_v27 = vpop.f32.mrb[14].mxu0  ;;  %v1078_v28 = vpop.f32.mrb[14].mxu1  ;;  %v809_v54 = vmax.f32 %v793_v38, 0.0 }
 0x120   : > { %v1031_v31 = vpop.f32.mrb[15].mxu0  ;;  %v718_v32 = vpop.f32.mrb[15].mxu1 }
 0x121   : > { %v724_v33 = vadd.f32 %v1077_v20, %v1029_v25  ;;  %v773_v34 = vmul.f32 %v1280_v14, %v716_v26  ;;  %v1032_v35 = vadd.f32 %v1031_v31, %v1030_v27  ;;  %v719_v36 = vadd.f32 %v1026_v15, %v718_v32 }
 0x123   : > { %v775_v39 = vmul.f32 %v1280_v14, %v724_v33  ;;  %v796_v40 = vadd.f32 %v1287_v18, %v773_v34  ;;  %v727_v41 = vadd.f32 %v1078_v28, %v1032_v35  ;;  %v774_v42 = vmul.f32 %v1280_v14, %v719_v36 }
 0x125   : > { %v798_v45 = vadd.f32 %v1287_v18, %v775_v39  ;;  %v812_v46 = vmax.f32 %v796_v40, 0.0  ;;  %v776_v47 = vmul.f32 %v1280_v14, %v727_v41  ;;  %v797_v49 = vadd.f32 %v1287_v18, %v774_v42  ;;  %v1033_v50 = vpop.f32.mrb[16].mxu0  ;;  %v1081_v51 = vpop.f32.mrb[16].mxu1 }
 0x126   : > { %v1034_v55 = vpop.f32.mrb[17].mxu0  ;;  %v731_v56 = vpop.f32.mrb[17].mxu1 }
 0x127   : > { %v814_v57 = vmax.f32 %v798_v45, 0.0  ;;  %v824_v58 = vadd.f32 %v812_v46, %v808_v43  ;;  %v799_v59 = vadd.f32 %v1287_v18, %v776_v47  ;;  %v813_v61 = vmax.f32 %v797_v49, 0.0  ;;  %v1036_v62 = vpop.f32.mrb[18].mxu0  ;;  %v1082_v63 = vpop.f32.mrb[18].mxu1 }
 0x128   : > { %v1035_v2 = vadd.f32 %v1034_v55, %v1033_v50  ;;  %v1037_v3 = vpop.f32.mrb[19].mxu0  ;;  %v734_v4 = vpop.f32.mrb[19].mxu1 }
 0x129   : > { %v826_v5 = vadd.f32 %v814_v57, %v810_v52  ;;  %v815_v6 = vmax.f32 %v799_v59, 0.0  ;;  %v825_v7 = vadd.f32 %v813_v61, %v809_v54  ;;  %v1038_v8 = vadd.f32 %v1037_v3, %v1036_v62 }
 0x12a   : > { %v732_v9 = vadd.f32 %v1035_v2, %v731_v56 }
 0x12b   : > { %v827_v10 = vadd.f32 %v815_v6, %v811_v0  ;;  %v735_v11 = vadd.f32 %v1038_v8, %v734_v4 }
 0x12c   : > { %v777_v12 = vmul.f32 %v1280_v14, %v732_v9 }
 0x12d   : > { %v778_v13 = vmul.f32 %v1280_v14, %v735_v11  ;;  %v1039_v15 = vpop.f32.mrb[20].mxu0  ;;  %v1085_v16 = vpop.f32.mrb[20].mxu1 }
 0x12e   : > { %v800_v17 = vadd.f32 %v1287_v18, %v777_v12  ;;  %v756_v19 = vadd.f32 %v1085_v16, %v1272_v60  ;;  %v1040_v20 = vpop.f32.mrb[21].mxu0  ;;  %v747_v21 = vpop.f32.mrb[21].mxu1 }
 0x12f   : > { %v801_v22 = vadd.f32 %v1287_v18, %v778_v13  ;;  %v1041_v23 = vadd.f32 %v1040_v20, %v1039_v15  ;;  %v748_v24 = vadd.f32 %v1268_v48, %v747_v21  ;;  %v1042_v25 = vpop.f32.mrb[22].mxu0  ;;  %v1086_v26 = vpop.f32.mrb[22].mxu1 }
 0x130   : > { %v816_v27 = vmax.f32 %v800_v17, 0.0  ;;  %v783_v28 = vmul.f32 %v1280_v14, %v756_v19  ;;  %v759_v29 = vadd.f32 %v1086_v26, %v1274_v1  ;;  %v1043_v30 = vpop.f32.mrb[23].mxu0  ;;  %v750_v31 = vpop.f32.mrb[23].mxu1 }
 0x131   : > { %v817_v32 = vmax.f32 %v801_v22, 0.0  ;;  %v740_v33 = vadd.f32 %v1081_v51, %v1041_v23  ;;  %v781_v60 = vmul.f32 %v1280_v14, %v748_v24  ;;  %v1044_v34 = vadd.f32 %v1043_v30, %v1042_v25 }
 0x132   : > { %v828_v35 = vadd.f32 %v824_v58, %v816_v27  ;;  %v784_v36 = vmul.f32 %v1280_v14, %v759_v29  ;;  %v751_v48 = vadd.f32 %v1270_v53, %v750_v31  ;;  %v806_v41 = vadd.f32 %v1287_v18, %v783_v28 }
 0x133   : > { %v829_v37 = vadd.f32 %v825_v7, %v817_v32  ;;  %v779_v38 = vmul.f32 %v1280_v14, %v740_v33  ;;  %v804_v39 = vadd.f32 %v1287_v18, %v781_v60  ;;  %v743_v40 = vadd.f32 %v1082_v63, %v1044_v34 }
 0x134   : > { %v782_v1 = vmul.f32 %v1280_v14, %v751_v48  ;;  %v807_v47 = vadd.f32 %v1287_v18, %v784_v36  ;;  %v822_v51 = vmax.f32 %v806_v41, 0.0 }
 0x135   : > { %v802_v42 = vadd.f32 %v1287_v18, %v779_v38  ;;  %v820_v43 = vmax.f32 %v804_v39, 0.0  ;;  %v780_v44 = vmul.f32 %v1280_v14, %v743_v40 }
 0x136   : > { %v805_v45 = vadd.f32 %v1287_v18, %v782_v1  ;;  %v823_v14 = vmax.f32 %v807_v47, 0.0 }
 0x137   : > { %v818_v46 = vmax.f32 %v802_v42, 0.0  ;;  %v832_v53 = vadd.f32 %v828_v35, %v820_v43  ;;  %v803_v49 = vadd.f32 %v1287_v18, %v780_v44 }
 0x138   : > { %v821_v50 = vmax.f32 %v805_v45, 0.0 }
 0x139   : > { %v830_v52 = vadd.f32 %v826_v5, %v818_v46  ;;  %v836_v54 = vmul.f32 0.25, %v832_v53  ;;  %v819_v55 = vmax.f32 %v803_v49, 0.0 }
 0x13a   : > { %v833_v56 = vadd.f32 %v829_v37, %v821_v50 }
 0x13b   : > { %v834_v57 = vadd.f32 %v830_v52, %v822_v51  ;;  %840 = vst [vmem:[%s245_s8] sm:$0xff] %v836_v54  ;;  %v831_v58 = vadd.f32 %v827_v10, %v819_v55 }
 0x13c   : > { %v837_v59 = vmul.f32 0.25, %v833_v56 }
 0x13d   : > { %v838_v61 = vmul.f32 0.25, %v834_v57  ;;  %v835_v62 = vadd.f32 %v831_v58, %v823_v14 }
 0x13e   : > { %841 = vst [vmem:[%s245_s8 + $0x8] sm:$0xff] %v837_v59 }
 0x13f   : > { %842 = vst [vmem:[%s245_s8 + $0x10] sm:$0xff] %v838_v61  ;;  %v839_v18 = vmul.f32 0.25, %v835_v62 }
 0x141   : > { %843 = vst [vmem:[%s245_s8 + $0x18] sm:$0xff] %v839_v18 }
 0x142 PF: > { %s14_s15 = sadd.s32 1, %s1169_s15  }
 0x143   : > { %p11_p4 = scmp.ge.s32.totalorder %s14_s15, 10  }
 0x145   :  { %13 = sbr.rel (!%p11_p4) target bundleno = 1 (0x1), region = 75 }

// kernel: testnet0_forward.11
= control target key start
LH: loop header
LB: loop body
LE: loop exit
PB: predicated region body
PF: predicated region fallthrough
CT: control target
= control target key end

     0   :  { %s963_s15 = smov 0   ;;  %s1030_s0 = inlined_call_operand.vmem [shape: bf16[2,32,512], index: 0, kind: input, shape index: {}]   ;;  %s1031_s1 = inlined_call_operand.vmem [shape: bf16[2,512,128], index: 1, kind: input, shape index: {}]   ;;  %s1032_s2 = inlined_call_operand.vmem [shape: f32[2,1,128], index: 2, kind: input, shape index: {}]   ;;  %s1033_s3 = inlined_call_operand.vmem [shape: f32[2,1,128], index: 3, kind: input, shape index: {}]   ;;  %s1034_s4 = inlined_call_operand.vmem [shape: f32[2,32,128], index: 4, kind: output, shape index: {}]  }
   0x1 LB: > { %s764_s16 = sadd.s32 4294967295, %s936_s15   ;;  %p768_p0 = scmp.ge.s32.totalorder %s936_s15, 1  ;;  %s936_s15 = sphi %s963_s15, %s14_s15  }
   0x2   : > { %p188_p1 = scmp.lt.s32.totalorder %s936_s15, 3 }
   0x4   : > { %p189_p2 = pnand %p768_p0, %p188_p1 }
   0x5   : > { %p225_p3 = scmp.lt.s32.totalorder (!%p189_p2), %s764_s16, 1 }
   0x6   : > { %192 = sbr.rel (%p189_p2) target bundleno = 285 (0x11d), region = 36 }
   0xd   : > { %s1036_s16 = smov (!%p225_p3, %s764_s16), 1 }
   0xe   : > { %s820_s17 = sshll.u32 %s1036_s16, 8  ;;  %s819_s21 = sshll.u32 %s1036_s16, 6 }
   0xf   : > { %s977_s20 = scalar_lea.vmem %s1031_s1, %s820_s17  ;;  %s229_s24 = scalar_lea.vmem %s1030_s0, %s819_s21 }
  0x10   : > { %v886_v0 = vld [vmem:[%s977_s20 + $0x40] sm:$0xff]   ;;  %v890_v4 = vld [vmem:[%s977_s20 + $0x48] sm:$0xff]   ;;  %v894_v8 = vld [vmem:[%s977_s20 + $0x50] sm:$0xff]   ;;  %s237_s27 = scalar_lea.vmem %s1032_s2, %s1036_s16  ;;  %s240_s30 = scalar_lea.vmem %s1033_s3, %s1036_s16 }
  0x11   : > { %v887_v1 = vld [vmem:[%s977_s20 + $0xc0] sm:$0xff]   ;;  %822 = vmatprep.subr.bf16.mxu0 %v886_v0  ;;  %v891_v5 = vld [vmem:[%s977_s20 + $0xc8] sm:$0xff]   ;;  %v895_v9 = vld [vmem:[%s977_s20 + $0xd0] sm:$0xff]   ;;  %s821_s5 = sshll.u32 %s1036_s16, 5 }
  0x12   : > { %v888_v2 = vld [vmem:[%s977_s20] sm:$0xff]   ;;  %850 = vmatprep.subr.bf16.mxu1 %v887_v1  ;;  %v892_v6 = vld [vmem:[%s977_s20 + $0x8] sm:$0xff]   ;;  %v896_v10 = vld [vmem:[%s977_s20 + $0x10] sm:$0xff]   ;;  %s245_s8 = scalar_lea.vmem %s1034_s4, %s821_s5 }
  0x13   : > { %v889_v3 = vld [vmem:[%s977_s20 + $0x80] sm:$0xff]   ;;  %823 = vmatpush3.bf16.msra.mxu0 %v888_v2  ;;  %v893_v7 = vld [vmem:[%s977_s20 + $0x88] sm:$0xff]   ;;  %v897_v11 = vld [vmem:[%s977_s20 + $0x90] sm:$0xff]  }
  0x14   : > { %851 = vmatpush3.bf16.msra.mxu1 %v889_v3  ;;  %824 = vmatprep.subr.bf16.mxu0 %v890_v4  ;;  %v898_v12 = vld [vmem:[%s977_s20 + $0x58] sm:$0xff]   ;;  %v902_v16 = vld [vmem:[%s977_s20 + $0x60] sm:$0xff]   ;;  %v906_v20 = vld [vmem:[%s977_s20 + $0x68] sm:$0xff]  }
  0x15   : > { %852 = vmatprep.subr.bf16.mxu1 %v891_v5  ;;  %v899_v13 = vld [vmem:[%s977_s20 + $0xd8] sm:$0xff]   ;;  %v903_v17 = vld [vmem:[%s977_s20 + $0xe0] sm:$0xff]   ;;  %v907_v21 = vld [vmem:[%s977_s20 + $0xe8] sm:$0xff]  }
  0x16   : > { %v900_v14 = vld [vmem:[%s977_s20 + $0x18] sm:$0xff]   ;;  %v904_v18 = vld [vmem:[%s977_s20 + $0x20] sm:$0xff]   ;;  %v908_v22 = vld [vmem:[%s977_s20 + $0x28] sm:$0xff]  }
  0x17   : > { %825 = vmatpush3.bf16.msra.mxu0 %v892_v6  ;;  %v901_v15 = vld [vmem:[%s977_s20 + $0x98] sm:$0xff]   ;;  %v905_v19 = vld [vmem:[%s977_s20 + $0xa0] sm:$0xff]   ;;  %v909_v23 = vld [vmem:[%s977_s20 + $0xa8] sm:$0xff]  }
  0x18   : > { %853 = vmatpush3.bf16.msra.mxu1 %v893_v7  ;;  %826 = vmatprep.subr.bf16.mxu0 %v894_v8  ;;  %v910_v24 = vld [vmem:[%s977_s20 + $0x70] sm:$0xff]   ;;  %v914_v28 = vld [vmem:[%s977_s20 + $0x78] sm:$0xff]   ;;  %v815_v49 = vld [vmem:[%s237_s27] ss:$0 sm:$0xff] }
  0x19   : > { %854 = vmatprep.subr.bf16.mxu1 %v895_v9  ;;  %v911_v25 = vld [vmem:[%s977_s20 + $0xf0] sm:$0xff]   ;;  %v915_v29 = vld [vmem:[%s977_s20 + $0xf8] sm:$0xff]   ;;  %v816_v54 = vld [vmem:[%s240_s30] ss:$0 sm:$0xff] }
  0x1a   : > { %v912_v26 = vld [vmem:[%s977_s20 + $0x30] sm:$0xff]   ;;  %v916_v30 = vld [vmem:[%s977_s20 + $0x38] sm:$0xff]  }
  0x1b   : > { %827 = vmatpush3.bf16.msra.mxu0 %v896_v10  ;;  %v913_v27 = vld [vmem:[%s977_s20 + $0xb0] sm:$0xff]   ;;  %v917_v31 = vld [vmem:[%s977_s20 + $0xb8] sm:$0xff]  }
  0x1c   : > { %855 = vmatpush3.bf16.msra.mxu1 %v897_v11  ;;  %828 = vmatprep.subr.bf16.mxu0 %v898_v12  ;;  %v918_v32 = vld [vmem:[%s229_s24] ss:$16 sps:$4 sm:$0xff]   ;;  %v920_v33 = vld [vmem:[%s229_s24 + $0x4] ss:$16 sps:$4 sm:$0xff]   ;;  %v921_v34 = vld [vmem:[%s229_s24 + $0x8] ss:$16 sps:$4 sm:$0xff]  }
  0x1d   : > { %856 = vmatprep.subr.bf16.mxu1 %v899_v13  ;;  %v923_v35 = vld [vmem:[%s229_s24 + $0xc] ss:$16 sps:$4 sm:$0xff]   ;;  %583 = vmatprep.mubr.bf16.mxu0 %v920_v33  ;;  %v924_v36 = vld [vmem:[%s229_s24 + $0x24] ss:$16 sps:$4 sm:$0xff]   ;;  %v928_v38 = vld [vmem:[%s229_s24 + $0x20] ss:$16 sps:$4 sm:$0xff]  }
  0x1e   : > { %632 = vmatprep.mubr.bf16.mxu1 %v923_v35  ;;  %v926_v37 = vld [vmem:[%s229_s24 + $0x2c] ss:$16 sps:$4 sm:$0xff]   ;;  %v929_v39 = vld [vmem:[%s229_s24 + $0x28] ss:$16 sps:$4 sm:$0xff]  }
  0x1f   : > { %829 = vmatpush3.bf16.msra.mxu0 %v900_v14 }
  0x20   : > { %857 = vmatpush3.bf16.msra.mxu1 %v901_v15  ;;  %830 = vmatprep.subr.bf16.mxu0 %v902_v16 }
  0x21   : > { %858 = vmatprep.subr.bf16.mxu1 %v903_v17 }
  0x23   : > { %831 = vmatpush3.bf16.msra.mxu0 %v904_v18 }
  0x24   : > { %859 = vmatpush3.bf16.msra.mxu1 %v905_v19  ;;  %832 = vmatprep.subr.bf16.mxu0 %v906_v20 }
  0x25   : > { %860 = vmatprep.subr.bf16.mxu1 %v907_v21 }
  0x27   : > { %833 = vmatpush3.bf16.msra.mxu0 %v908_v22 }
  0x28   : > { %861 = vmatpush3.bf16.msra.mxu1 %v909_v23  ;;  %834 = vmatprep.subr.bf16.mxu0 %v910_v24 }
  0x29   : > { %862 = vmatprep.subr.bf16.mxu1 %v911_v25 }
  0x2b   : > { %835 = vmatpush3.bf16.msra.mxu0 %v912_v26 }
  0x2c   : > { %863 = vmatpush3.bf16.msra.mxu1 %v913_v27  ;;  %836 = vmatprep.subr.bf16.mxu0 %v914_v28 }
  0x2d   : > { %864 = vmatprep.subr.bf16.mxu1 %v915_v29 }
  0x2f   : > { %837 = vmatpush3.bf16.msra.mxu0 %v916_v30 }
  0x30   : > { %865 = vmatpush3.bf16.msra.mxu1 %v917_v31 }
  0x32   : > { %584 = vmatmul.mubr.bf16.vlgmr.msra.gmra.mrb[0].mxu0 %v918_v32 }
  0x33   : > { %633 = vmatmul.mubr.bf16.vlgmr.msra.gmra.mrb[0].mxu1 %v921_v34  ;;  %591 = vmatprep.mubr.bf16.mxu0 %v924_v36 }
  0x34   : > { %640 = vmatprep.mubr.bf16.mxu1 %v926_v37 }
  0x3a   : > { %592 = vmatmul.mubr.bf16.gmra.mrb[4].mxu0 %v928_v38 }
  0x3b   : > { %641 = vmatmul.mubr.bf16.gmra.mrb[4].mxu1 %v929_v39 }
 0x105   : > { %v838_v40 = vpop.f32.mrb[0].mxu0 }
 0x106   : > { %v866_v41 = vpop.f32.mrb[0].mxu1  ;;  %v839_v42 = vpop.f32.mrb[1].mxu0 }
 0x107   : > { %v840_v43 = vadd.f32 %v839_v42, %v838_v40  ;;  %v867_v44 = vpop.f32.mrb[1].mxu1  ;;  %v841_v45 = vpop.f32.mrb[2].mxu0 }
 0x108   : > { %v868_v46 = vadd.f32 %v867_v44, %v866_v41  ;;  %v869_v47 = vpop.f32.mrb[2].mxu1  ;;  %v842_v48 = vpop.f32.mrb[3].mxu0 }
 0x109   : > { %v843_v50 = vadd.f32 %v842_v48, %v841_v45  ;;  %v870_v51 = vpop.f32.mrb[3].mxu1 }
 0x10a   : > { %v635_v52 = vadd.f32 %v868_v46, %v840_v43  ;;  %v871_v53 = vadd.f32 %v870_v51, %v869_v47 }
 0x10c   : > { %v656_v55 = vmul.f32 %v815_v49, %v635_v52  ;;  %v638_v56 = vadd.f32 %v871_v53, %v843_v50 }
 0x10d   : > { %v844_v57 = vpop.f32.mrb[4].mxu0 }
 0x10e   : > { %v667_v58 = vadd.f32 %v816_v54, %v656_v55  ;;  %v657_v59 = vmul.f32 %v815_v49, %v638_v56  ;;  %v872_v60 = vpop.f32.mrb[4].mxu1  ;;  %v845_v61 = vpop.f32.mrb[5].mxu0 }
 0x10f   : > { %v846_v62 = vadd.f32 %v845_v61, %v844_v57  ;;  %v873_v63 = vpop.f32.mrb[5].mxu1  ;;  %v847_v0 = vpop.f32.mrb[6].mxu0 }
 0x110   : > { %v671_v1 = vmax.f32 %v667_v58, 0.0  ;;  %v668_v2 = vadd.f32 %v816_v54, %v657_v59  ;;  %v874_v3 = vadd.f32 %v873_v63, %v872_v60  ;;  %v875_v4 = vpop.f32.mrb[6].mxu1  ;;  %v848_v5 = vpop.f32.mrb[7].mxu0 }
 0x111   : > { %v849_v6 = vadd.f32 %v848_v5, %v847_v0  ;;  %v876_v7 = vpop.f32.mrb[7].mxu1 }
 0x112   : > { %675 = vst [vmem:[%s245_s8] sm:$0xff] %v671_v1  ;;  %v672_v8 = vmax.f32 %v668_v2, 0.0  ;;  %v643_v9 = vadd.f32 %v874_v3, %v846_v62  ;;  %v877_v10 = vadd.f32 %v876_v7, %v875_v4 }
 0x114   : > { %676 = vst [vmem:[%s245_s8 + $0x8] sm:$0xff] %v672_v8  ;;  %v658_v11 = vmul.f32 %v815_v49, %v643_v9  ;;  %v646_v12 = vadd.f32 %v877_v10, %v849_v6 }
 0x116   : > { %v669_v13 = vadd.f32 %v816_v54, %v658_v11  ;;  %v659_v14 = vmul.f32 %v815_v49, %v646_v12 }
 0x118   : > { %v673_v15 = vmax.f32 %v669_v13, 0.0  ;;  %v670_v16 = vadd.f32 %v816_v54, %v659_v14 }
 0x11a   : > { %677 = vst [vmem:[%s245_s8 + $0x10] sm:$0xff] %v673_v15  ;;  %v674_v17 = vmax.f32 %v670_v16, 0.0 }
 0x11c   : > { %678 = vst [vmem:[%s245_s8 + $0x18] sm:$0xff] %v674_v17 }
 0x11d PF: > { %s14_s15 = sadd.s32 1, %s936_s15  }
 0x11e   : > { %p11_p4 = scmp.ge.s32.totalorder %s14_s15, 4  }
 0x120   :  { %13 = sbr.rel (!%p11_p4) target bundleno = 1 (0x1), region = 75 }

// kernel: testnet0_forward.12
= control target key start
LH: loop header
LB: loop body
LE: loop exit
PB: predicated region body
PF: predicated region fallthrough
CT: control target
= control target key end

     0   :  { %v288_v36 = vlaneseq  ;;  %vm335_vm0 = vcmask 130048   ;;  %s636_s1 = inlined_call_operand.vmem [shape: bf16[1,256,144], index: 1, kind: input, shape index: {}]   ;;  %s637_s0 = inlined_call_operand.vmem [shape: bf16[1,32,256], index: 0, kind: input, shape index: {}]   ;;  %s638_s2 = inlined_call_operand.vmem [shape: f32[1,1,144], index: 2, kind: input, shape index: {}]   ;;  %s639_s3 = inlined_call_operand.vmem [shape: f32[1,1,144], index: 3, kind: input, shape index: {}]   ;;  %s640_s4 = inlined_call_operand.vmem [shape: f32[1,32,144], index: 4, kind: output, shape index: {}]  }
   0x1   :  { %v415_v0 = vld [vmem:[%s636_s1 + $0x4] ss:$8 sps:$4 sm:$0xff]   ;;  %v417_v1 = vld [vmem:[%s636_s1] ss:$8 sps:$4 sm:$0xff]   ;;  %v418_v2 = vld [vmem:[%s636_s1 + $0x14] ss:$8 sps:$4 sm:$0xff]  }
   0x2   :  { %233 = vmatprep.subr.bf16.mxu0 %v415_v0  ;;  %383 = vmatprep.subr.bf16.mxu1 %v415_v0  ;;  %v420_v3 = vld [vmem:[%s636_s1 + $0x10] ss:$8 sps:$4 sm:$0xff]   ;;  %v421_v4 = vld [vmem:[%s636_s1 + $0x24] ss:$8 sps:$4 sm:$0xff]   ;;  %v423_v5 = vld [vmem:[%s636_s1 + $0x20] ss:$8 sps:$4 sm:$0xff]  }
   0x3   :  { %234 = vmatpush1.bf16.msra.mxu0 %v417_v1  ;;  %399 = vmatpush1.bf16.msra.mxu1 %v417_v1  ;;  %v424_v6 = vld [vmem:[%s636_s1 + $0x34] ss:$8 sps:$4 sm:$0xff]   ;;  %v426_v7 = vld [vmem:[%s636_s1 + $0x30] ss:$8 sps:$4 sm:$0xff]   ;;  %v427_v8 = vld [vmem:[%s636_s1 + $0x44] ss:$8 sps:$4 sm:$0xff]  }
   0x4   :  { %235 = vmatprep.subr.bf16.mxu0 %v418_v2  ;;  %384 = vmatprep.subr.bf16.mxu1 %v418_v2  ;;  %v429_v9 = vld [vmem:[%s636_s1 + $0x40] ss:$8 sps:$4 sm:$0xff]   ;;  %v430_v10 = vld [vmem:[%s636_s1 + $0x54] ss:$8 sps:$4 sm:$0xff]   ;;  %v432_v11 = vld [vmem:[%s636_s1 + $0x50] ss:$8 sps:$4 sm:$0xff]  }
   0x5   :  { %v433_v12 = vld [vmem:[%s636_s1 + $0x64] ss:$8 sps:$4 sm:$0xff]   ;;  %v435_v14 = vld [vmem:[%s636_s1 + $0x60] ss:$8 sps:$4 sm:$0xff]   ;;  %v468_v15 = vld [vmem:[%s637_s0 + $0x14] ss:$8 sps:$4 sm:$0xff]  }
   0x6   :  { %v465_v13 = vld [vmem:[%s637_s0 + $0x4] ss:$8 sps:$4 sm:$0xff]   ;;  %v436_v16 = vld [vmem:[%s636_s1 + $0x74] ss:$8 sps:$4 sm:$0xff]   ;;  %275 = vmatprep.mubr.bf16.mxu1 %v468_v15  ;;  %v438_v17 = vld [vmem:[%s636_s1 + $0x70] ss:$8 sps:$4 sm:$0xff]  }
   0x7   :  { %236 = vmatpush1.bf16.msra.mxu0 %v420_v3  ;;  %400 = vmatpush1.bf16.msra.mxu1 %v420_v3  ;;  %v439_v18 = vld [vmem:[%s636_s1 + $0x84] ss:$8 sps:$4 sm:$0xff]   ;;  %v441_v19 = vld [vmem:[%s636_s1 + $0x80] ss:$8 sps:$4 sm:$0xff]   ;;  %v442_v20 = vld [vmem:[%s636_s1 + $0x94] ss:$8 sps:$4 sm:$0xff]  }
   0x8   :  { %237 = vmatprep.subr.bf16.mxu0 %v421_v4  ;;  %385 = vmatprep.subr.bf16.mxu1 %v421_v4  ;;  %v444_v21 = vld [vmem:[%s636_s1 + $0x90] ss:$8 sps:$4 sm:$0xff]   ;;  %v445_v22 = vld [vmem:[%s636_s1 + $0xa4] ss:$8 sps:$4 sm:$0xff]   ;;  %v447_v23 = vld [vmem:[%s636_s1 + $0xa0] ss:$8 sps:$4 sm:$0xff]  }
   0x9   :  { %265 = vmatprep.mubr.bf16.mxu0 %v465_v13  ;;  %v448_v24 = vld [vmem:[%s636_s1 + $0xb4] ss:$8 sps:$4 sm:$0xff]   ;;  %v450_v25 = vld [vmem:[%s636_s1 + $0xb0] ss:$8 sps:$4 sm:$0xff]   ;;  %v451_v26 = vld [vmem:[%s636_s1 + $0xc4] ss:$8 sps:$4 sm:$0xff]  }
   0xa   :  { %v453_v27 = vld [vmem:[%s636_s1 + $0xc0] ss:$8 sps:$4 sm:$0xff]   ;;  %v454_v28 = vld [vmem:[%s636_s1 + $0xd4] ss:$8 sps:$4 sm:$0xff]   ;;  %v456_v29 = vld [vmem:[%s636_s1 + $0xd0] ss:$8 sps:$4 sm:$0xff]  }
   0xb   :  { %238 = vmatpush1.bf16.msra.mxu0 %v423_v5  ;;  %401 = vmatpush1.bf16.msra.mxu1 %v423_v5  ;;  %v457_v30 = vld [vmem:[%s636_s1 + $0xe4] ss:$8 sps:$4 sm:$0xff]   ;;  %v459_v31 = vld [vmem:[%s636_s1 + $0xe0] ss:$8 sps:$4 sm:$0xff]   ;;  %v460_v32 = vld [vmem:[%s636_s1 + $0xf4] ss:$8 sps:$4 sm:$0xff]  }
   0xc   :  { %239 = vmatprep.subr.bf16.mxu0 %v424_v6  ;;  %386 = vmatprep.subr.bf16.mxu1 %v424_v6  ;;  %v462_v33 = vld [vmem:[%s636_s1 + $0xf0] ss:$8 sps:$4 sm:$0xff]   ;;  %v463_v34 = vld [vmem:[%s637_s0] ss:$8 sps:$4 sm:$0xff]   ;;  %v289_v37 = vshrl.u32 %v288_v36, 7 }
   0xd   :  { %v466_v35 = vld [vmem:[%s637_s0 + $0x10] ss:$8 sps:$4 sm:$0xff]   ;;  %v286_v39 = vld [vmem:[%s638_s2] sm:$0x3] }
   0xe   :  { %v290_v38 = vsub.s32 0, %v289_v37  ;;  %v294_v40 = vsub.s32 1, %v289_v37  ;;  %v306_v41 = vld [vmem:[%s639_s3] sm:$0x3] }
   0xf   :  { %240 = vmatpush1.bf16.msra.mxu0 %v426_v7  ;;  %402 = vmatpush1.bf16.msra.mxu1 %v426_v7 }
  0x10   :  { %241 = vmatprep.subr.bf16.mxu0 %v427_v8  ;;  %387 = vmatprep.subr.bf16.mxu1 %v427_v8  ;;  %v291_v42 = vrot.slane %v286_v39, %v290_v38  ;;  %v295_v43 = vrot.slane %v286_v39, %v294_v40  ;;  %v311_v44 = vrot.slane %v306_v41, %v290_v38 }
  0x11   :  { %v315_v47 = vrot.slane %v306_v41, %v294_v40 }
  0x13   :  { %242 = vmatpush1.bf16.msra.mxu0 %v429_v9  ;;  %403 = vmatpush1.bf16.msra.mxu1 %v429_v9 }
  0x14   :  { %243 = vmatprep.subr.bf16.mxu0 %v430_v10  ;;  %388 = vmatprep.subr.bf16.mxu1 %v430_v10 }
  0x17   :  { %244 = vmatpush1.bf16.msra.mxu0 %v432_v11  ;;  %404 = vmatpush1.bf16.msra.mxu1 %v432_v11 }
  0x18   :  { %245 = vmatprep.subr.bf16.mxu0 %v433_v12  ;;  %389 = vmatprep.subr.bf16.mxu1 %v433_v12 }
  0x1b   :  { %246 = vmatpush1.bf16.msra.mxu0 %v435_v14  ;;  %405 = vmatpush1.bf16.msra.mxu1 %v435_v14 }
  0x1c   :  { %247 = vmatprep.subr.bf16.mxu0 %v436_v16  ;;  %390 = vmatprep.subr.bf16.mxu1 %v436_v16 }
  0x1f   :  { %248 = vmatpush1.bf16.msra.mxu0 %v438_v17  ;;  %406 = vmatpush1.bf16.msra.mxu1 %v438_v17 }
  0x20   :  { %249 = vmatprep.subr.bf16.mxu0 %v439_v18  ;;  %391 = vmatprep.subr.bf16.mxu1 %v439_v18 }
  0x23   :  { %250 = vmatpush1.bf16.msra.mxu0 %v441_v19  ;;  %407 = vmatpush1.bf16.msra.mxu1 %v441_v19 }
  0x24   :  { %251 = vmatprep.subr.bf16.mxu0 %v442_v20  ;;  %392 = vmatprep.subr.bf16.mxu1 %v442_v20 }
  0x27   :  { %252 = vmatpush1.bf16.msra.mxu0 %v444_v21  ;;  %408 = vmatpush1.bf16.msra.mxu1 %v444_v21 }
  0x28   :  { %253 = vmatprep.subr.bf16.mxu0 %v445_v22  ;;  %393 = vmatprep.subr.bf16.mxu1 %v445_v22 }
  0x2b   :  { %254 = vmatpush1.bf16.msra.mxu0 %v447_v23  ;;  %409 = vmatpush1.bf16.msra.mxu1 %v447_v23 }
  0x2c   :  { %255 = vmatprep.subr.bf16.mxu0 %v448_v24  ;;  %394 = vmatprep.subr.bf16.mxu1 %v448_v24 }
  0x2f   :  { %256 = vmatpush1.bf16.msra.mxu0 %v450_v25  ;;  %410 = vmatpush1.bf16.msra.mxu1 %v450_v25 }
  0x30   :  { %257 = vmatprep.subr.bf16.mxu0 %v451_v26  ;;  %395 = vmatprep.subr.bf16.mxu1 %v451_v26 }
  0x33   :  { %258 = vmatpush1.bf16.msra.mxu0 %v453_v27  ;;  %411 = vmatpush1.bf16.msra.mxu1 %v453_v27 }
  0x34   :  { %259 = vmatprep.subr.bf16.mxu0 %v454_v28  ;;  %396 = vmatprep.subr.bf16.mxu1 %v454_v28 }
  0x37   :  { %260 = vmatpush1.bf16.msra.mxu0 %v456_v29  ;;  %412 = vmatpush1.bf16.msra.mxu1 %v456_v29 }
  0x38   :  { %261 = vmatprep.subr.bf16.mxu0 %v457_v30  ;;  %397 = vmatprep.subr.bf16.mxu1 %v457_v30 }
  0x3b   :  { %262 = vmatpush1.bf16.msra.mxu0 %v459_v31  ;;  %413 = vmatpush1.bf16.msra.mxu1 %v459_v31 }
  0x3c   :  { %263 = vmatprep.subr.bf16.mxu0 %v460_v32  ;;  %398 = vmatprep.subr.bf16.mxu1 %v460_v32 }
  0x3f   :  { %264 = vmatpush1.bf16.msra.mxu0 %v462_v33  ;;  %414 = vmatpush1.bf16.msra.mxu1 %v462_v33 }
  0x42   :  { %266 = vmatmul.mubr.bf16.vlgmr.msra.gmra.mrb[0].mxu0 %v463_v34  ;;  %276 = vmatmul.mubr.bf16.vlgmr.msra.gmra.mrb[0].mxu1 %v466_v35 }
 0x115   :  { %v267_v45 = vpop.f32.mrb[0].mxu0  ;;  %v277_v46 = vpop.f32.mrb[0].mxu1 }
 0x116   :  { %v298_v48 = vmul.f32 %v291_v42, %v267_v45  ;;  %v302_v49 = vmul.f32 %v291_v42, %v277_v46  ;;  %v269_v50 = vpop.f32.mrb[1].mxu0  ;;  %v279_v51 = vpop.f32.mrb[1].mxu1 }
 0x117   :  { %v299_v52 = vmul.f32 %v295_v43, %v269_v50  ;;  %v303_v53 = vmul.f32 %v295_v43, %v279_v51  ;;  %v271_v54 = vpop.f32.mrb[2].mxu0  ;;  %v281_v55 = vpop.f32.mrb[2].mxu1 }
 0x118   :  { %v318_v56 = vadd.f32 %v311_v44, %v298_v48  ;;  %v322_v57 = vadd.f32 %v311_v44, %v302_v49  ;;  %v300_v58 = vmul.f32 %v291_v42, %v271_v54  ;;  %v304_v59 = vmul.f32 %v291_v42, %v281_v55  ;;  %v273_v60 = vpop.f32.mrb[3].mxu0  ;;  %v283_v61 = vpop.f32.mrb[3].mxu1 }
 0x119   :  { %v319_v62 = vadd.f32 %v315_v47, %v299_v52  ;;  %v323_v63 = vadd.f32 %v315_v47, %v303_v53  ;;  %v301_v0 = vmul.f32 %v295_v43, %v273_v60  ;;  %v305_v1 = vmul.f32 %v295_v43, %v283_v61 }
 0x11a   :  { %v326_v2 = vmax.f32 %v318_v56, 0.0  ;;  %v330_v3 = vmax.f32 %v322_v57, 0.0  ;;  %v320_v4 = vadd.f32 %v311_v44, %v300_v58  ;;  %v324_v5 = vadd.f32 %v311_v44, %v304_v59 }
 0x11b   :  { %v327_v6 = vmax.f32 %v319_v62, 0.0  ;;  %v331_v7 = vmax.f32 %v323_v63, 0.0  ;;  %v321_v8 = vadd.f32 %v315_v47, %v301_v0  ;;  %v325_v9 = vadd.f32 %v315_v47, %v305_v1 }
 0x11c   :  { %334 = vst [vmem:[%s640_s4] sm:$0xff] %v326_v2  ;;  %339 = vst [vmem:[%s640_s4 + $0x20] sm:$0xff] %v330_v3  ;;  %v328_v10 = vmax.f32 %v320_v4, 0.0  ;;  %v332_v11 = vmax.f32 %v324_v5, 0.0 }
 0x11d   :  { %336 = vst.msk [vmem:[%s640_s4 + $0x8] sm:$0xff] %vm335_vm0, %v327_v6  ;;  %340 = vst.msk [vmem:[%s640_s4 + $0x28] sm:$0xff] %vm335_vm0, %v331_v7  ;;  %v329_v12 = vmax.f32 %v321_v8, 0.0  ;;  %v333_v13 = vmax.f32 %v325_v9, 0.0 }
 0x11e   :  { %337 = vst [vmem:[%s640_s4 + $0x10] sm:$0xff] %v328_v10  ;;  %341 = vst [vmem:[%s640_s4 + $0x30] sm:$0xff] %v332_v11 }
 0x11f   :  { %338 = vst.msk [vmem:[%s640_s4 + $0x18] sm:$0xff] %vm335_vm0, %v329_v12  ;;  %342 = vst.msk [vmem:[%s640_s4 + $0x38] sm:$0xff] %vm335_vm0, %v333_v13 }

// kernel: testnet0_forward.13
= control target key start
LH: loop header
LB: loop body
LE: loop exit
PB: predicated region body
PF: predicated region fallthrough
CT: control target
= control target key end

     0   :  { %s600_s15 = smov 0   ;;  %s633_s0 = inlined_call_operand.vmem [shape: bf16[4,32,128], index: 0, kind: input, shape index: {}]   ;;  %s634_s1 = inlined_call_operand.vmem [shape: bf16[4,128,128], index: 1, kind: input, shape index: {}]   ;;  %s635_s2 = inlined_call_operand.vmem [shape: f32[4,1,128], index: 2, kind: input, shape index: {}]   ;;  %s636_s3 = inlined_call_operand.vmem [shape: f32[4,1,128], index: 3, kind: input, shape index: {}]   ;;  %s637_s4 = inlined_call_operand.vmem [shape: f32[4,32,128], index: 4, kind: output, shape index: {}]  }
   0x1 LB: > { %s491_s16 = sadd.s32 4294967295, %s573_s15   ;;  %p495_p0 = scmp.ge.s32.totalorder %s573_s15, 1  ;;  %s573_s15 = sphi %s600_s15, %s14_s15  }
   0x2   : > { %p188_p1 = scmp.lt.s32.totalorder %s573_s15, 5 }
   0x4   : > { %p189_p2 = pnand %p495_p0, %p188_p1 }
   0x5   : > { %p225_p3 = scmp.lt.s32.totalorder (!%p189_p2), %s491_s16, 3 }
   0x6   : > { %192 = sbr.rel (%p189_p2) target bundleno = 271 (0x10f), region = 36 }
   0xd   : > { %s639_s16 = smov (!%p225_p3, %s491_s16), 3 }
   0xe   : > { %s517_s17 = sshll.u32 %s639_s16, 6  ;;  %s516_s21 = sshll.u32 %s639_s16, 4 }
   0xf   : > { %s234_s20 = scalar_lea.vmem %s634_s1, %s517_s17  ;;  %s229_s24 = scalar_lea.vmem %s633_s0, %s516_s21 }
  0x10   : > { %v557_v0 = vld [vmem:[%s234_s20] sm:$0xff]   ;;  %v558_v1 = vld [vmem:[%s234_s20 + $0x8] sm:$0xff]   ;;  %v559_v2 = vld [vmem:[%s234_s20 + $0x10] sm:$0xff]   ;;  %s237_s27 = scalar_lea.vmem %s635_s2, %s639_s16  ;;  %s240_s30 = scalar_lea.vmem %s636_s3, %s639_s16 }
  0x11   : > { %529 = vmatprep.subr.bf16.mxu0 %v557_v0  ;;  %v560_v3 = vld [vmem:[%s234_s20 + $0x18] sm:$0xff]   ;;  %v565_v4 = vld [vmem:[%s229_s24] sm:$0xff]   ;;  %v562_v6 = vld [vmem:[%s234_s20 + $0x28] sm:$0xff]   ;;  %s518_s5 = sshll.u32 %s639_s16, 5 }
  0x12   : > { %530 = vmatpush3.bf16.msra.mxu0 %v557_v0  ;;  %545 = vmatprep.mubr.bf16.mxu0 %v565_v4  ;;  %v561_v5 = vld [vmem:[%s234_s20 + $0x20] sm:$0xff]   ;;  %v563_v7 = vld [vmem:[%s234_s20 + $0x30] sm:$0xff]   ;;  %v564_v8 = vld [vmem:[%s234_s20 + $0x38] sm:$0xff]   ;;  %s245_s8 = scalar_lea.vmem %s637_s4, %s518_s5 }
  0x13   : > { %531 = vmatprep.subr.bf16.mxu0 %v558_v1  ;;  %v566_v9 = vld [vmem:[%s229_s24 + $0x8] sm:$0xff]   ;;  %v512_v10 = vld [vmem:[%s237_s27] ss:$0 sm:$0xff] }
  0x14   : > { %v513_v12 = vld [vmem:[%s240_s30] ss:$0 sm:$0xff] }
  0x16   : > { %532 = vmatpush3.bf16.msra.mxu0 %v558_v1 }
  0x17   : > { %533 = vmatprep.subr.bf16.mxu0 %v559_v2 }
  0x1a   : > { %534 = vmatpush3.bf16.msra.mxu0 %v559_v2 }
  0x1b   : > { %535 = vmatprep.subr.bf16.mxu0 %v560_v3 }
  0x1e   : > { %536 = vmatpush3.bf16.msra.mxu0 %v560_v3 }
  0x1f   : > { %537 = vmatprep.subr.bf16.mxu0 %v561_v5 }
  0x22   : > { %538 = vmatpush3.bf16.msra.mxu0 %v561_v5 }
  0x23   : > { %539 = vmatprep.subr.bf16.mxu0 %v562_v6 }
  0x26   : > { %540 = vmatpush3.bf16.msra.mxu0 %v562_v6 }
  0x27   : > { %541 = vmatprep.subr.bf16.mxu0 %v563_v7 }
  0x2a   : > { %542 = vmatpush3.bf16.msra.mxu0 %v563_v7 }
  0x2b   : > { %543 = vmatprep.subr.bf16.mxu0 %v564_v8 }
  0x2e   : > { %544 = vmatpush3.bf16.msra.mxu0 %v564_v8 }
  0x31   : > { %546 = vmatmul.mubr.bf16.vlgmr.msra.gmra.mrb[0].mxu0 %v566_v9 }
 0x104   : > { %v547_v11 = vpop.f32.mrb[0].mxu0 }
 0x105   : > { %v385_v13 = vmul.f32 %v547_v11, %v512_v10  ;;  %v361_v14 = vpop.f32.mrb[1].mxu0 }
 0x106   : > { %v383_v15 = vmul.f32 %v512_v10, %v361_v14  ;;  %v548_v16 = vpop.f32.mrb[2].mxu0 }
 0x107   : > { %v396_v17 = vadd.f32 %v513_v12, %v385_v13  ;;  %v386_v18 = vmul.f32 %v548_v16, %v512_v10  ;;  %v364_v19 = vpop.f32.mrb[3].mxu0 }
 0x108   : > { %v394_v20 = vadd.f32 %v513_v12, %v383_v15  ;;  %v384_v21 = vmul.f32 %v512_v10, %v364_v19 }
 0x109   : > { %v400_v22 = vmax.f32 %v396_v17, 0.0  ;;  %v397_v23 = vadd.f32 %v513_v12, %v386_v18 }
 0x10a   : > { %v398_v24 = vmax.f32 %v394_v20, 0.0  ;;  %v395_v25 = vadd.f32 %v513_v12, %v384_v21 }
 0x10b   : > { %404 = vst [vmem:[%s245_s8 + $0x10] sm:$0xff] %v400_v22  ;;  %v401_v26 = vmax.f32 %v397_v23, 0.0 }
 0x10c   : > { %402 = vst [vmem:[%s245_s8] sm:$0xff] %v398_v24  ;;  %v399_v27 = vmax.f32 %v395_v25, 0.0 }
 0x10d   : > { %405 = vst [vmem:[%s245_s8 + $0x18] sm:$0xff] %v401_v26 }
 0x10e   : > { %403 = vst [vmem:[%s245_s8 + $0x8] sm:$0xff] %v399_v27 }
 0x10f PF: > { %s14_s15 = sadd.s32 1, %s573_s15  }
 0x110   : > { %p11_p4 = scmp.ge.s32.totalorder %s14_s15, 6  }
 0x112   :  { %13 = sbr.rel (!%p11_p4) target bundleno = 1 (0x1), region = 75 }

// kernel: testnet0_forward.14
= control target key start
LH: loop header
LB: loop body
LE: loop exit
PB: predicated region body
PF: predicated region fallthrough
CT: control target
= control target key end

     0   :  { %vm626_vm0 = vcmask 130048   ;;  %s1146_s1 = inlined_call_operand.vmem [shape: bf16[1,384,16], index: 1, kind: input, shape index: {}]   ;;  %s1147_s0 = inlined_call_operand.vmem [shape: bf16[1,128,384], index: 0, kind: input, shape index: {}]   ;;  %s1148_s2 = inlined_call_operand.vmem [shape: f32[1,1,16], index: 2, kind: input, shape index: {}]   ;;  %s1149_s3 = inlined_call_operand.vmem [shape: f32[1,1,16], index: 3, kind: input, shape index: {}]   ;;  %s1150_s4 = inlined_call_operand.vmem [shape: f32[1,128,16], index: 4, kind: output, shape index: {}]  }
   0x1   :  { %v809_v0 = vld [vmem:[%s1146_s1 + $0x40] sm:$0xff]   ;;  %v812_v3 = vld [vmem:[%s1146_s1 + $0x48] sm:$0xff]   ;;  %v815_v6 = vld [vmem:[%s1146_s1 + $0x50] sm:$0xff]  }
   0x2   :  { %v810_v1 = vld [vmem:[%s1146_s1] sm:$0xff]   ;;  %697 = vmatprep.subr.bf16.mxu0 %v809_v0  ;;  %v813_v4 = vld [vmem:[%s1146_s1 + $0x8] sm:$0xff]   ;;  %v816_v7 = vld [vmem:[%s1146_s1 + $0x10] sm:$0xff]  }
   0x3   :  { %v811_v2 = vld [vmem:[%s1146_s1 + $0x80] sm:$0xff]   ;;  %698 = vmatpush3.bf16.msra.mxu0 %v810_v1  ;;  %v814_v5 = vld [vmem:[%s1146_s1 + $0x88] sm:$0xff]   ;;  %v817_v8 = vld [vmem:[%s1146_s1 + $0x90] sm:$0xff]  }
   0x4   :  { %777 = vmatprep.subr.bf16.mxu1 %v811_v2  ;;  %699 = vmatprep.subr.bf16.mxu0 %v812_v3  ;;  %v818_v9 = vld [vmem:[%s1146_s1 + $0x58] sm:$0xff]   ;;  %v821_v12 = vld [vmem:[%s1146_s1 + $0x60] sm:$0xff]   ;;  %v824_v15 = vld [vmem:[%s1146_s1 + $0x68] sm:$0xff]  }
   0x5   :  { %778 = vmatpush3.bf16.msra.mxu1 %v811_v2  ;;  %v819_v10 = vld [vmem:[%s1146_s1 + $0x18] sm:$0xff]   ;;  %v823_v13 = vld [vmem:[%s1146_s1 + $0xa0] sm:$0xff]   ;;  %v826_v16 = vld [vmem:[%s1146_s1 + $0xa8] sm:$0xff]  }
   0x6   :  { %779 = vmatprep.subr.bf16.mxu1 %v814_v5  ;;  %v820_v11 = vld [vmem:[%s1146_s1 + $0x98] sm:$0xff]   ;;  %v822_v14 = vld [vmem:[%s1146_s1 + $0x20] sm:$0xff]   ;;  %v825_v17 = vld [vmem:[%s1146_s1 + $0x28] sm:$0xff]  }
   0x7   :  { %700 = vmatpush3.bf16.msra.mxu0 %v813_v4  ;;  %v827_v18 = vld [vmem:[%s1146_s1 + $0x70] sm:$0xff]   ;;  %v830_v21 = vld [vmem:[%s1146_s1 + $0x78] sm:$0xff]   ;;  %v833_v26 = vld [vmem:[%s1147_s0] ss:$12 sps:$4 sm:$0xff]  }
   0x8   :  { %701 = vmatprep.subr.bf16.mxu0 %v815_v6  ;;  %v828_v19 = vld [vmem:[%s1146_s1 + $0x30] sm:$0xff]   ;;  %v832_v22 = vld [vmem:[%s1146_s1 + $0xb8] sm:$0xff]   ;;  %v837_v28 = vld [vmem:[%s1147_s0 + $0x20] ss:$12 sps:$4 sm:$0xff]  }
   0x9   :  { %780 = vmatpush3.bf16.msra.mxu1 %v814_v5  ;;  %v829_v20 = vld [vmem:[%s1146_s1 + $0xb0] sm:$0xff]   ;;  %v831_v25 = vld [vmem:[%s1146_s1 + $0x38] sm:$0xff]   ;;  %v853_v36 = vld [vmem:[%s1147_s0 + $0x80] ss:$12 sps:$4 sm:$0xff]  }
   0xa   :  { %781 = vmatprep.subr.bf16.mxu1 %v817_v8  ;;  %v835_v23 = vld [vmem:[%s1147_s0 + $0x4] ss:$12 sps:$4 sm:$0xff]   ;;  %v836_v24 = vld [vmem:[%s1147_s0 + $0x8] ss:$12 sps:$4 sm:$0xff]   ;;  %v846_v35 = vld [vmem:[%s1147_s0 + $0x4c] ss:$12 sps:$4 sm:$0xff]  }
   0xb   :  { %702 = vmatpush3.bf16.msra.mxu0 %v816_v7  ;;  %402 = vmatprep.mubr.bf16.mxu0 %v835_v23  ;;  %v838_v27 = vld [vmem:[%s1147_s0 + $0x1c] ss:$12 sps:$4 sm:$0xff]   ;;  %v844_v29 = vld [vmem:[%s1147_s0 + $0x38] ss:$12 sps:$4 sm:$0xff]   ;;  %v841_v31 = vld [vmem:[%s1147_s0 + $0x34] ss:$12 sps:$4 sm:$0xff]  }
   0xc   :  { %703 = vmatprep.subr.bf16.mxu0 %v818_v9  ;;  %793 = vmatprep.mubr.bf16.mxu1 %v836_v24  ;;  %v840_v30 = vld [vmem:[%s1147_s0 + $0x18] ss:$12 sps:$4 sm:$0xff]   ;;  %v845_v32 = vld [vmem:[%s1147_s0 + $0x50] ss:$12 sps:$4 sm:$0xff]   ;;  %v852_v33 = vld [vmem:[%s1147_s0 + $0x68] ss:$12 sps:$4 sm:$0xff]  }
   0xd   :  { %782 = vmatpush3.bf16.msra.mxu1 %v817_v8  ;;  %v843_v34 = vld [vmem:[%s1147_s0 + $0x30] ss:$12 sps:$4 sm:$0xff]   ;;  %v860_v37 = vld [vmem:[%s1147_s0 + $0x98] ss:$12 sps:$4 sm:$0xff]   ;;  %v848_v38 = vld [vmem:[%s1147_s0 + $0x48] ss:$12 sps:$4 sm:$0xff]  }
   0xe   :  { %783 = vmatprep.subr.bf16.mxu1 %v820_v11  ;;  %v849_v39 = vld [vmem:[%s1147_s0 + $0x64] ss:$12 sps:$4 sm:$0xff]   ;;  %v851_v41 = vld [vmem:[%s1147_s0 + $0x60] ss:$12 sps:$4 sm:$0xff]   ;;  %v854_v42 = vld [vmem:[%s1147_s0 + $0x7c] ss:$12 sps:$4 sm:$0xff]  }
   0xf   :  { %704 = vmatpush3.bf16.msra.mxu0 %v819_v10  ;;  %v861_v40 = vld [vmem:[%s1147_s0 + $0xb0] ss:$12 sps:$4 sm:$0xff]   ;;  %v856_v43 = vld [vmem:[%s1147_s0 + $0x78] ss:$12 sps:$4 sm:$0xff]   ;;  %v857_v44 = vld [vmem:[%s1147_s0 + $0x94] ss:$12 sps:$4 sm:$0xff]  }
  0x10   :  { %705 = vmatprep.subr.bf16.mxu0 %v821_v12  ;;  %v859_v45 = vld [vmem:[%s1147_s0 + $0x90] ss:$12 sps:$4 sm:$0xff]   ;;  %v862_v46 = vld [vmem:[%s1147_s0 + $0xac] ss:$12 sps:$4 sm:$0xff]   ;;  %v864_v47 = vld [vmem:[%s1147_s0 + $0xa8] ss:$12 sps:$4 sm:$0xff]  }
  0x11   :  { %784 = vmatpush3.bf16.msra.mxu1 %v820_v11  ;;  %v1037_v55 = vld [vmem:[%s1148_s2] ss:$0 sm:$0xff] }
  0x12   :  { %785 = vmatprep.subr.bf16.mxu1 %v823_v13  ;;  %v1042_v59 = vld [vmem:[%s1149_s3] ss:$0 sm:$0xff] }
  0x13   :  { %706 = vmatpush3.bf16.msra.mxu0 %v822_v14 }
  0x14   :  { %707 = vmatprep.subr.bf16.mxu0 %v824_v15 }
  0x15   :  { %786 = vmatpush3.bf16.msra.mxu1 %v823_v13 }
  0x16   :  { %787 = vmatprep.subr.bf16.mxu1 %v826_v16 }
  0x17   :  { %708 = vmatpush3.bf16.msra.mxu0 %v825_v17 }
  0x18   :  { %709 = vmatprep.subr.bf16.mxu0 %v827_v18 }
  0x19   :  { %788 = vmatpush3.bf16.msra.mxu1 %v826_v16 }
  0x1a   :  { %789 = vmatprep.subr.bf16.mxu1 %v829_v20 }
  0x1b   :  { %710 = vmatpush3.bf16.msra.mxu0 %v828_v19 }
  0x1c   :  { %711 = vmatprep.subr.bf16.mxu0 %v830_v21 }
  0x1d   :  { %790 = vmatpush3.bf16.msra.mxu1 %v829_v20 }
  0x1e   :  { %791 = vmatprep.subr.bf16.mxu1 %v832_v22 }
  0x1f   :  { %712 = vmatpush3.bf16.msra.mxu0 %v831_v25 }
  0x21   :  { %792 = vmatpush3.bf16.msra.mxu1 %v832_v22 }
  0x22   :  { %403 = vmatmul.mubr.bf16.vlgmr.msra.gmra.mrb[0].mxu0 %v833_v26 }
  0x23   :  { %410 = vmatprep.mubr.bf16.mxu0 %v838_v27 }
  0x24   :  { %794 = vmatmul.mubr.bf16.vlgmr.msra.gmra.mrb[0].mxu1 %v837_v28 }
  0x25   :  { %797 = vmatprep.mubr.bf16.mxu1 %v844_v29 }
  0x2a   :  { %411 = vmatmul.mubr.bf16.gmra.mrb[4].mxu0 %v840_v30 }
  0x2b   :  { %418 = vmatprep.mubr.bf16.mxu0 %v841_v31 }
  0x2c   :  { %798 = vmatmul.mubr.bf16.gmra.mrb[4].mxu1 %v845_v32 }
  0x2d   :  { %801 = vmatprep.mubr.bf16.mxu1 %v852_v33 }
  0x32   :  { %419 = vmatmul.mubr.bf16.gmra.mrb[8].mxu0 %v843_v34 }
  0x33   :  { %426 = vmatprep.mubr.bf16.mxu0 %v846_v35 }
  0x34   :  { %802 = vmatmul.mubr.bf16.gmra.mrb[8].mxu1 %v853_v36 }
  0x35   :  { %805 = vmatprep.mubr.bf16.mxu1 %v860_v37 }
  0x3a   :  { %427 = vmatmul.mubr.bf16.gmra.mrb[12].mxu0 %v848_v38 }
  0x3b   :  { %434 = vmatprep.mubr.bf16.mxu0 %v849_v39 }
  0x3c   :  { %806 = vmatmul.mubr.bf16.gmra.mrb[12].mxu1 %v861_v40 }
  0x42   :  { %435 = vmatmul.mubr.bf16.gmra.mrb[16].mxu0 %v851_v41 }
  0x43   :  { %442 = vmatprep.mubr.bf16.mxu0 %v854_v42 }
  0x4a   :  { %443 = vmatmul.mubr.bf16.gmra.mrb[20].mxu0 %v856_v43 }
  0x4b   :  { %450 = vmatprep.mubr.bf16.mxu0 %v857_v44 }
  0x52   :  { %451 = vmatmul.mubr.bf16.gmra.mrb[24].mxu0 %v859_v45 }
  0x53   :  { %458 = vmatprep.mubr.bf16.mxu0 %v862_v46 }
  0x5a   :  { %459 = vmatmul.mubr.bf16.gmra.mrb[28].mxu0 %v864_v47 }
  0xf5   :  { %v713_v48 = vpop.f32.mrb[0].mxu0 }
  0xf6   :  { %v714_v49 = vpop.f32.mrb[1].mxu0 }
  0xf7   :  { %v715_v50 = vadd.f32 %v714_v49, %v713_v48  ;;  %v716_v51 = vpop.f32.mrb[2].mxu0  ;;  %v795_v52 = vpop.f32.mrb[0].mxu1 }
  0xf8   :  { %v717_v53 = vpop.f32.mrb[3].mxu0  ;;  %v501_v54 = vpop.f32.mrb[1].mxu1 }
  0xf9   :  { %v718_v56 = vadd.f32 %v717_v53, %v716_v51  ;;  %v502_v57 = vadd.f32 %v715_v50, %v501_v54  ;;  %v796_v58 = vpop.f32.mrb[2].mxu1 }
  0xfa   :  { %v504_v60 = vpop.f32.mrb[3].mxu1 }
  0xfb   :  { %v571_v61 = vmul.f32 %v1037_v55, %v502_v57  ;;  %v505_v62 = vadd.f32 %v718_v56, %v504_v60 }
  0xfd   :  { %v594_v63 = vadd.f32 %v1042_v59, %v571_v61  ;;  %v572_v0 = vmul.f32 %v1037_v55, %v505_v62  ;;  %v719_v1 = vpop.f32.mrb[4].mxu0 }
  0xfe   :  { %v720_v2 = vpop.f32.mrb[5].mxu0 }
  0xff   :  { %v610_v3 = vmax.f32 %v594_v63, 0.0  ;;  %v595_v4 = vadd.f32 %v1042_v59, %v572_v0  ;;  %v721_v5 = vadd.f32 %v720_v2, %v719_v1  ;;  %v722_v6 = vpop.f32.mrb[6].mxu0  ;;  %v799_v7 = vpop.f32.mrb[4].mxu1 }
 0x100   :  { %v723_v8 = vpop.f32.mrb[7].mxu0  ;;  %v517_v9 = vpop.f32.mrb[5].mxu1 }
 0x101   :  { %627 = vst.msk [vmem:[%s1150_s4] sm:$0xff] %vm626_vm0, %v610_v3  ;;  %v611_v10 = vmax.f32 %v595_v4, 0.0  ;;  %v510_v11 = vadd.f32 %v795_v52, %v721_v5  ;;  %v724_v12 = vadd.f32 %v723_v8, %v722_v6  ;;  %v800_v13 = vpop.f32.mrb[6].mxu1 }
 0x102   :  { %v520_v14 = vpop.f32.mrb[7].mxu1 }
 0x103   :  { %628 = vst.msk [vmem:[%s1150_s4 + $0x8] sm:$0xff] %vm626_vm0, %v611_v10  ;;  %v573_v15 = vmul.f32 %v1037_v55, %v510_v11  ;;  %v513_v16 = vadd.f32 %v796_v58, %v724_v12 }
 0x105   :  { %v596_v17 = vadd.f32 %v1042_v59, %v573_v15  ;;  %v574_v18 = vmul.f32 %v1037_v55, %v513_v16  ;;  %v725_v19 = vpop.f32.mrb[8].mxu0 }
 0x106   :  { %v726_v20 = vpop.f32.mrb[9].mxu0 }
 0x107   :  { %v612_v21 = vmax.f32 %v596_v17, 0.0  ;;  %v597_v22 = vadd.f32 %v1042_v59, %v574_v18  ;;  %v727_v23 = vadd.f32 %v726_v20, %v725_v19  ;;  %v728_v24 = vpop.f32.mrb[10].mxu0  ;;  %v803_v25 = vpop.f32.mrb[8].mxu1 }
 0x108   :  { %v729_v26 = vpop.f32.mrb[11].mxu0  ;;  %v533_v27 = vpop.f32.mrb[9].mxu1 }
 0x109   :  { %629 = vst.msk [vmem:[%s1150_s4 + $0x10] sm:$0xff] %vm626_vm0, %v612_v21  ;;  %v613_v28 = vmax.f32 %v597_v22, 0.0  ;;  %v730_v29 = vadd.f32 %v729_v26, %v728_v24  ;;  %v518_v30 = vadd.f32 %v727_v23, %v517_v9  ;;  %v804_v31 = vpop.f32.mrb[10].mxu1 }
 0x10a   :  { %v536_v32 = vpop.f32.mrb[11].mxu1 }
 0x10b   :  { %630 = vst.msk [vmem:[%s1150_s4 + $0x18] sm:$0xff] %vm626_vm0, %v613_v28  ;;  %v575_v33 = vmul.f32 %v1037_v55, %v518_v30  ;;  %v521_v34 = vadd.f32 %v730_v29, %v520_v14 }
 0x10d   :  { %v598_v35 = vadd.f32 %v1042_v59, %v575_v33  ;;  %v576_v36 = vmul.f32 %v1037_v55, %v521_v34  ;;  %v731_v37 = vpop.f32.mrb[12].mxu0 }
 0x10e   :  { %v732_v38 = vpop.f32.mrb[13].mxu0 }
 0x10f   :  { %v614_v39 = vmax.f32 %v598_v35, 0.0  ;;  %v599_v40 = vadd.f32 %v1042_v59, %v576_v36  ;;  %v733_v41 = vadd.f32 %v732_v38, %v731_v37  ;;  %v734_v42 = vpop.f32.mrb[14].mxu0  ;;  %v1072_v43 = vpop.f32.mrb[12].mxu1 }
 0x110   :  { %v735_v44 = vpop.f32.mrb[15].mxu0  ;;  %v549_v45 = vpop.f32.mrb[13].mxu1 }
 0x111   :  { %631 = vst.msk [vmem:[%s1150_s4 + $0x20] sm:$0xff] %vm626_vm0, %v614_v39  ;;  %v615_v46 = vmax.f32 %v599_v40, 0.0  ;;  %v526_v47 = vadd.f32 %v799_v7, %v733_v41  ;;  %v736_v48 = vadd.f32 %v735_v44, %v734_v42  ;;  %v1078_v49 = vpop.f32.mrb[14].mxu1 }
 0x112   :  { %v552_v50 = vpop.f32.mrb[15].mxu1 }
 0x113   :  { %632 = vst.msk [vmem:[%s1150_s4 + $0x28] sm:$0xff] %vm626_vm0, %v615_v46  ;;  %v577_v51 = vmul.f32 %v1037_v55, %v526_v47  ;;  %v529_v52 = vadd.f32 %v800_v13, %v736_v48 }
 0x115   :  { %v600_v53 = vadd.f32 %v1042_v59, %v577_v51  ;;  %v578_v54 = vmul.f32 %v1037_v55, %v529_v52  ;;  %v737_v56 = vpop.f32.mrb[16].mxu0 }
 0x116   :  { %v738_v57 = vpop.f32.mrb[17].mxu0 }
 0x117   :  { %v616_v58 = vmax.f32 %v600_v53, 0.0  ;;  %v601_v60 = vadd.f32 %v1042_v59, %v578_v54  ;;  %v739_v61 = vadd.f32 %v738_v57, %v737_v56  ;;  %v740_v62 = vpop.f32.mrb[18].mxu0 }
 0x118   :  { %v741_v63 = vpop.f32.mrb[19].mxu0 }
 0x119   :  { %633 = vst.msk [vmem:[%s1150_s4 + $0x30] sm:$0xff] %vm626_vm0, %v616_v58  ;;  %v617_v0 = vmax.f32 %v601_v60, 0.0  ;;  %v742_v1 = vadd.f32 %v741_v63, %v740_v62  ;;  %v534_v2 = vadd.f32 %v739_v61, %v533_v27 }
 0x11b   :  { %634 = vst.msk [vmem:[%s1150_s4 + $0x38] sm:$0xff] %vm626_vm0, %v617_v0  ;;  %v579_v3 = vmul.f32 %v1037_v55, %v534_v2  ;;  %v537_v4 = vadd.f32 %v742_v1, %v536_v32 }
 0x11d   :  { %v602_v5 = vadd.f32 %v1042_v59, %v579_v3  ;;  %v580_v6 = vmul.f32 %v1037_v55, %v537_v4  ;;  %v743_v7 = vpop.f32.mrb[20].mxu0 }
 0x11e   :  { %v744_v8 = vpop.f32.mrb[21].mxu0 }
 0x11f   :  { %v618_v9 = vmax.f32 %v602_v5, 0.0  ;;  %v603_v10 = vadd.f32 %v1042_v59, %v580_v6  ;;  %v745_v11 = vadd.f32 %v744_v8, %v743_v7  ;;  %v746_v12 = vpop.f32.mrb[22].mxu0 }
 0x120   :  { %v747_v13 = vpop.f32.mrb[23].mxu0 }
 0x121   :  { %635 = vst.msk [vmem:[%s1150_s4 + $0x40] sm:$0xff] %vm626_vm0, %v618_v9  ;;  %v619_v14 = vmax.f32 %v603_v10, 0.0  ;;  %v542_v15 = vadd.f32 %v803_v25, %v745_v11  ;;  %v748_v16 = vadd.f32 %v747_v13, %v746_v12 }
 0x123   :  { %636 = vst.msk [vmem:[%s1150_s4 + $0x48] sm:$0xff] %vm626_vm0, %v619_v14  ;;  %v581_v17 = vmul.f32 %v1037_v55, %v542_v15  ;;  %v545_v18 = vadd.f32 %v804_v31, %v748_v16 }
 0x125   :  { %v604_v19 = vadd.f32 %v1042_v59, %v581_v17  ;;  %v582_v20 = vmul.f32 %v1037_v55, %v545_v18  ;;  %v749_v21 = vpop.f32.mrb[24].mxu0 }
 0x126   :  { %v750_v22 = vpop.f32.mrb[25].mxu0 }
 0x127   :  { %v620_v23 = vmax.f32 %v604_v19, 0.0  ;;  %v605_v24 = vadd.f32 %v1042_v59, %v582_v20  ;;  %v751_v26 = vadd.f32 %v750_v22, %v749_v21  ;;  %v752_v25 = vpop.f32.mrb[26].mxu0 }
 0x128   :  { %v753_v27 = vpop.f32.mrb[27].mxu0 }
 0x129   :  { %637 = vst.msk [vmem:[%s1150_s4 + $0x50] sm:$0xff] %vm626_vm0, %v620_v23  ;;  %v621_v28 = vmax.f32 %v605_v24, 0.0  ;;  %v754_v29 = vadd.f32 %v753_v27, %v752_v25  ;;  %v550_v30 = vadd.f32 %v751_v26, %v549_v45 }
 0x12b   :  { %638 = vst.msk [vmem:[%s1150_s4 + $0x58] sm:$0xff] %vm626_vm0, %v621_v28  ;;  %v583_v31 = vmul.f32 %v1037_v55, %v550_v30  ;;  %v553_v32 = vadd.f32 %v754_v29, %v552_v50 }
 0x12d   :  { %v606_v33 = vadd.f32 %v1042_v59, %v583_v31  ;;  %v584_v34 = vmul.f32 %v1037_v55, %v553_v32  ;;  %v755_v35 = vpop.f32.mrb[28].mxu0 }
 0x12e   :  { %v756_v36 = vpop.f32.mrb[29].mxu0 }
 0x12f   :  { %v622_v37 = vmax.f32 %v606_v33, 0.0  ;;  %v607_v38 = vadd.f32 %v1042_v59, %v584_v34  ;;  %v757_v39 = vadd.f32 %v756_v36, %v755_v35  ;;  %v758_v40 = vpop.f32.mrb[30].mxu0 }
 0x130   :  { %v759_v41 = vpop.f32.mrb[31].mxu0 }
 0x131   :  { %639 = vst.msk [vmem:[%s1150_s4 + $0x60] sm:$0xff] %vm626_vm0, %v622_v37  ;;  %v623_v42 = vmax.f32 %v607_v38, 0.0  ;;  %v558_v44 = vadd.f32 %v1072_v43, %v757_v39  ;;  %v760_v45 = vadd.f32 %v759_v41, %v758_v40 }
 0x133   :  { %640 = vst.msk [vmem:[%s1150_s4 + $0x68] sm:$0xff] %vm626_vm0, %v623_v42  ;;  %v585_v46 = vmul.f32 %v1037_v55, %v558_v44  ;;  %v561_v47 = vadd.f32 %v1078_v49, %v760_v45 }
 0x135   :  { %v608_v48 = vadd.f32 %v1042_v59, %v585_v46  ;;  %v586_v50 = vmul.f32 %v1037_v55, %v561_v47 }
 0x137   :  { %v624_v51 = vmax.f32 %v608_v48, 0.0  ;;  %v609_v52 = vadd.f32 %v1042_v59, %v586_v50 }
 0x139   :  { %641 = vst.msk [vmem:[%s1150_s4 + $0x70] sm:$0xff] %vm626_vm0, %v624_v51  ;;  %v625_v43 = vmax.f32 %v609_v52, 0.0 }
 0x13b   :  { %642 = vst.msk [vmem:[%s1150_s4 + $0x78] sm:$0xff] %vm626_vm0, %v625_v43 }

// kernel: testnet0_forward.15
= control target key start
LH: loop header
LB: loop body
LE: loop exit
PB: predicated region body
PF: predicated region fallthrough
CT: control target
= control target key end

     0   :  { %v1240_v22 = vmov 1966171168   ;;  %v186_v24 = vlaneseq  ;;  %vm959_vm0 = vcmask 156672   ;;  %s1536_s1 = inlined_call_operand.vmem [shape: bf16[1,1280,20], index: 1, kind: input, shape index: {}]   ;;  %s1537_s0 = inlined_call_operand.vmem [shape: bf16[1,2,1280], index: 0, kind: input, shape index: {}]   ;;  %s1538_s2 = inlined_call_operand.vmem [shape: f32[1,1,20], index: 2, kind: input, shape index: {}]   ;;  %s1539_s3 = inlined_call_operand.vmem [shape: f32[1,1,20], index: 3, kind: input, shape index: {}]   ;;  %s1540_s4 = inlined_call_operand.vmem [shape: f32[1,2,20], index: 4, kind: output, shape index: {}]  }
   0x1   :  { %v1159_v0 = vld [vmem:[%s1536_s1 + $0x40] sm:$0xff]   ;;  %v1163_v4 = vld [vmem:[%s1536_s1 + $0x48] sm:$0xff]   ;;  %v1167_v8 = vld [vmem:[%s1536_s1 + $0x50] sm:$0xff]   ;;  %v184_v23 = vunpack.c.l.s4 %v1240_v22 }
   0x2   :  { %v1160_v1 = vld [vmem:[%s1536_s1 + $0xc0] sm:$0xff]   ;;  %1048 = vmatprep.subr.bf16.mxu0 %v1159_v0  ;;  %v1164_v5 = vld [vmem:[%s1536_s1 + $0xc8] sm:$0xff]   ;;  %v1168_v9 = vld [vmem:[%s1536_s1 + $0xd0] sm:$0xff]   ;;  %v187_v30 = vshrl.u32 %v186_v24, 7 }
   0x3   :  { %v1161_v2 = vld [vmem:[%s1536_s1] sm:$0xff]   ;;  %1070 = vmatprep.subr.bf16.mxu1 %v1160_v1  ;;  %v1165_v6 = vld [vmem:[%s1536_s1 + $0x8] sm:$0xff]   ;;  %v1169_v10 = vld [vmem:[%s1536_s1 + $0x10] sm:$0xff]   ;;  %v185_v29 = vunpack.c.0.s8 %v184_v23 }
   0x4   :  { %v1162_v3 = vld [vmem:[%s1536_s1 + $0x80] sm:$0xff]   ;;  %1049 = vmatpush3.bf16.msra.mxu0 %v1161_v2  ;;  %v1166_v7 = vld [vmem:[%s1536_s1 + $0x88] sm:$0xff]   ;;  %v1170_v11 = vld [vmem:[%s1536_s1 + $0x90] sm:$0xff]  }
   0x5   :  { %1071 = vmatpush3.bf16.msra.mxu1 %v1162_v3  ;;  %1050 = vmatprep.subr.bf16.mxu0 %v1163_v4  ;;  %v1171_v12 = vld [vmem:[%s1536_s1 + $0x58] sm:$0xff]   ;;  %v1175_v16 = vld [vmem:[%s1536_s1 + $0x60] sm:$0xff]   ;;  %v1179_v20 = vld [vmem:[%s1536_s1 + $0x68] sm:$0xff]   ;;  %v1356_v35 = vsub.s32 %v185_v29, %v187_v30 }
   0x6   :  { %1072 = vmatprep.subr.bf16.mxu1 %v1164_v5  ;;  %v1172_v13 = vld [vmem:[%s1536_s1 + $0xd8] sm:$0xff]   ;;  %v1176_v17 = vld [vmem:[%s1536_s1 + $0xe0] sm:$0xff]   ;;  %v1180_v21 = vld [vmem:[%s1536_s1 + $0xe8] sm:$0xff]  }
   0x7   :  { %v1173_v14 = vld [vmem:[%s1536_s1 + $0x18] sm:$0xff]   ;;  %v1177_v18 = vld [vmem:[%s1536_s1 + $0x20] sm:$0xff]   ;;  %v1181_v25 = vld [vmem:[%s1536_s1 + $0x28] sm:$0xff]  }
   0x8   :  { %1051 = vmatpush3.bf16.msra.mxu0 %v1165_v6  ;;  %v1174_v15 = vld [vmem:[%s1536_s1 + $0x98] sm:$0xff]   ;;  %v1178_v19 = vld [vmem:[%s1536_s1 + $0xa0] sm:$0xff]   ;;  %v1182_v26 = vld [vmem:[%s1536_s1 + $0xa8] sm:$0xff]  }
   0x9   :  { %1073 = vmatpush3.bf16.msra.mxu1 %v1166_v7  ;;  %1052 = vmatprep.subr.bf16.mxu0 %v1167_v8  ;;  %v1183_v27 = vld [vmem:[%s1536_s1 + $0x70] sm:$0xff]   ;;  %v1187_v33 = vld [vmem:[%s1536_s1 + $0x78] sm:$0xff]   ;;  %v18_v38 = vld [vmem:[%s1537_s0] sm:$0xff] }
   0xa   :  { %1074 = vmatprep.subr.bf16.mxu1 %v1168_v9  ;;  %v1184_v28 = vld [vmem:[%s1536_s1 + $0xf0] sm:$0xff]   ;;  %v1188_v34 = vld [vmem:[%s1536_s1 + $0xf8] sm:$0xff]   ;;  %v182_v39 = vcombine.high %v18_v38, %v18_v38  ;;  %v189_v40 = vrot.slane %v18_v38, %v1356_v35  ;;  %v1192_v41 = vld [vmem:[%s1536_s1 + $0x140] sm:$0xff]  }
   0xb   :  { %v1185_v31 = vld [vmem:[%s1536_s1 + $0x30] sm:$0xff]   ;;  %v1189_v36 = vld [vmem:[%s1536_s1 + $0x38] sm:$0xff]   ;;  %v1194_v44 = vld [vmem:[%s1536_s1 + $0x1c0] sm:$0xff]  }
   0xc   :  { %1053 = vmatpush3.bf16.msra.mxu0 %v1169_v10  ;;  %v1186_v32 = vld [vmem:[%s1536_s1 + $0xb0] sm:$0xff]   ;;  %v1190_v37 = vld [vmem:[%s1536_s1 + $0xb8] sm:$0xff]   ;;  %v197_v42 = vcombine.high %v189_v40, %v189_v40  ;;  %v205_v43 = vrot.slane %v189_v40, %v1356_v35  ;;  %v1376_v45 = vrot.slane %v182_v39, %v1356_v35  ;;  %v1193_v47 = vld [vmem:[%s1536_s1 + $0x100] sm:$0xff]  }
   0xd   :  { %1075 = vmatpush3.bf16.msra.mxu1 %v1170_v11  ;;  %1054 = vmatprep.subr.bf16.mxu0 %v1171_v12  ;;  %v1196_v50 = vld [vmem:[%s1536_s1 + $0x148] sm:$0xff]   ;;  %v1195_v52 = vld [vmem:[%s1536_s1 + $0x180] sm:$0xff]   ;;  %v1200_v57 = vld [vmem:[%s1536_s1 + $0x150] sm:$0xff]  }
   0xe   :  { %1076 = vmatprep.subr.bf16.mxu1 %v1172_v13  ;;  %v219_v46 = vrot.slane %v197_v42, %v1356_v35  ;;  %v198_v48 = vcombine.high %v1376_v45, %v1376_v45  ;;  %v227_v49 = vcombine.high %v205_v43, %v205_v43  ;;  %v1198_v54 = vld [vmem:[%s1536_s1 + $0x1c8] sm:$0xff]   ;;  %v1202_v59 = vld [vmem:[%s1536_s1 + $0x1d0] sm:$0xff]   ;;  %v1204_v61 = vld [vmem:[%s1536_s1 + $0x158] sm:$0xff]  }
   0xf   :  { %v1197_v55 = vld [vmem:[%s1536_s1 + $0x108] sm:$0xff]   ;;  %v1201_v60 = vld [vmem:[%s1536_s1 + $0x110] sm:$0xff]   ;;  %v1206_v63 = vld [vmem:[%s1536_s1 + $0x1d8] sm:$0xff]  }
  0x10   :  { %1055 = vmatpush3.bf16.msra.mxu0 %v1173_v14  ;;  %775 = vmatprep.mubr.bf16.mxu0 %v219_v46  ;;  %v229_v51 = vcombine.high %v219_v46, %v219_v46  ;;  %v226_v53 = vrot.slane %v198_v48, %v1356_v35  ;;  %v1199_v58 = vld [vmem:[%s1536_s1 + $0x188] sm:$0xff]   ;;  %v1203_v62 = vld [vmem:[%s1536_s1 + $0x190] sm:$0xff]   ;;  %v1205_v0 = vld [vmem:[%s1536_s1 + $0x118] sm:$0xff]  }
  0x11   :  { %1077 = vmatpush3.bf16.msra.mxu1 %v1174_v15  ;;  %1056 = vmatprep.subr.bf16.mxu0 %v1175_v16  ;;  %v1208_v1 = vld [vmem:[%s1536_s1 + $0x160] sm:$0xff]   ;;  %v1207_v2 = vld [vmem:[%s1536_s1 + $0x198] sm:$0xff]   ;;  %v1212_v5 = vld [vmem:[%s1536_s1 + $0x168] sm:$0xff]  }
  0x12   :  { %1078 = vmatprep.subr.bf16.mxu1 %v1176_v17  ;;  %815 = vmatprep.mubr.bf16.mxu1 %v229_v51  ;;  %v230_v56 = vcombine.high %v226_v53, %v226_v53  ;;  %v1210_v3 = vld [vmem:[%s1536_s1 + $0x1e0] sm:$0xff]   ;;  %v1214_v7 = vld [vmem:[%s1536_s1 + $0x1e8] sm:$0xff]   ;;  %v1216_v9 = vld [vmem:[%s1536_s1 + $0x170] sm:$0xff]   ;;  %v212_v17 = vrot.slane %v1376_v45, %v1356_v35 }
  0x13   :  { %v1209_v4 = vld [vmem:[%s1536_s1 + $0x120] sm:$0xff]   ;;  %v1213_v8 = vld [vmem:[%s1536_s1 + $0x128] sm:$0xff]   ;;  %v1218_v11 = vld [vmem:[%s1536_s1 + $0x1f0] sm:$0xff]  }
  0x14   :  { %1057 = vmatpush3.bf16.msra.mxu0 %v1177_v18  ;;  %v1211_v6 = vld [vmem:[%s1536_s1 + $0x1a0] sm:$0xff]   ;;  %v1215_v10 = vld [vmem:[%s1536_s1 + $0x1a8] sm:$0xff]   ;;  %v1217_v12 = vld [vmem:[%s1536_s1 + $0x130] sm:$0xff]  }
  0x15   :  { %1079 = vmatpush3.bf16.msra.mxu1 %v1178_v19  ;;  %1058 = vmatprep.subr.bf16.mxu0 %v1179_v20  ;;  %v1220_v13 = vld [vmem:[%s1536_s1 + $0x178] sm:$0xff]   ;;  %v1219_v14 = vld [vmem:[%s1536_s1 + $0x1b0] sm:$0xff]   ;;  %v1224_v18 = vld [vmem:[%s1536_s1 + $0x240] sm:$0xff]  }
  0x16   :  { %1080 = vmatprep.subr.bf16.mxu1 %v1180_v21  ;;  %v1222_v15 = vld [vmem:[%s1536_s1 + $0x1f8] sm:$0xff]   ;;  %v1225_v20 = vld [vmem:[%s1536_s1 + $0x200] sm:$0xff]   ;;  %v228_v21 = vcombine.high %v212_v17, %v212_v17  ;;  %v1226_v22 = vld [vmem:[%s1536_s1 + $0x248] sm:$0xff]  }
  0x17   :  { %v1221_v16 = vld [vmem:[%s1536_s1 + $0x138] sm:$0xff]   ;;  %v1227_v23 = vld [vmem:[%s1536_s1 + $0x208] sm:$0xff]   ;;  %v1228_v24 = vld [vmem:[%s1536_s1 + $0x250] sm:$0xff]  }
  0x18   :  { %1059 = vmatpush3.bf16.msra.mxu0 %v1181_v25  ;;  %v1223_v19 = vld [vmem:[%s1536_s1 + $0x1b8] sm:$0xff]   ;;  %v1229_v25 = vld [vmem:[%s1536_s1 + $0x210] sm:$0xff]   ;;  %v1232_v30 = vld [vmem:[%s1536_s1 + $0x260] sm:$0xff]  }
  0x19   :  { %1081 = vmatpush3.bf16.msra.mxu1 %v1182_v26  ;;  %1060 = vmatprep.subr.bf16.mxu0 %v1183_v27  ;;  %v1230_v26 = vld [vmem:[%s1536_s1 + $0x258] sm:$0xff]   ;;  %v965_v27 = vld.sshfl [vmem:[%s1537_s0 + $0x8] sm:$0x11 pattern:$0x75316420] }
  0x1a   :  { %1082 = vmatprep.subr.bf16.mxu1 %v1184_v28  ;;  %v1231_v28 = vld [vmem:[%s1536_s1 + $0x218] sm:$0xff]   ;;  %v238_v29 = vcombine.high %v965_v27, %v965_v27  ;;  %v245_v40 = vrot.slane %v965_v27, %v1356_v35 }
  0x1b   :  { %v1238_v38 = vld [vmem:[%s1536_s1 + $0x278] sm:$0xff]  }
  0x1c   :  { %1061 = vmatpush3.bf16.msra.mxu0 %v1185_v31  ;;  %v252_v31 = vrot.slane %v238_v29, %v1356_v35  ;;  %v1239_v39 = vld [vmem:[%s1536_s1 + $0x238] sm:$0xff]  }
  0x1d   :  { %1083 = vmatpush3.bf16.msra.mxu1 %v1186_v32  ;;  %1062 = vmatprep.subr.bf16.mxu0 %v1187_v33  ;;  %v1233_v32 = vld [vmem:[%s1536_s1 + $0x220] sm:$0xff]   ;;  %v1234_v33 = vld [vmem:[%s1536_s1 + $0x268] sm:$0xff]  }
  0x1e   :  { %1084 = vmatprep.subr.bf16.mxu1 %v1188_v34  ;;  %v1235_v34 = vld [vmem:[%s1536_s1 + $0x228] sm:$0xff]  }
  0x20   :  { %1063 = vmatpush3.bf16.msra.mxu0 %v1189_v36  ;;  %v1236_v36 = vld [vmem:[%s1536_s1 + $0x270] sm:$0xff]  }
  0x21   :  { %1085 = vmatpush3.bf16.msra.mxu1 %v1190_v37  ;;  %1092 = vmatprep.subr.bf16.mxu0 %v1192_v41  ;;  %v1237_v37 = vld [vmem:[%s1536_s1 + $0x230] sm:$0xff]  }
  0x22   :  { %1114 = vmatprep.subr.bf16.mxu1 %v1194_v44 }
  0x23   :  { %776 = vmatmul.mubr.bf16.vlgmr.msra.gmra.mrb[0].mxu0 %v205_v43 }
  0x24   :  { %1093 = vmatpush3.bf16.msra.mxu0 %v1193_v47  ;;  %816 = vmatmul.mubr.bf16.vlgmr.msra.gmra.mrb[0].mxu1 %v227_v49 }
  0x25   :  { %1094 = vmatprep.subr.bf16.mxu0 %v1196_v50  ;;  %1115 = vmatpush3.bf16.msra.mxu1 %v1195_v52 }
  0x26   :  { %855 = vmatprep.mubr.bf16.mxu0 %v226_v53  ;;  %1116 = vmatprep.subr.bf16.mxu1 %v1198_v54 }
  0x27   :  { %895 = vmatprep.mubr.bf16.mxu1 %v230_v56 }
  0x28   :  { %1095 = vmatpush3.bf16.msra.mxu0 %v1197_v55 }
  0x29   :  { %1096 = vmatprep.subr.bf16.mxu0 %v1200_v57  ;;  %1117 = vmatpush3.bf16.msra.mxu1 %v1199_v58 }
  0x2a   :  { %1118 = vmatprep.subr.bf16.mxu1 %v1202_v59 }
  0x2c   :  { %1097 = vmatpush3.bf16.msra.mxu0 %v1201_v60 }
  0x2d   :  { %1098 = vmatprep.subr.bf16.mxu0 %v1204_v61  ;;  %1119 = vmatpush3.bf16.msra.mxu1 %v1203_v62 }
  0x2e   :  { %1120 = vmatprep.subr.bf16.mxu1 %v1206_v63 }
  0x30   :  { %1099 = vmatpush3.bf16.msra.mxu0 %v1205_v0 }
  0x31   :  { %1100 = vmatprep.subr.bf16.mxu0 %v1208_v1  ;;  %1121 = vmatpush3.bf16.msra.mxu1 %v1207_v2 }
  0x32   :  { %1122 = vmatprep.subr.bf16.mxu1 %v1210_v3  ;;  %v1046_v3 = vld [vmem:[%s1538_s2] ss:$0 sm:$0xff] }
  0x34   :  { %1101 = vmatpush3.bf16.msra.mxu0 %v1209_v4 }
  0x35   :  { %1102 = vmatprep.subr.bf16.mxu0 %v1212_v5  ;;  %1123 = vmatpush3.bf16.msra.mxu1 %v1211_v6  ;;  %v1047_v6 = vld [vmem:[%s1539_s3] ss:$0 sm:$0xff] }
  0x36   :  { %1124 = vmatprep.subr.bf16.mxu1 %v1214_v7 }
  0x38   :  { %1103 = vmatpush3.bf16.msra.mxu0 %v1213_v8 }
  0x39   :  { %1104 = vmatprep.subr.bf16.mxu0 %v1216_v9  ;;  %1125 = vmatpush3.bf16.msra.mxu1 %v1215_v10 }
  0x3a   :  { %1126 = vmatprep.subr.bf16.mxu1 %v1218_v11 }
  0x3c   :  { %1105 = vmatpush3.bf16.msra.mxu0 %v1217_v12 }
  0x3d   :  { %1106 = vmatprep.subr.bf16.mxu0 %v1220_v13  ;;  %1127 = vmatpush3.bf16.msra.mxu1 %v1219_v14 }
  0x3e   :  { %1128 = vmatprep.subr.bf16.mxu1 %v1222_v15 }
  0x40   :  { %1107 = vmatpush3.bf16.msra.mxu0 %v1221_v16 }
  0x41   :  { %1136 = vmatprep.subr.bf16.mxu0 %v1224_v18  ;;  %1129 = vmatpush3.bf16.msra.mxu1 %v1223_v19 }
  0x43   :  { %856 = vmatmul.mubr.bf16.vlgmr.msra.gmra.mrb[4].mxu0 %v212_v17 }
  0x44   :  { %1137 = vmatpush3.bf16.msra.mxu0 %v1225_v20  ;;  %896 = vmatmul.mubr.bf16.vlgmr.msra.gmra.mrb[4].mxu1 %v228_v21 }
  0x45   :  { %1138 = vmatprep.subr.bf16.mxu0 %v1226_v22  ;;  %935 = vmatprep.mubr.bf16.mxu0 %v252_v31 }
  0x48   :  { %1139 = vmatpush3.bf16.msra.mxu0 %v1227_v23 }
  0x49   :  { %1140 = vmatprep.subr.bf16.mxu0 %v1228_v24 }
  0x4c   :  { %1141 = vmatpush3.bf16.msra.mxu0 %v1229_v25 }
  0x4d   :  { %1142 = vmatprep.subr.bf16.mxu0 %v1230_v26 }
  0x50   :  { %1143 = vmatpush3.bf16.msra.mxu0 %v1231_v28 }
  0x51   :  { %1144 = vmatprep.subr.bf16.mxu0 %v1232_v30 }
  0x54   :  { %1145 = vmatpush3.bf16.msra.mxu0 %v1233_v32 }
  0x55   :  { %1146 = vmatprep.subr.bf16.mxu0 %v1234_v33 }
  0x58   :  { %1147 = vmatpush3.bf16.msra.mxu0 %v1235_v34 }
  0x59   :  { %1148 = vmatprep.subr.bf16.mxu0 %v1236_v36 }
  0x5c   :  { %1149 = vmatpush3.bf16.msra.mxu0 %v1237_v37 }
  0x5d   :  { %1150 = vmatprep.subr.bf16.mxu0 %v1238_v38 }
  0x60   :  { %1151 = vmatpush3.bf16.msra.mxu0 %v1239_v39 }
  0x63   :  { %936 = vmatmul.mubr.bf16.vlgmr.msra.gmra.mrb[8].mxu0 %v245_v40 }
  0xf6   :  { %v1064_v41 = vpop.f32.mrb[0].mxu0 }
  0xf7   :  { %v1065_v42 = vpop.f32.mrb[1].mxu0  ;;  %v1086_v43 = vpop.f32.mrb[0].mxu1 }
  0xf8   :  { %v1066_v44 = vadd.f32 %v1065_v42, %v1064_v41  ;;  %v1067_v45 = vpop.f32.mrb[2].mxu0  ;;  %v1087_v46 = vpop.f32.mrb[1].mxu1 }
  0xf9   :  { %v1068_v47 = vpop.f32.mrb[3].mxu0  ;;  %v1088_v48 = vadd.f32 %v1087_v46, %v1086_v43  ;;  %v1089_v49 = vpop.f32.mrb[2].mxu1 }
  0xfa   :  { %v1090_v50 = vpop.f32.mrb[3].mxu1 }
  0xfb   :  { %v818_v51 = vadd.f32 %v1088_v48, %v1066_v44 }
 0x116   :  { %v1108_v52 = vpop.f32.mrb[4].mxu0 }
 0x117   :  { %v1109_v53 = vpop.f32.mrb[5].mxu0  ;;  %v1130_v56 = vpop.f32.mrb[4].mxu1 }
 0x118   :  { %v1110_v54 = vadd.f32 %v1109_v53, %v1108_v52  ;;  %v1111_v55 = vpop.f32.mrb[6].mxu0  ;;  %v1131_v35 = vpop.f32.mrb[5].mxu1 }
 0x119   :  { %v1112_v57 = vpop.f32.mrb[7].mxu0  ;;  %v1132_v59 = vadd.f32 %v1131_v35, %v1130_v56  ;;  %v1133_v60 = vpop.f32.mrb[6].mxu1 }
 0x11a   :  { %v858_v58 = vadd.f32 %v1110_v54, %v818_v51  ;;  %v1134_v61 = vpop.f32.mrb[7].mxu1 }
 0x11c   :  { %v898_v62 = vadd.f32 %v1132_v59, %v858_v58 }
 0x136   :  { %v1152_v63 = vpop.f32.mrb[8].mxu0 }
 0x137   :  { %v1153_v0 = vpop.f32.mrb[9].mxu0 }
 0x138   :  { %v1154_v1 = vadd.f32 %v1153_v0, %v1152_v63  ;;  %v1155_v2 = vpop.f32.mrb[10].mxu0 }
 0x139   :  { %v1156_v4 = vpop.f32.mrb[11].mxu0 }
 0x13a   :  { %v938_v5 = vadd.f32 %v1154_v1, %v898_v62 }
 0x13c   :  { %v950_v7 = vmul.f32 %v1046_v3, %v938_v5 }
 0x13e   :  { %v958_v8 = vadd.f32 %v1047_v6, %v950_v7 }
 0x140   :  { %960 = vst.msk [vmem:[%s1540_s4] sm:$0x3] %vm959_vm0, %v958_v8 }

</bundles_post_ra>
